<compile_context>
chip_gen: v7x
topology: tpu7x:2x2x1
jax: 0.10.0
libtpu: 0.0.40
codegen_flags: <defaults>
</compile_context>

<pallas_src>
import functools

import jax
import jax.numpy as jnp
from jax.experimental import pallas as pl
from jax.experimental.pallas import tpu as pltpu

_BN_EPS = 1e-5
_PAD = 8          # left halo width -> centre writes land at a sublane-aligned offset


# ------------------------------ Pallas kernel -------------------------------

def _basic_block_kernel(x_ref, w1_ref, w2_ref, o_ref, xpad_ref, xcat_ref, *, eps):
    n, h, w, c = x_ref.shape          # NHWC block == full array (grid=(1,))
    cout = o_ref.shape[-1]
    m = n * h * w
    L = _PAD
    bf16 = xpad_ref.dtype

    # ---- one-time halo zeroing (halo only, NOT the whole scratch) -----------
    # Conv padding=1 for BOTH convolutions relies on these staying zero: every
    # centre write below touches only rows [1, h+1) / cols [L, L+w) of xpad and
    # rows [1, h+1) of xcat, so the halo written here is never overwritten.
    xpad_ref[:, 1:h + 1, 0:L, :] = jnp.zeros((n, h, L, c), bf16)              # left halo (col L-1)
    xpad_ref[:, 1:h + 1, L + w:L + w + 8, :] = jnp.zeros((n, h, 8, c), bf16)  # right halo (col L+w)
    xcat_ref[:, 0:1, :, :] = jnp.zeros((n, 1, w, 3 * c), bf16)                # top halo row
    xcat_ref[:, h + 1:h + 2, :, :] = jnp.zeros((n, 1, w, 3 * c), bf16)        # bottom halo row

    def build_dw_taps():
        # im2col over the W (sublane) shifts: pack the three shifted copies of
        # the padded activation onto the lane axis. Only dw=0/2 are misaligned
        # copies; the matmul operands below then slice major dims only.
        for dw in range(3):
            xcat_ref[:, 1:h + 1, :, dw * c:(dw + 1) * c] = \
                xpad_ref[:, 1:h + 1, L - 1 + dw:L - 1 + dw + w, :]

    def conv3x3(w_ref):
        # Wide-K conv: 3 bf16 MXU matmuls (M=m, K=3*C, N=planes), f32 accumulate.
        acc = None
        for dh in range(3):
            lhs = xcat_ref[:, dh:dh + h, :, :].reshape(m, 3 * c)   # aligned load
            part = jnp.dot(lhs, w_ref[dh], preferred_element_type=jnp.float32)
            acc = part if acc is None else acc + part
        return acc

    def batch_norm(z):
        # BatchNorm2d(affine=False, track_running_stats=False): batch stats,
        # biased variance. Single-pass stats: var = E[z^2] - E[z]^2, f32 math.
        s1 = jnp.sum(z, axis=0, keepdims=True)
        s2 = jnp.sum(z * z, axis=0, keepdims=True)
        mean = s1 * (1.0 / m)
        var = s2 * (1.0 / m) - mean * mean
        return (z - mean) * jax.lax.rsqrt(var + eps)

    # conv1 -> bn1 -> relu1
    xpad_ref[:, 1:h + 1, L:L + w, :] = x_ref[...].astype(bf16)     # aligned centre write
    build_dw_taps()
    y = jnp.maximum(batch_norm(conv3x3(w1_ref)), 0.0)

    # conv2 -> bn2  (halo of xpad/xcat is still zero: centre-only rewrite above)
    xpad_ref[:, 1:h + 1, L:L + w, :] = y.reshape(n, h, w, c).astype(bf16)
    build_dw_taps()
    z = batch_norm(conv3x3(w2_ref))

    # identity shortcut + relu2
    # TODO(synk): self.downsample is None in the reference __init__ (PyTorch's
    # forward would raise if called); identity shortcut used, stride=1 only.
    identity = x_ref[...].reshape(m, c).astype(jnp.float32)
    out = jnp.maximum(z + identity, 0.0)
    o_ref[...] = out.reshape(n, h, w, cout).astype(o_ref.dtype)


# --------------------------------- wrapper ----------------------------------

def _round_up(v, mult):
    return (v + mult - 1) // mult * mult


def _basic_block_pallas(x_nhwc, w1_oihw, w2_oihw):
    n, h, w, c = x_nhwc.shape
    planes = w1_oihw.shape[0]
    assert w1_oihw.shape == (planes, c, 3, 3)
    assert w2_oihw.shape == (planes, planes, 3, 3)
    assert planes == c, "identity shortcut requires inplanes == planes"
    assert w % 8 == 0, "W must be a multiple of 8 (sublane tiling)"

    def prep(wt):  # OIHW -> (dh, dw*Cin + ci, Cout), bf16 MXU operand
        cin = wt.shape[1]
        t = jnp.transpose(wt, (2, 3, 1, 0))                 # (dh, dw, ci, co)
        return t.reshape(3, 3 * cin, wt.shape[0]).astype(jnp.bfloat16)

    w1, w2 = prep(w1_oihw), prep(w2_oihw)

    wp = _PAD + _round_up(w + 1, 8)      # minimal sublane-aligned halo width
    itm = x_nhwc.dtype.itemsize
    xpad_bytes = n * (h + 2) * wp * c * 2                   # bf16 halo scratch
    xcat_bytes = n * (h + 2) * w * (3 * c) * 2              # bf16 im2col slab
    io_bytes = 2 * (n * h * w * c * itm + n * h * w * planes * itm
                    + w1.size * 2 + w2.size * 2)            # double-buffered blocks
    vmem_limit = max(xpad_bytes + xcat_bytes + io_bytes + (8 << 20), 32 << 20)
    # Never request more than is safe on every generation (v7x: 64 MiB physical
    # per TensorCore). Larger shapes need N/H tiling + a two-pass BN (see TODO).
    assert vmem_limit <= (48 << 20), (
        "activation too large for the single-block BasicBlock kernel; "
        "tile over N/H with a two-pass BatchNorm")

    flops = 2 * 2 * (n * h * w) * 9 * c * planes            # two 3x3 convs
    bytes_accessed = itm * (n * h * w * c + n * h * w * planes) \
        + 2 * (w1.size + w2.size)

    return pl.pallas_call(
        functools.partial(_basic_block_kernel, eps=_BN_EPS),
        out_shape=jax.ShapeDtypeStruct((n, h, w, planes), x_nhwc.dtype),
        grid=(1,),                       # BN needs global (N,H,W) stats -> one block
        in_specs=[pl.BlockSpec((n, h, w, c), lambda i: (0, 0, 0, 0)),
                  pl.BlockSpec((3, 3 * c, planes), lambda i: (0, 0, 0)),
                  pl.BlockSpec((3, 3 * planes, planes), lambda i: (0, 0, 0))],
        out_specs=pl.BlockSpec((n, h, w, planes), lambda i: (0, 0, 0, 0)),
        scratch_shapes=[pltpu.VMEM((n, h + 2, wp, c), jnp.bfloat16),      # halo-padded act
                        pltpu.VMEM((n, h + 2, w, 3 * c), jnp.bfloat16)],  # dw-im2col slab
        compiler_params=pltpu.CompilerParams(
            dimension_semantics=("arbitrary",),
            vmem_limit_bytes=int(vmem_limit)),
        cost_estimate=pl.CostEstimate(flops=int(flops),
                                      transcendentals=2 * planes,
                                      bytes_accessed=int(bytes_accessed)),
    )(x_nhwc, w1, w2)


@jax.jit
def basic_block_forward_nhwc(x_nhwc, w1_oihw, w2_oihw):
    """Preferred entry: NHWC in/out, no layout transposes around the kernel."""
    return _basic_block_pallas(x_nhwc, w1_oihw, w2_oihw)


@jax.jit
def basic_block_forward(x_nchw, w1_oihw, w2_oihw):
    """NCHW interface matching the PyTorch module (adds two HBM transposes)."""
    x = jnp.transpose(x_nchw, (0, 2, 3, 1))                 # NCHW -> NHWC
    out = _basic_block_pallas(x, w1_oihw, w2_oihw)
    return jnp.transpose(out, (0, 3, 1, 2))                 # NHWC -> NCHW


# --------------------------- pure-JAX reference ------------------------------

def _reference_forward(x, w1, w2, eps=_BN_EPS):
    conv = lambda a, wt: jax.lax.conv_general_dilated(
        a, wt, window_strides=(1, 1), padding=((1, 1), (1, 1)),
        dimension_numbers=("NCHW", "OIHW", "NCHW"),
        precision=jax.lax.Precision.HIGHEST)

    def bn(z):
        mean = jnp.mean(z, axis=(0, 2, 3), keepdims=True)
        var = jnp.mean((z - mean) ** 2, axis=(0, 2, 3), keepdims=True)
        return (z - mean) * jax.lax.rsqrt(var + eps)

    y = jnp.maximum(bn(conv(x, w1)), 0.0)
    z = bn(conv(y, w2))
    return jnp.maximum(z + x, 0.0)


# ----------------------------------- main ------------------------------------

if __name__ == "__main__":
    key = jax.random.PRNGKey(0)
    kx, k1, k2 = jax.random.split(key, 3)
    N, C, H, W = 2, 128, 16, 16        # lane-dense channels (C == 128 lanes)
    x = jax.random.normal(kx, (N, C, H, W), jnp.float32)
    std = (2.0 / (9 * C)) ** 0.5       # kaiming-style init; convs have bias=False
    w1 = std * jax.random.normal(k1, (C, C, 3, 3), jnp.float32)
    w2 = std * jax.random.normal(k2, (C, C, 3, 3), jnp.float32)

    out = jax.block_until_ready(basic_block_forward(x, w1, w2))
    ref = jax.block_until_ready(_reference_forward(x, w1, w2))

    assert out.shape == (N, C, H, W) and out.dtype == jnp.float32
    assert bool(jnp.all(out >= 0.0)) and bool(jnp.isfinite(out).all())
    err = float(jnp.max(jnp.abs(out - ref)))
    assert bool(jnp.allclose(out, ref, atol=2e-2, rtol=2e-2)), err

    # NHWC entry point (what an NHWC end-to-end model would call: no transposes).
    out_nhwc = jax.block_until_ready(
        basic_block_forward_nhwc(jnp.transpose(x, (0, 2, 3, 1)), w1, w2))
    assert bool(jnp.allclose(out_nhwc, jnp.transpose(ref, (0, 2, 3, 1)),
                             atol=2e-2, rtol=2e-2))

    print("KERNEL_OK")
</pallas_src>

<mosaic_0001>
module attributes {stable_mosaic.version = 11 : i64} {
  func.func @_basic_block_kernel(%arg0: i32, %arg1: memref<2x16x16x128xf32, #tpu.memory_space<vmem>>, %arg2: memref<3x384x128xbf16, #tpu.memory_space<vmem>>, %arg3: memref<3x384x128xbf16, #tpu.memory_space<vmem>>, %arg4: memref<2x16x16x128xf32, #tpu.memory_space<vmem>>, %arg5: memref<2x18x32x128xbf16, #tpu.memory_space<vmem>>, %arg6: memref<2x18x16x384xbf16, #tpu.memory_space<vmem>>) attributes {dimension_semantics = [#tpu.dimension_semantics<arbitrary>], iteration_bounds = array<i64: 1>, scalar_prefetch = 0 : i64, scratch_operands = 2 : i64, tpu.core_type = #tpu.core_type<tc>, window_params = [{pipeline_mode = #tpu.pipeline_mode<synchronous>, transform_indices = @transform_0, window_bounds = array<i64: 2, 16, 16, 128>}, {pipeline_mode = #tpu.pipeline_mode<synchronous>, transform_indices = @transform_1, window_bounds = array<i64: 3, 384, 128>}, {pipeline_mode = #tpu.pipeline_mode<synchronous>, transform_indices = @transform_2, window_bounds = array<i64: 3, 384, 128>}, {pipeline_mode = #tpu.pipeline_mode<synchronous>, transform_indices = @transform_3, window_bounds = array<i64: 2, 16, 16, 128>}]} {
    %cst = arith.constant 0.000000e+00 : bf16
    %0 = vector.broadcast %cst : bf16 to vector<2x16x8x128xbf16>
    %c0 = arith.constant 0 : index
    %c1 = arith.constant 1 : index
    %c0_0 = arith.constant 0 : index
    %c0_1 = arith.constant 0 : index
    %1 = vector.load %arg5[%c0, %c1, %c0_0, %c0_1] : memref<2x18x32x128xbf16, #tpu.memory_space<vmem>>, vector<2x16x8x128xbf16>
    tpu.vector_store %arg5[%c0, %c1, %c0_0, %c0_1], %0 {strides = array<i32>} : memref<2x18x32x128xbf16, #tpu.memory_space<vmem>>, vector<2x16x8x128xbf16>,
    %cst_2 = arith.constant 0.000000e+00 : bf16
    %2 = vector.broadcast %cst_2 : bf16 to vector<2x16x8x128xbf16>
    %c0_3 = arith.constant 0 : index
    %c1_4 = arith.constant 1 : index
    %c24 = arith.constant 24 : index
    %c0_5 = arith.constant 0 : index
    %3 = vector.load %arg5[%c0_3, %c1_4, %c24, %c0_5] : memref<2x18x32x128xbf16, #tpu.memory_space<vmem>>, vector<2x16x8x128xbf16>
    tpu.vector_store %arg5[%c0_3, %c1_4, %c24, %c0_5], %2 {strides = array<i32>} : memref<2x18x32x128xbf16, #tpu.memory_space<vmem>>, vector<2x16x8x128xbf16>,
    %cst_6 = arith.constant 0.000000e+00 : bf16
    %4 = vector.broadcast %cst_6 : bf16 to vector<2x1x16x384xbf16>
    %c0_7 = arith.constant 0 : index
    %c0_8 = arith.constant 0 : index
    %c0_9 = arith.constant 0 : index
    %c0_10 = arith.constant 0 : index
    %5 = vector.load %arg6[%c0_7, %c0_8, %c0_9, %c0_10] : memref<2x18x16x384xbf16, #tpu.memory_space<vmem>>, vector<2x1x16x384xbf16>
    tpu.vector_store %arg6[%c0_7, %c0_8, %c0_9, %c0_10], %4 {strides = array<i32>} : memref<2x18x16x384xbf16, #tpu.memory_space<vmem>>, vector<2x1x16x384xbf16>,
    %cst_11 = arith.constant 0.000000e+00 : bf16
    %6 = vector.broadcast %cst_11 : bf16 to vector<2x1x16x384xbf16>
    %c0_12 = arith.constant 0 : index
    %c17 = arith.constant 17 : index
    %c0_13 = arith.constant 0 : index
    %c0_14 = arith.constant 0 : index
    %7 = vector.load %arg6[%c0_12, %c17, %c0_13, %c0_14] : memref<2x18x16x384xbf16, #tpu.memory_space<vmem>>, vector<2x1x16x384xbf16>
    tpu.vector_store %arg6[%c0_12, %c17, %c0_13, %c0_14], %6 {strides = array<i32>} : memref<2x18x16x384xbf16, #tpu.memory_space<vmem>>, vector<2x1x16x384xbf16>,
    %c0_15 = arith.constant 0 : index
    %c0_16 = arith.constant 0 : index
    %c0_17 = arith.constant 0 : index
    %c0_18 = arith.constant 0 : index
    %8 = vector.load %arg1[%c0_15, %c0_16, %c0_17, %c0_18] : memref<2x16x16x128xf32, #tpu.memory_space<vmem>>, vector<2x16x16x128xf32>
    %9 = arith.truncf %8 : vector<2x16x16x128xf32> to vector<2x16x16x128xbf16>
    %c0_19 = arith.constant 0 : index
    %c1_20 = arith.constant 1 : index
    %c8 = arith.constant 8 : index
    %c0_21 = arith.constant 0 : index
    %10 = vector.load %arg5[%c0_19, %c1_20, %c8, %c0_21] : memref<2x18x32x128xbf16, #tpu.memory_space<vmem>>, vector<2x16x16x128xbf16>
    tpu.vector_store %arg5[%c0_19, %c1_20, %c8, %c0_21], %9 {strides = array<i32>} : memref<2x18x32x128xbf16, #tpu.memory_space<vmem>>, vector<2x16x16x128xbf16>,
    %c0_22 = arith.constant 0 : index
    %c1_23 = arith.constant 1 : index
    %c7 = arith.constant 7 : index
    %c0_24 = arith.constant 0 : index
    %11 = vector.load %arg5[%c0_22, %c1_23, %c7, %c0_24] : memref<2x18x32x128xbf16, #tpu.memory_space<vmem>>, vector<2x16x16x128xbf16>
    %c0_25 = arith.constant 0 : index
    %c1_26 = arith.constant 1 : index
    %c0_27 = arith.constant 0 : index
    %c0_28 = arith.constant 0 : index
    %12 = vector.load %arg6[%c0_25, %c1_26, %c0_27, %c0_28] : memref<2x18x16x384xbf16, #tpu.memory_space<vmem>>, vector<2x16x16x128xbf16>
    tpu.vector_store %arg6[%c0_25, %c1_26, %c0_27, %c0_28], %11 {strides = array<i32>} : memref<2x18x16x384xbf16, #tpu.memory_space<vmem>>, vector<2x16x16x128xbf16>,
    %c0_29 = arith.constant 0 : index
    %c1_30 = arith.constant 1 : index
    %c8_31 = arith.constant 8 : index
    %c0_32 = arith.constant 0 : index
    %13 = vector.load %arg5[%c0_29, %c1_30, %c8_31, %c0_32] : memref<2x18x32x128xbf16, #tpu.memory_space<vmem>>, vector<2x16x16x128xbf16>
    %c0_33 = arith.constant 0 : index
    %c1_34 = arith.constant 1 : index
    %c0_35 = arith.constant 0 : index
    %c128 = arith.constant 128 : index
    %14 = vector.load %arg6[%c0_33, %c1_34, %c0_35, %c128] : memref<2x18x16x384xbf16, #tpu.memory_space<vmem>>, vector<2x16x16x128xbf16>
    tpu.vector_store %arg6[%c0_33, %c1_34, %c0_35, %c128], %13 {strides = array<i32>} : memref<2x18x16x384xbf16, #tpu.memory_space<vmem>>, vector<2x16x16x128xbf16>,
    %c0_36 = arith.constant 0 : index
    %c1_37 = arith.constant 1 : index
    %c9 = arith.constant 9 : index
    %c0_38 = arith.constant 0 : index
    %15 = vector.load %arg5[%c0_36, %c1_37, %c9, %c0_38] : memref<2x18x32x128xbf16, #tpu.memory_space<vmem>>, vector<2x16x16x128xbf16>
    %c0_39 = arith.constant 0 : index
    %c1_40 = arith.constant 1 : index
    %c0_41 = arith.constant 0 : index
    %c256 = arith.constant 256 : index
    %16 = vector.load %arg6[%c0_39, %c1_40, %c0_41, %c256] : memref<2x18x16x384xbf16, #tpu.memory_space<vmem>>, vector<2x16x16x128xbf16>
    tpu.vector_store %arg6[%c0_39, %c1_40, %c0_41, %c256], %15 {strides = array<i32>} : memref<2x18x16x384xbf16, #tpu.memory_space<vmem>>, vector<2x16x16x128xbf16>,
    %c0_42 = arith.constant 0 : index
    %c0_43 = arith.constant 0 : index
    %c0_44 = arith.constant 0 : index
    %c0_45 = arith.constant 0 : index
    %17 = vector.load %arg6[%c0_42, %c0_43, %c0_44, %c0_45] : memref<2x18x16x384xbf16, #tpu.memory_space<vmem>>, vector<2x16x16x384xbf16>
    %18 = vector.shape_cast %17 : vector<2x16x16x384xbf16> to vector<512x384xbf16>
    %c0_46 = arith.constant 0 : index
    %c0_47 = arith.constant 0 : index
    %c0_48 = arith.constant 0 : index
    %19 = vector.load %arg2[%c0_46, %c0_47, %c0_48] : memref<3x384x128xbf16, #tpu.memory_space<vmem>>, vector<1x384x128xbf16>
    %20 = vector.shape_cast %19 : vector<1x384x128xbf16> to vector<384x128xbf16>
    %cst_49 = arith.constant dense<0.000000e+00> : vector<512x128xf32>
    %21 = tpu.matmul %18, %20, %cst_49 {dimension_numbers = #tpu.dot_dimension_numbers<[1], [0], [0], [1], [0, 0, 1, 1], [], []>} : vector<512x384xbf16>, vector<384x128xbf16>, vector<512x128xf32> -> vector<512x128xf32>
    %c0_50 = arith.constant 0 : index
    %c1_51 = arith.constant 1 : index
    %c0_52 = arith.constant 0 : index
    %c0_53 = arith.constant 0 : index
    %22 = vector.load %arg6[%c0_50, %c1_51, %c0_52, %c0_53] : memref<2x18x16x384xbf16, #tpu.memory_space<vmem>>, vector<2x16x16x384xbf16>
    %23 = vector.shape_cast %22 : vector<2x16x16x384xbf16> to vector<512x384xbf16>
    %c1_54 = arith.constant 1 : index
    %c0_55 = arith.constant 0 : index
    %c0_56 = arith.constant 0 : index
    %24 = vector.load %arg2[%c1_54, %c0_55, %c0_56] : memref<3x384x128xbf16, #tpu.memory_space<vmem>>, vector<1x384x128xbf16>
    %25 = vector.shape_cast %24 : vector<1x384x128xbf16> to vector<384x128xbf16>
    %cst_57 = arith.constant dense<0.000000e+00> : vector<512x128xf32>
    %26 = tpu.matmul %23, %25, %cst_57 {dimension_numbers = #tpu.dot_dimension_numbers<[1], [0], [0], [1], [0, 0, 1, 1], [], []>} : vector<512x384xbf16>, vector<384x128xbf16>, vector<512x128xf32> -> vector<512x128xf32>
    %27 = arith.addf %21, %26 : vector<512x128xf32>
    %c0_58 = arith.constant 0 : index
    %c2 = arith.constant 2 : index
    %c0_59 = arith.constant 0 : index
    %c0_60 = arith.constant 0 : index
    %28 = vector.load %arg6[%c0_58, %c2, %c0_59, %c0_60] : memref<2x18x16x384xbf16, #tpu.memory_space<vmem>>, vector<2x16x16x384xbf16>
    %29 = vector.shape_cast %28 : vector<2x16x16x384xbf16> to vector<512x384xbf16>
    %c2_61 = arith.constant 2 : index
    %c0_62 = arith.constant 0 : index
    %c0_63 = arith.constant 0 : index
    %30 = vector.load %arg2[%c2_61, %c0_62, %c0_63] : memref<3x384x128xbf16, #tpu.memory_space<vmem>>, vector<1x384x128xbf16>
    %31 = vector.shape_cast %30 : vector<1x384x128xbf16> to vector<384x128xbf16>
    %cst_64 = arith.constant dense<0.000000e+00> : vector<512x128xf32>
    %32 = tpu.matmul %29, %31, %cst_64 {dimension_numbers = #tpu.dot_dimension_numbers<[1], [0], [0], [1], [0, 0, 1, 1], [], []>} : vector<512x384xbf16>, vector<384x128xbf16>, vector<512x128xf32> -> vector<512x128xf32>
    %33 = arith.addf %27, %32 : vector<512x128xf32>
    %cst_65 = arith.constant dense<0.000000e+00> : vector<128xf32>
    %34 = vector.multi_reduction <add>, %33, %cst_65 [0] : vector<512x128xf32> to vector<128xf32>
    %35 = vector.shape_cast %34 : vector<128xf32> to vector<1x128xf32>
    %36 = arith.mulf %33, %33 : vector<512x128xf32>
    %cst_66 = arith.constant dense<0.000000e+00> : vector<128xf32>
    %37 = vector.multi_reduction <add>, %36, %cst_66 [0] : vector<512x128xf32> to vector<128xf32>
    %38 = vector.shape_cast %37 : vector<128xf32> to vector<1x128xf32>
    %cst_67 = arith.constant 0.001953125 : f32
    %39 = vector.broadcast %cst_67 : f32 to vector<1x128xf32>
    %40 = arith.mulf %35, %39 : vector<1x128xf32>
    %cst_68 = arith.constant 0.001953125 : f32
    %41 = vector.broadcast %cst_68 : f32 to vector<1x128xf32>
    %42 = arith.mulf %38, %41 : vector<1x128xf32>
    %43 = arith.mulf %40, %40 : vector<1x128xf32>
    %44 = arith.subf %42, %43 : vector<1x128xf32>
    %45 = vector.broadcast %40 : vector<1x128xf32> to vector<512x128xf32>
    %46 = arith.subf %33, %45 : vector<512x128xf32>
    %cst_69 = arith.constant 9.99999974E-6 : f32
    %47 = vector.broadcast %cst_69 : f32 to vector<1x128xf32>
    %48 = arith.addf %44, %47 : vector<1x128xf32>
    %49 = math.rsqrt %48 : vector<1x128xf32>
    %50 = vector.broadcast %49 : vector<1x128xf32> to vector<512x128xf32>
    %51 = arith.mulf %46, %50 : vector<512x128xf32>
    %cst_70 = arith.constant 0.000000e+00 : f32
    %52 = vector.broadcast %cst_70 : f32 to vector<512x128xf32>
    %53 = arith.maximumf %51, %52 : vector<512x128xf32>
    %54 = vector.shape_cast %53 : vector<512x128xf32> to vector<2x16x16x128xf32>
    %55 = arith.truncf %54 : vector<2x16x16x128xf32> to vector<2x16x16x128xbf16>
    %c0_71 = arith.constant 0 : index
    %c1_72 = arith.constant 1 : index
    %c8_73 = arith.constant 8 : index
    %c0_74 = arith.constant 0 : index
    %56 = vector.load %arg5[%c0_71, %c1_72, %c8_73, %c0_74] : memref<2x18x32x128xbf16, #tpu.memory_space<vmem>>, vector<2x16x16x128xbf16>
    tpu.vector_store %arg5[%c0_71, %c1_72, %c8_73, %c0_74], %55 {strides = array<i32>} : memref<2x18x32x128xbf16, #tpu.memory_space<vmem>>, vector<2x16x16x128xbf16>,
    %c0_75 = arith.constant 0 : index
    %c1_76 = arith.constant 1 : index
    %c7_77 = arith.constant 7 : index
    %c0_78 = arith.constant 0 : index
    %57 = vector.load %arg5[%c0_75, %c1_76, %c7_77, %c0_78] : memref<2x18x32x128xbf16, #tpu.memory_space<vmem>>, vector<2x16x16x128xbf16>
    %c0_79 = arith.constant 0 : index
    %c1_80 = arith.constant 1 : index
    %c0_81 = arith.constant 0 : index
    %c0_82 = arith.constant 0 : index
    %58 = vector.load %arg6[%c0_79, %c1_80, %c0_81, %c0_82] : memref<2x18x16x384xbf16, #tpu.memory_space<vmem>>, vector<2x16x16x128xbf16>
    tpu.vector_store %arg6[%c0_79, %c1_80, %c0_81, %c0_82], %57 {strides = array<i32>} : memref<2x18x16x384xbf16, #tpu.memory_space<vmem>>, vector<2x16x16x128xbf16>,
    %c0_83 = arith.constant 0 : index
    %c1_84 = arith.constant 1 : index
    %c8_85 = arith.constant 8 : index
    %c0_86 = arith.constant 0 : index
    %59 = vector.load %arg5[%c0_83, %c1_84, %c8_85, %c0_86] : memref<2x18x32x128xbf16, #tpu.memory_space<vmem>>, vector<2x16x16x128xbf16>
    %c0_87 = arith.constant 0 : index
    %c1_88 = arith.constant 1 : index
    %c0_89 = arith.constant 0 : index
    %c128_90 = arith.constant 128 : index
    %60 = vector.load %arg6[%c0_87, %c1_88, %c0_89, %c128_90] : memref<2x18x16x384xbf16, #tpu.memory_space<vmem>>, vector<2x16x16x128xbf16>
    tpu.vector_store %arg6[%c0_87, %c1_88, %c0_89, %c128_90], %59 {strides = array<i32>} : memref<2x18x16x384xbf16, #tpu.memory_space<vmem>>, vector<2x16x16x128xbf16>,
    %c0_91 = arith.constant 0 : index
    %c1_92 = arith.constant 1 : index
    %c9_93 = arith.constant 9 : index
    %c0_94 = arith.constant 0 : index
    %61 = vector.load %arg5[%c0_91, %c1_92, %c9_93, %c0_94] : memref<2x18x32x128xbf16, #tpu.memory_space<vmem>>, vector<2x16x16x128xbf16>
    %c0_95 = arith.constant 0 : index
    %c1_96 = arith.constant 1 : index
    %c0_97 = arith.constant 0 : index
    %c256_98 = arith.constant 256 : index
    %62 = vector.load %arg6[%c0_95, %c1_96, %c0_97, %c256_98] : memref<2x18x16x384xbf16, #tpu.memory_space<vmem>>, vector<2x16x16x128xbf16>
    tpu.vector_store %arg6[%c0_95, %c1_96, %c0_97, %c256_98], %61 {strides = array<i32>} : memref<2x18x16x384xbf16, #tpu.memory_space<vmem>>, vector<2x16x16x128xbf16>,
    %c0_99 = arith.constant 0 : index
    %c0_100 = arith.constant 0 : index
    %c0_101 = arith.constant 0 : index
    %c0_102 = arith.constant 0 : index
    %63 = vector.load %arg6[%c0_99, %c0_100, %c0_101, %c0_102] : memref<2x18x16x384xbf16, #tpu.memory_space<vmem>>, vector<2x16x16x384xbf16>
    %64 = vector.shape_cast %63 : vector<2x16x16x384xbf16> to vector<512x384xbf16>
    %c0_103 = arith.constant 0 : index
    %c0_104 = arith.constant 0 : index
    %c0_105 = arith.constant 0 : index
    %65 = vector.load %arg3[%c0_103, %c0_104, %c0_105] : memref<3x384x128xbf16, #tpu.memory_space<vmem>>, vector<1x384x128xbf16>
    %66 = vector.shape_cast %65 : vector<1x384x128xbf16> to vector<384x128xbf16>
    %cst_106 = arith.constant dense<0.000000e+00> : vector<512x128xf32>
    %67 = tpu.matmul %64, %66, %cst_106 {dimension_numbers = #tpu.dot_dimension_numbers<[1], [0], [0], [1], [0, 0, 1, 1], [], []>} : vector<512x384xbf16>, vector<384x128xbf16>, vector<512x128xf32> -> vector<512x128xf32>
    %c0_107 = arith.constant 0 : index
    %c1_108 = arith.constant 1 : index
    %c0_109 = arith.constant 0 : index
    %c0_110 = arith.constant 0 : index
    %68 = vector.load %arg6[%c0_107, %c1_108, %c0_109, %c0_110] : memref<2x18x16x384xbf16, #tpu.memory_space<vmem>>, vector<2x16x16x384xbf16>
    %69 = vector.shape_cast %68 : vector<2x16x16x384xbf16> to vector<512x384xbf16>
    %c1_111 = arith.constant 1 : index
    %c0_112 = arith.constant 0 : index
    %c0_113 = arith.constant 0 : index
    %70 = vector.load %arg3[%c1_111, %c0_112, %c0_113] : memref<3x384x128xbf16, #tpu.memory_space<vmem>>, vector<1x384x128xbf16>
    %71 = vector.shape_cast %70 : vector<1x384x128xbf16> to vector<384x128xbf16>
    %cst_114 = arith.constant dense<0.000000e+00> : vector<512x128xf32>
    %72 = tpu.matmul %69, %71, %cst_114 {dimension_numbers = #tpu.dot_dimension_numbers<[1], [0], [0], [1], [0, 0, 1, 1], [], []>} : vector<512x384xbf16>, vector<384x128xbf16>, vector<512x128xf32> -> vector<512x128xf32>
    %73 = arith.addf %67, %72 : vector<512x128xf32>
    %c0_115 = arith.constant 0 : index
    %c2_116 = arith.constant 2 : index
    %c0_117 = arith.constant 0 : index
    %c0_118 = arith.constant 0 : index
    %74 = vector.load %arg6[%c0_115, %c2_116, %c0_117, %c0_118] : memref<2x18x16x384xbf16, #tpu.memory_space<vmem>>, vector<2x16x16x384xbf16>
    %75 = vector.shape_cast %74 : vector<2x16x16x384xbf16> to vector<512x384xbf16>
    %c2_119 = arith.constant 2 : index
    %c0_120 = arith.constant 0 : index
    %c0_121 = arith.constant 0 : index
    %76 = vector.load %arg3[%c2_119, %c0_120, %c0_121] : memref<3x384x128xbf16, #tpu.memory_space<vmem>>, vector<1x384x128xbf16>
    %77 = vector.shape_cast %76 : vector<1x384x128xbf16> to vector<384x128xbf16>
    %cst_122 = arith.constant dense<0.000000e+00> : vector<512x128xf32>
    %78 = tpu.matmul %75, %77, %cst_122 {dimension_numbers = #tpu.dot_dimension_numbers<[1], [0], [0], [1], [0, 0, 1, 1], [], []>} : vector<512x384xbf16>, vector<384x128xbf16>, vector<512x128xf32> -> vector<512x128xf32>
    %79 = arith.addf %73, %78 : vector<512x128xf32>
    %cst_123 = arith.constant dense<0.000000e+00> : vector<128xf32>
    %80 = vector.multi_reduction <add>, %79, %cst_123 [0] : vector<512x128xf32> to vector<128xf32>
    %81 = vector.shape_cast %80 : vector<128xf32> to vector<1x128xf32>
    %82 = arith.mulf %79, %79 : vector<512x128xf32>
    %cst_124 = arith.constant dense<0.000000e+00> : vector<128xf32>
    %83 = vector.multi_reduction <add>, %82, %cst_124 [0] : vector<512x128xf32> to vector<128xf32>
    %84 = vector.shape_cast %83 : vector<128xf32> to vector<1x128xf32>
    %cst_125 = arith.constant 0.001953125 : f32
    %85 = vector.broadcast %cst_125 : f32 to vector<1x128xf32>
    %86 = arith.mulf %81, %85 : vector<1x128xf32>
    %cst_126 = arith.constant 0.001953125 : f32
    %87 = vector.broadcast %cst_126 : f32 to vector<1x128xf32>
    %88 = arith.mulf %84, %87 : vector<1x128xf32>
    %89 = arith.mulf %86, %86 : vector<1x128xf32>
    %90 = arith.subf %88, %89 : vector<1x128xf32>
    %91 = vector.broadcast %86 : vector<1x128xf32> to vector<512x128xf32>
    %92 = arith.subf %79, %91 : vector<512x128xf32>
    %cst_127 = arith.constant 9.99999974E-6 : f32
    %93 = vector.broadcast %cst_127 : f32 to vector<1x128xf32>
    %94 = arith.addf %90, %93 : vector<1x128xf32>
    %95 = math.rsqrt %94 : vector<1x128xf32>
    %96 = vector.broadcast %95 : vector<1x128xf32> to vector<512x128xf32>
    %97 = arith.mulf %92, %96 : vector<512x128xf32>
    %c0_128 = arith.constant 0 : index
    %c0_129 = arith.constant 0 : index
    %c0_130 = arith.constant 0 : index
    %c0_131 = arith.constant 0 : index
    %98 = vector.load %arg1[%c0_128, %c0_129, %c0_130, %c0_131] : memref<2x16x16x128xf32, #tpu.memory_space<vmem>>, vector<2x16x16x128xf32>
    %99 = vector.shape_cast %98 : vector<2x16x16x128xf32> to vector<512x128xf32>
    %100 = arith.addf %97, %99 : vector<512x128xf32>
    %cst_132 = arith.constant 0.000000e+00 : f32
    %101 = vector.broadcast %cst_132 : f32 to vector<512x128xf32>
    %102 = arith.maximumf %100, %101 : vector<512x128xf32>
    %103 = vector.shape_cast %102 : vector<512x128xf32> to vector<2x16x16x128xf32>
    %c0_133 = arith.constant 0 : index
    %c0_134 = arith.constant 0 : index
    %c0_135 = arith.constant 0 : index
    %c0_136 = arith.constant 0 : index
    %104 = vector.load %arg4[%c0_133, %c0_134, %c0_135, %c0_136] : memref<2x16x16x128xf32, #tpu.memory_space<vmem>>, vector<2x16x16x128xf32>
    tpu.vector_store %arg4[%c0_133, %c0_134, %c0_135, %c0_136], %103 {strides = array<i32>} : memref<2x16x16x128xf32, #tpu.memory_space<vmem>>, vector<2x16x16x128xf32>,
    return
  }
  func.func @transform_0(%arg0: i32) -> (i32, i32, i32, i32) {
    %c0_i32 = arith.constant 0 : i32
    %c0_i32_0 = arith.constant 0 : i32
    %c0_i32_1 = arith.constant 0 : i32
    %c0_i32_2 = arith.constant 0 : i32
    %c0_i32_3 = arith.constant 0 : i32
    return %c0_i32, %c0_i32_0, %c0_i32_1, %c0_i32_2 : i32, i32, i32, i32
  }
  func.func @transform_1(%arg0: i32) -> (i32, i32, i32) {
    %c0_i32 = arith.constant 0 : i32
    %c0_i32_0 = arith.constant 0 : i32
    %c0_i32_1 = arith.constant 0 : i32
    %c0_i32_2 = arith.constant 0 : i32
    return %c0_i32, %c0_i32_0, %c0_i32_1 : i32, i32, i32
  }
  func.func @transform_2(%arg0: i32) -> (i32, i32, i32) {
    %c0_i32 = arith.constant 0 : i32
    %c0_i32_0 = arith.constant 0 : i32
    %c0_i32_1 = arith.constant 0 : i32
    %c0_i32_2 = arith.constant 0 : i32
    return %c0_i32, %c0_i32_0, %c0_i32_1 : i32, i32, i32
  }
  func.func @transform_3(%arg0: i32) -> (i32, i32, i32, i32) {
    %c0_i32 = arith.constant 0 : i32
    %c0_i32_0 = arith.constant 0 : i32
    %c0_i32_1 = arith.constant 0 : i32
    %c0_i32_2 = arith.constant 0 : i32
    %c0_i32_3 = arith.constant 0 : i32
    return %c0_i32, %c0_i32_0, %c0_i32_1, %c0_i32_2 : i32, i32, i32, i32
  }
}

</mosaic_0001>

<bundles_post_ra>
// kernel: basic_block_forward.1
= control target key start
LH: loop header
LB: loop body
LE: loop exit
PB: predicated region body
PF: predicated region fallthrough
CT: control target
= control target key end

     0   :  { %v17655_v1 = vmov 0   ;;  %vm1377_vm0 = vsmask.f32 3328  ;;  %vm1152_vm1 = vcmask 1043456   ;;  %vm414_vm2 = vsmask.f32 4352  ;;  %s17651_s0 = inlined_call_operand.vmem [shape: f32[2,16,16,128], index: 0, kind: input, shape index: {}]   ;;  %s17652_s1 = inlined_call_operand.vmem [shape: bf16[3,384,128], index: 1, kind: input, shape index: {}]   ;;  %s17653_s2 = inlined_call_operand.vmem [shape: bf16[3,384,128], index: 2, kind: input, shape index: {}]   ;;  %s17654_s3 = inlined_call_operand.hbm [shape: f32[2,16,16,128], index: 3, kind: output, shape index: {}]  }
   0x1   :  { %v11406_v0 = vld [vmem:[%s17652_s1 + $0xc0] sm:$0xff]   ;;  %2419 = vmatprep.subr.bf16.mxu0 %v17655_v1  ;;  %17 = vst [vmem:[#allocation2 + $0x10] sm:$0xf] %v17655_v1  ;;  %18 = vst [vmem:[#allocation2 + $0x20] sm:$0xf] %v17655_v1  ;;  %v11209_v3 = vld [vmem:[%s17652_s1 + $0xc8] sm:$0xff]  }
   0x2   :  { %19 = vst [vmem:[#allocation2 + $0x30] sm:$0xf] %v17655_v1  ;;  %20 = vst [vmem:[#allocation2 + $0x40] sm:$0xf] %v17655_v1  ;;  %v11208_v2 = vld [vmem:[%s17652_s1 + $0x140] sm:$0xff]   ;;  %2420 = vmatpush1.bf16.msra.mxu0 %v11406_v0  ;;  %v11210_v4 = vld [vmem:[%s17652_s1 + $0x148] sm:$0xff]  }
   0x3   :  { %21 = vst [vmem:[#allocation2 + $0x50] sm:$0xf] %v17655_v1  ;;  %22 = vst [vmem:[#allocation2 + $0x60] sm:$0xf] %v17655_v1  ;;  %10723 = vmatprep.subr.bf16.mxu1 %v11208_v2  ;;  %2421 = vmatprep.subr.bf16.mxu0 %v17655_v1  ;;  %v11212_v5 = vld [vmem:[%s17652_s1 + $0x150] sm:$0xff]   ;;  %v11214_v7 = vld [vmem:[%s17652_s1 + $0x158] sm:$0xff]  }
   0x4   :  { %23 = vst [vmem:[#allocation2 + $0x70] sm:$0xf] %v17655_v1  ;;  %24 = vst [vmem:[#allocation2 + $0x80] sm:$0xf] %v17655_v1  ;;  %10724 = vmatpush3.bf16.msra.mxu1 %v11208_v2  ;;  %v11211_v6 = vld [vmem:[%s17652_s1 + $0xd0] sm:$0xff]   ;;  %v11213_v8 = vld [vmem:[%s17652_s1 + $0xd8] sm:$0xff]  }
   0x5   :  { %25 = vst [vmem:[#allocation2 + $0x90] sm:$0xf] %v17655_v1  ;;  %26 = vst [vmem:[#allocation2 + $0xa0] sm:$0xf] %v17655_v1  ;;  %10725 = vmatprep.subr.bf16.mxu1 %v11210_v4  ;;  %v11216_v9 = vld [vmem:[%s17652_s1 + $0x160] sm:$0xff]   ;;  %v11217_v11 = vld [vmem:[%s17652_s1 + $0xe8] sm:$0xff]  }
   0x6   :  { %27 = vst [vmem:[#allocation2 + $0xb0] sm:$0xf] %v17655_v1  ;;  %28 = vst [vmem:[#allocation2 + $0xc0] sm:$0xf] %v17655_v1  ;;  %2422 = vmatpush1.bf16.msra.mxu0 %v11209_v3  ;;  %v11215_v10 = vld [vmem:[%s17652_s1 + $0xe0] sm:$0xff]   ;;  %v95_v13 = vld [vmem:[%s17651_s0 + $0x8] sm:$0xff] }
   0x7   :  { %29 = vst [vmem:[#allocation2 + $0xd0] sm:$0xf] %v17655_v1  ;;  %30 = vst [vmem:[#allocation2 + $0xe0] sm:$0xf] %v17655_v1  ;;  %2423 = vmatprep.subr.bf16.mxu0 %v17655_v1  ;;  %v94_v12 = vld [vmem:[%s17651_s0] sm:$0xff]  ;;  %v11218_v14 = vld [vmem:[%s17652_s1 + $0x168] sm:$0xff]  }
   0x8   :  { %31 = vst [vmem:[#allocation2 + $0xf0] sm:$0xf] %v17655_v1  ;;  %32 = vst [vmem:[#allocation2 + $0x100] sm:$0xf] %v17655_v1  ;;  %10726 = vmatpush3.bf16.msra.mxu1 %v11210_v4  ;;  %v158_v15 = vpack.c.bf16 %v95_v13, %v94_v12  ;;  %v96_v16 = vld [vmem:[%s17651_s0 + $0x10] sm:$0xff]  ;;  %v97_v17 = vld [vmem:[%s17651_s0 + $0x18] sm:$0xff] }
   0x9   :  { %33 = vst [vmem:[#allocation2 + $0x130] sm:$0xf] %v17655_v1  ;;  %34 = vst [vmem:[#allocation2 + $0x140] sm:$0xf] %v17655_v1  ;;  %10727 = vmatprep.subr.bf16.mxu1 %v11212_v5  ;;  %v159_v19 = vpack.c.bf16 %v97_v17, %v96_v16  ;;  %v11219_v20 = vld [vmem:[%s17652_s1 + $0xf0] sm:$0xff]   ;;  %v98_v21 = vld [vmem:[%s17651_s0 + $0x20] sm:$0xff] }
   0xa   :  { %35 = vst [vmem:[#allocation2 + $0x150] sm:$0xf] %v17655_v1  ;;  %36 = vst [vmem:[#allocation2 + $0x160] sm:$0xf] %v17655_v1  ;;  %2424 = vmatpush1.bf16.msra.mxu0 %v11211_v6  ;;  %v222_v18 = vrot.slane %v158_v15, 4  ;;  %v99_v22 = vld [vmem:[%s17651_s0 + $0x28] sm:$0xff] }
   0xb   :  { %37 = vst [vmem:[#allocation2 + $0x170] sm:$0xf] %v17655_v1  ;;  %38 = vst [vmem:[#allocation2 + $0x180] sm:$0xf] %v17655_v1  ;;  %2425 = vmatprep.subr.bf16.mxu0 %v17655_v1  ;;  %v11220_v23 = vld [vmem:[%s17652_s1 + $0x170] sm:$0xff]   ;;  %v223_v24 = vrot.slane %v159_v19, 4  ;;  %v160_v25 = vpack.c.bf16 %v99_v22, %v98_v21 }
   0xc   :  { %39 = vst [vmem:[#allocation2 + $0x190] sm:$0xf] %v17655_v1  ;;  %40 = vst [vmem:[#allocation2 + $0x1a0] sm:$0xf] %v17655_v1  ;;  %10728 = vmatpush3.bf16.msra.mxu1 %v11212_v5  ;;  %v100_v26 = vld [vmem:[%s17651_s0 + $0x30] sm:$0xff]  ;;  %v101_v27 = vld [vmem:[%s17651_s0 + $0x38] sm:$0xff] }
   0xd   :  { %41 = vst [vmem:[#allocation2 + $0x1b0] sm:$0xf] %v17655_v1  ;;  %42 = vst [vmem:[#allocation2 + $0x1c0] sm:$0xf] %v17655_v1  ;;  %10729 = vmatprep.subr.bf16.mxu1 %v11214_v7  ;;  %v224_v28 = vrot.slane %v160_v25, 4  ;;  %v161_v29 = vpack.c.bf16 %v101_v27, %v100_v26  ;;  %v11222_v30 = vld [vmem:[%s17652_s1 + $0x178] sm:$0xff]  }
   0xe   :  { %43 = vst [vmem:[#allocation2 + $0x1d0] sm:$0xf] %v17655_v1  ;;  %44 = vst [vmem:[#allocation2 + $0x1e0] sm:$0xf] %v17655_v1  ;;  %2426 = vmatpush1.bf16.msra.mxu0 %v11213_v8  ;;  %v102_v31 = vld [vmem:[%s17651_s0 + $0x40] sm:$0xff]  ;;  %v103_v33 = vld [vmem:[%s17651_s0 + $0x48] sm:$0xff] }
   0xf   :  { %45 = vst [vmem:[#allocation2 + $0x1f0] sm:$0xf] %v17655_v1  ;;  %46 = vst [vmem:[#allocation2 + $0x200] sm:$0xf] %v17655_v1  ;;  %2427 = vmatprep.subr.bf16.mxu0 %v17655_v1  ;;  %v225_v32 = vrot.slane %v161_v29, 4  ;;  %v11221_v34 = vld [vmem:[%s17652_s1 + $0xf8] sm:$0xff]   ;;  %v162_v35 = vpack.c.bf16 %v103_v33, %v102_v31 }
  0x10   :  { %47 = vst [vmem:[#allocation2 + $0x210] sm:$0xf] %v17655_v1  ;;  %48 = vst [vmem:[#allocation2 + $0x220] sm:$0xf] %v17655_v1  ;;  %10730 = vmatpush3.bf16.msra.mxu1 %v11214_v7  ;;  %v104_v36 = vld [vmem:[%s17651_s0 + $0x50] sm:$0xff]  ;;  %v105_v37 = vld [vmem:[%s17651_s0 + $0x58] sm:$0xff] }
  0x11   :  { %49 = vst [vmem:[#allocation2 + $0x18] sm:$0xf0] %v17655_v1  ;;  %50 = vst [vmem:[#allocation2 + $0x28] sm:$0xf0] %v17655_v1  ;;  %10731 = vmatprep.subr.bf16.mxu1 %v11216_v9  ;;  %v163_v38 = vpack.c.bf16 %v105_v37, %v104_v36  ;;  %v226_v41 = vrot.slane %v162_v35, 4  ;;  %v11223_v46 = vld [vmem:[%s17652_s1 + $0x100] sm:$0xff]  }
  0x12   :  { %51 = vst [vmem:[#allocation2 + $0x38] sm:$0xf0] %v17655_v1  ;;  %52 = vst [vmem:[#allocation2 + $0x48] sm:$0xf0] %v17655_v1  ;;  %2428 = vmatpush1.bf16.msra.mxu0 %v11215_v10  ;;  %v11225_v61 = vld [vmem:[%s17652_s1 + $0x108] sm:$0xff]   ;;  %v11224_v8 = vld [vmem:[%s17652_s1] sm:$0xff]  }
  0x13   :  { %53 = vst [vmem:[#allocation2 + $0x58] sm:$0xf0] %v17655_v1  ;;  %54 = vst [vmem:[#allocation2 + $0x68] sm:$0xf0] %v17655_v1  ;;  %2429 = vmatprep.subr.bf16.mxu0 %v17655_v1  ;;  %v227_v49 = vrot.slane %v163_v38, 4  ;;  %v11226_v19 = vld [vmem:[%s17652_s1 + $0x110] sm:$0xff]  }
  0x14   :  { %55 = vst [vmem:[#allocation2 + $0x78] sm:$0xf0] %v17655_v1  ;;  %56 = vst [vmem:[#allocation2 + $0x88] sm:$0xf0] %v17655_v1  ;;  %10732 = vmatpush3.bf16.msra.mxu1 %v11216_v9  ;;  %v11227_v27 = vld [vmem:[%s17652_s1 + $0x8] sm:$0xff]   ;;  %v11228_v38 = vld [vmem:[%s17652_s1 + $0x118] sm:$0xff]  }
  0x15   :  { %57 = vst [vmem:[#allocation2 + $0x98] sm:$0xf0] %v17655_v1  ;;  %58 = vst [vmem:[#allocation2 + $0xa8] sm:$0xf0] %v17655_v1  ;;  %10733 = vmatprep.subr.bf16.mxu1 %v11218_v14  ;;  %v107_v35 = vld [vmem:[%s17651_s0 + $0x68] sm:$0xff] }
  0x16   :  { %59 = vst [vmem:[#allocation2 + $0xb8] sm:$0xf0] %v17655_v1  ;;  %60 = vst [vmem:[#allocation2 + $0xc8] sm:$0xf0] %v17655_v1  ;;  %2430 = vmatpush1.bf16.msra.mxu0 %v11217_v11 }
  0x17   :  { %61 = vst [vmem:[#allocation2 + $0xd8] sm:$0xf0] %v17655_v1  ;;  %62 = vst [vmem:[#allocation2 + $0xe8] sm:$0xf0] %v17655_v1  ;;  %2431 = vmatprep.subr.bf16.mxu0 %v17655_v1 }
  0x18   :  { %63 = vst [vmem:[#allocation2 + $0xf8] sm:$0xf0] %v17655_v1  ;;  %64 = vst [vmem:[#allocation2 + $0x108] sm:$0xf0] %v17655_v1  ;;  %10734 = vmatpush3.bf16.msra.mxu1 %v11218_v14 }
  0x19   :  { %65 = vst [vmem:[#allocation2 + $0x138] sm:$0xf0] %v17655_v1  ;;  %66 = vst [vmem:[#allocation2 + $0x148] sm:$0xf0] %v17655_v1  ;;  %10735 = vmatprep.subr.bf16.mxu1 %v11220_v23 }
  0x1a   :  { %67 = vst [vmem:[#allocation2 + $0x158] sm:$0xf0] %v17655_v1  ;;  %68 = vst [vmem:[#allocation2 + $0x168] sm:$0xf0] %v17655_v1  ;;  %2432 = vmatpush1.bf16.msra.mxu0 %v11219_v20 }
  0x1b   :  { %69 = vst [vmem:[#allocation2 + $0x178] sm:$0xf0] %v17655_v1  ;;  %70 = vst [vmem:[#allocation2 + $0x188] sm:$0xf0] %v17655_v1  ;;  %2433 = vmatprep.subr.bf16.mxu0 %v17655_v1 }
  0x1c   :  { %71 = vst [vmem:[#allocation2 + $0x198] sm:$0xf0] %v17655_v1  ;;  %72 = vst [vmem:[#allocation2 + $0x1a8] sm:$0xf0] %v17655_v1  ;;  %10736 = vmatpush3.bf16.msra.mxu1 %v11220_v23 }
  0x1d   :  { %73 = vst [vmem:[#allocation2 + $0x1b8] sm:$0xf0] %v17655_v1  ;;  %74 = vst [vmem:[#allocation2 + $0x1c8] sm:$0xf0] %v17655_v1  ;;  %10737 = vmatprep.subr.bf16.mxu1 %v11222_v30 }
  0x1e   :  { %75 = vst [vmem:[#allocation2 + $0x1d8] sm:$0xf0] %v17655_v1  ;;  %76 = vst [vmem:[#allocation2 + $0x1e8] sm:$0xf0] %v17655_v1  ;;  %2434 = vmatpush1.bf16.msra.mxu0 %v11221_v34  ;;  %v106_v34 = vld [vmem:[%s17651_s0 + $0x60] sm:$0xff] }
  0x1f   :  { %77 = vst [vmem:[#allocation2 + $0x1f8] sm:$0xf0] %v17655_v1  ;;  %78 = vst [vmem:[#allocation2 + $0x208] sm:$0xf0] %v17655_v1  ;;  %2435 = vmatprep.subr.bf16.mxu0 %v17655_v1 }
  0x20   :  { %79 = vst [vmem:[#allocation2 + $0x218] sm:$0xf0] %v17655_v1  ;;  %80 = vst [vmem:[#allocation2 + $0x228] sm:$0xf0] %v17655_v1  ;;  %10738 = vmatpush3.bf16.msra.mxu1 %v11222_v30 }
  0x21   :  { %286 = vst [vmem:[#allocation2 + $0x18] ss:$-4 sps:$4 sm:$0xff] %v222_v18   ;;  %288 = vst [vmem:[#allocation2 + $0x28] ss:$-4 sps:$4 sm:$0xff] %v223_v24   ;;  %3141 = vmatprep.subr.bf16.mxu1 %v17655_v1 }
  0x22   :  { %290 = vst [vmem:[#allocation2 + $0x38] ss:$-4 sps:$4 sm:$0xff] %v224_v28   ;;  %292 = vst [vmem:[#allocation2 + $0x48] ss:$-4 sps:$4 sm:$0xff] %v225_v32   ;;  %2436 = vmatpush1.bf16.msra.mxu0 %v11223_v46 }
  0x23   :  { %294 = vst [vmem:[#allocation2 + $0x58] ss:$-4 sps:$4 sm:$0xff] %v226_v41   ;;  %296 = vst [vmem:[#allocation2 + $0x68] ss:$-4 sps:$4 sm:$0xff] %v227_v49   ;;  %2437 = vmatprep.subr.bf16.mxu0 %v17655_v1 }
  0x26   :  { %2438 = vmatpush1.bf16.msra.mxu0 %v11225_v61  ;;  %v164_v61 = vpack.c.bf16 %v107_v35, %v106_v34 }
  0x27   :  { %2439 = vmatprep.subr.bf16.mxu0 %v17655_v1 }
  0x28   :  { %v1313_v39 = vld [vmem:[#allocation2 + $0x10] sm:$0xf0]  ;;  %v1314_v40 = vld [vmem:[#allocation2 + $0x18] sm:$0x1f]  ;;  %v1315_v47 = vld [vmem:[#allocation2 + $0x20] sm:$0xf0] }
  0x29   :  { %v1379_v42 = vshrl.u32 %v1313_v39, 16  ;;  %v1382_v43 = vshll.u32 %v1313_v39, 16  ;;  %v1387_v44 = vshrl.u32 %v1314_v40, 16  ;;  %v1390_v45 = vshll.u32 %v1314_v40, 16  ;;  %v1316_v48 = vld [vmem:[#allocation2 + $0x28] sm:$0x1f] }
  0x2a   :  { %v1396_v54 = vshrl.u32 %v1315_v47, 16  ;;  %v1399_v55 = vshll.u32 %v1315_v47, 16  ;;  %v1404_v56 = vshrl.u32 %v1316_v48, 16  ;;  %v1407_v57 = vshll.u32 %v1316_v48, 16  ;;  %v1317_v58 = vld [vmem:[#allocation2 + $0x30] sm:$0xf0]  ;;  %2440 = vmatpush1.bf16.msra.mxu0 %v11226_v19 }
  0x2b   :  { %v1381_v50 = vrot.slane %v1379_v42, 4  ;;  %v1384_v51 = vrot.slane %v1382_v43, 5  ;;  %v1389_v52 = vrot.slane %v1387_v44, 4  ;;  %v1392_v53 = vrot.slane %v1390_v45, 5  ;;  %v1318_v62 = vld [vmem:[#allocation2 + $0x38] sm:$0x1f]  ;;  %2441 = vmatprep.subr.bf16.mxu0 %v17655_v1 }
  0x2c   :  { %v1413_v63 = vshrl.u32 %v1317_v58, 16  ;;  %v1416_v0 = vshll.u32 %v1317_v58, 16  ;;  %v1398_v2 = vrot.slane %v1396_v54, 4  ;;  %v1401_v3 = vrot.slane %v1399_v55, 5  ;;  %v1319_v6 = vld [vmem:[#allocation2 + $0x40] sm:$0xf0] }
  0x2d   :  { %v1385_v59 = vor.u32 %v1384_v51, %v1381_v50  ;;  %v1393_v60 = vor.u32 %v1392_v53, %v1389_v52  ;;  %v1406_v4 = vrot.slane %v1404_v56, 4  ;;  %v1409_v5 = vrot.slane %v1407_v57, 5  ;;  %v1320_v12 = vld [vmem:[#allocation2 + $0x48] sm:$0x1f]  ;;  %v1321_v22 = vld [vmem:[#allocation2 + $0x50] sm:$0xf0] }
  0x2e   :  { %v1415_v9 = vrot.slane %v1413_v63, 4  ;;  %v1418_v10 = vrot.slane %v1416_v0, 5  ;;  %v1421_v11 = vshrl.u32 %v1318_v62, 16  ;;  %v1402_v13 = vor.u32 %v1401_v3, %v1398_v2  ;;  %v1322_v28 = vld [vmem:[#allocation2 + $0x58] sm:$0x1f]  ;;  %v108_v42 = vld [vmem:[%s17651_s0 + $0x70] sm:$0xff]  ;;  %2442 = vmatpush1.bf16.msra.mxu0 %v11228_v38 }
  0x2f   :  { %v11571_v7 = vsel %vm1377_vm0, %v1385_v59, %v1393_v60  ;;  %v1410_v14 = vor.u32 %v1409_v5, %v1406_v4  ;;  %v1424_v15 = vshll.u32 %v1318_v62, 16  ;;  %v1430_v16 = vshrl.u32 %v1319_v6, 16  ;;  %v1323_v33 = vld [vmem:[#allocation2 + $0x60] sm:$0xf0]  ;;  %v1324_v41 = vld [vmem:[#allocation2 + $0x68] sm:$0x1f]  ;;  %2443 = vmatprep.subr.bf16.mxu0 %v17655_v1 }
  0x30   :  { %18020 = vst [vmem:[#allocation7_spill] sm:$0xff] %v11571_v7  ;;  %10739 = vmatprep.mubr.bf16.mxu1 %v11571_v7  ;;  %v1419_v17 = vor.u32 %v1418_v10, %v1415_v9  ;;  %v1423_v18 = vrot.slane %v1421_v11, 4  ;;  %v1433_v20 = vshll.u32 %v1319_v6, 16  ;;  %v1438_v21 = vshrl.u32 %v1320_v12, 16  ;;  %v109_v47 = vld [vmem:[%s17651_s0 + $0x78] sm:$0xff]  ;;  %v11230_v56 = vld [vmem:[%s17652_s1 + $0x10] sm:$0xff]  }
  0x31   :  { %v11582_v23 = vsel %vm1377_vm0, %v1402_v13, %v1410_v14  ;;  %v1426_v24 = vrot.slane %v1424_v15, 5  ;;  %v1432_v25 = vrot.slane %v1430_v16, 4  ;;  %v1441_v26 = vshll.u32 %v1320_v12, 16  ;;  %v11229_v59 = vld [vmem:[%s17652_s1 + $0x120] sm:$0xff]   ;;  %v1024_v62 = vld [vmem:[#allocation2 + $0x10] sm:$0xf0] }
  0x32   :  { %18021 = vst [vmem:[#allocation8_spill] sm:$0xff] %v11582_v23  ;;  %10740 = vmatmul.mubr.bf16.vlgmr.msra.gmra.mrb[0].mxu1 %v11582_v23  ;;  %v1435_v29 = vrot.slane %v1433_v20, 5  ;;  %v1440_v30 = vrot.slane %v1438_v21, 4  ;;  %v1447_v31 = vshrl.u32 %v1321_v22, 16  ;;  %v1450_v32 = vshll.u32 %v1321_v22, 16  ;;  %v110_v0 = vld [vmem:[%s17651_s0 + $0x80] sm:$0xff]  ;;  %2444 = vmatpush1.bf16.msra.mxu0 %v11229_v59 }
  0x33   :  { %3142 = vmatpush1.bf16.msra.mxu1 %v11224_v8  ;;  %v1427_v36 = vor.u32 %v1426_v24, %v1423_v18  ;;  %v1443_v37 = vrot.slane %v1441_v26, 5  ;;  %v1455_v39 = vshrl.u32 %v1322_v28, 16  ;;  %v1458_v40 = vshll.u32 %v1322_v28, 16  ;;  %v1025_v63 = vld [vmem:[#allocation2 + $0x18] sm:$0xf]  ;;  %v111_v2 = vld [vmem:[%s17651_s0 + $0x88] sm:$0xff]  ;;  %2445 = vmatprep.subr.bf16.mxu0 %v17655_v1 }
  0x34   :  { %v1436_v43 = vor.u32 %v1435_v29, %v1432_v25  ;;  %3143 = vmatprep.subr.bf16.mxu1 %v17655_v1  ;;  %v1449_v44 = vrot.slane %v1447_v31, 4  ;;  %v1452_v45 = vrot.slane %v1450_v32, 5  ;;  %v1464_v46 = vshrl.u32 %v1323_v33, 16  ;;  %v350_v8 = vld [vmem:[#allocation2 + $0x10] sm:$0xf8]  ;;  %v113_v15 = vld [vmem:[%s17651_s0 + $0x98] sm:$0xff] }
  0x35   :  { %v11606_v48 = vsel %vm1377_vm0, %v1419_v17, %v1427_v36  ;;  %v1444_v49 = vor.u32 %v1443_v37, %v1440_v30  ;;  %v1457_v50 = vrot.slane %v1455_v39, 4  ;;  %v1460_v51 = vrot.slane %v1458_v40, 5  ;;  %v112_v9 = vld [vmem:[%s17651_s0 + $0x90] sm:$0xff]  ;;  %v351_v14 = vld [vmem:[#allocation2 + $0x18] sm:$0xf]  ;;  %v11231_v22 = vld [vmem:[%s17652_s1 + $0x128] sm:$0xff]  }
  0x36   :  { %18022 = vst [vmem:[#allocation9_spill] sm:$0xff] %v11606_v48  ;;  %10743 = vmatprep.mubr.bf16.mxu1 %v11606_v48  ;;  %v1453_v52 = vor.u32 %v1452_v45, %v1449_v44  ;;  %v1466_v53 = vrot.slane %v1464_v46, 4  ;;  %v1467_v54 = vshll.u32 %v1323_v33, 16  ;;  %v1472_v55 = vshrl.u32 %v1324_v41, 16  ;;  %v11233_v18 = vld [vmem:[%s17652_s1 + $0x18] sm:$0xff]   ;;  %v114_v28 = vld [vmem:[%s17651_s0 + $0xa0] sm:$0xff]  ;;  %2446 = vmatpush1.bf16.msra.mxu0 %v11231_v22 }
  0x37   :  { %v11614_v57 = vsel %vm1377_vm0, %v1436_v43, %v1444_v49  ;;  %3144 = vmatpush1.bf16.msra.mxu1 %v11227_v27  ;;  %v1461_v58 = vor.u32 %v1460_v51, %v1457_v50  ;;  %v1475_v60 = vshll.u32 %v1324_v41, 16  ;;  %v165_v5 = vpack.c.bf16 %v109_v47, %v108_v42  ;;  %v1026_v27 = vld [vmem:[#allocation2 + $0x20] sm:$0xf0]  ;;  %v1027_v33 = vld [vmem:[#allocation2 + $0x28] sm:$0xf]  ;;  %v11665_v46 = vld [vmem:[%s17651_s0 + $0xb0] sm:$0xff]  ;;  %2447 = vmatprep.subr.bf16.mxu0 %v17655_v1 }
  0x38   :  { %18023 = vst [vmem:[#allocation10_spill] sm:$0xff] %v11614_v57  ;;  %v1469_v3 = vrot.slane %v1467_v54, 5  ;;  %v1474_v4 = vrot.slane %v1472_v55, 4  ;;  %3145 = vmatprep.subr.bf16.mxu1 %v17655_v1  ;;  %v1153_v6 = vrot.slane %v1024_v62, 4  ;;  %v228_v12 = vrot.slane %v164_v61, 4  ;;  %v115_v40 = vld [vmem:[%s17651_s0 + $0xa8] sm:$0xff] }
  0x39   :  { %v11630_v10 = vsel %vm1377_vm0, %v1453_v52, %v1461_v58  ;;  %v1477_v11 = vrot.slane %v1475_v60, 5  ;;  %v1154_v13 = vrot.slane %v1025_v63, 4  ;;  %v229_v17 = vrot.slane %v165_v5, 4  ;;  %v352_v34 = vld [vmem:[#allocation2 + $0x20] sm:$0xf8]  ;;  %v11670_v47 = vld [vmem:[%s17651_s0 + $0xb8] sm:$0xff] }
  0x3a   :  { %18024 = vst [vmem:[#allocation11_spill] sm:$0xff] %v11630_v10  ;;  %10744 = vmatmul.mubr.bf16.gmra.mrb[4].mxu1 %v11614_v57  ;;  %v1470_v16 = vor.u32 %v1469_v3, %v1466_v53  ;;  %v416_v19 = vshrl.u32 %v350_v8, 16  ;;  %v419_v20 = vshll.u32 %v350_v8, 16  ;;  %298 = vst [vmem:[#allocation2 + $0x78] ss:$-4 sps:$4 sm:$0xff] %v228_v12   ;;  %v424_v25 = vshrl.u32 %v351_v14, 16 }
  0x3b   :  { %10747 = vmatprep.mubr.bf16.mxu1 %v11630_v10  ;;  %v1478_v21 = vor.u32 %v1477_v11, %v1474_v4  ;;  %3146 = vmatpush1.bf16.msra.mxu1 %v11230_v56  ;;  %v11645_v24 = vsel %vm1152_vm1, %v1153_v6, %v1154_v13  ;;  %v427_v26 = vshll.u32 %v351_v14, 16  ;;  %300 = vst [vmem:[#allocation2 + $0x88] ss:$-4 sps:$4 sm:$0xff] %v229_v17   ;;  %v1156_v38 = vrot.slane %v1026_v27, 4  ;;  %v353_v39 = vld [vmem:[#allocation2 + $0x28] sm:$0xf] }
  0x3c   :  { %3147 = vmatprep.subr.bf16.mxu1 %v17655_v1  ;;  %2451 = vmatprep.mubr.bf16.mxu0 %v11645_v24  ;;  %v418_v29 = vrot.slane %v416_v19, 3  ;;  %v421_v30 = vrot.slane %v419_v20, 4  ;;  %v166_v31 = vpack.c.bf16 %v111_v2, %v110_v0  ;;  %v167_v32 = vpack.c.bf16 %v113_v15, %v112_v9  ;;  %v11235_v44 = vld [vmem:[%s17652_s1 + $0x20] sm:$0xff]   ;;  %v11684_v58 = vld [vmem:[%s17651_s0 + $0xc8] sm:$0xff]  ;;  %v11232_v59 = vld [vmem:[%s17652_s1 + $0x130] sm:$0xff]  }
  0x3d   :  { %v11653_v35 = vsel %vm1377_vm0, %v1470_v16, %v1478_v21  ;;  %v426_v36 = vrot.slane %v424_v25, 3  ;;  %v429_v37 = vrot.slane %v427_v26, 4  ;;  %v1157_v45 = vrot.slane %v1027_v33, 4  ;;  %v11675_v53 = vld [vmem:[%s17651_s0 + $0xc0] sm:$0xff]  ;;  %v11236_v0 = vld [vmem:[%s17652_s1 + $0x28] sm:$0xff]   ;;  %v11705_v20 = vld [vmem:[%s17651_s0 + $0xd0] sm:$0xff]  ;;  %2448 = vmatpush1.bf16.msra.mxu0 %v11232_v59 }
  0x3e   :  { %18025 = vst [vmem:[#allocation12_spill] sm:$0xff] %v11653_v35  ;;  %v422_v41 = vor.u32 %v421_v30, %v418_v29  ;;  %v230_v42 = vrot.slane %v166_v31, 4  ;;  %v231_v43 = vrot.slane %v167_v32, 4  ;;  %v433_v50 = vshrl.u32 %v352_v34, 16  ;;  %v11234_v27 = vld [vmem:[%s17652_s1 + $0x138] sm:$0xff]   ;;  %2449 = vmatprep.subr.bf16.mxu0 %v17655_v1  ;;  %v11237_v33 = vld [vmem:[%s17652_s1 + $0x30] sm:$0xff]  }
  0x3f   :  { %3148 = vmatpush1.bf16.msra.mxu1 %v11233_v18  ;;  %v430_v49 = vor.u32 %v429_v37, %v426_v36  ;;  %v436_v51 = vshll.u32 %v352_v34, 16  ;;  %v441_v52 = vshrl.u32 %v353_v39, 16  ;;  %v11679_v54 = vsel %vm1152_vm1, %v1156_v38, %v1157_v45  ;;  %v11714_v32 = vld [vmem:[%s17651_s0 + $0xd8] sm:$0xff] }
  0x40   :  { %302 = vst [vmem:[#allocation2 + $0x98] ss:$-4 sps:$4 sm:$0xff] %v230_v42   ;;  %304 = vst [vmem:[#allocation2 + $0xa8] ss:$-4 sps:$4 sm:$0xff] %v231_v43   ;;  %3149 = vmatprep.subr.bf16.mxu1 %v17655_v1  ;;  %v444_v55 = vshll.u32 %v353_v39, 16  ;;  %v168_v56 = vpack.c.bf16 %v115_v40, %v114_v28  ;;  %v435_v60 = vrot.slane %v433_v50, 3  ;;  %v169_v63 = vpack.c.bf16 %v11670_v47, %v11665_v46 }
  0x41   :  { %18026 = vst [vmem:[#allocation13_spill] sm:$0xff] %v11679_v54  ;;  %v438_v61 = vrot.slane %v436_v51, 4  ;;  %v443_v62 = vrot.slane %v441_v52, 3  ;;  %v1325_v2 = vld [vmem:[#allocation2 + $0x70] sm:$0xf0]  ;;  %v11697_v4 = vsel %vm414_vm2, %v422_v41, %v430_v49  ;;  %v170_v8 = vpack.c.bf16 %v11684_v58, %v11675_v53  ;;  %2450 = vmatpush1.bf16.msra.mxu0 %v11234_v27 }
  0x42   :  { %10748 = vmatmul.mubr.bf16.gmra.mrb[8].mxu1 %v11653_v35  ;;  %v1326_v3 = vld [vmem:[#allocation2 + $0x78] sm:$0x1f]  ;;  %v446_v5 = vrot.slane %v444_v55, 4  ;;  %v232_v6 = vrot.slane %v168_v56, 4  ;;  %v1481_v9 = vshrl.u32 %v1325_v2, 16  ;;  %v1484_v11 = vshll.u32 %v1325_v2, 16 }
  0x43   :  { %v1489_v12 = vshrl.u32 %v1326_v3, 16  ;;  %v1492_v13 = vshll.u32 %v1326_v3, 16  ;;  %v1327_v14 = vld [vmem:[#allocation2 + $0x80] sm:$0xf0]  ;;  %3150 = vmatpush1.bf16.msra.mxu1 %v11235_v44  ;;  %v1328_v15 = vld [vmem:[#allocation2 + $0x88] sm:$0x1f]  ;;  %v439_v18 = vor.u32 %v438_v61, %v435_v60  ;;  %v171_v41 = vpack.c.bf16 %v11714_v32, %v11705_v20 }
  0x44   :  { %v1498_v16 = vshrl.u32 %v1327_v14, 16  ;;  %v1501_v17 = vshll.u32 %v1327_v14, 16  ;;  %v447_v19 = vor.u32 %v446_v5, %v443_v62  ;;  %306 = vst [vmem:[#allocation2 + $0xb8] ss:$-4 sps:$4 sm:$0xff] %v232_v6   ;;  %3151 = vmatprep.subr.bf16.mxu1 %v17655_v1  ;;  %v1483_v21 = vrot.slane %v1481_v9, 4  ;;  %2452 = vmatmul.mubr.bf16.vlgmr.msra.gmra.mrb[0].mxu0 %v11697_v4 }
  0x45   :  { %v1486_v22 = vrot.slane %v1484_v11, 5  ;;  %v1491_v25 = vrot.slane %v1489_v12, 4  ;;  %v1494_v26 = vrot.slane %v1492_v13, 5  ;;  %v1506_v30 = vshrl.u32 %v1328_v15, 16  ;;  %2459 = vmatprep.mubr.bf16.mxu0 %v11679_v54  ;;  %v354_v27 = vld [vmem:[#allocation2 + $0x30] sm:$0xf8] }
  0x46   :  { %v1500_v28 = vrot.slane %v1498_v16, 4  ;;  %v1503_v29 = vrot.slane %v1501_v17, 5  ;;  %v1509_v31 = vshll.u32 %v1328_v15, 16  ;;  %v11720_v40 = vsel %vm414_vm2, %v439_v18, %v447_v19  ;;  %v1028_v18 = vld [vmem:[#allocation2 + $0x30] sm:$0xf0] }
  0x47   :  { %v1487_v34 = vor.u32 %v1486_v22, %v1483_v21  ;;  %v1495_v36 = vor.u32 %v1494_v26, %v1491_v25  ;;  %v1329_v37 = vld [vmem:[#allocation2 + $0x90] sm:$0xf0]  ;;  %v1330_v38 = vld [vmem:[#allocation2 + $0x98] sm:$0x1f]  ;;  %v1331_v39 = vld [vmem:[#allocation2 + $0xa0] sm:$0xf0]  ;;  %3152 = vmatpush1.bf16.msra.mxu1 %v11236_v0 }
  0x48   :  { %18027 = vst [vmem:[#allocation14_spill] sm:$0xff] %v11720_v40  ;;  %v1504_v42 = vor.u32 %v1503_v29, %v1500_v28  ;;  %v1508_v43 = vrot.slane %v1506_v30, 4  ;;  %v1511_v44 = vrot.slane %v1509_v31, 5  ;;  %v1515_v45 = vshrl.u32 %v1329_v37, 16  ;;  %v1332_v49 = vld [vmem:[#allocation2 + $0xa8] sm:$0x1f]  ;;  %3153 = vmatprep.subr.bf16.mxu1 %v17655_v1 }
  0x49   :  { %v11726_v50 = vsel %vm1377_vm0, %v1487_v34, %v1495_v36  ;;  %v1518_v51 = vshll.u32 %v1329_v37, 16  ;;  %v1523_v52 = vshrl.u32 %v1330_v38, 16  ;;  %v1526_v55 = vshll.u32 %v1330_v38, 16  ;;  %v1029_v19 = vld [vmem:[#allocation2 + $0x38] sm:$0xf] }
  0x4a   :  { %18028 = vst [vmem:[#allocation15_spill] sm:$0xff] %v11726_v50  ;;  %10751 = vmatprep.mubr.bf16.mxu1 %v11726_v50  ;;  %v1512_v56 = vor.u32 %v1511_v44, %v1508_v43  ;;  %v1517_v59 = vrot.slane %v1515_v45, 4  ;;  %v1532_v60 = vshrl.u32 %v1331_v39, 16  ;;  %v1535_v61 = vshll.u32 %v1331_v39, 16  ;;  %v11238_v28 = vld [vmem:[%s17652_s1 + $0x38] sm:$0xff]  }
  0x4b   :  { %v1520_v62 = vrot.slane %v1518_v51, 5  ;;  %v1525_v0 = vrot.slane %v1523_v52, 4  ;;  %v1528_v2 = vrot.slane %v1526_v55, 5  ;;  %v1540_v3 = vshrl.u32 %v1332_v49, 16  ;;  %v1333_v5 = vld [vmem:[#allocation2 + $0xb0] sm:$0xf0]  ;;  %3154 = vmatpush1.bf16.msra.mxu1 %v11237_v33 }
  0x4c   :  { %v11730_v6 = vsel %vm1377_vm0, %v1504_v42, %v1512_v56  ;;  %v1534_v9 = vrot.slane %v1532_v60, 4  ;;  %v1537_v11 = vrot.slane %v1535_v61, 5  ;;  %v1543_v12 = vshll.u32 %v1332_v49, 16  ;;  %v1334_v13 = vld [vmem:[#allocation2 + $0xb8] sm:$0x1f]  ;;  %3155 = vmatprep.subr.bf16.mxu1 %v17655_v1  ;;  %v122_v55 = vld [vmem:[%s17651_s0 + $0xe0] sm:$0xff]  ;;  %2460 = vmatmul.mubr.bf16.gmra.mrb[4].mxu0 %v11720_v40 }
  0x4d   :  { %18029 = vst [vmem:[#allocation16_spill] sm:$0xff] %v11730_v6  ;;  %10752 = vmatmul.mubr.bf16.gmra.mrb[12].mxu1 %v11730_v6  ;;  %v1521_v14 = vor.u32 %v1520_v62, %v1517_v59  ;;  %v1529_v15 = vor.u32 %v1528_v2, %v1525_v0  ;;  %v1542_v16 = vrot.slane %v1540_v3, 4  ;;  %v1549_v17 = vshrl.u32 %v1333_v5, 16  ;;  %v355_v34 = vld [vmem:[#allocation2 + $0x38] sm:$0xf]  ;;  %v123_v56 = vld [vmem:[%s17651_s0 + $0xe8] sm:$0xff] }
  0x4e   :  { %v1538_v21 = vor.u32 %v1537_v11, %v1534_v9  ;;  %v1545_v22 = vrot.slane %v1543_v12, 5  ;;  %v1552_v25 = vshll.u32 %v1333_v5, 16  ;;  %v1557_v26 = vshrl.u32 %v1334_v13, 16  ;;  %v1030_v51 = vld [vmem:[#allocation2 + $0x40] sm:$0xf0]  ;;  %v124_v59 = vld [vmem:[%s17651_s0 + $0xf0] sm:$0xff] }
  0x4f   :  { %v11740_v29 = vsel %vm1377_vm0, %v1521_v14, %v1529_v15  ;;  %v1551_v30 = vrot.slane %v1549_v17, 4  ;;  %v1560_v31 = vshll.u32 %v1334_v13, 16  ;;  %v233_v33 = vrot.slane %v169_v63, 4  ;;  %3156 = vmatpush1.bf16.msra.mxu1 %v11238_v28  ;;  %v1031_v52 = vld [vmem:[#allocation2 + $0x48] sm:$0xf]  ;;  %v125_v60 = vld [vmem:[%s17651_s0 + $0xf8] sm:$0xff] }
  0x50   :  { %18030 = vst [vmem:[#allocation17_spill] sm:$0xff] %v11740_v29  ;;  %10755 = vmatprep.mubr.bf16.mxu1 %v11740_v29  ;;  %v1546_v36 = vor.u32 %v1545_v22, %v1542_v16  ;;  %v1554_v37 = vrot.slane %v1552_v25, 5  ;;  %v1559_v38 = vrot.slane %v1557_v26, 4  ;;  %v1159_v39 = vrot.slane %v1028_v18, 4  ;;  %3157 = vmatprep.subr.bf16.mxu1 %v17655_v1  ;;  %v356_v3 = vld [vmem:[#allocation2 + $0x40] sm:$0xf8] }
  0x51   :  { %v1562_v42 = vrot.slane %v1560_v31, 5  ;;  %308 = vst [vmem:[#allocation2 + $0xc8] ss:$-4 sps:$4 sm:$0xff] %v233_v33   ;;  %v1160_v43 = vrot.slane %v1029_v19, 4  ;;  %v450_v44 = vshrl.u32 %v354_v27, 16  ;;  %v453_v45 = vshll.u32 %v354_v27, 16 }
  0x52   :  { %v11748_v49 = vsel %vm1377_vm0, %v1538_v21, %v1546_v36  ;;  %v1555_v46 = vor.u32 %v1554_v37, %v1551_v30  ;;  %v458_v47 = vshrl.u32 %v355_v34, 16  ;;  %v461_v63 = vshll.u32 %v355_v34, 16  ;;  %v357_v5 = vld [vmem:[#allocation2 + $0x48] sm:$0xf]  ;;  %v11775_v14 = vld [vmem:[%s17651_s0 + $0x100] sm:$0xff] }
  0x53   :  { %18031 = vst [vmem:[#allocation18_spill] sm:$0xff] %v11748_v49  ;;  %v1563_v61 = vor.u32 %v1562_v42, %v1559_v38  ;;  %v11763_v62 = vsel %vm1152_vm1, %v1159_v39, %v1160_v43  ;;  %v452_v0 = vrot.slane %v450_v44, 3  ;;  %v455_v2 = vrot.slane %v453_v45, 4  ;;  %v11780_v15 = vld [vmem:[%s17651_s0 + $0x108] sm:$0xff]  ;;  %v11239_v18 = vld [vmem:[%s17652_s1 + $0x40] sm:$0xff]   ;;  %v11810_v43 = vld [vmem:[%s17651_s0 + $0x110] sm:$0xff] }
  0x54   :  { %18032 = vst [vmem:[#allocation19_spill] sm:$0xff] %v11763_v62  ;;  %v460_v9 = vrot.slane %v458_v47, 3  ;;  %v463_v11 = vrot.slane %v461_v63, 4  ;;  %v234_v12 = vrot.slane %v170_v8, 4  ;;  %v235_v13 = vrot.slane %v171_v41, 4  ;;  %2467 = vmatprep.mubr.bf16.mxu0 %v11763_v62  ;;  %3158 = vmatpush1.bf16.msra.mxu1 %v11239_v18  ;;  %v11818_v63 = vld [vmem:[%s17651_s0 + $0x118] sm:$0xff] }
  0x55   :  { %10756 = vmatmul.mubr.bf16.gmra.mrb[16].mxu1 %v11748_v49  ;;  %v11784_v16 = vsel %vm1377_vm0, %v1555_v46, %v1563_v61  ;;  %v456_v53 = vor.u32 %v455_v2, %v452_v0  ;;  %v1162_v58 = vrot.slane %v1030_v51, 4  ;;  %v1163_v8 = vrot.slane %v1031_v52, 4  ;;  %v11794_v26 = vld [vmem:[#allocation2 + $0x50] sm:$0xf0]  ;;  %v11796_v27 = vld [vmem:[#allocation2 + $0x58] sm:$0xf]  ;;  %3159 = vmatprep.subr.bf16.mxu1 %v17655_v1 }
  0x56   :  { %18033 = vst [vmem:[#allocation20_spill] sm:$0xff] %v11784_v16  ;;  %10759 = vmatprep.mubr.bf16.mxu1 %v11784_v16  ;;  %v464_v20 = vor.u32 %v463_v11, %v460_v9  ;;  %310 = vst [vmem:[#allocation2 + $0xd8] ss:$-4 sps:$4 sm:$0xff] %v234_v12   ;;  %v467_v32 = vshrl.u32 %v356_v3, 16  ;;  %v470_v41 = vshll.u32 %v356_v3, 16  ;;  %v475_v17 = vshrl.u32 %v357_v5, 16 }
  0x57   :  { %312 = vst [vmem:[#allocation2 + $0xe8] ss:$-4 sps:$4 sm:$0xff] %v235_v13   ;;  %v11792_v19 = vsel %vm1152_vm1, %v1162_v58, %v1163_v8  ;;  %v478_v21 = vshll.u32 %v357_v5, 16  ;;  %v172_v22 = vpack.c.bf16 %v123_v56, %v122_v55  ;;  %v173_v25 = vpack.c.bf16 %v125_v60, %v124_v59  ;;  %v11823_v51 = vld [vmem:[%s17651_s0 + $0x120] sm:$0xff]  ;;  %v11828_v52 = vld [vmem:[%s17651_s0 + $0x128] sm:$0xff] }
  0x58   :  { %18034 = vst [vmem:[#allocation21_spill] sm:$0xff] %v11792_v19  ;;  %v1335_v28 = vld [vmem:[#allocation2 + $0xc0] sm:$0xf0]  ;;  %v1336_v30 = vld [vmem:[#allocation2 + $0xc8] sm:$0x1f]  ;;  %v11799_v31 = vsel %vm414_vm2, %v456_v53, %v464_v20  ;;  %v11801_v33 = vrot.slane %v467_v32, 3  ;;  %v174_v36 = vpack.c.bf16 %v11780_v15, %v11775_v14  ;;  %v175_v58 = vpack.c.bf16 %v11818_v63, %v11810_v43 }
  0x59   :  { %18035 = vst [vmem:[#allocation22_spill] sm:$0xff] %v11799_v31  ;;  %v11803_v34 = vrot.slane %v470_v41, 4  ;;  %v1566_v37 = vshrl.u32 %v1335_v28, 16  ;;  %v1569_v38 = vshll.u32 %v1335_v28, 16  ;;  %v1574_v39 = vshrl.u32 %v1336_v30, 16  ;;  %2468 = vmatmul.mubr.bf16.gmra.mrb[8].mxu0 %v11799_v31  ;;  %v11240_v5 = vld [vmem:[%s17652_s1 + $0x48] sm:$0xff]  }
  0x5a   :  { %v1577_v42 = vshll.u32 %v1336_v30, 16  ;;  %v477_v45 = vrot.slane %v475_v17, 3  ;;  %v480_v46 = vrot.slane %v478_v21, 4  ;;  %v236_v47 = vrot.slane %v172_v22, 4  ;;  %2475 = vmatprep.mubr.bf16.mxu0 %v11792_v19  ;;  %3160 = vmatpush1.bf16.msra.mxu1 %v11240_v5  ;;  %v361_v8 = vld [vmem:[#allocation2 + $0x68] sm:$0xf] }
  0x5b   :  { %v473_v44 = vor.u32 %v11803_v34, %v11801_v33  ;;  %v1568_v55 = vrot.slane %v1566_v37, 4  ;;  %v1571_v56 = vrot.slane %v1569_v38, 5  ;;  %v1576_v59 = vrot.slane %v1574_v39, 4  ;;  %3161 = vmatprep.subr.bf16.mxu1 %v17655_v1  ;;  %v11849_v37 = vld [vmem:[%s17651_s0 + $0x130] sm:$0xff]  ;;  %v11854_v38 = vld [vmem:[%s17651_s0 + $0x138] sm:$0xff] }
  0x5c   :  { %v1579_v60 = vrot.slane %v1577_v42, 5  ;;  %v481_v61 = vor.u32 %v480_v46, %v477_v45  ;;  %314 = vst [vmem:[#allocation2 + $0xf8] ss:$-4 sps:$4 sm:$0xff] %v236_v47   ;;  %v237_v0 = vrot.slane %v173_v25, 4  ;;  %v1165_v2 = vrot.slane %v11794_v26, 4  ;;  %v11242_v15 = vld [vmem:[%s17652_s1 + $0x58] sm:$0xff]  }
  0x5d   :  { %v1166_v3 = vrot.slane %v11796_v27, 4  ;;  %v1572_v9 = vor.u32 %v1571_v56, %v1568_v55  ;;  %v1337_v12 = vld [vmem:[#allocation2 + $0xd0] sm:$0xf0]  ;;  %v1338_v13 = vld [vmem:[#allocation2 + $0xd8] sm:$0x1f] }
  0x5e   :  { %v1580_v11 = vor.u32 %v1579_v60, %v1576_v59  ;;  %v1339_v53 = vld [vmem:[#allocation2 + $0xe0] sm:$0xf0]  ;;  %v1583_v20 = vshrl.u32 %v1337_v12, 16  ;;  %v1586_v32 = vshll.u32 %v1337_v12, 16  ;;  %v1591_v41 = vshrl.u32 %v1338_v13, 16 }
  0x5f   :  { %v1594_v17 = vshll.u32 %v1338_v13, 16  ;;  %v1340_v18 = vld [vmem:[#allocation2 + $0xe8] sm:$0x1f]  ;;  %316 = vst [vmem:[#allocation2 + $0x108] ss:$-4 sps:$4 sm:$0xff] %v237_v0   ;;  %v1600_v22 = vshrl.u32 %v1339_v53, 16  ;;  %v11857_v56 = vsel %vm414_vm2, %v473_v44, %v481_v61  ;;  %v11860_v59 = vsel %vm1152_vm1, %v1165_v2, %v1166_v3 }
  0x60   :  { %v11842_v21 = vsel %vm1377_vm0, %v1572_v9, %v1580_v11  ;;  %v1603_v25 = vshll.u32 %v1339_v53, 16  ;;  %v1608_v26 = vshrl.u32 %v1340_v18, 16  ;;  %v358_v27 = vld [vmem:[#allocation2 + $0x50] sm:$0xf8]  ;;  %v1585_v28 = vrot.slane %v1583_v20, 4  ;;  %18037 = vst [vmem:[#allocation24_spill] sm:$0xff] %v11857_v56 }
  0x61   :  { %18036 = vst [vmem:[#allocation23_spill] sm:$0xff] %v11842_v21  ;;  %10760 = vmatmul.mubr.bf16.gmra.mrb[20].mxu1 %v11842_v21  ;;  %v1588_v30 = vrot.slane %v1586_v32, 5  ;;  %v1593_v33 = vrot.slane %v1591_v41, 4  ;;  %v1596_v34 = vrot.slane %v1594_v17, 5  ;;  %v1602_v39 = vrot.slane %v1600_v22, 4  ;;  %18038 = vst [vmem:[#allocation25_spill] sm:$0xff] %v11860_v59  ;;  %2476 = vmatmul.mubr.bf16.gmra.mrb[12].mxu0 %v11857_v56 }
  0x62   :  { %v1605_v42 = vrot.slane %v1603_v25, 5  ;;  %v1610_v45 = vrot.slane %v1608_v26, 4  ;;  %v1611_v46 = vshll.u32 %v1340_v18, 16  ;;  %v11865_v60 = vld [vmem:[%s17651_s0 + $0x140] sm:$0xff]  ;;  %v11870_v0 = vld [vmem:[%s17651_s0 + $0x148] sm:$0xff]  ;;  %v484_v13 = vshrl.u32 %v358_v27, 16  ;;  %2483 = vmatprep.mubr.bf16.mxu0 %v11860_v59 }
  0x63   :  { %v1589_v47 = vor.u32 %v1588_v30, %v1585_v28  ;;  %v1597_v55 = vor.u32 %v1596_v34, %v1593_v33  ;;  %v1341_v11 = vld [vmem:[#allocation2 + $0xf0] sm:$0xf0]  ;;  %v1342_v12 = vld [vmem:[#allocation2 + $0xf8] sm:$0x1f]  ;;  %v238_v44 = vrot.slane %v174_v36, 4 }
  0x64   :  { %v1606_v5 = vor.u32 %v1605_v42, %v1602_v39  ;;  %v1613_v9 = vrot.slane %v1611_v46, 5  ;;  %v1617_v2 = vshrl.u32 %v1341_v11, 16  ;;  %v1620_v3 = vshll.u32 %v1341_v11, 16  ;;  %v359_v20 = vld [vmem:[#allocation2 + $0x58] sm:$0xf] }
  0x65   :  { %v11875_v61 = vsel %vm1377_vm0, %v1589_v47, %v1597_v55  ;;  %v1625_v53 = vshrl.u32 %v1342_v12, 16  ;;  %v1628_v41 = vshll.u32 %v1342_v12, 16  ;;  %v11880_v22 = vrot.slane %v484_v13, 3  ;;  %v1034_v46 = vld [vmem:[#allocation2 + $0x60] sm:$0xf0]  ;;  %v11241_v47 = vld [vmem:[%s17652_s1 + $0x50] sm:$0xff]  }
  0x66   :  { %18039 = vst [vmem:[#allocation26_spill] sm:$0xff] %v11875_v61  ;;  %10763 = vmatprep.mubr.bf16.mxu1 %v11875_v61  ;;  %v1614_v32 = vor.u32 %v1613_v9, %v1610_v45  ;;  %v1343_v17 = vld [vmem:[#allocation2 + $0x100] sm:$0xf0]  ;;  %v1344_v18 = vld [vmem:[#allocation2 + $0x108] sm:$0x1f]  ;;  %v1619_v26 = vrot.slane %v1617_v2, 4  ;;  %3162 = vmatpush1.bf16.msra.mxu1 %v11241_v47 }
  0x67   :  { %v1622_v28 = vrot.slane %v1620_v3, 5  ;;  %v1627_v30 = vrot.slane %v1625_v53, 4  ;;  %v1634_v33 = vshrl.u32 %v1343_v17, 16  ;;  %v1630_v39 = vrot.slane %v1628_v41, 5  ;;  %v1035_v13 = vld [vmem:[#allocation2 + $0x68] sm:$0xf]  ;;  %3163 = vmatprep.subr.bf16.mxu1 %v17655_v1 }
  0x68   :  { %v11885_v34 = vsel %vm1377_vm0, %v1606_v5, %v1614_v32  ;;  %v1637_v42 = vshll.u32 %v1343_v17, 16  ;;  %v1642_v45 = vshrl.u32 %v1344_v18, 16  ;;  %v1645_v11 = vshll.u32 %v1344_v18, 16  ;;  %v360_v32 = vld [vmem:[#allocation2 + $0x60] sm:$0xf8] }
  0x69   :  { %18040 = vst [vmem:[#allocation27_spill] sm:$0xff] %v11885_v34  ;;  %10764 = vmatmul.mubr.bf16.gmra.mrb[24].mxu1 %v11885_v34  ;;  %v1623_v55 = vor.u32 %v1622_v28, %v1619_v26  ;;  %v1636_v9 = vrot.slane %v1634_v33, 4  ;;  %v487_v12 = vshll.u32 %v358_v27, 16  ;;  %v1631_v2 = vor.u32 %v1630_v39, %v1627_v30  ;;  %318 = vst [vmem:[#allocation2 + $0x138] ss:$-4 sps:$4 sm:$0xff] %v238_v44  }
  0x6a   :  { %v1639_v3 = vrot.slane %v1637_v42, 5  ;;  %v1644_v53 = vrot.slane %v1642_v45, 4  ;;  %v492_v5 = vshrl.u32 %v359_v20, 16  ;;  %v1647_v41 = vrot.slane %v1645_v11, 5  ;;  %v1036_v47 = vld [vmem:[#allocation2 + $0x70] sm:$0xf0]  ;;  %3164 = vmatpush1.bf16.msra.mxu1 %v11242_v15 }
  0x6b   :  { %v489_v17 = vrot.slane %v487_v12, 4  ;;  %v495_v25 = vshll.u32 %v359_v20, 16  ;;  %v11896_v18 = vsel %vm1377_vm0, %v1623_v55, %v1631_v2  ;;  %v239_v28 = vrot.slane %v175_v58, 4  ;;  %3165 = vmatprep.subr.bf16.mxu1 %v17655_v1 }
  0x6c   :  { %18041 = vst [vmem:[#allocation28_spill] sm:$0xff] %v11896_v18  ;;  %v1640_v27 = vor.u32 %v1639_v3, %v1636_v9  ;;  %v494_v26 = vrot.slane %v492_v5, 3  ;;  %10767 = vmatprep.mubr.bf16.mxu1 %v11896_v18  ;;  %v1648_v30 = vor.u32 %v1647_v41, %v1644_v53  ;;  %v1168_v14 = vrot.slane %v1034_v46, 4  ;;  %v362_v46 = vld [vmem:[#allocation2 + $0x70] sm:$0xf8]  ;;  %v11933_v5 = vld [vmem:[%s17651_s0 + $0x158] sm:$0xff] }
  0x6d   :  { %v490_v20 = vor.u32 %v489_v17, %v11880_v22  ;;  %v497_v33 = vrot.slane %v495_v25, 4  ;;  %320 = vst [vmem:[#allocation2 + $0x148] ss:$-4 sps:$4 sm:$0xff] %v239_v28   ;;  %v1169_v36 = vrot.slane %v1035_v13, 4  ;;  %v501_v39 = vshrl.u32 %v360_v32, 16  ;;  %v11928_v53 = vld [vmem:[%s17651_s0 + $0x150] sm:$0xff] }
  0x6e   :  { %v504_v42 = vshll.u32 %v360_v32, 16  ;;  %v509_v45 = vshrl.u32 %v361_v8, 16  ;;  %v11907_v43 = vsel %vm1377_vm0, %v1640_v27, %v1648_v30  ;;  %v512_v58 = vshll.u32 %v361_v8, 16  ;;  %v1037_v25 = vld [vmem:[#allocation2 + $0x78] sm:$0xf]  ;;  %v11243_v32 = vld [vmem:[%s17652_s1 + $0x60] sm:$0xff]  }
  0x6f   :  { %18042 = vst [vmem:[#allocation29_spill] sm:$0xff] %v11907_v43  ;;  %v498_v63 = vor.u32 %v497_v33, %v494_v26  ;;  %v18043_v22 = vpack.c.bf16 %v11828_v52, %v11823_v51  ;;  %v11913_v55 = vsel %vm1152_vm1, %v1168_v14, %v1169_v36  ;;  %v503_v9 = vrot.slane %v501_v39, 3  ;;  %v11915_v13 = vld [vmem:[#allocation2 + $0x78] sm:$0xf]  ;;  %3166 = vmatpush1.bf16.msra.mxu1 %v11243_v32 }
  0x70   :  { %18044 = vst [vmem:[#allocation30_spill] sm:$0xff] %v11913_v55  ;;  %v506_v11 = vrot.slane %v504_v42, 4  ;;  %v511_v12 = vrot.slane %v509_v45, 3  ;;  %v514_v51 = vrot.slane %v512_v58, 4  ;;  %v18046_v52 = vpack.c.bf16 %v11854_v38, %v11849_v37  ;;  %v1345_v33 = vld [vmem:[#allocation2 + $0x130] sm:$0xf0]  ;;  %3167 = vmatprep.subr.bf16.mxu1 %v17655_v1 }
  0x71   :  { %v240_v44 = vrot.slane %v18043_v22, 4  ;;  %10768 = vmatmul.mubr.bf16.gmra.mrb[28].mxu1 %v11907_v43  ;;  %v11920_v8 = vsel %vm414_vm2, %v490_v20, %v498_v63  ;;  %v1171_v3 = vrot.slane %v1036_v47, 4  ;;  %v1172_v37 = vrot.slane %v1037_v25, 4  ;;  %v1346_v14 = vld [vmem:[#allocation2 + $0x138] sm:$0x1f] }
  0x72   :  { %18045 = vst [vmem:[#allocation31_spill] sm:$0xff] %v11920_v8  ;;  %v241_v2 = vrot.slane %v18046_v52, 4  ;;  %2484 = vmatmul.mubr.bf16.gmra.mrb[16].mxu0 %v11920_v8  ;;  %v507_v41 = vor.u32 %v506_v11, %v503_v9  ;;  %v518_v38 = vshrl.u32 %v362_v46, 16  ;;  %v521_v17 = vshll.u32 %v362_v46, 16 }
  0x73   :  { %322 = vst [vmem:[#allocation2 + $0x158] ss:$-4 sps:$4 sm:$0xff] %v240_v44   ;;  %2491 = vmatprep.mubr.bf16.mxu0 %v11913_v55  ;;  %v515_v27 = vor.u32 %v514_v51, %v511_v12  ;;  %v526_v26 = vshrl.u32 %v11915_v13, 16  ;;  %v529_v28 = vshll.u32 %v11915_v13, 16  ;;  %v18047_v30 = vpack.c.bf16 %v11870_v0, %v11865_v60  ;;  %v365_v13 = vld [vmem:[#allocation2 + $0x88] sm:$0xf] }
  0x74   :  { %324 = vst [vmem:[#allocation2 + $0x168] ss:$-4 sps:$4 sm:$0xff] %v241_v2   ;;  %v11946_v15 = vsel %vm1152_vm1, %v1171_v3, %v1172_v37  ;;  %v11948_v36 = vrot.slane %v518_v38, 3  ;;  %v11950_v39 = vrot.slane %v521_v17, 4  ;;  %v179_v42 = vpack.c.bf16 %v11933_v5, %v11928_v53  ;;  %v1347_v0 = vld [vmem:[#allocation2 + $0x140] sm:$0xf0] }
  0x75   :  { %v242_v20 = vrot.slane %v18047_v30, 4  ;;  %18048 = vst [vmem:[#allocation32_spill] sm:$0xff] %v11946_v15  ;;  %v1651_v45 = vshrl.u32 %v1345_v33, 16  ;;  %v1654_v47 = vshll.u32 %v1345_v33, 16  ;;  %v1659_v63 = vshrl.u32 %v1346_v14, 16 }
  0x76   :  { %v1662_v60 = vshll.u32 %v1346_v14, 16  ;;  %v1348_v58 = vld [vmem:[#allocation2 + $0x148] sm:$0x1f]  ;;  %v1668_v22 = vshrl.u32 %v1347_v0, 16  ;;  %v1671_v44 = vshll.u32 %v1347_v0, 16  ;;  %v11956_v25 = vsel %vm414_vm2, %v507_v41, %v515_v27 }
  0x77   :  { %326 = vst [vmem:[#allocation2 + $0x178] ss:$-4 sps:$4 sm:$0xff] %v242_v20   ;;  %18049 = vst [vmem:[#allocation33_spill] sm:$0xff] %v11956_v25  ;;  %v524_v46 = vor.u32 %v11950_v39, %v11948_v36  ;;  %v1653_v9 = vrot.slane %v1651_v45, 4  ;;  %v1656_v11 = vrot.slane %v1654_v47, 5  ;;  %v1661_v12 = vrot.slane %v1659_v63, 4 }
  0x78   :  { %v1664_v51 = vrot.slane %v1662_v60, 5  ;;  %v1670_v52 = vrot.slane %v1668_v22, 4  ;;  %v1673_v2 = vrot.slane %v1671_v44, 5  ;;  %v1676_v3 = vshrl.u32 %v1348_v58, 16  ;;  %v1040_v5 = vld [vmem:[#allocation2 + $0x90] sm:$0xf0] }
  0x79   :  { %v1679_v32 = vshll.u32 %v1348_v58, 16  ;;  %v1657_v38 = vor.u32 %v1656_v11, %v1653_v9  ;;  %v1041_v39 = vld [vmem:[#allocation2 + $0x98] sm:$0xf] }
  0x7a   :  { %v1349_v37 = vld [vmem:[#allocation2 + $0x150] sm:$0xf0]  ;;  %v1665_v17 = vor.u32 %v1664_v51, %v1661_v12  ;;  %v1350_v30 = vld [vmem:[#allocation2 + $0x158] sm:$0x1f]  ;;  %v1674_v14 = vor.u32 %v1673_v2, %v1670_v52  ;;  %v1678_v41 = vrot.slane %v1676_v3, 4  ;;  %2492 = vmatmul.mubr.bf16.gmra.mrb[20].mxu0 %v11956_v25  ;;  %v11244_v52 = vld [vmem:[%s17652_s1 + $0x68] sm:$0xff]  }
  0x7b   :  { %v1685_v20 = vshrl.u32 %v1349_v37, 16  ;;  %v1688_v33 = vshll.u32 %v1349_v37, 16  ;;  %v1681_v27 = vrot.slane %v1679_v32, 5  ;;  %v1693_v0 = vshrl.u32 %v1350_v30, 16  ;;  %v1351_v45 = vld [vmem:[#allocation2 + $0x160] sm:$0xf0]  ;;  %2499 = vmatprep.mubr.bf16.mxu0 %v11946_v15  ;;  %3168 = vmatpush1.bf16.msra.mxu1 %v11244_v52 }
  0x7c   :  { %v11962_v47 = vsel %vm1377_vm0, %v1657_v38, %v1665_v17  ;;  %v1696_v22 = vshll.u32 %v1350_v30, 16  ;;  %v1352_v58 = vld [vmem:[#allocation2 + $0x168] sm:$0x1f]  ;;  %v1702_v11 = vshrl.u32 %v1351_v45, 16  ;;  %v1705_v12 = vshll.u32 %v1351_v45, 16  ;;  %3169 = vmatprep.subr.bf16.mxu1 %v17655_v1 }
  0x7d   :  { %18050 = vst [vmem:[#allocation34_spill] sm:$0xff] %v11962_v47  ;;  %v1687_v63 = vrot.slane %v1685_v20, 4  ;;  %v1690_v60 = vrot.slane %v1688_v33, 5  ;;  %10771 = vmatprep.mubr.bf16.mxu1 %v11962_v47  ;;  %v1682_v44 = vor.u32 %v1681_v27, %v1678_v41  ;;  %v1695_v9 = vrot.slane %v1693_v0, 4  ;;  %v1038_v41 = vld [vmem:[#allocation2 + $0x80] sm:$0xf0] }
  0x7e   :  { %v1353_v51 = vld [vmem:[#allocation2 + $0x170] sm:$0xf0]  ;;  %v1698_v3 = vrot.slane %v1696_v22, 5  ;;  %v1710_v32 = vshrl.u32 %v1352_v58, 16  ;;  %v1713_v37 = vshll.u32 %v1352_v58, 16  ;;  %v1704_v30 = vrot.slane %v1702_v11, 4 }
  0x7f   :  { %v1691_v2 = vor.u32 %v1690_v60, %v1687_v63  ;;  %v1354_v38 = vld [vmem:[#allocation2 + $0x178] sm:$0x1f]  ;;  %v11970_v17 = vsel %vm1377_vm0, %v1674_v14, %v1682_v44  ;;  %v1707_v20 = vrot.slane %v1705_v12, 5  ;;  %v528_v33 = vrot.slane %v526_v26, 3  ;;  %v1039_v60 = vld [vmem:[#allocation2 + $0x88] sm:$0xf] }
  0x80   :  { %18051 = vst [vmem:[#allocation35_spill] sm:$0xff] %v11970_v17  ;;  %10772 = vmatmul.mubr.bf16.gmra.mrb[32].mxu1 %v11970_v17  ;;  %v1699_v27 = vor.u32 %v1698_v3, %v1695_v9  ;;  %v1712_v0 = vrot.slane %v1710_v32, 4  ;;  %v1715_v45 = vrot.slane %v1713_v37, 5  ;;  %v531_v63 = vrot.slane %v529_v28, 4  ;;  %v364_v22 = vld [vmem:[#allocation2 + $0x80] sm:$0xf8] }
  0x81   :  { %v1708_v58 = vor.u32 %v1707_v20, %v1704_v30  ;;  %v1719_v14 = vshrl.u32 %v1353_v51, 16  ;;  %v1722_v44 = vshll.u32 %v1353_v51, 16  ;;  %v1727_v11 = vshrl.u32 %v1354_v38, 16  ;;  %v138_v26 = vld [vmem:[%s17651_s0 + $0x160] sm:$0xff]  ;;  %v139_v28 = vld [vmem:[%s17651_s0 + $0x168] sm:$0xff]  ;;  %v11245_v51 = vld [vmem:[%s17652_s1 + $0x70] sm:$0xff]  }
  0x82   :  { %v11980_v12 = vsel %vm1377_vm0, %v1691_v2, %v1699_v27  ;;  %v1716_v9 = vor.u32 %v1715_v45, %v1712_v0  ;;  %v532_v52 = vor.u32 %v531_v63, %v528_v33  ;;  %v1730_v3 = vshll.u32 %v1354_v38, 16  ;;  %v140_v38 = vld [vmem:[%s17651_s0 + $0x170] sm:$0xff]  ;;  %v141_v20 = vld [vmem:[%s17651_s0 + $0x178] sm:$0xff]  ;;  %3170 = vmatpush1.bf16.msra.mxu1 %v11245_v51 }
  0x83   :  { %18052 = vst [vmem:[#allocation36_spill] sm:$0xff] %v11980_v12  ;;  %10775 = vmatprep.mubr.bf16.mxu1 %v11980_v12  ;;  %v1721_v32 = vrot.slane %v1719_v14, 4  ;;  %v1724_v37 = vrot.slane %v1722_v44, 5  ;;  %v1729_v30 = vrot.slane %v1727_v11, 4  ;;  %v243_v2 = vrot.slane %v179_v42, 4  ;;  %3171 = vmatprep.subr.bf16.mxu1 %v17655_v1 }
  0x84   :  { %v11999_v33 = vsel %vm1377_vm0, %v1708_v58, %v1716_v9  ;;  %v12005_v27 = vsel %vm414_vm2, %v524_v46, %v532_v52  ;;  %v1732_v0 = vrot.slane %v1730_v3, 5  ;;  %v1174_v53 = vrot.slane %v1038_v41, 4  ;;  %v366_v46 = vld [vmem:[#allocation2 + $0x90] sm:$0xf8]  ;;  %v142_v41 = vld [vmem:[%s17651_s0 + $0x180] sm:$0xff] }
  0x85   :  { %18053 = vst [vmem:[#allocation37_spill] sm:$0xff] %v11999_v33  ;;  %18054 = vst [vmem:[#allocation38_spill] sm:$0xff] %v12005_v27  ;;  %2500 = vmatmul.mubr.bf16.gmra.mrb[24].mxu0 %v12005_v27  ;;  %v1725_v42 = vor.u32 %v1724_v37, %v1721_v32  ;;  %v1175_v45 = vrot.slane %v1039_v60, 4  ;;  %v535_v63 = vshrl.u32 %v364_v22, 16  ;;  %v538_v14 = vshll.u32 %v364_v22, 16  ;;  %v143_v22 = vld [vmem:[%s17651_s0 + $0x188] sm:$0xff] }
  0x86   :  { %328 = vst [vmem:[#allocation2 + $0x188] ss:$-4 sps:$4 sm:$0xff] %v243_v2   ;;  %v1733_v58 = vor.u32 %v1732_v0, %v1729_v30  ;;  %v543_v44 = vshrl.u32 %v365_v13, 16  ;;  %v546_v11 = vshll.u32 %v365_v13, 16  ;;  %v180_v36 = vpack.c.bf16 %v139_v28, %v138_v26  ;;  %v367_v51 = vld [vmem:[#allocation2 + $0x98] sm:$0xf] }
  0x87   :  { %v12013_v9 = vsel %vm1152_vm1, %v1174_v53, %v1175_v45  ;;  %v537_v52 = vrot.slane %v535_v63, 3  ;;  %v540_v3 = vrot.slane %v538_v14, 4  ;;  %v181_v60 = vpack.c.bf16 %v141_v20, %v140_v38  ;;  %v144_v26 = vld [vmem:[%s17651_s0 + $0x190] sm:$0xff]  ;;  %v145_v30 = vld [vmem:[%s17651_s0 + $0x198] sm:$0xff]  ;;  %v12032_v2 = vld [vmem:[%s17651_s0 + $0x1a0] sm:$0xff] }
  0x88   :  { %18055 = vst [vmem:[#allocation39_spill] sm:$0xff] %v12013_v9  ;;  %10776 = vmatmul.mubr.bf16.gmra.mrb[36].mxu1 %v11999_v33  ;;  %v12023_v13 = vsel %vm1377_vm0, %v1725_v42, %v1733_v58  ;;  %2507 = vmatprep.mubr.bf16.mxu0 %v12013_v9  ;;  %v545_v28 = vrot.slane %v543_v44, 3  ;;  %v548_v32 = vrot.slane %v546_v11, 4  ;;  %v244_v37 = vrot.slane %v180_v36, 4  ;;  %v12037_v38 = vld [vmem:[%s17651_s0 + $0x1a8] sm:$0xff]  ;;  %v11246_v45 = vld [vmem:[%s17652_s1 + $0x78] sm:$0xff]  }
  0x89   :  { %18056 = vst [vmem:[#allocation40_spill] sm:$0xff] %v12023_v13  ;;  %10779 = vmatprep.mubr.bf16.mxu1 %v12023_v13  ;;  %v541_v20 = vor.u32 %v540_v3, %v537_v52  ;;  %v245_v0 = vrot.slane %v181_v60, 4  ;;  %v1177_v53 = vrot.slane %v1040_v5, 4  ;;  %v1178_v42 = vrot.slane %v1041_v39, 4  ;;  %v11247_v11 = vld [vmem:[%s17652_s1 + $0x80] sm:$0xff]   ;;  %3172 = vmatpush1.bf16.msra.mxu1 %v11246_v45 }
  0x8a   :  { %v549_v63 = vor.u32 %v548_v32, %v545_v28  ;;  %330 = vst [vmem:[#allocation2 + $0x198] ss:$-4 sps:$4 sm:$0xff] %v244_v37   ;;  %v552_v14 = vshrl.u32 %v366_v46, 16  ;;  %v555_v58 = vshll.u32 %v366_v46, 16  ;;  %v560_v44 = vshrl.u32 %v367_v51, 16  ;;  %10803 = vmatprep.subr.bf16.mxu0 %v11247_v11 }
  0x8b   :  { %332 = vst [vmem:[#allocation2 + $0x1a8] ss:$-4 sps:$4 sm:$0xff] %v245_v0   ;;  %v12047_v36 = vsel %vm1152_vm1, %v1177_v53, %v1178_v42  ;;  %v563_v52 = vshll.u32 %v367_v51, 16  ;;  %v182_v5 = vpack.c.bf16 %v143_v22, %v142_v41  ;;  %v183_v39 = vpack.c.bf16 %v145_v30, %v144_v26  ;;  %v12049_v3 = vld [vmem:[#allocation2 + $0xa0] sm:$0xf0]  ;;  %10804 = vmatpush3.bf16.msra.mxu0 %v11247_v11 }
  0x8c   :  { %18057 = vst [vmem:[#allocation41_spill] sm:$0xff] %v12047_v36  ;;  %v12052_v32 = vsel %vm414_vm2, %v541_v20, %v549_v63  ;;  %v554_v46 = vrot.slane %v552_v14, 3  ;;  %v557_v37 = vrot.slane %v555_v58, 4  ;;  %v18059_v0 = vmov 0   ;;  %v1043_v26 = vld [vmem:[#allocation2 + $0xa8] sm:$0xf] }
  0x8d   :  { %v1355_v60 = vld [vmem:[#allocation2 + $0x180] sm:$0xf0]  ;;  %v1356_v28 = vld [vmem:[#allocation2 + $0x188] sm:$0x1f]  ;;  %18058 = vst [vmem:[#allocation42_spill] sm:$0xff] %v12052_v32  ;;  %4009 = vmatprep.subr.bf16.mxu1 %v18059_v0  ;;  %2508 = vmatmul.mubr.bf16.gmra.mrb[28].mxu0 %v12052_v32  ;;  %v562_v20 = vrot.slane %v560_v44, 3  ;;  %v18065_v61 = vpack.c.bf16 %v12037_v38, %v12032_v2 }
  0x8e   :  { %v1736_v53 = vshrl.u32 %v1355_v60, 16  ;;  %v1739_v51 = vshll.u32 %v1355_v60, 16  ;;  %v1744_v41 = vshrl.u32 %v1356_v28, 16  ;;  %v1747_v22 = vshll.u32 %v1356_v28, 16  ;;  %2515 = vmatprep.mubr.bf16.mxu0 %v12047_v36  ;;  %v12059_v63 = vld [vmem:[#allocation2 + $0xa0] sm:$0xf8] }
  0x8f   :  { %v558_v30 = vor.u32 %v557_v37, %v554_v46  ;;  %v565_v42 = vrot.slane %v563_v52, 4  ;;  %v246_v45 = vrot.slane %v182_v5, 4  ;;  %v247_v60 = vrot.slane %v183_v39, 4  ;;  %v11250_v46 = vld [vmem:[%s17652_s1 + $0x88] sm:$0xff]   ;;  %v153_v38 = vld [vmem:[%s17651_s0 + $0x1d8] sm:$0xff] }
  0x90   :  { %v1738_v14 = vrot.slane %v1736_v53, 4  ;;  %v1741_v58 = vrot.slane %v1739_v51, 5  ;;  %v1746_v1 = vrot.slane %v1744_v41, 4  ;;  %v1749_v43 = vrot.slane %v1747_v22, 5  ;;  %10805 = vmatprep.subr.bf16.mxu0 %v11250_v46 }
  0x91   :  { %v566_v13 = vor.u32 %v565_v42, %v562_v20  ;;  %334 = vst [vmem:[#allocation2 + $0x1b8] ss:$-4 sps:$4 sm:$0xff] %v246_v45   ;;  %v1180_v28 = vrot.slane %v12049_v3, 4  ;;  %v1181_v33 = vrot.slane %v1043_v26, 4  ;;  %v1357_v5 = vld [vmem:[#allocation2 + $0x190] sm:$0xf0]  ;;  %10806 = vmatpush3.bf16.msra.mxu0 %v11250_v46 }
  0x92   :  { %v1742_v44 = vor.u32 %v1741_v58, %v1738_v14  ;;  %v1750_v52 = vor.u32 %v1749_v43, %v1746_v1  ;;  %v1358_v37 = vld [vmem:[#allocation2 + $0x198] sm:$0x1f]  ;;  %v569_v11 = vshrl.u32 %v12059_v63, 16  ;;  %v572_v53 = vshll.u32 %v12059_v63, 16  ;;  %v1359_v39 = vld [vmem:[#allocation2 + $0x1a0] sm:$0xf0] }
  0x93   :  { %v1753_v51 = vshrl.u32 %v1357_v5, 16  ;;  %v1756_v41 = vshll.u32 %v1357_v5, 16  ;;  %v1761_v22 = vshrl.u32 %v1358_v37, 16  ;;  %v1764_v20 = vshll.u32 %v1358_v37, 16  ;;  %336 = vst [vmem:[#allocation2 + $0x1c8] ss:$-4 sps:$4 sm:$0xff] %v247_v60  }
  0x94   :  { %v12070_v3 = vld [vmem:[%s17651_s0 + $0x1b0] sm:$0xff]  ;;  %v12075_v1 = vld [vmem:[%s17651_s0 + $0x1b8] sm:$0xff]  ;;  %v12078_v43 = vsel %vm1377_vm0, %v1742_v44, %v1750_v52  ;;  %v1360_v26 = vld [vmem:[#allocation2 + $0x1a8] sm:$0x1f]  ;;  %v1770_v42 = vshrl.u32 %v1359_v39, 16  ;;  %v1773_v45 = vshll.u32 %v1359_v39, 16  ;;  %v12081_v63 = vsel %vm414_vm2, %v558_v30, %v566_v13 }
  0x95   :  { %18060 = vst [vmem:[#allocation43_spill] sm:$0xff] %v12078_v43  ;;  %18061 = vst [vmem:[#allocation44_spill] sm:$0xff] %v12081_v63  ;;  %10780 = vmatmul.mubr.bf16.gmra.mrb[40].mxu1 %v12078_v43  ;;  %v1755_v14 = vrot.slane %v1753_v51, 4  ;;  %v1758_v58 = vrot.slane %v1756_v41, 5  ;;  %v1763_v60 = vrot.slane %v1761_v22, 4  ;;  %v1766_v5 = vrot.slane %v1764_v20, 5  ;;  %2516 = vmatmul.mubr.bf16.gmra.mrb[32].mxu0 %v12081_v63 }
  0x96   :  { %v1772_v37 = vrot.slane %v1770_v42, 4  ;;  %v1775_v12 = vrot.slane %v1773_v45, 5  ;;  %v1778_v17 = vshrl.u32 %v1360_v26, 16  ;;  %v1781_v47 = vshll.u32 %v1360_v26, 16  ;;  %v12093_v30 = vld [vmem:[%s17651_s0 + $0x1c0] sm:$0xff]  ;;  %v12098_v46 = vld [vmem:[%s17651_s0 + $0x1c8] sm:$0xff] }
  0x97   :  { %v1759_v44 = vor.u32 %v1758_v58, %v1755_v14  ;;  %v1767_v52 = vor.u32 %v1766_v5, %v1763_v60  ;;  %v12086_v39 = vsel %vm1152_vm1, %v1180_v28, %v1181_v33  ;;  %v12088_v13 = vrot.slane %v569_v11, 3  ;;  %v369_v14 = vld [vmem:[#allocation2 + $0xa8] sm:$0xf]  ;;  %v12367_v48 = vld [vmem:[#allocation2 + $0x198] sm:$0xf] }
  0x98   :  { %18062 = vst [vmem:[#allocation45_spill] sm:$0xff] %v12086_v39  ;;  %v1776_v51 = vor.u32 %v1775_v12, %v1772_v37  ;;  %v1780_v41 = vrot.slane %v1778_v17, 4  ;;  %v1783_v22 = vrot.slane %v1781_v47, 5  ;;  %v1361_v20 = vld [vmem:[#allocation2 + $0x1b0] sm:$0xf0]  ;;  %2523 = vmatprep.mubr.bf16.mxu0 %v12086_v39  ;;  %v185_v33 = vpack.c.bf16 %v12075_v1, %v12070_v3 }
  0x99   :  { %v1362_v26 = vld [vmem:[#allocation2 + $0x1b8] sm:$0x1f]  ;;  %v12104_v28 = vsel %vm1377_vm0, %v1759_v44, %v1767_v52  ;;  %v1787_v11 = vshrl.u32 %v1361_v20, 16  ;;  %v1790_v42 = vshll.u32 %v1361_v20, 16  ;;  %v12107_v60 = vrot.slane %v572_v53, 4  ;;  %v11253_v53 = vld [vmem:[%s17652_s1 + $0x90] sm:$0xff]  }
  0x9a   :  { %18063 = vst [vmem:[#allocation46_spill] sm:$0xff] %v12104_v28  ;;  %v1795_v45 = vshrl.u32 %v1362_v26, 16  ;;  %10783 = vmatprep.mubr.bf16.mxu1 %v12104_v28  ;;  %v1784_v58 = vor.u32 %v1783_v22, %v1780_v41  ;;  %v1798_v12 = vshll.u32 %v1362_v26, 16  ;;  %v1363_v17 = vld [vmem:[#allocation2 + $0x1c0] sm:$0xf0]  ;;  %v186_v5 = vpack.c.bf16 %v12098_v46, %v12093_v30  ;;  %10807 = vmatprep.subr.bf16.mxu0 %v11253_v53 }
  0x9b   :  { %v1364_v47 = vld [vmem:[#allocation2 + $0x1c8] sm:$0x1f]  ;;  %v1789_v37 = vrot.slane %v1787_v11, 4  ;;  %v1792_v3 = vrot.slane %v1790_v42, 5  ;;  %v1804_v44 = vshrl.u32 %v1363_v17, 16  ;;  %v1807_v18 = vshll.u32 %v1363_v17, 16  ;;  %10808 = vmatpush3.bf16.msra.mxu0 %v11253_v53 }
  0x9c   :  { %v1797_v1 = vrot.slane %v1795_v45, 4  ;;  %v1044_v52 = vld [vmem:[#allocation2 + $0xb0] sm:$0xf0]  ;;  %v12112_v20 = vsel %vm1377_vm0, %v1776_v51, %v1784_v58  ;;  %v1800_v43 = vrot.slane %v1798_v12, 5  ;;  %v1812_v28 = vshrl.u32 %v1364_v47, 16 }
  0x9d   :  { %18064 = vst [vmem:[#allocation47_spill] sm:$0xff] %v12112_v20  ;;  %v1045_v41 = vld [vmem:[#allocation2 + $0xb8] sm:$0xf]  ;;  %10784 = vmatmul.mubr.bf16.gmra.mrb[44].mxu1 %v12112_v20  ;;  %v1793_v22 = vor.u32 %v1792_v3, %v1789_v37  ;;  %v1806_v30 = vrot.slane %v1804_v44, 4  ;;  %v1815_v46 = vshll.u32 %v1364_v47, 16  ;;  %v575_v26 = vor.u32 %v12107_v60, %v12088_v13 }
  0x9e   :  { %v370_v11 = vld [vmem:[#allocation2 + $0xb0] sm:$0xf8]  ;;  %v371_v42 = vld [vmem:[#allocation2 + $0xb8] sm:$0xf]  ;;  %v1801_v51 = vor.u32 %v1800_v43, %v1797_v1  ;;  %v1809_v45 = vrot.slane %v1807_v18, 5  ;;  %v1814_v58 = vrot.slane %v1812_v28, 4 }
  0x9f   :  { %v577_v12 = vshrl.u32 %v369_v14, 16  ;;  %v1817_v17 = vrot.slane %v1815_v46, 5  ;;  %v580_v34 = vshll.u32 %v369_v14, 16  ;;  %v248_v21 = vrot.slane %v18065_v61, 4  ;;  %v152_v18 = vld [vmem:[%s17651_s0 + $0x1d0] sm:$0xff] }
  0xa0   :  { %v249_v20 = vrot.slane %v185_v33, 4  ;;  %v12124_v47 = vsel %vm1377_vm0, %v1793_v22, %v1801_v51  ;;  %v1810_v37 = vor.u32 %v1809_v45, %v1806_v30  ;;  %v1183_v60 = vrot.slane %v1044_v52, 4  ;;  %v1046_v43 = vld [vmem:[#allocation2 + $0xc0] sm:$0xf0]  ;;  %v1047_v33 = vld [vmem:[#allocation2 + $0xc8] sm:$0xf] }
  0xa1   :  { %18066 = vst [vmem:[#allocation48_spill] sm:$0xff] %v12124_v47  ;;  %v579_v13 = vrot.slane %v577_v12, 3  ;;  %10787 = vmatprep.mubr.bf16.mxu1 %v12124_v47  ;;  %v1818_v28 = vor.u32 %v1817_v17, %v1814_v58  ;;  %v582_v14 = vrot.slane %v580_v34, 4  ;;  %338 = vst [vmem:[#allocation2 + $0x1d8] ss:$-4 sps:$4 sm:$0xff] %v248_v21   ;;  %v1184_v61 = vrot.slane %v1045_v41, 4 }
  0xa2   :  { %340 = vst [vmem:[#allocation2 + $0x1e8] ss:$-4 sps:$4 sm:$0xff] %v249_v20   ;;  %v586_v2 = vshrl.u32 %v370_v11, 16  ;;  %v589_v3 = vshll.u32 %v370_v11, 16  ;;  %v594_v1 = vshrl.u32 %v371_v42, 16  ;;  %v597_v44 = vshll.u32 %v371_v42, 16 }
  0xa3   :  { %v250_v52 = vrot.slane %v186_v5, 4  ;;  %v12133_v53 = vld [vmem:[#allocation2 + $0xc0] sm:$0xf8]  ;;  %v12136_v22 = vsel %vm1377_vm0, %v1810_v37, %v1818_v28  ;;  %v583_v30 = vor.u32 %v582_v14, %v579_v13  ;;  %v12139_v21 = vsel %vm1152_vm1, %v1183_v60, %v1184_v61  ;;  %v12141_v45 = vld [vmem:[#allocation2 + $0xc8] sm:$0xf]  ;;  %v11256_v14 = vld [vmem:[%s17652_s1 + $0x98] sm:$0xff]  }
  0xa4   :  { %18067 = vst [vmem:[#allocation49_spill] sm:$0xff] %v12136_v22  ;;  %18068 = vst [vmem:[#allocation50_spill] sm:$0xff] %v12139_v21  ;;  %v588_v34 = vrot.slane %v586_v2, 3  ;;  %v591_v20 = vrot.slane %v589_v3, 4  ;;  %v596_v41 = vrot.slane %v594_v1, 3  ;;  %v599_v46 = vrot.slane %v597_v44, 4  ;;  %10809 = vmatprep.subr.bf16.mxu0 %v11256_v14 }
  0xa5   :  { %342 = vst [vmem:[#allocation2 + $0x1f8] ss:$-4 sps:$4 sm:$0xff] %v250_v52   ;;  %v187_v51 = vpack.c.bf16 %v153_v38, %v152_v18  ;;  %10788 = vmatmul.mubr.bf16.gmra.mrb[48].mxu1 %v12136_v22  ;;  %v12145_v5 = vsel %vm414_vm2, %v575_v26, %v583_v30  ;;  %v1186_v11 = vrot.slane %v1046_v43, 4  ;;  %v1187_v42 = vrot.slane %v1047_v33, 4  ;;  %v12151_v12 = vld [vmem:[%s17651_s0 + $0x1e0] sm:$0xff]  ;;  %v12156_v17 = vld [vmem:[%s17651_s0 + $0x1e8] sm:$0xff]  ;;  %10810 = vmatpush3.bf16.msra.mxu0 %v11256_v14 }
  0xa6   :  { %18069 = vst [vmem:[#allocation51_spill] sm:$0xff] %v12145_v5  ;;  %v603_v58 = vshrl.u32 %v12133_v53, 16  ;;  %2524 = vmatmul.mubr.bf16.gmra.mrb[36].mxu0 %v12145_v5  ;;  %v592_v37 = vor.u32 %v591_v20, %v588_v34  ;;  %v600_v13 = vor.u32 %v599_v46, %v596_v41  ;;  %v396_v7 = vld [vmem:[#allocation2 + $0x1a0] sm:$0xf8] }
  0xa7   :  { %v251_v26 = vrot.slane %v187_v51, 4  ;;  %2531 = vmatprep.mubr.bf16.mxu0 %v12139_v21  ;;  %v12172_v3 = vsel %vm1152_vm1, %v1186_v11, %v1187_v42  ;;  %v157_v11 = vld [vmem:[%s17651_s0 + $0x1f8] sm:$0xff] }
  0xa8   :  { %v12161_v18 = vrot.slane %v603_v58, 3  ;;  %v1365_v61 = vld [vmem:[#allocation2 + $0x1d0] sm:$0xf0]  ;;  %v1366_v2 = vld [vmem:[#allocation2 + $0x1d8] sm:$0x1f]  ;;  %v12169_v33 = vsel %vm414_vm2, %v592_v37, %v600_v13  ;;  %18071 = vst [vmem:[#allocation53_spill] sm:$0xff] %v12172_v3 }
  0xa9   :  { %v1367_v38 = vld [vmem:[#allocation2 + $0x1e0] sm:$0xf0]  ;;  %18070 = vst [vmem:[#allocation52_spill] sm:$0xff] %v12169_v33  ;;  %344 = vst [vmem:[#allocation2 + $0x208] ss:$-4 sps:$4 sm:$0xff] %v251_v26   ;;  %v1821_v44 = vshrl.u32 %v1365_v61, 16 }
  0xaa   :  { %v1824_v52 = vshll.u32 %v1365_v61, 16  ;;  %v1829_v30 = vshrl.u32 %v1366_v2, 16  ;;  %v1832_v34 = vshll.u32 %v1366_v2, 16  ;;  %v1368_v20 = vld [vmem:[#allocation2 + $0x1e8] sm:$0x1f]  ;;  %v1838_v41 = vshrl.u32 %v1367_v38, 16 }
  0xab   :  { %v1841_v46 = vshll.u32 %v1367_v38, 16  ;;  %v1846_v51 = vshrl.u32 %v1368_v20, 16  ;;  %v1849_v58 = vshll.u32 %v1368_v20, 16  ;;  %v156_v37 = vld [vmem:[%s17651_s0 + $0x1f0] sm:$0xff]  ;;  %v1823_v42 = vrot.slane %v1821_v44, 4 }
  0xac   :  { %v1826_v13 = vrot.slane %v1824_v52, 5  ;;  %v1831_v26 = vrot.slane %v1829_v30, 4  ;;  %v1834_v61 = vrot.slane %v1832_v34, 5  ;;  %v1369_v2 = vld [vmem:[#allocation2 + $0x1f0] sm:$0xf0]  ;;  %v1840_v1 = vrot.slane %v1838_v41, 4 }
  0xad   :  { %v1843_v28 = vrot.slane %v1841_v46, 5  ;;  %v1848_v43 = vrot.slane %v1846_v51, 4  ;;  %v1851_v38 = vrot.slane %v1849_v58, 5  ;;  %v1370_v60 = vld [vmem:[#allocation2 + $0x1f8] sm:$0x1f]  ;;  %v1855_v47 = vshrl.u32 %v1369_v2, 16 }
  0xae   :  { %v1827_v20 = vor.u32 %v1826_v13, %v1823_v42  ;;  %v1835_v22 = vor.u32 %v1834_v61, %v1831_v26  ;;  %v1858_v16 = vshll.u32 %v1369_v2, 16  ;;  %2532 = vmatmul.mubr.bf16.gmra.mrb[40].mxu0 %v12169_v33  ;;  %v1863_v6 = vshrl.u32 %v1370_v60, 16  ;;  %v1048_v58 = vld [vmem:[#allocation2 + $0xd0] sm:$0xf0]  ;;  %v1049_v42 = vld [vmem:[#allocation2 + $0xd8] sm:$0xf] }
  0xaf   :  { %v1844_v49 = vor.u32 %v1843_v28, %v1840_v1  ;;  %v1852_v29 = vor.u32 %v1851_v38, %v1848_v43  ;;  %v1866_v14 = vshll.u32 %v1370_v60, 16  ;;  %v1857_v52 = vrot.slane %v1855_v47, 4  ;;  %2539 = vmatprep.mubr.bf16.mxu0 %v12172_v3  ;;  %v374_v13 = vld [vmem:[#allocation2 + $0xd0] sm:$0xf8] }
  0xb0   :  { %v12184_v44 = vsel %vm1377_vm0, %v1827_v20, %v1835_v22  ;;  %v1860_v30 = vrot.slane %v1858_v16, 5  ;;  %v1371_v34 = vld [vmem:[#allocation2 + $0x200] sm:$0xf0]  ;;  %v1372_v41 = vld [vmem:[#allocation2 + $0x208] sm:$0x1f]  ;;  %v189_v46 = vpack.c.bf16 %v157_v11, %v156_v37  ;;  %v1865_v43 = vrot.slane %v1863_v6, 4 }
  0xb1   :  { %18072 = vst [vmem:[#allocation54_spill] sm:$0xff] %v12184_v44  ;;  %10791 = vmatprep.mubr.bf16.mxu1 %v12184_v44  ;;  %v12189_v51 = vsel %vm1377_vm0, %v1844_v49, %v1852_v29  ;;  %v1868_v28 = vrot.slane %v1866_v14, 5  ;;  %v1872_v1 = vshrl.u32 %v1371_v34, 16  ;;  %v1875_v60 = vshll.u32 %v1371_v34, 16  ;;  %v375_v6 = vld [vmem:[#allocation2 + $0xd8] sm:$0xf] }
  0xb2   :  { %18073 = vst [vmem:[#allocation55_spill] sm:$0xff] %v12189_v51  ;;  %10792 = vmatmul.mubr.bf16.gmra.mrb[52].mxu1 %v12189_v51  ;;  %v1861_v22 = vor.u32 %v1860_v30, %v1857_v52  ;;  %v1880_v47 = vshrl.u32 %v1372_v41, 16  ;;  %v1883_v16 = vshll.u32 %v1372_v41, 16  ;;  %v18074_v37 = vshll.u32 %v12133_v53, 16  ;;  %v1050_v30 = vld [vmem:[#allocation2 + $0xe0] sm:$0xf0] }
  0xb3   :  { %v1869_v26 = vor.u32 %v1868_v28, %v1865_v43  ;;  %v1874_v61 = vrot.slane %v1872_v1, 4  ;;  %v18075_v29 = vshrl.u32 %v12141_v45, 16  ;;  %v1877_v2 = vrot.slane %v1875_v60, 5 }
  0xb4   :  { %v608_v11 = vrot.slane %v18074_v37, 4  ;;  %v1882_v38 = vrot.slane %v1880_v47, 4  ;;  %v1885_v20 = vrot.slane %v1883_v16, 5  ;;  %v18076_v14 = vshll.u32 %v12141_v45, 16  ;;  %v1051_v37 = vld [vmem:[#allocation2 + $0xe8] sm:$0xf] }
  0xb5   :  { %v613_v49 = vrot.slane %v18075_v29, 3  ;;  %v12199_v34 = vsel %vm1377_vm0, %v1861_v22, %v1869_v26  ;;  %v18078_v53 = vpack.c.bf16 %v12156_v17, %v12151_v12  ;;  %v253_v28 = vrot.slane %v189_v46, 4  ;;  %v376_v45 = vld [vmem:[#allocation2 + $0xe0] sm:$0xf8] }
  0xb6   :  { %v616_v52 = vrot.slane %v18076_v14, 4  ;;  %18077 = vst [vmem:[#allocation56_spill] sm:$0xff] %v12199_v34  ;;  %v609_v41 = vor.u32 %v608_v11, %v12161_v18  ;;  %10795 = vmatprep.mubr.bf16.mxu1 %v12199_v34  ;;  %v1878_v1 = vor.u32 %v1877_v2, %v1874_v61  ;;  %v1886_v60 = vor.u32 %v1885_v20, %v1882_v38  ;;  %v377_v18 = vld [vmem:[#allocation2 + $0xe8] sm:$0xf]  ;;  %v12212_v61 = vld [vmem:[#allocation2 + $0xf0] sm:$0xf0] }
  0xb7   :  { %v252_v43 = vrot.slane %v18078_v53, 4  ;;  %v1189_v16 = vrot.slane %v1048_v58, 4  ;;  %348 = vst [vmem:[#allocation2 + $0x228] ss:$-4 sps:$4 sm:$0xff] %v253_v28   ;;  %v1190_v29 = vrot.slane %v1049_v42, 4  ;;  %v620_v22 = vshrl.u32 %v374_v13, 16 }
  0xb8   :  { %v617_v47 = vor.u32 %v616_v52, %v613_v49  ;;  %v623_v26 = vshll.u32 %v374_v13, 16  ;;  %v628_v14 = vshrl.u32 %v375_v6, 16  ;;  %v12207_v11 = vsel %vm1377_vm0, %v1878_v1, %v1886_v60 }
  0xb9   :  { %346 = vst [vmem:[#allocation2 + $0x218] ss:$-4 sps:$4 sm:$0xff] %v252_v43   ;;  %18079 = vst [vmem:[#allocation57_spill] sm:$0xff] %v12207_v11  ;;  %v631_v17 = vshll.u32 %v375_v6, 16  ;;  %v1192_v46 = vrot.slane %v1050_v30, 4  ;;  %v12216_v58 = vsel %vm1152_vm1, %v1189_v16, %v1190_v29  ;;  %v622_v42 = vrot.slane %v620_v22, 3 }
  0xba   :  { %v12210_v12 = vsel %vm414_vm2, %v609_v41, %v617_v47  ;;  %18081 = vst [vmem:[#allocation59_spill] sm:$0xff] %v12216_v58  ;;  %v625_v49 = vrot.slane %v623_v26, 4  ;;  %v630_v13 = vrot.slane %v628_v14, 3  ;;  %10796 = vmatmul.mubr.bf16.gmra.mrb[56].mxu1 %v12207_v11  ;;  %v1193_v38 = vrot.slane %v1051_v37, 4  ;;  %v378_v6 = vld [vmem:[#allocation2 + $0xf0] sm:$0xf8] }
  0xbb   :  { %18080 = vst [vmem:[#allocation58_spill] sm:$0xff] %v12210_v12  ;;  %2540 = vmatmul.mubr.bf16.gmra.mrb[44].mxu0 %v12210_v12  ;;  %v633_v2 = vrot.slane %v631_v17, 4  ;;  %v637_v20 = vshrl.u32 %v376_v45, 16  ;;  %v640_v52 = vshll.u32 %v376_v45, 16  ;;  %v645_v41 = vshrl.u32 %v377_v18, 16 }
  0xbc   :  { %2547 = vmatprep.mubr.bf16.mxu0 %v12216_v58  ;;  %v626_v30 = vor.u32 %v625_v49, %v622_v42  ;;  %v648_v53 = vshll.u32 %v377_v18, 16  ;;  %v1195_v16 = vrot.slane %v12212_v61, 4  ;;  %v654_v29 = vshrl.u32 %v378_v6, 16  ;;  %v1053_v42 = vld [vmem:[#allocation2 + $0xf8] sm:$0xf] }
  0xbd   :  { %v634_v43 = vor.u32 %v633_v2, %v630_v13  ;;  %v639_v28 = vrot.slane %v637_v20, 3  ;;  %v642_v1 = vrot.slane %v640_v52, 4  ;;  %v647_v60 = vrot.slane %v645_v41, 3 }
  0xbe   :  { %v650_v47 = vrot.slane %v648_v53, 4  ;;  %v1375_v14 = vld [vmem:[#allocation2 + $0x220] sm:$0xf0]  ;;  %v12225_v37 = vsel %vm1152_vm1, %v1192_v46, %v1193_v38  ;;  %v1376_v20 = vld [vmem:[#allocation2 + $0x228] sm:$0x1f]  ;;  %v1196_v50 = vrot.slane %v1053_v42, 4 }
  0xbf   :  { %v12222_v17 = vsel %vm414_vm2, %v626_v30, %v634_v43  ;;  %18083 = vst [vmem:[#allocation61_spill] sm:$0xff] %v12225_v37  ;;  %v643_v45 = vor.u32 %v642_v1, %v639_v28  ;;  %v1906_v52 = vshrl.u32 %v1375_v14, 16  ;;  %v1909_v41 = vshll.u32 %v1375_v14, 16  ;;  %v379_v28 = vld [vmem:[#allocation2 + $0xf8] sm:$0xf] }
  0xc0   :  { %v1373_v22 = vld [vmem:[#allocation2 + $0x210] sm:$0xf0]  ;;  %v1374_v26 = vld [vmem:[#allocation2 + $0x218] sm:$0x1f]  ;;  %18082 = vst [vmem:[#allocation60_spill] sm:$0xff] %v12222_v17  ;;  %v1914_v61 = vshrl.u32 %v1376_v20, 16 }
  0xc1   :  { %v1889_v18 = vshrl.u32 %v1373_v22, 16  ;;  %v1892_v49 = vshll.u32 %v1373_v22, 16  ;;  %v1897_v13 = vshrl.u32 %v1374_v26, 16  ;;  %v1900_v2 = vshll.u32 %v1374_v26, 16  ;;  %v1054_v42 = vld [vmem:[#allocation2 + $0x100] sm:$0xf0] }
  0xc2   :  { %v1917_v53 = vshll.u32 %v1376_v20, 16  ;;  %v1908_v30 = vrot.slane %v1906_v52, 4  ;;  %v1911_v46 = vrot.slane %v1909_v41, 5  ;;  %v1916_v38 = vrot.slane %v1914_v61, 4  ;;  %v1055_v41 = vld [vmem:[#allocation2 + $0x108] sm:$0xf] }
  0xc3   :  { %v1891_v11 = vrot.slane %v1889_v18, 4  ;;  %v1894_v34 = vrot.slane %v1892_v49, 5  ;;  %v1899_v51 = vrot.slane %v1897_v13, 4  ;;  %v1902_v44 = vrot.slane %v1900_v2, 5  ;;  %2548 = vmatmul.mubr.bf16.gmra.mrb[48].mxu0 %v12222_v17 }
  0xc4   :  { %v1919_v43 = vrot.slane %v1917_v53, 5  ;;  %2555 = vmatprep.mubr.bf16.mxu0 %v12225_v37  ;;  %v651_v26 = vor.u32 %v650_v47, %v647_v60  ;;  %v1912_v14 = vor.u32 %v1911_v46, %v1908_v30  ;;  %v657_v20 = vshll.u32 %v378_v6, 16  ;;  %v381_v47 = vld [vmem:[#allocation2 + $0x108] sm:$0xf] }
  0xc5   :  { %v1895_v1 = vor.u32 %v1894_v34, %v1891_v11  ;;  %v1903_v22 = vor.u32 %v1902_v44, %v1899_v51  ;;  %v662_v49 = vshrl.u32 %v379_v28, 16  ;;  %v665_v13 = vshll.u32 %v379_v28, 16  ;;  %v380_v51 = vld [vmem:[#allocation2 + $0x100] sm:$0xf8] }
  0xc6   :  { %v1920_v35 = vor.u32 %v1919_v43, %v1916_v38  ;;  %v12237_v52 = vsel %vm414_vm2, %v643_v45, %v651_v26  ;;  %v656_v34 = vrot.slane %v654_v29, 3  ;;  %v659_v44 = vrot.slane %v657_v20, 4  ;;  %v11259_v29 = vld [vmem:[%s17652_s1 + $0xa0] sm:$0xff]  }
  0xc7   :  { %v12230_v18 = vsel %vm1377_vm0, %v1895_v1, %v1903_v22  ;;  %18086 = vst [vmem:[#allocation64_spill] sm:$0xff] %v12237_v52  ;;  %v12241_v11 = vsel %vm1152_vm1, %v1195_v16, %v1196_v50  ;;  %v664_v6 = vrot.slane %v662_v49, 3  ;;  %v667_v60 = vrot.slane %v665_v13, 4  ;;  %10811 = vmatprep.subr.bf16.mxu0 %v11259_v29  ;;  %v11248_v38 = vld [vmem:[%s17652_s1 + $0x180] sm:$0xff]   ;;  %v383_v49 = vld [vmem:[#allocation2 + $0x138] sm:$0xf] }
  0xc8   :  { %18084 = vst [vmem:[#allocation62_spill] sm:$0xff] %v12230_v18  ;;  %10799 = vmatprep.mubr.bf16.mxu1 %v12230_v18  ;;  %v12234_v2 = vsel %vm1377_vm0, %v1912_v14, %v1920_v35  ;;  %18087 = vst [vmem:[#allocation65_spill] sm:$0xff] %v12241_v11  ;;  %v671_v35 = vshrl.u32 %v380_v51, 16  ;;  %v674_v45 = vshll.u32 %v380_v51, 16  ;;  %v660_v61 = vor.u32 %v659_v44, %v656_v34  ;;  %v382_v14 = vld [vmem:[#allocation2 + $0x130] sm:$0xf8] }
  0xc9   :  { %18085 = vst [vmem:[#allocation63_spill] sm:$0xff] %v12234_v2  ;;  %10800 = vmatmul.mubr.bf16.gmra.mrb[60].mxu1 %v12234_v2  ;;  %v668_v50 = vor.u32 %v667_v60, %v664_v6  ;;  %v679_v16 = vshrl.u32 %v381_v47, 16  ;;  %v682_v53 = vshll.u32 %v381_v47, 16  ;;  %v1198_v30 = vrot.slane %v1054_v42, 4  ;;  %10812 = vmatpush3.bf16.msra.mxu0 %v11259_v29  ;;  %v11249_v13 = vld [vmem:[%s17652_s1 + $0x188] sm:$0xff]  }
  0xca   :  { %3173 = vmatprep.mubr.bf16.mxu1 %v18059_v0  ;;  %v1199_v46 = vrot.slane %v1055_v41, 4  ;;  %v673_v43 = vrot.slane %v671_v35, 3  ;;  %v676_v28 = vrot.slane %v674_v45, 4  ;;  %v1056_v34 = vld [vmem:[#allocation2 + $0x130] sm:$0xf0]  ;;  %v688_v6 = vshrl.u32 %v382_v14, 16 }
  0xcb   :  { %2556 = vmatmul.mubr.bf16.gmra.mrb[52].mxu0 %v12237_v52  ;;  %v12253_v1 = vsel %vm414_vm2, %v660_v61, %v668_v50  ;;  %v681_v22 = vrot.slane %v679_v16, 3  ;;  %v684_v26 = vrot.slane %v682_v53, 4  ;;  %v1057_v44 = vld [vmem:[#allocation2 + $0x138] sm:$0xf]  ;;  %v691_v47 = vshll.u32 %v382_v14, 16  ;;  %v11251_v45 = vld [vmem:[%s17652_s1 + $0x190] sm:$0xff]  }
  0xcc   :  { %2563 = vmatprep.mubr.bf16.mxu0 %v12241_v11  ;;  %18088 = vst [vmem:[#allocation66_spill] sm:$0xff] %v12253_v1  ;;  %v12257_v20 = vsel %vm1152_vm1, %v1198_v30, %v1199_v46  ;;  %v677_v51 = vor.u32 %v676_v28, %v673_v43  ;;  %v696_v42 = vshrl.u32 %v383_v49, 16  ;;  %v699_v41 = vshll.u32 %v383_v49, 16  ;;  %v384_v61 = vld [vmem:[#allocation2 + $0x140] sm:$0xf8] }
  0xcd   :  { %18089 = vst [vmem:[#allocation67_spill] sm:$0xff] %v12257_v20  ;;  %v685_v60 = vor.u32 %v684_v26, %v681_v22  ;;  %v1201_v35 = vrot.slane %v1056_v34, 4  ;;  %v690_v29 = vrot.slane %v688_v6, 3  ;;  %v693_v16 = vrot.slane %v691_v47, 4  ;;  %v1058_v43 = vld [vmem:[#allocation2 + $0x140] sm:$0xf0] }
  0xce   :  { %v698_v53 = vrot.slane %v696_v42, 3  ;;  %v701_v30 = vrot.slane %v699_v41, 4  ;;  %v1059_v28 = vld [vmem:[#allocation2 + $0x148] sm:$0xf]  ;;  %v11252_v22 = vld [vmem:[%s17652_s1 + $0x198] sm:$0xff]   ;;  %v705_v26 = vshrl.u32 %v384_v61, 16 }
  0xcf   :  { %v12271_v50 = vsel %vm414_vm2, %v677_v51, %v685_v60  ;;  %v708_v14 = vshll.u32 %v384_v61, 16  ;;  %v1205_v51 = vrot.slane %v1059_v28, 4  ;;  %v386_v6 = vld [vmem:[#allocation2 + $0x150] sm:$0xf8]  ;;  %v11254_v60 = vld [vmem:[%s17652_s1 + $0x1a0] sm:$0xff]  }
  0xd0   :  { %18090 = vst [vmem:[#allocation68_spill] sm:$0xff] %v12271_v50  ;;  %v702_v49 = vor.u32 %v701_v30, %v698_v53  ;;  %v707_v47 = vrot.slane %v705_v26, 3  ;;  %v387_v42 = vld [vmem:[#allocation2 + $0x158] sm:$0xf]  ;;  %v1060_v61 = vld [vmem:[#allocation2 + $0x150] sm:$0xf0] }
  0xd1   :  { %3174 = vmatmul.mubr.bf16.vlgmr.msra.gmra.mrb[64].mxu1 %v18059_v0  ;;  %v11255_v53 = vld [vmem:[%s17652_s1 + $0x1a8] sm:$0xff]   ;;  %v722_v30 = vshrl.u32 %v386_v6, 16  ;;  %v733_v26 = vshll.u32 %v387_v42, 16 }
  0xd2   :  { %4010 = vmatpush1.bf16.msra.mxu1 %v11248_v38  ;;  %3181 = vmatprep.mubr.bf16.mxu1 %v11645_v24  ;;  %v1202_v24 = vrot.slane %v1057_v44, 4  ;;  %v385_v38 = vld [vmem:[#allocation2 + $0x148] sm:$0xf]  ;;  %v1204_v44 = vrot.slane %v1058_v43, 4  ;;  %v730_v43 = vshrl.u32 %v387_v42, 16 }
  0xd3   :  { %2564 = vmatmul.mubr.bf16.gmra.mrb[56].mxu0 %v12253_v1  ;;  %4011 = vmatprep.subr.bf16.mxu1 %v18059_v0  ;;  %v716_v34 = vshll.u32 %v385_v38, 16  ;;  %v12432_v1 = vld [vmem:[#allocation2 + $0x1c0] sm:$0xf0] }
  0xd4   :  { %2571 = vmatprep.mubr.bf16.mxu0 %v12257_v20  ;;  %v12275_v46 = vsel %vm1152_vm1, %v1201_v35, %v1202_v24  ;;  %v710_v35 = vrot.slane %v708_v14, 4  ;;  %v1207_v14 = vrot.slane %v1060_v61, 4  ;;  %v393_v20 = vld [vmem:[#allocation2 + $0x188] sm:$0xf] }
  0xd5   :  { %18091 = vst [vmem:[#allocation69_spill] sm:$0xff] %v12275_v46  ;;  %v784_v57 = vshll.u32 %v393_v20, 16 }
  0xd6   :  { %4012 = vmatpush1.bf16.msra.mxu1 %v11249_v13  ;;  %v713_v13 = vshrl.u32 %v385_v38, 16  ;;  %v725_v38 = vshll.u32 %v386_v6, 16  ;;  %v711_v28 = vor.u32 %v710_v35, %v707_v47  ;;  %v724_v6 = vrot.slane %v722_v30, 3  ;;  %v11262_v47 = vld [vmem:[%s17652_s1 + $0xa8] sm:$0xff]  }
  0xd7   :  { %4013 = vmatprep.subr.bf16.mxu1 %v18059_v0  ;;  %v735_v35 = vrot.slane %v733_v26, 4  ;;  %10813 = vmatprep.subr.bf16.mxu0 %v11262_v47 }
  0xd8   :  { %v715_v24 = vrot.slane %v713_v13, 3  ;;  %v11257_v13 = vld [vmem:[%s17652_s1 + $0x1b0] sm:$0xff]   ;;  %v727_v2 = vrot.slane %v725_v38, 4  ;;  %10814 = vmatpush3.bf16.msra.mxu0 %v11262_v47 }
  0xd9   :  { %3182 = vmatmul.mubr.bf16.gmra.mrb[68].mxu1 %v11697_v4  ;;  %v694_v4 = vor.u32 %v693_v16, %v690_v29  ;;  %v12293_v29 = vsel %vm1152_vm1, %v1204_v44, %v1205_v51  ;;  %v1061_v16 = vld [vmem:[#allocation2 + $0x158] sm:$0xf]  ;;  %v1063_v44 = vld [vmem:[#allocation2 + $0x168] sm:$0xf] }
  0xda   :  { %3189 = vmatprep.mubr.bf16.mxu1 %v11679_v54  ;;  %4014 = vmatpush1.bf16.msra.mxu1 %v11251_v45  ;;  %v718_v45 = vrot.slane %v716_v34, 4  ;;  %18093 = vst [vmem:[#allocation71_spill] sm:$0xff] %v12293_v29  ;;  %v1062_v34 = vld [vmem:[#allocation2 + $0x160] sm:$0xf0]  ;;  %v389_v51 = vld [vmem:[#allocation2 + $0x168] sm:$0xf]  ;;  %v728_v26 = vor.u32 %v727_v2, %v724_v6 }
  0xdb   :  { %2572 = vmatmul.mubr.bf16.gmra.mrb[60].mxu0 %v12271_v50  ;;  %4015 = vmatprep.subr.bf16.mxu1 %v18059_v0  ;;  %v12289_v41 = vsel %vm414_vm2, %v694_v4, %v702_v49  ;;  %v1208_v4 = vrot.slane %v1061_v16, 4  ;;  %v388_v49 = vld [vmem:[#allocation2 + $0x160] sm:$0xf8]  ;;  %v732_v50 = vrot.slane %v730_v43, 3  ;;  %v12318_v16 = vld [vmem:[#allocation2 + $0x170] sm:$0xf0] }
  0xdc   :  { %2579 = vmatprep.mubr.bf16.mxu0 %v12275_v46  ;;  %18092 = vst [vmem:[#allocation70_spill] sm:$0xff] %v12289_v41  ;;  %v747_v30 = vshrl.u32 %v389_v51, 16  ;;  %v750_v38 = vshll.u32 %v389_v51, 16  ;;  %v12321_v43 = vld [vmem:[#allocation2 + $0x178] sm:$0xf]  ;;  %v11260_v2 = vld [vmem:[%s17652_s1 + $0x1c0] sm:$0xff]  }
  0xdd   :  { %v12316_v61 = vsel %vm1152_vm1, %v1207_v14, %v1208_v4  ;;  %v1210_v14 = vrot.slane %v1062_v34, 4  ;;  %v1211_v4 = vrot.slane %v1063_v44, 4  ;;  %v736_v51 = vor.u32 %v735_v35, %v732_v50  ;;  %v11263_v34 = vld [vmem:[%s17652_s1 + $0xb0] sm:$0xff]   ;;  %v12342_v50 = vld [vmem:[#allocation2 + $0x180] sm:$0xf0] }
  0xde   :  { %4016 = vmatpush1.bf16.msra.mxu1 %v11252_v22  ;;  %v719_v22 = vor.u32 %v718_v45, %v715_v24  ;;  %v739_v24 = vshrl.u32 %v388_v49, 16  ;;  %v742_v45 = vshll.u32 %v388_v49, 16  ;;  %18095 = vst [vmem:[#allocation73_spill] sm:$0xff] %v12316_v61  ;;  %v12344_v35 = vld [vmem:[#allocation2 + $0x188] sm:$0xf]  ;;  %10815 = vmatprep.subr.bf16.mxu0 %v11263_v34  ;;  %v1214_v47 = vrot.slane %v12321_v43, 4 }
  0xdf   :  { %4017 = vmatprep.subr.bf16.mxu1 %v18059_v0  ;;  %10816 = vmatpush3.bf16.msra.mxu0 %v11263_v34  ;;  %v12401_v34 = vld [vmem:[#allocation2 + $0x1a8] sm:$0xf]  ;;  %v18103_v52 = vrot.slane %v12342_v50, 4 }
  0xe0   :  { %v12312_v42 = vsel %vm414_vm2, %v711_v28, %v719_v22  ;;  %v392_v28 = vld [vmem:[#allocation2 + $0x180] sm:$0xf8]  ;;  %v11258_v22 = vld [vmem:[%s17652_s1 + $0x1b8] sm:$0xff]   ;;  %v12330_v18 = vrot.slane %v739_v24, 3  ;;  %v12346_v24 = vrot.slane %v747_v30, 3 }
  0xe1   :  { %3190 = vmatmul.mubr.bf16.gmra.mrb[72].mxu1 %v11720_v40  ;;  %18094 = vst [vmem:[#allocation72_spill] sm:$0xff] %v12312_v42  ;;  %v12352_v40 = vld [vmem:[#allocation2 + $0x198] sm:$0xf]  ;;  %v773_v10 = vshrl.u32 %v392_v28, 16  ;;  %v776_v30 = vshll.u32 %v392_v28, 16 }
  0xe2   :  { %3197 = vmatprep.mubr.bf16.mxu1 %v11763_v62  ;;  %4018 = vmatpush1.bf16.msra.mxu1 %v11254_v60  ;;  %v12305_v60 = vld [vmem:[#allocation2 + $0x170] sm:$0xf8] }
  0xe3   :  { %2580 = vmatmul.mubr.bf16.gmra.mrb[64].mxu0 %v12289_v41  ;;  %4019 = vmatprep.subr.bf16.mxu1 %v18059_v0  ;;  %v756_v49 = vshrl.u32 %v12305_v60, 16  ;;  %v759_v44 = vshll.u32 %v12305_v60, 16  ;;  %v12350_v62 = vld [vmem:[#allocation2 + $0x190] sm:$0xf0]  ;;  %v11264_v60 = vld [vmem:[%s17652_s1 + $0xb8] sm:$0xff]  }
  0xe4   :  { %2587 = vmatprep.mubr.bf16.mxu0 %v12293_v29  ;;  %10817 = vmatprep.subr.bf16.mxu0 %v11264_v60  ;;  %v401_v29 = vld [vmem:[#allocation2 + $0x1c8] sm:$0xf] }
  0xe5   :  { %v12358_v54 = vrot.slane %v756_v49, 3  ;;  %v12370_v43 = vrot.slane %v759_v44, 4  ;;  %v12389_v44 = vld [vmem:[#allocation2 + $0x1a0] sm:$0xf0]  ;;  %10818 = vmatpush3.bf16.msra.mxu0 %v11264_v60 }
  0xe6   :  { %4020 = vmatpush1.bf16.msra.mxu1 %v11255_v53  ;;  %v391_v53 = vld [vmem:[#allocation2 + $0x178] sm:$0xf] }
  0xe7   :  { %4021 = vmatprep.subr.bf16.mxu1 %v18059_v0  ;;  %v764_v6 = vshrl.u32 %v391_v53, 16 }
  0xe9   :  { %3198 = vmatmul.mubr.bf16.gmra.mrb[76].mxu1 %v11799_v31  ;;  %v394_v31 = vld [vmem:[#allocation2 + $0x190] sm:$0xf8]  ;;  %v12372_v49 = vrot.slane %v764_v6, 3 }
  0xea   :  { %3205 = vmatprep.mubr.bf16.mxu1 %v11792_v19  ;;  %4022 = vmatpush1.bf16.msra.mxu1 %v11257_v13  ;;  %v12332_v13 = vrot.slane %v742_v45, 4  ;;  %v12348_v45 = vrot.slane %v750_v38, 4  ;;  %v767_v19 = vshll.u32 %v391_v53, 16  ;;  %v12362_v53 = vsel %vm414_vm2, %v728_v26, %v736_v51  ;;  %v398_v6 = vld [vmem:[#allocation2 + $0x1b0] sm:$0xf8] }
  0xeb   :  { %2588 = vmatmul.mubr.bf16.gmra.mrb[68].mxu0 %v12312_v42  ;;  %4023 = vmatprep.subr.bf16.mxu1 %v18059_v0  ;;  %18096 = vst [vmem:[#allocation74_spill] sm:$0xff] %v12362_v53  ;;  %v12365_v38 = vsel %vm1152_vm1, %v1210_v14, %v1211_v4  ;;  %v790_v28 = vshrl.u32 %v394_v31, 16  ;;  %v793_v23 = vshll.u32 %v394_v31, 16  ;;  %v11261_v4 = vld [vmem:[%s17652_s1 + $0x1c8] sm:$0xff]   ;;  %v12383_v51 = vrot.slane %v773_v10, 3 }
  0xec   :  { %2595 = vmatprep.mubr.bf16.mxu0 %v12316_v61  ;;  %18097 = vst [vmem:[#allocation75_spill] sm:$0xff] %v12365_v38  ;;  %v397_v61 = vld [vmem:[#allocation2 + $0x1a8] sm:$0xf]  ;;  %v12375_v26 = vrot.slane %v767_v19, 4  ;;  %v12385_v31 = vrot.slane %v776_v30, 4  ;;  %v798_v19 = vshrl.u32 %v12352_v40, 16  ;;  %v753_v10 = vor.u32 %v12348_v45, %v12346_v24 }
  0xed   :  { %v12399_v30 = vrot.slane %v784_v57, 4  ;;  %v399_v14 = vld [vmem:[#allocation2 + $0x1b8] sm:$0xf]  ;;  %v810_v24 = vshll.u32 %v396_v7, 16  ;;  %v815_v45 = vshrl.u32 %v397_v61, 16  ;;  %v11265_v57 = vld [vmem:[%s17652_s1 + $0x1d0] sm:$0xff]  }
  0xee   :  { %4024 = vmatpush1.bf16.msra.mxu1 %v11258_v22  ;;  %v781_v22 = vshrl.u32 %v393_v20, 16  ;;  %v12416_v60 = vrot.slane %v798_v19, 3  ;;  %v824_v42 = vshrl.u32 %v398_v6, 16  ;;  %v827_v41 = vshll.u32 %v398_v6, 16 }
  0xef   :  { %4025 = vmatprep.subr.bf16.mxu1 %v18059_v0  ;;  %v832_v46 = vshrl.u32 %v399_v14, 16  ;;  %v770_v6 = vor.u32 %v12375_v26, %v12372_v49  ;;  %v849_v49 = vshrl.u32 %v401_v29, 16  ;;  %v852_v26 = vshll.u32 %v401_v29, 16 }
  0xf0   :  { %v12397_v20 = vrot.slane %v781_v22, 3  ;;  %v12411_v22 = vld [vmem:[#allocation2 + $0x1b8] sm:$0xf] }
  0xf1   :  { %3206 = vmatmul.mubr.bf16.gmra.mrb[80].mxu1 %v11857_v56  ;;  %v12404_v56 = vrot.slane %v790_v28, 3  ;;  %v818_v28 = vshll.u32 %v397_v61, 16 }
  0xf2   :  { %3213 = vmatprep.mubr.bf16.mxu1 %v11860_v59  ;;  %4026 = vmatpush1.bf16.msra.mxu1 %v11260_v2  ;;  %v745_v2 = vor.u32 %v12332_v13, %v12330_v18  ;;  %v12409_v18 = vld [vmem:[#allocation2 + $0x1b0] sm:$0xf0]  ;;  %v807_v13 = vshrl.u32 %v396_v7, 16  ;;  %v400_v59 = vld [vmem:[#allocation2 + $0x1c0] sm:$0xf8] }
  0xf3   :  { %2596 = vmatmul.mubr.bf16.gmra.mrb[72].mxu0 %v12362_v53  ;;  %4027 = vmatprep.subr.bf16.mxu1 %v18059_v0  ;;  %v12406_v53 = vrot.slane %v793_v23, 4  ;;  %v12449_v61 = vrot.slane %v818_v28, 4  ;;  %v12462_v28 = vld [vmem:[#allocation2 + $0x1d8] sm:$0xf] }
  0xf4   :  { %2603 = vmatprep.mubr.bf16.mxu0 %v12365_v38  ;;  %v801_v38 = vshll.u32 %v12352_v40, 16  ;;  %v12420_v23 = vsel %vm414_vm2, %v745_v2, %v753_v10  ;;  %v18099_v40 = vrot.slane %v12318_v16, 4  ;;  %v402_v2 = vld [vmem:[#allocation2 + $0x1d0] sm:$0xf8]  ;;  %v12435_v16 = vrot.slane %v807_v13, 3 }
  0xf5   :  { %18098 = vst [vmem:[#allocation76_spill] sm:$0xff] %v12420_v23  ;;  %v12439_v10 = vrot.slane %v815_v45, 3  ;;  %v12454_v45 = vrot.slane %v824_v42, 3  ;;  %v18102_v13 = vrot.slane %v12344_v35, 4  ;;  %v11267_v42 = vld [vmem:[%s17652_s1 + $0x1e0] sm:$0xff]  }
  0xf6   :  { %4028 = vmatpush1.bf16.msra.mxu1 %v11261_v4  ;;  %v12425_v7 = vsel %vm1152_vm1, %v18099_v40, %v1214_v47  ;;  %v12429_v19 = vrot.slane %v801_v38, 4  ;;  %v12437_v47 = vrot.slane %v810_v24, 4  ;;  %v12442_v4 = vld [vmem:[#allocation2 + $0x1c8] sm:$0xf]  ;;  %v762_v38 = vor.u32 %v12370_v43, %v12358_v54  ;;  %v403_v24 = vld [vmem:[#allocation2 + $0x1d8] sm:$0xf] }
  0xf7   :  { %4029 = vmatprep.subr.bf16.mxu1 %v18059_v0  ;;  %18100 = vst [vmem:[#allocation77_spill] sm:$0xff] %v12425_v7  ;;  %v841_v40 = vshrl.u32 %v400_v59, 16  ;;  %v12458_v54 = vrot.slane %v827_v41, 4  ;;  %v12460_v43 = vrot.slane %v832_v46, 3  ;;  %v866_v29 = vshrl.u32 %v403_v24, 16 }
  0xf8   :  { %v869_v50 = vshll.u32 %v403_v24, 16  ;;  %v404_v24 = vld [vmem:[#allocation2 + $0x1e0] sm:$0xf8] }
  0xf9   :  { %3214 = vmatmul.mubr.bf16.gmra.mrb[84].mxu1 %v11920_v8  ;;  %v12456_v8 = vld [vmem:[#allocation2 + $0x1d0] sm:$0xf0]  ;;  %v12473_v41 = vrot.slane %v841_v40, 3  ;;  %v878_v40 = vshll.u32 %v404_v24, 16 }
  0xfa   :  { %3221 = vmatprep.mubr.bf16.mxu1 %v11913_v55  ;;  %4030 = vmatpush1.bf16.msra.mxu1 %v11265_v57  ;;  %v835_v57 = vshll.u32 %v399_v14, 16  ;;  %v844_v55 = vshll.u32 %v400_v59, 16  ;;  %v861_v14 = vshll.u32 %v402_v2, 16  ;;  %v12469_v59 = vld [vmem:[#allocation2 + $0x1e0] sm:$0xf0] }
  0xfb   :  { %2604 = vmatmul.mubr.bf16.gmra.mrb[76].mxu0 %v12420_v23  ;;  %4031 = vmatprep.subr.bf16.mxu1 %v18059_v0  ;;  %v858_v23 = vshrl.u32 %v402_v2, 16  ;;  %v12487_v2 = vrot.slane %v852_v26, 4  ;;  %v12505_v26 = vrot.slane %v866_v29, 3  ;;  %v796_v29 = vor.u32 %v12406_v53, %v12404_v56 }
  0xfc   :  { %2611 = vmatprep.mubr.bf16.mxu0 %v12425_v7  ;;  %v12466_v7 = vsel %vm414_vm2, %v762_v38, %v770_v6  ;;  %v12471_v11 = vrot.slane %v835_v57, 4  ;;  %v12475_v46 = vrot.slane %v844_v55, 4  ;;  %v12483_v38 = vsel %vm1152_vm1, %v18103_v52, %v18102_v13  ;;  %v11266_v55 = vld [vmem:[%s17652_s1 + $0x1d8] sm:$0xff]  }
  0xfd   :  { %18101 = vst [vmem:[#allocation78_spill] sm:$0xff] %v12466_v7  ;;  %18104 = vst [vmem:[#allocation79_spill] sm:$0xff] %v12483_v38  ;;  %v12485_v6 = vrot.slane %v849_v49, 3  ;;  %v12495_v35 = vrot.slane %v858_v23, 3  ;;  %v12498_v52 = vrot.slane %v861_v14, 4  ;;  %v779_v13 = vor.u32 %v12385_v31, %v12383_v51 }
  0xfe   :  { %4032 = vmatpush1.bf16.msra.mxu1 %v11266_v55  ;;  %v787_v49 = vor.u32 %v12399_v30, %v12397_v20  ;;  %v12509_v23 = vld [vmem:[#allocation2 + $0x1e8] sm:$0xf]  ;;  %v18106_v55 = vrot.slane %v12367_v48, 4  ;;  %v18107_v51 = vrot.slane %v12350_v62, 4  ;;  %v804_v48 = vor.u32 %v12429_v19, %v12416_v60 }
  0xff   :  { %4033 = vmatprep.subr.bf16.mxu1 %v18059_v0  ;;  %v18110_v56 = vrot.slane %v12401_v34, 4  ;;  %v18111_v53 = vrot.slane %v12389_v44, 4  ;;  %v813_v34 = vor.u32 %v12437_v47, %v12435_v16  ;;  %v821_v44 = vor.u32 %v12449_v61, %v12439_v10  ;;  %v12578_v16 = vld [vmem:[#allocation2 + $0x1f8] sm:$0xf] }
 0x100   :  { %v12512_v14 = vsel %vm414_vm2, %v779_v13, %v787_v49  ;;  %v12520_v20 = vsel %vm1152_vm1, %v18107_v51, %v18106_v55  ;;  %v12532_v13 = vrot.slane %v869_v50, 4  ;;  %v405_v49 = vld [vmem:[#allocation2 + $0x1e8] sm:$0xf]  ;;  %v875_v51 = vshrl.u32 %v404_v24, 16  ;;  %v12549_v50 = vld [vmem:[#allocation2 + $0x1f0] sm:$0xf0] }
 0x101   :  { %3222 = vmatmul.mubr.bf16.gmra.mrb[88].mxu1 %v11956_v25  ;;  %18105 = vst [vmem:[#allocation80_spill] sm:$0xff] %v12512_v14  ;;  %18108 = vst [vmem:[#allocation81_spill] sm:$0xff] %v12520_v20  ;;  %v12539_v30 = vsel %vm414_vm2, %v796_v29, %v804_v48  ;;  %v12547_v60 = vsel %vm1152_vm1, %v18111_v53, %v18110_v56  ;;  %v883_v19 = vshrl.u32 %v405_v49, 16  ;;  %v886_v29 = vshll.u32 %v405_v49, 16 }
 0x102   :  { %3229 = vmatprep.mubr.bf16.mxu1 %v11946_v15  ;;  %18109 = vst [vmem:[#allocation82_spill] sm:$0xff] %v12539_v30  ;;  %18112 = vst [vmem:[#allocation83_spill] sm:$0xff] %v12547_v60  ;;  %4034 = vmatpush1.bf16.msra.mxu1 %v11267_v42  ;;  %v12565_v56 = vrot.slane %v875_v51, 3  ;;  %v18114_v61 = vrot.slane %v12411_v22, 4  ;;  %v18115_v47 = vrot.slane %v12409_v18, 4  ;;  %v830_v22 = vor.u32 %v12458_v54, %v12454_v45 }
 0x103   :  { %2612 = vmatmul.mubr.bf16.gmra.mrb[80].mxu0 %v12466_v7  ;;  %4035 = vmatprep.subr.bf16.mxu1 %v18059_v0  ;;  %v838_v18 = vor.u32 %v12471_v11, %v12460_v43  ;;  %v18118_v11 = vrot.slane %v12442_v4, 4  ;;  %v18119_v45 = vrot.slane %v12432_v1, 4  ;;  %v847_v4 = vor.u32 %v12475_v46, %v12473_v41 }
 0x104   :  { %2619 = vmatprep.mubr.bf16.mxu0 %v12483_v38  ;;  %v12586_v10 = vsel %vm1152_vm1, %v18115_v47, %v18114_v61  ;;  %v12603_v61 = vrot.slane %v886_v29, 4  ;;  %v11268_v29 = vld [vmem:[%s17652_s1 + $0x1e8] sm:$0xff]   ;;  %v855_v1 = vor.u32 %v12487_v2, %v12485_v6  ;;  %v18122_v2 = vrot.slane %v12462_v28, 4 }
 0x105   :  { %v12524_v31 = vpop.f32.mrb[0].mxu1  ;;  %18116 = vst [vmem:[#allocation85_spill] sm:$0xff] %v12586_v10  ;;  %v12622_v54 = vsel %vm1152_vm1, %v18119_v45, %v18118_v11  ;;  %v872_v28 = vor.u32 %v12532_v13, %v12505_v26  ;;  %v18127_v26 = vrot.slane %v12469_v59, 4 }
 0x106   :  { %v2742_v62 = vpop.f32.mrb[1].mxu1  ;;  %18120 = vst [vmem:[#allocation87_spill] sm:$0xff] %v12622_v54  ;;  %4036 = vmatpush1.bf16.msra.mxu1 %v11268_v29 }
 0x107   :  { %v12534_v55 = vpop.f32.mrb[2].mxu1  ;;  %4037 = vmatprep.subr.bf16.mxu1 %v18059_v0 }
 0x108   :  { %v12536_v57 = vpop.f32.mrb[3].mxu1 }
 0x109   :  { %3230 = vmatmul.mubr.bf16.gmra.mrb[92].mxu1 %v12005_v27 }
 0x10a   :  { %3237 = vmatprep.mubr.bf16.mxu1 %v12013_v9  ;;  %v12614_v9 = vld [vmem:[#allocation2 + $0x1f8] sm:$0xf] }
 0x10b   :  { %2620 = vmatmul.mubr.bf16.gmra.mrb[84].mxu0 %v12512_v14 }
 0x10c   :  { %2627 = vmatprep.mubr.bf16.mxu0 %v12520_v20 }
 0x10d   :  { %v12556_v24 = vpop.f32.mrb[4].mxu1 }
 0x10e   :  { %v12563_v48 = vpop.f32.mrb[5].mxu1 }
 0x10f   :  { %v12568_v53 = vpop.f32.mrb[6].mxu1 }
 0x110   :  { %v12572_v49 = vpop.f32.mrb[7].mxu1 }
 0x111   :  { %3238 = vmatmul.mubr.bf16.gmra.mrb[96].mxu1 %v12052_v32  ;;  %v12576_v32 = vsel %vm414_vm2, %v813_v34, %v821_v44  ;;  %v12594_v34 = vrot.slane %v883_v19, 3 }
 0x112   :  { %3245 = vmatprep.mubr.bf16.mxu1 %v12047_v36  ;;  %v12570_v36 = vrot.slane %v878_v40, 4  ;;  %18113 = vst [vmem:[#allocation84_spill] sm:$0xff] %v12576_v32  ;;  %v12588_v40 = vld [vmem:[#allocation2 + $0x1f0] sm:$0xf8] }
 0x113   :  { %2628 = vmatmul.mubr.bf16.gmra.mrb[88].mxu0 %v12539_v30  ;;  %v892_v19 = vshrl.u32 %v12588_v40, 16  ;;  %v895_v43 = vshll.u32 %v12588_v40, 16 }
 0x114   :  { %2635 = vmatprep.mubr.bf16.mxu0 %v12547_v60  ;;  %v881_v59 = vor.u32 %v12570_v36, %v12565_v56 }
 0x115   :  { %v12592_v51 = vpop.f32.mrb[8].mxu1 }
 0x116   :  { %v12601_v44 = vpop.f32.mrb[9].mxu1 }
 0x117   :  { %v12605_v47 = vpop.f32.mrb[10].mxu1  ;;  %v2453_v40 = vpop.f32.mrb[0].mxu0 }
 0x118   :  { %v12639_v11 = vadd.f32 %v2742_v62, %v2453_v40  ;;  %v2455_v45 = vpop.f32.mrb[1].mxu0  ;;  %v18123_v62 = vrot.slane %v12456_v8, 4 }
 0x119   :  { %3246 = vmatmul.mubr.bf16.gmra.mrb[100].mxu1 %v12081_v63  ;;  %v12612_v63 = vsel %vm414_vm2, %v830_v22, %v838_v18  ;;  %v900_v22 = vshrl.u32 %v12614_v9, 16  ;;  %v2456_v29 = vpop.f32.mrb[2].mxu0 }
 0x11a   :  { %3253 = vmatprep.mubr.bf16.mxu1 %v12086_v39  ;;  %v12608_v39 = vpop.f32.mrb[11].mxu1  ;;  %18117 = vst [vmem:[#allocation86_spill] sm:$0xff] %v12612_v63  ;;  %v12649_v46 = vadd.f32 %v12536_v57, %v2456_v29  ;;  %v2458_v6 = vpop.f32.mrb[3].mxu0  ;;  %v12657_v40 = vsel %vm1152_vm1, %v18123_v62, %v18122_v2  ;;  %v864_v57 = vor.u32 %v12498_v52, %v12495_v35 }
 0x11b   :  { %2636 = vmatmul.mubr.bf16.gmra.mrb[92].mxu0 %v12576_v32  ;;  %18124 = vst [vmem:[#allocation89_spill] sm:$0xff] %v12657_v40 }
 0x11c   :  { %2643 = vmatprep.mubr.bf16.mxu0 %v12586_v10  ;;  %v12679_v62 = vsel %vm414_vm2, %v864_v57, %v872_v28  ;;  %v11269_v57 = vld [vmem:[%s17652_s1 + $0x1f0] sm:$0xff]   ;;  %v408_v28 = vld [vmem:[#allocation2 + $0x200] sm:$0xf8] }
 0x11d   :  { %18125 = vst [vmem:[#allocation90_spill] sm:$0xff] %v12679_v62  ;;  %4038 = vmatpush1.bf16.msra.mxu1 %v11269_v57 }
 0x11e   :  { %4039 = vmatprep.subr.bf16.mxu1 %v18059_v0 }
 0x11f   :  { %v2461_v8 = vpop.f32.mrb[4].mxu0 }
 0x120   :  { %v12637_v18 = vpop.f32.mrb[12].mxu1  ;;  %v2463_v29 = vpop.f32.mrb[5].mxu0 }
 0x121   :  { %3254 = vmatmul.mubr.bf16.gmra.mrb[104].mxu1 %v12145_v5  ;;  %v12641_v42 = vpop.f32.mrb[13].mxu1  ;;  %v12661_v5 = vrot.slane %v892_v19, 3  ;;  %v12674_v19 = vadd.f32 %v12524_v31, %v2461_v8  ;;  %v2464_v2 = vpop.f32.mrb[6].mxu0  ;;  %v897_v8 = vrot.slane %v895_v43, 4 }
 0x122   :  { %3261 = vmatprep.mubr.bf16.mxu1 %v12139_v21  ;;  %v12644_v21 = vsel %vm414_vm2, %v847_v4, %v855_v1  ;;  %v12646_v41 = vpop.f32.mrb[14].mxu1  ;;  %v903_v4 = vshll.u32 %v12614_v9, 16  ;;  %v12684_v35 = vadd.f32 %v12534_v55, %v2464_v2  ;;  %v2466_v52 = vpop.f32.mrb[7].mxu0  ;;  %v18126_v9 = vrot.slane %v12509_v23, 4  ;;  %v1082_v55 = vld [vmem:[#allocation2 + $0x200] sm:$0xf0] }
 0x123   :  { %2644 = vmatmul.mubr.bf16.gmra.mrb[96].mxu0 %v12612_v63  ;;  %18121 = vst [vmem:[#allocation88_spill] sm:$0xff] %v12644_v21  ;;  %v12659_v45 = vpop.f32.mrb[15].mxu1  ;;  %v889_v23 = vor.u32 %v12603_v61, %v12594_v34  ;;  %v902_v2 = vrot.slane %v900_v22, 3  ;;  %v1083_v34 = vld [vmem:[#allocation2 + $0x208] sm:$0xf]  ;;  %v18133_v22 = vrot.slane %v12549_v50, 4  ;;  %v898_v50 = vor.u32 %v897_v8, %v12661_v5 }
 0x124   :  { %2651 = vmatprep.mubr.bf16.mxu0 %v12622_v54  ;;  %v12692_v31 = vsel %vm1152_vm1, %v18127_v26, %v18126_v9  ;;  %v409_v26 = vld [vmem:[#allocation2 + $0x208] sm:$0xf]  ;;  %v905_v36 = vrot.slane %v903_v4, 4 }
 0x125   :  { %18128 = vst [vmem:[#allocation91_spill] sm:$0xff] %v12692_v31 }
 0x128   :  { %v12671_v1 = vpop.f32.mrb[16].mxu1 }
 0x129   :  { %3262 = vmatmul.mubr.bf16.gmra.mrb[108].mxu1 %v12169_v33  ;;  %v12676_v6 = vpop.f32.mrb[17].mxu1 }
 0x12a   :  { %3269 = vmatprep.mubr.bf16.mxu1 %v12172_v3  ;;  %v12681_v3 = vpop.f32.mrb[18].mxu1 }
 0x12b   :  { %2652 = vmatmul.mubr.bf16.gmra.mrb[100].mxu0 %v12644_v21  ;;  %v12694_v13 = vpop.f32.mrb[19].mxu1 }
 0x12c   :  { %2659 = vmatprep.mubr.bf16.mxu0 %v12657_v40  ;;  %v2469_v29 = vpop.f32.mrb[8].mxu0 }
 0x12d   :  { %v12708_v52 = vadd.f32 %v12563_v48, %v2469_v29  ;;  %v2471_v9 = vpop.f32.mrb[9].mxu0  ;;  %v18132_v48 = vrot.slane %v12578_v16, 4  ;;  %v906_v16 = vor.u32 %v905_v36, %v902_v2 }
 0x12e   :  { %v2472_v57 = vpop.f32.mrb[10].mxu0 }
 0x12f   :  { %18129 = vst [vmem:[#allocation92_spill] sm:$0xff] %v12708_v52  ;;  %v12714_v56 = vadd.f32 %v12572_v49, %v2472_v57  ;;  %v2474_v61 = vpop.f32.mrb[11].mxu0  ;;  %v12724_v29 = vsel %vm1152_vm1, %v18133_v22, %v18132_v48  ;;  %v912_v49 = vshll.u32 %v408_v28, 16  ;;  %v920_v57 = vshll.u32 %v409_v26, 16 }
 0x130   :  { %18134 = vst [vmem:[#allocation95_spill] sm:$0xff] %v12724_v29  ;;  %v1241_v61 = vrot.slane %v1083_v34, 4 }
 0x131   :  { %3270 = vmatmul.mubr.bf16.gmra.mrb[112].mxu1 %v12210_v12  ;;  %v12711_v12 = vsel %vm414_vm2, %v881_v59, %v889_v23  ;;  %18131 = vst [vmem:[#allocation94_spill] sm:$0xff] %v12714_v56  ;;  %v917_v23 = vshrl.u32 %v409_v26, 16 }
 0x132   :  { %3277 = vmatprep.mubr.bf16.mxu1 %v12216_v58  ;;  %v1240_v58 = vrot.slane %v1082_v55, 4  ;;  %18130 = vst [vmem:[#allocation93_spill] sm:$0xff] %v12711_v12  ;;  %v909_v55 = vshrl.u32 %v408_v28, 16 }
 0x133   :  { %2660 = vmatmul.mubr.bf16.gmra.mrb[104].mxu0 %v12679_v62 }
 0x134   :  { %2667 = vmatprep.mubr.bf16.mxu0 %v12692_v31  ;;  %v12717_v43 = vpop.f32.mrb[20].mxu1  ;;  %v2477_v48 = vpop.f32.mrb[12].mxu0  ;;  %v911_v28 = vrot.slane %v909_v55, 3 }
 0x135   :  { %v12727_v4 = vpop.f32.mrb[21].mxu1  ;;  %v12737_v22 = vadd.f32 %v12556_v24, %v2477_v48 }
 0x136   :  { %v12730_v59 = vpop.f32.mrb[22].mxu1 }
 0x137   :  { %v12733_v9 = vpop.f32.mrb[23].mxu1  ;;  %18135 = vst [vmem:[#allocation96_spill] sm:$0xff] %v12737_v22 }
 0x139   :  { %3278 = vmatmul.mubr.bf16.gmra.mrb[116].mxu1 %v12222_v17  ;;  %v914_v17 = vrot.slane %v912_v49, 4 }
 0x13a   :  { %3285 = vmatprep.mubr.bf16.mxu1 %v12225_v37  ;;  %v2479_v37 = vpop.f32.mrb[13].mxu0 }
 0x13b   :  { %2668 = vmatmul.mubr.bf16.gmra.mrb[108].mxu0 %v12711_v12  ;;  %v2480_v33 = vpop.f32.mrb[14].mxu0 }
 0x13c   :  { %2675 = vmatprep.mubr.bf16.mxu0 %v12724_v29 }
 0x13d   :  { %8 = vsyncpa [#allocation5], 0  ;;  %v12740_v27 = vsel %vm414_vm2, %v898_v50, %v906_v16  ;;  %v919_v15 = vrot.slane %v917_v23, 3  ;;  %v922_v25 = vrot.slane %v920_v57, 4  ;;  %v12743_v56 = vadd.f32 %v12568_v53, %v2480_v33  ;;  %v410_v5 = vld [vmem:[#allocation2 + $0x210] sm:$0xf8] }
 0x13e   :  { %18136 = vst [vmem:[#allocation97_spill] sm:$0xff] %v12740_v27  ;;  %v2482_v8 = vpop.f32.mrb[15].mxu0  ;;  %v18138_v2 = vld [vmem:[#allocation64_spill] sm:$0xff]  ;;  %v12746_v26 = vpop.f32.mrb[24].mxu1  ;;  %v12749_v37 = vsel %vm1152_vm1, %v1240_v58, %v1241_v61  ;;  %v411_v24 = vld [vmem:[#allocation2 + $0x218] sm:$0xf]  ;;  %v915_v23 = vor.u32 %v914_v17, %v911_v28 }
 0x13f   :  { %18137 = vst [vmem:[#allocation98_spill] sm:$0xff] %v12743_v56  ;;  %18139 = vst [vmem:[#allocation99_spill] sm:$0xff] %v12749_v37  ;;  %v11270_v36 = vld [vmem:[%s17652_s1 + $0x1f8] sm:$0xff]   ;;  %v18140_v34 = vld [vmem:[#allocation65_spill] sm:$0xff]  ;;  %v12755_v55 = vpop.f32.mrb[25].mxu1  ;;  %v926_v50 = vshrl.u32 %v410_v5, 16  ;;  %v923_v16 = vor.u32 %v922_v25, %v919_v15 }
 0x140   :  { %v1084_v33 = vld [vmem:[#allocation2 + $0x210] sm:$0xf0]  ;;  %v1085_v53 = vld [vmem:[#allocation2 + $0x218] sm:$0xf]  ;;  %v12758_v49 = vpop.f32.mrb[26].mxu1  ;;  %4040 = vmatpush1.bf16.msra.mxu1 %v11270_v36  ;;  %v929_v57 = vshll.u32 %v410_v5, 16 }
 0x141   :  { %3286 = vmatmul.mubr.bf16.gmra.mrb[120].mxu1 %v18138_v2  ;;  %v12761_v58 = vpop.f32.mrb[27].mxu1  ;;  %v934_v61 = vshrl.u32 %v411_v24, 16  ;;  %v937_v48 = vshll.u32 %v411_v24, 16  ;;  %v1243_v8 = vrot.slane %v1084_v33, 4  ;;  %v928_v2 = vrot.slane %v926_v50, 3  ;;  %v18142_v28 = vld [vmem:[#allocation66_spill] sm:$0xff] }
 0x142   :  { %3293 = vmatprep.mubr.bf16.mxu1 %v18140_v34  ;;  %v1244_v34 = vrot.slane %v1085_v53, 4  ;;  %v12764_v56 = vsel %vm414_vm2, %v915_v23, %v923_v16  ;;  %v931_v22 = vrot.slane %v929_v57, 4  ;;  %v412_v17 = vld [vmem:[#allocation2 + $0x220] sm:$0xf8]  ;;  %v413_v15 = vld [vmem:[#allocation2 + $0x228] sm:$0xf] }
 0x143   :  { %2676 = vmatmul.mubr.bf16.gmra.mrb[112].mxu0 %v12740_v27  ;;  %18141 = vst [vmem:[#allocation100_spill] sm:$0xff] %v12764_v56  ;;  %v936_v27 = vrot.slane %v934_v61, 3  ;;  %v939_v52 = vrot.slane %v937_v48, 4  ;;  %v1086_v24 = vld [vmem:[#allocation2 + $0x220] sm:$0xf0]  ;;  %v943_v16 = vshrl.u32 %v412_v17, 16 }
 0x144   :  { %2683 = vmatprep.mubr.bf16.mxu0 %v12749_v37  ;;  %v12767_v36 = vpop.f32.mrb[28].mxu1  ;;  %v12770_v37 = vsel %vm1152_vm1, %v1243_v8, %v1244_v34  ;;  %v1087_v33 = vld [vmem:[#allocation2 + $0x228] sm:$0xf]  ;;  %v946_v57 = vshll.u32 %v412_v17, 16  ;;  %v932_v61 = vor.u32 %v931_v22, %v928_v2  ;;  %v954_v29 = vshll.u32 %v413_v15, 16  ;;  %v18148_v2 = vld [vmem:[#allocation69_spill] sm:$0xff] }
 0x145   :  { %18143 = vst [vmem:[#allocation101_spill] sm:$0xff] %v12767_v36  ;;  %18144 = vst [vmem:[#allocation102_spill] sm:$0xff] %v12770_v37  ;;  %v12773_v25 = vpop.f32.mrb[29].mxu1  ;;  %v2485_v5 = vpop.f32.mrb[16].mxu0  ;;  %v940_v48 = vor.u32 %v939_v52, %v936_v27  ;;  %v945_v17 = vrot.slane %v943_v16, 3 }
 0x146   :  { %v12776_v53 = vpop.f32.mrb[30].mxu1  ;;  %v12779_v23 = vadd.f32 %v12601_v44, %v2485_v5  ;;  %v2487_v50 = vpop.f32.mrb[17].mxu0  ;;  %v11271_v44 = vld [vmem:[%s17652_s1 + $0x200] sm:$0xff]   ;;  %v948_v22 = vrot.slane %v946_v57, 4  ;;  %v956_v52 = vrot.slane %v954_v29, 4 }
 0x147   :  { %18145 = vst [vmem:[#allocation103_spill] sm:$0xff] %v12776_v53  ;;  %v12782_v34 = vpop.f32.mrb[31].mxu1  ;;  %v2488_v8 = vpop.f32.mrb[18].mxu0  ;;  %v1247_v53 = vrot.slane %v1087_v33, 4  ;;  %10883 = vmatprep.subr.bf16.mxu0 %v11271_v44  ;;  %v12791_v5 = vsel %vm414_vm2, %v932_v61, %v940_v48  ;;  %v18150_v61 = vld [vmem:[#allocation70_spill] sm:$0xff]  ;;  %v18151_v48 = vld [vmem:[#allocation71_spill] sm:$0xff] }
 0x148   :  { %v12785_v12 = vadd.f32 %v12608_v39, %v2488_v8  ;;  %v2490_v36 = vpop.f32.mrb[19].mxu0  ;;  %18146 = vst [vmem:[#allocation104_spill] sm:$0xff] %v12791_v5  ;;  %v949_v33 = vor.u32 %v948_v22, %v945_v17 }
 0x149   :  { %3294 = vmatmul.mubr.bf16.gmra.mrb[124].mxu1 %v18142_v28  ;;  %v951_v28 = vshrl.u32 %v413_v15, 16 }
 0x14a   :  { %3301 = vmatprep.mubr.bf16.mxu1 %v18059_v0 }
 0x14b   :  { %2684 = vmatmul.mubr.bf16.gmra.mrb[116].mxu0 %v12764_v56  ;;  %v1246_v56 = vrot.slane %v1086_v24, 4  ;;  %v953_v27 = vrot.slane %v951_v28, 3 }
 0x14c   :  { %2691 = vmatprep.mubr.bf16.mxu0 %v12770_v37 }
 0x14d   :  { %v12795_v39 = vsel %vm1152_vm1, %v1246_v56, %v1247_v53  ;;  %v2493_v36 = vpop.f32.mrb[20].mxu0  ;;  %v957_v50 = vor.u32 %v956_v52, %v953_v27 }
 0x14e   :  { %18147 = vst [vmem:[#allocation105_spill] sm:$0xff] %v12795_v39  ;;  %v12800_v15 = vadd.f32 %v12592_v51, %v2493_v36  ;;  %v2495_v24 = vpop.f32.mrb[21].mxu0 }
 0x14f   :  { %v2496_v28 = vpop.f32.mrb[22].mxu0  ;;  %v12811_v57 = vsel %vm414_vm2, %v949_v33, %v957_v50  ;;  %v18152_v33 = vld [vmem:[#allocation72_spill] sm:$0xff] }
 0x150   :  { %v12804_v29 = vadd.f32 %v12605_v47, %v2496_v28  ;;  %v2498_v16 = vpop.f32.mrb[23].mxu0  ;;  %18149 = vst [vmem:[#allocation69_spill] sm:$0xff] %v12811_v57  ;;  %v11272_v28 = vld [vmem:[%s17652_s1 + $0x208] sm:$0xff]  }
 0x151   :  { %3302 = vmatmul.mubr.bf16.gmra.mrb[128].mxu1 %v18059_v0 }
 0x152   :  { %3309 = vmatprep.mubr.bf16.mxu1 %v18148_v2 }
 0x153   :  { %2692 = vmatmul.mubr.bf16.gmra.mrb[120].mxu0 %v12791_v5  ;;  %v12806_v56 = vpop.f32.mrb[32].mxu1 }
 0x154   :  { %2699 = vmatprep.mubr.bf16.mxu0 %v12795_v39  ;;  %v12808_v53 = vpop.f32.mrb[33].mxu1 }
 0x155   :  { %v12814_v51 = vpop.f32.mrb[34].mxu1 }
 0x156   :  { %v12817_v8 = vpop.f32.mrb[35].mxu1 }
 0x158   :  { %v2501_v47 = vpop.f32.mrb[24].mxu0 }
 0x159   :  { %3310 = vmatmul.mubr.bf16.gmra.mrb[132].mxu1 %v18150_v61  ;;  %v12822_v17 = vadd.f32 %v12641_v42, %v2501_v47  ;;  %v2503_v22 = vpop.f32.mrb[25].mxu0  ;;  %v18153_v42 = vld [vmem:[#allocation73_spill] sm:$0xff]  ;;  %v18154_v61 = vld [vmem:[#allocation7_spill] sm:$0xff]  ;;  %v18155_v47 = vld [vmem:[#allocation8_spill] sm:$0xff] }
 0x15a   :  { %3317 = vmatprep.mubr.bf16.mxu1 %v18151_v48  ;;  %v2504_v27 = vpop.f32.mrb[26].mxu0  ;;  %v18161_v48 = vld [vmem:[#allocation10_spill] sm:$0xff] }
 0x15b   :  { %2700 = vmatmul.mubr.bf16.gmra.mrb[124].mxu0 %v12811_v57  ;;  %v12824_v52 = vpop.f32.mrb[36].mxu1  ;;  %v12827_v2 = vadd.f32 %v12659_v45, %v2504_v27  ;;  %v2506_v36 = vpop.f32.mrb[27].mxu0 }
 0x15c   :  { %10819 = vmatprep.mubr.bf16.mxu0 %v18059_v0  ;;  %v12829_v24 = vpop.f32.mrb[37].mxu1  ;;  %v11273_v36 = vld [vmem:[%s17652_s1 + $0x210] sm:$0xff]  }
 0x15d   :  { %v12832_v50 = vpop.f32.mrb[38].mxu1 }
 0x15e   :  { %v12838_v16 = vpop.f32.mrb[39].mxu1 }
 0x160   :  { %v2509_v45 = vpop.f32.mrb[28].mxu0 }
 0x161   :  { %3318 = vmatmul.mubr.bf16.gmra.mrb[136].mxu1 %v18152_v33  ;;  %v12843_v22 = vadd.f32 %v12637_v18, %v2509_v45  ;;  %v2511_v27 = vpop.f32.mrb[29].mxu0  ;;  %v11274_v18 = vld [vmem:[%s17652_s1 + $0x218] sm:$0xff]  }
 0x162   :  { %3325 = vmatprep.mubr.bf16.mxu1 %v18153_v42  ;;  %v2512_v57 = vpop.f32.mrb[30].mxu0  ;;  %v18160_v27 = vld [vmem:[#allocation9_spill] sm:$0xff] }
 0x163   :  { %10820 = vmatmul.mubr.bf16.vlgmr.msra.gmra.mrb[128].mxu0 %v18154_v61  ;;  %v12849_v39 = vadd.f32 %v12646_v41, %v2512_v57  ;;  %v2514_v42 = vpop.f32.mrb[31].mxu0  ;;  %v18157_v61 = vld [vmem:[#allocation74_spill] sm:$0xff] }
 0x164   :  { %10823 = vmatprep.mubr.bf16.mxu0 %v18155_v47  ;;  %10884 = vmatpush3.bf16.msra.mxu0 %v11271_v44  ;;  %v18158_v44 = vld [vmem:[#allocation75_spill] sm:$0xff] }
 0x165   :  { %10885 = vmatprep.subr.bf16.mxu0 %v11272_v28  ;;  %18156 = vst [vmem:[#allocation70_spill] sm:$0xff] %v12849_v39  ;;  %v18168_v39 = vld [vmem:[#allocation12_spill] sm:$0xff] }
 0x168   :  { %10886 = vmatpush3.bf16.msra.mxu0 %v11272_v28  ;;  %v12856_v45 = vpop.f32.mrb[40].mxu1  ;;  %v2517_v41 = vpop.f32.mrb[32].mxu0 }
 0x169   :  { %3326 = vmatmul.mubr.bf16.gmra.mrb[140].mxu1 %v18157_v61  ;;  %10887 = vmatprep.subr.bf16.mxu0 %v11273_v36  ;;  %18159 = vst [vmem:[#allocation7_spill] sm:$0xff] %v12856_v45  ;;  %v12859_v33 = vpop.f32.mrb[41].mxu1  ;;  %v12865_v28 = vadd.f32 %v12676_v6, %v2517_v41  ;;  %v2519_v42 = vpop.f32.mrb[33].mxu0  ;;  %v11276_v6 = vld [vmem:[%s17652_s1 + $0x228] sm:$0xff]   ;;  %v18165_v41 = vld [vmem:[#allocation77_spill] sm:$0xff] }
 0x16a   :  { %3333 = vmatprep.mubr.bf16.mxu1 %v18158_v44  ;;  %v12862_v57 = vpop.f32.mrb[42].mxu1  ;;  %v11275_v44 = vld [vmem:[%s17652_s1 + $0x220] sm:$0xff]  }
 0x16b   :  { %10824 = vmatmul.mubr.bf16.gmra.mrb[132].mxu0 %v18160_v27  ;;  %18162 = vst [vmem:[#allocation8_spill] sm:$0xff] %v12862_v57  ;;  %18163 = vst [vmem:[#allocation106_spill] sm:$0xff] %v12865_v28  ;;  %v12870_v61 = vpop.f32.mrb[43].mxu1  ;;  %v2520_v27 = vpop.f32.mrb[34].mxu0  ;;  %v18167_v28 = vld [vmem:[#allocation11_spill] sm:$0xff] }
 0x16c   :  { %10827 = vmatprep.mubr.bf16.mxu0 %v18161_v48  ;;  %10888 = vmatpush3.bf16.msra.mxu0 %v11273_v36  ;;  %v12873_v45 = vadd.f32 %v12694_v13, %v2520_v27  ;;  %v2522_v48 = vpop.f32.mrb[35].mxu0  ;;  %v18164_v36 = vld [vmem:[#allocation76_spill] sm:$0xff]  ;;  %v11278_v27 = vld [vmem:[%s17652_s1 + $0x238] sm:$0xff]  }
 0x16d   :  { %10889 = vmatprep.subr.bf16.mxu0 %v11274_v18  ;;  %v11277_v48 = vld [vmem:[%s17652_s1 + $0x230] sm:$0xff]  }
 0x170   :  { %10890 = vmatpush3.bf16.msra.mxu0 %v11274_v18  ;;  %v12880_v42 = vpop.f32.mrb[44].mxu1 }
 0x171   :  { %3334 = vmatmul.mubr.bf16.gmra.mrb[144].mxu1 %v18164_v36  ;;  %10891 = vmatprep.subr.bf16.mxu0 %v11275_v44  ;;  %18166 = vst [vmem:[#allocation107_spill] sm:$0xff] %v12880_v42  ;;  %v12883_v57 = vpop.f32.mrb[45].mxu1  ;;  %v18172_v42 = vld [vmem:[#allocation16_spill] sm:$0xff] }
 0x172   :  { %3341 = vmatprep.mubr.bf16.mxu1 %v18165_v41  ;;  %v12886_v13 = vpop.f32.mrb[46].mxu1  ;;  %v18171_v41 = vld [vmem:[#allocation15_spill] sm:$0xff] }
 0x173   :  { %10828 = vmatmul.mubr.bf16.gmra.mrb[136].mxu0 %v18167_v28  ;;  %18169 = vst [vmem:[#allocation108_spill] sm:$0xff] %v12886_v13  ;;  %v12891_v18 = vpop.f32.mrb[47].mxu1 }
 0x174   :  { %10831 = vmatprep.mubr.bf16.mxu0 %v18168_v39  ;;  %10892 = vmatpush3.bf16.msra.mxu0 %v11275_v44 }
 0x175   :  { %10893 = vmatprep.subr.bf16.mxu0 %v11276_v6 }
 0x178   :  { %10894 = vmatpush3.bf16.msra.mxu0 %v11276_v6  ;;  %v12898_v44 = vpop.f32.mrb[48].mxu1 }
 0x179   :  { %3342 = vmatmul.mubr.bf16.gmra.mrb[148].mxu1 %v12466_v7  ;;  %10895 = vmatprep.subr.bf16.mxu0 %v11277_v48  ;;  %18170 = vst [vmem:[#allocation109_spill] sm:$0xff] %v12898_v44  ;;  %v12901_v36 = vpop.f32.mrb[49].mxu1  ;;  %v2525_v13 = vpop.f32.mrb[36].mxu0 }
 0x17a   :  { %3349 = vmatprep.mubr.bf16.mxu1 %v12483_v38  ;;  %v12904_v6 = vpop.f32.mrb[50].mxu1  ;;  %v12907_v7 = vadd.f32 %v12671_v1, %v2525_v13  ;;  %v2527_v39 = vpop.f32.mrb[37].mxu0  ;;  %v18176_v13 = vld [vmem:[#allocation18_spill] sm:$0xff] }
 0x17b   :  { %10832 = vmatmul.mubr.bf16.gmra.mrb[140].mxu0 %v18171_v41  ;;  %18173 = vst [vmem:[#allocation16_spill] sm:$0xff] %v12904_v6  ;;  %v12909_v28 = vpop.f32.mrb[51].mxu1  ;;  %v2528_v38 = vpop.f32.mrb[38].mxu0 }
 0x17c   :  { %10835 = vmatprep.mubr.bf16.mxu0 %v18172_v42  ;;  %10896 = vmatpush3.bf16.msra.mxu0 %v11277_v48  ;;  %18174 = vst [vmem:[#allocation110_spill] sm:$0xff] %v12909_v28  ;;  %v12912_v44 = vadd.f32 %v12681_v3, %v2528_v38  ;;  %v2530_v41 = vpop.f32.mrb[39].mxu0  ;;  %v18175_v48 = vld [vmem:[#allocation17_spill] sm:$0xff] }
 0x17d   :  { %10897 = vmatprep.subr.bf16.mxu0 %v11278_v27 }
 0x180   :  { %10898 = vmatpush3.bf16.msra.mxu0 %v11278_v27 }
 0x181   :  { %3350 = vmatmul.mubr.bf16.gmra.mrb[152].mxu1 %v12512_v14  ;;  %7308 = vmatprep.subr.bf16.mxu0 %v18059_v0  ;;  %v2533_v1 = vpop.f32.mrb[40].mxu0 }
 0x182   :  { %3357 = vmatprep.mubr.bf16.mxu1 %v12520_v20  ;;  %v12920_v39 = vadd.f32 %v12727_v4, %v2533_v1  ;;  %v2535_v6 = vpop.f32.mrb[41].mxu0  ;;  %v18181_v4 = vld [vmem:[#allocation20_spill] sm:$0xff] }
 0x183   :  { %10836 = vmatmul.mubr.bf16.gmra.mrb[144].mxu0 %v18175_v48  ;;  %v2536_v28 = vpop.f32.mrb[42].mxu0  ;;  %v18182_v6 = vld [vmem:[#allocation23_spill] sm:$0xff] }
 0x184   :  { %10839 = vmatprep.mubr.bf16.mxu0 %v18176_v13  ;;  %v12925_v38 = vadd.f32 %v12733_v9, %v2536_v28  ;;  %v2538_v41 = vpop.f32.mrb[43].mxu0 }
 0x185   :  { %v12922_v3 = vpop.f32.mrb[52].mxu1 }
 0x186   :  { %18177 = vst [vmem:[#allocation17_spill] sm:$0xff] %v12922_v3  ;;  %v12927_v27 = vpop.f32.mrb[53].mxu1 }
 0x187   :  { %18178 = vst [vmem:[#allocation18_spill] sm:$0xff] %v12927_v27  ;;  %v12930_v20 = vpop.f32.mrb[54].mxu1 }
 0x188   :  { %18179 = vst [vmem:[#allocation111_spill] sm:$0xff] %v12930_v20  ;;  %v12932_v14 = vpop.f32.mrb[55].mxu1 }
 0x189   :  { %3358 = vmatmul.mubr.bf16.gmra.mrb[156].mxu1 %v12539_v30  ;;  %18180 = vst [vmem:[#allocation112_spill] sm:$0xff] %v12932_v14 }
 0x18a   :  { %3365 = vmatprep.mubr.bf16.mxu1 %v12547_v60 }
 0x18b   :  { %10840 = vmatmul.mubr.bf16.gmra.mrb[148].mxu0 %v18181_v4 }
 0x18c   :  { %10843 = vmatprep.mubr.bf16.mxu0 %v18182_v6 }
 0x18d   :  { %v12937_v3 = vpop.f32.mrb[56].mxu1 }
 0x18e   :  { %v2541_v1 = vpop.f32.mrb[44].mxu0  ;;  %18183 = vst [vmem:[#allocation20_spill] sm:$0xff] %v12937_v3  ;;  %v12942_v41 = vpop.f32.mrb[57].mxu1  ;;  %v18186_v3 = vld [vmem:[#allocation26_spill] sm:$0xff] }
 0x18f   :  { %v12940_v9 = vadd.f32 %v12717_v43, %v2541_v1  ;;  %v2543_v28 = vpop.f32.mrb[45].mxu0  ;;  %18184 = vst [vmem:[#allocation23_spill] sm:$0xff] %v12942_v41  ;;  %v12945_v20 = vpop.f32.mrb[58].mxu1  ;;  %v18187_v43 = vld [vmem:[#allocation27_spill] sm:$0xff] }
 0x190   :  { %v2544_v30 = vpop.f32.mrb[46].mxu0  ;;  %18185 = vst [vmem:[#allocation113_spill] sm:$0xff] %v12945_v20  ;;  %v12950_v27 = vpop.f32.mrb[59].mxu1 }
 0x191   :  { %3366 = vmatmul.mubr.bf16.gmra.mrb[160].mxu1 %v12576_v32  ;;  %v12948_v60 = vadd.f32 %v12730_v59, %v2544_v30  ;;  %v2546_v14 = vpop.f32.mrb[47].mxu0  ;;  %v18188_v59 = vld [vmem:[#allocation28_spill] sm:$0xff] }
 0x192   :  { %3373 = vmatprep.mubr.bf16.mxu1 %v12586_v10 }
 0x193   :  { %10844 = vmatmul.mubr.bf16.gmra.mrb[152].mxu0 %v18186_v3 }
 0x194   :  { %10847 = vmatprep.mubr.bf16.mxu0 %v18187_v43 }
 0x196   :  { %v2549_v1 = vpop.f32.mrb[48].mxu0 }
 0x197   :  { %v12956_v28 = vadd.f32 %v12755_v55, %v2549_v1  ;;  %v2551_v41 = vpop.f32.mrb[49].mxu0 }
 0x198   :  { %v2552_v32 = vpop.f32.mrb[50].mxu0 }
 0x199   :  { %3374 = vmatmul.mubr.bf16.gmra.mrb[164].mxu1 %v12612_v63  ;;  %v12960_v30 = vadd.f32 %v12761_v58, %v2552_v32  ;;  %v2554_v14 = vpop.f32.mrb[51].mxu0 }
 0x19a   :  { %3381 = vmatprep.mubr.bf16.mxu1 %v12622_v54 }
 0x19b   :  { %10848 = vmatmul.mubr.bf16.gmra.mrb[156].mxu0 %v18188_v59 }
 0x19c   :  { %v12964_v10 = vpop.f32.mrb[60].mxu1  ;;  %10851 = vmatprep.mubr.bf16.mxu0 %v18059_v0 }
 0x19d   :  { %18189 = vst [vmem:[#allocation26_spill] sm:$0xff] %v12964_v10  ;;  %v12967_v20 = vpop.f32.mrb[61].mxu1  ;;  %v18193_v10 = vld [vmem:[#allocation34_spill] sm:$0xff] }
 0x19e   :  { %18190 = vst [vmem:[#allocation27_spill] sm:$0xff] %v12967_v20  ;;  %v12969_v55 = vpop.f32.mrb[62].mxu1  ;;  %v2557_v41 = vpop.f32.mrb[52].mxu0 }
 0x19f   :  { %18191 = vst [vmem:[#allocation28_spill] sm:$0xff] %v12969_v55  ;;  %v12971_v1 = vpop.f32.mrb[63].mxu1  ;;  %v12974_v63 = vadd.f32 %v12746_v26, %v2557_v41  ;;  %v2559_v32 = vpop.f32.mrb[53].mxu0  ;;  %v18194_v55 = vld [vmem:[#allocation35_spill] sm:$0xff] }
 0x1a0   :  { %18192 = vst [vmem:[#allocation114_spill] sm:$0xff] %v12971_v1  ;;  %v2560_v58 = vpop.f32.mrb[54].mxu0 }
 0x1a1   :  { %3382 = vmatmul.mubr.bf16.gmra.mrb[168].mxu1 %v12644_v21  ;;  %v12978_v14 = vadd.f32 %v12758_v49, %v2560_v58  ;;  %v2562_v54 = vpop.f32.mrb[55].mxu0 }
 0x1a2   :  { %3389 = vmatprep.mubr.bf16.mxu1 %v12657_v40 }
 0x1a3   :  { %10852 = vmatmul.mubr.bf16.gmra.mrb[160].mxu0 %v18193_v10 }
 0x1a4   :  { %v3175_v20 = vpop.f32.mrb[64].mxu1  ;;  %10855 = vmatprep.mubr.bf16.mxu0 %v18194_v55 }
 0x1a5   :  { %v12984_v1 = vadd.f32 %v3175_v20, %v12639_v11  ;;  %v3177_v26 = vpop.f32.mrb[65].mxu1  ;;  %v18197_v20 = vld [vmem:[#allocation36_spill] sm:$0xff] }
 0x1a6   :  { %v3178_v41 = vpop.f32.mrb[66].mxu1  ;;  %v2565_v32 = vpop.f32.mrb[56].mxu0  ;;  %v18198_v26 = vld [vmem:[#allocation37_spill] sm:$0xff] }
 0x1a7   :  { %18195 = vst [vmem:[#allocation34_spill] sm:$0xff] %v12984_v1  ;;  %v12987_v0 = vadd.f32 %v3178_v41, %v12649_v46  ;;  %v3180_v21 = vpop.f32.mrb[67].mxu1  ;;  %v12990_v49 = vadd.f32 %v12773_v25, %v2565_v32  ;;  %v2567_v54 = vpop.f32.mrb[57].mxu0 }
 0x1a8   :  { %v2568_v58 = vpop.f32.mrb[58].mxu0 }
 0x1a9   :  { %18196 = vst [vmem:[#allocation35_spill] sm:$0xff] %v12987_v0  ;;  %3390 = vmatmul.mubr.bf16.gmra.mrb[172].mxu1 %v12679_v62  ;;  %v12994_v10 = vadd.f32 %v12782_v34, %v2568_v58  ;;  %v2570_v40 = vpop.f32.mrb[59].mxu0  ;;  %v18201_v34 = vld [vmem:[#allocation101_spill] sm:$0xff]  ;;  %v18203_v0 = vld [vmem:[#allocation103_spill] sm:$0xff] }
 0x1aa   :  { %3397 = vmatprep.mubr.bf16.mxu1 %v12692_v31  ;;  %v18202_v62 = vld [vmem:[#allocation93_spill] sm:$0xff] }
 0x1ab   :  { %10856 = vmatmul.mubr.bf16.gmra.mrb[164].mxu0 %v18197_v20 }
 0x1ac   :  { %v3183_v11 = vpop.f32.mrb[68].mxu1  ;;  %10859 = vmatprep.mubr.bf16.mxu0 %v18198_v26 }
 0x1ad   :  { %v13000_v21 = vadd.f32 %v3183_v11, %v12674_v19  ;;  %v3185_v46 = vpop.f32.mrb[69].mxu1  ;;  %v18204_v19 = vld [vmem:[#allocation95_spill] sm:$0xff]  ;;  %v18205_v11 = vld [vmem:[#allocation40_spill] sm:$0xff] }
 0x1ae   :  { %v3186_v25 = vpop.f32.mrb[70].mxu1  ;;  %v2573_v41 = vpop.f32.mrb[60].mxu0 }
 0x1af   :  { %18199 = vst [vmem:[#allocation36_spill] sm:$0xff] %v13000_v21  ;;  %v13003_v32 = vadd.f32 %v3186_v25, %v12684_v35  ;;  %v3188_v54 = vpop.f32.mrb[71].mxu1  ;;  %v13006_v58 = vadd.f32 %v18201_v34, %v2573_v41  ;;  %v2575_v40 = vpop.f32.mrb[61].mxu0  ;;  %v18206_v21 = vld [vmem:[#allocation43_spill] sm:$0xff]  ;;  %v18207_v35 = vld [vmem:[#allocation92_spill] sm:$0xff] }
 0x1b0   :  { %v2576_v31 = vpop.f32.mrb[62].mxu0  ;;  %v18209_v40 = vld [vmem:[#allocation94_spill] sm:$0xff] }
 0x1b1   :  { %18200 = vst [vmem:[#allocation115_spill] sm:$0xff] %v13003_v32  ;;  %3398 = vmatmul.mubr.bf16.gmra.mrb[176].mxu1 %v18202_v62  ;;  %v13010_v1 = vadd.f32 %v18203_v0, %v2576_v31  ;;  %v2578_v26 = vpop.f32.mrb[63].mxu0 }
 0x1b2   :  { %3405 = vmatprep.mubr.bf16.mxu1 %v18204_v19  ;;  %v18211_v19 = vld [vmem:[#allocation97_spill] sm:$0xff] }
 0x1b3   :  { %10860 = vmatmul.mubr.bf16.gmra.mrb[168].mxu0 %v18205_v11 }
 0x1b4   :  { %v3191_v46 = vpop.f32.mrb[72].mxu1  ;;  %10863 = vmatprep.mubr.bf16.mxu0 %v18206_v21 }
 0x1b5   :  { %v13016_v25 = vadd.f32 %v3191_v46, %v18207_v35  ;;  %v3193_v41 = vpop.f32.mrb[73].mxu1  ;;  %v18212_v46 = vld [vmem:[#allocation99_spill] sm:$0xff]  ;;  %v18213_v35 = vld [vmem:[#allocation46_spill] sm:$0xff] }
 0x1b6   :  { %v3194_v54 = vpop.f32.mrb[74].mxu1  ;;  %v2581_v34 = vpop.f32.mrb[64].mxu0 }
 0x1b7   :  { %18208 = vst [vmem:[#allocation101_spill] sm:$0xff] %v13016_v25  ;;  %v13019_v32 = vadd.f32 %v3194_v54, %v18209_v40  ;;  %v3196_v62 = vpop.f32.mrb[75].mxu1  ;;  %v13022_v0 = vadd.f32 %v12808_v53, %v2581_v34  ;;  %v2583_v31 = vpop.f32.mrb[65].mxu0  ;;  %v18214_v25 = vld [vmem:[#allocation47_spill] sm:$0xff]  ;;  %v18215_v54 = vld [vmem:[#allocation96_spill] sm:$0xff] }
 0x1b8   :  { %v2584_v26 = vpop.f32.mrb[66].mxu0  ;;  %v18216_v31 = vld [vmem:[#allocation98_spill] sm:$0xff] }
 0x1b9   :  { %18210 = vst [vmem:[#allocation103_spill] sm:$0xff] %v13019_v32  ;;  %3406 = vmatmul.mubr.bf16.gmra.mrb[180].mxu1 %v18211_v19  ;;  %v13026_v11 = vadd.f32 %v12817_v8, %v2584_v26  ;;  %v2586_v21 = vpop.f32.mrb[67].mxu0 }
 0x1ba   :  { %3413 = vmatprep.mubr.bf16.mxu1 %v18212_v46  ;;  %v18217_v46 = vld [vmem:[#allocation100_spill] sm:$0xff] }
 0x1bb   :  { %10864 = vmatmul.mubr.bf16.gmra.mrb[172].mxu0 %v18213_v35 }
 0x1bc   :  { %v3199_v41 = vpop.f32.mrb[76].mxu1  ;;  %10867 = vmatprep.mubr.bf16.mxu0 %v18214_v25 }
 0x1bd   :  { %v13032_v62 = vadd.f32 %v3199_v41, %v18215_v54  ;;  %v3201_v53 = vpop.f32.mrb[77].mxu1  ;;  %v18218_v41 = vld [vmem:[#allocation48_spill] sm:$0xff] }
 0x1be   :  { %v3202_v34 = vpop.f32.mrb[78].mxu1  ;;  %v2589_v40 = vpop.f32.mrb[68].mxu0  ;;  %v18219_v53 = vld [vmem:[#allocation49_spill] sm:$0xff] }
 0x1bf   :  { %v13035_v32 = vadd.f32 %v3202_v34, %v18216_v31  ;;  %v3204_v19 = vpop.f32.mrb[79].mxu1  ;;  %v13038_v8 = vadd.f32 %v12806_v56, %v2589_v40  ;;  %v2591_v21 = vpop.f32.mrb[69].mxu0 }
 0x1c0   :  { %v2592_v26 = vpop.f32.mrb[70].mxu0 }
 0x1c1   :  { %3414 = vmatmul.mubr.bf16.gmra.mrb[184].mxu1 %v18217_v46  ;;  %v13042_v35 = vadd.f32 %v12814_v51, %v2592_v26  ;;  %v2594_v25 = vpop.f32.mrb[71].mxu0 }
 0x1c2   :  { %3421 = vmatprep.mubr.bf16.mxu1 %v12770_v37 }
 0x1c3   :  { %10868 = vmatmul.mubr.bf16.gmra.mrb[176].mxu0 %v18218_v41 }
 0x1c4   :  { %v3207_v54 = vpop.f32.mrb[80].mxu1  ;;  %10871 = vmatprep.mubr.bf16.mxu0 %v18219_v53 }
 0x1c5   :  { %v13048_v19 = vadd.f32 %v3207_v54, %v12779_v23  ;;  %v3209_v56 = vpop.f32.mrb[81].mxu1  ;;  %v18222_v23 = vld [vmem:[#allocation13_spill] sm:$0xff]  ;;  %v18223_v54 = vld [vmem:[#allocation54_spill] sm:$0xff] }
 0x1c6   :  { %v3210_v34 = vpop.f32.mrb[82].mxu1  ;;  %v2597_v40 = vpop.f32.mrb[72].mxu0 }
 0x1c7   :  { %18220 = vst [vmem:[#allocation92_spill] sm:$0xff] %v13048_v19  ;;  %v13051_v31 = vadd.f32 %v3210_v34, %v12785_v12  ;;  %v3212_v21 = vpop.f32.mrb[83].mxu1  ;;  %v13054_v51 = vadd.f32 %v12829_v24, %v2597_v40  ;;  %v2599_v25 = vpop.f32.mrb[73].mxu0  ;;  %v18224_v19 = vld [vmem:[#allocation55_spill] sm:$0xff] }
 0x1c8   :  { %v2600_v26 = vpop.f32.mrb[74].mxu0 }
 0x1c9   :  { %18221 = vst [vmem:[#allocation94_spill] sm:$0xff] %v13051_v31  ;;  %3422 = vmatmul.mubr.bf16.gmra.mrb[188].mxu1 %v12791_v5  ;;  %v13058_v37 = vadd.f32 %v12838_v16, %v2600_v26  ;;  %v2602_v46 = vpop.f32.mrb[75].mxu0 }
 0x1ca   :  { %4041 = vmatprep.mubr.bf16.mxu1 %v18222_v23  ;;  %v18226_v23 = vld [vmem:[#allocation14_spill] sm:$0xff] }
 0x1cb   :  { %10872 = vmatmul.mubr.bf16.gmra.mrb[180].mxu0 %v18223_v54 }
 0x1cc   :  { %v3215_v56 = vpop.f32.mrb[84].mxu1  ;;  %10875 = vmatprep.mubr.bf16.mxu0 %v18224_v19 }
 0x1cd   :  { %v13064_v12 = vadd.f32 %v3215_v56, %v12800_v15  ;;  %v3217_v24 = vpop.f32.mrb[85].mxu1  ;;  %v18227_v15 = vld [vmem:[#allocation19_spill] sm:$0xff]  ;;  %v18228_v56 = vld [vmem:[#allocation56_spill] sm:$0xff] }
 0x1ce   :  { %v3218_v34 = vpop.f32.mrb[86].mxu1  ;;  %v2605_v40 = vpop.f32.mrb[76].mxu0 }
 0x1cf   :  { %18225 = vst [vmem:[#allocation96_spill] sm:$0xff] %v13064_v12  ;;  %v13067_v21 = vadd.f32 %v3218_v34, %v12804_v29  ;;  %v3220_v25 = vpop.f32.mrb[87].mxu1  ;;  %v13070_v16 = vadd.f32 %v12824_v52, %v2605_v40  ;;  %v2607_v46 = vpop.f32.mrb[77].mxu0  ;;  %v18229_v12 = vld [vmem:[#allocation57_spill] sm:$0xff] }
 0x1d0   :  { %v2608_v26 = vpop.f32.mrb[78].mxu0 }
 0x1d1   :  { %4042 = vmatmul.mubr.bf16.vlgmr.msra.gmra.mrb[192].mxu1 %v18226_v23  ;;  %v13074_v5 = vadd.f32 %v12832_v50, %v2608_v26  ;;  %v2610_v31 = vpop.f32.mrb[79].mxu0  ;;  %v18232_v23 = vld [vmem:[#allocation22_spill] sm:$0xff] }
 0x1d2   :  { %4049 = vmatprep.mubr.bf16.mxu1 %v18227_v15 }
 0x1d3   :  { %10876 = vmatmul.mubr.bf16.gmra.mrb[184].mxu0 %v18228_v56 }
 0x1d4   :  { %v3223_v24 = vpop.f32.mrb[88].mxu1  ;;  %10879 = vmatprep.mubr.bf16.mxu0 %v18229_v12 }
 0x1d5   :  { %v13080_v29 = vadd.f32 %v3223_v24, %v12822_v17  ;;  %v3225_v52 = vpop.f32.mrb[89].mxu1  ;;  %v18233_v17 = vld [vmem:[#allocation21_spill] sm:$0xff]  ;;  %v18234_v24 = vld [vmem:[#allocation62_spill] sm:$0xff] }
 0x1d6   :  { %v3226_v34 = vpop.f32.mrb[90].mxu1  ;;  %v2613_v40 = vpop.f32.mrb[80].mxu0 }
 0x1d7   :  { %18230 = vst [vmem:[#allocation98_spill] sm:$0xff] %v13080_v29  ;;  %v13083_v25 = vadd.f32 %v3226_v34, %v12827_v2  ;;  %v3228_v46 = vpop.f32.mrb[91].mxu1  ;;  %v13086_v50 = vadd.f32 %v12859_v33, %v2613_v40  ;;  %v2615_v31 = vpop.f32.mrb[81].mxu0 }
 0x1d8   :  { %v2616_v26 = vpop.f32.mrb[82].mxu0  ;;  %v18236_v46 = vld [vmem:[#allocation70_spill] sm:$0xff] }
 0x1d9   :  { %18231 = vst [vmem:[#allocation48_spill] sm:$0xff] %v13083_v25  ;;  %4050 = vmatmul.mubr.bf16.gmra.mrb[196].mxu1 %v18232_v23  ;;  %v13090_v15 = vadd.f32 %v12870_v61, %v2616_v26  ;;  %v2618_v12 = vpop.f32.mrb[83].mxu0  ;;  %v18237_v61 = vld [vmem:[#allocation7_spill] sm:$0xff]  ;;  %v18238_v25 = vld [vmem:[#allocation24_spill] sm:$0xff] }
 0x1da   :  { %4057 = vmatprep.mubr.bf16.mxu1 %v18233_v17 }
 0x1db   :  { %10880 = vmatmul.mubr.bf16.gmra.mrb[188].mxu0 %v18234_v24  ;;  %v18239_v24 = vld [vmem:[#allocation8_spill] sm:$0xff] }
 0x1dc   :  { %v3231_v52 = vpop.f32.mrb[92].mxu1  ;;  %10899 = vmatprep.mubr.bf16.mxu0 %v18155_v47 }
 0x1dd   :  { %v13096_v2 = vadd.f32 %v3231_v52, %v12843_v22  ;;  %v3233_v33 = vpop.f32.mrb[93].mxu1  ;;  %v18240_v22 = vld [vmem:[#allocation25_spill] sm:$0xff] }
 0x1de   :  { %v3234_v34 = vpop.f32.mrb[94].mxu1  ;;  %v2621_v40 = vpop.f32.mrb[84].mxu0  ;;  %v18241_v52 = vld [vmem:[#allocation9_spill] sm:$0xff] }
 0x1df   :  { %18235 = vst [vmem:[#allocation49_spill] sm:$0xff] %v13096_v2  ;;  %v13099_v31 = vadd.f32 %v3234_v34, %v18236_v46  ;;  %v3236_v23 = vpop.f32.mrb[95].mxu1  ;;  %v13102_v26 = vadd.f32 %v18237_v61, %v2621_v40  ;;  %v2623_v12 = vpop.f32.mrb[85].mxu0  ;;  %v18242_v2 = vld [vmem:[#allocation10_spill] sm:$0xff] }
 0x1e0   :  { %v2624_v17 = vpop.f32.mrb[86].mxu0  ;;  %v18243_v34 = vld [vmem:[#allocation106_spill] sm:$0xff] }
 0x1e1   :  { %4058 = vmatmul.mubr.bf16.gmra.mrb[200].mxu1 %v18238_v25  ;;  %v13106_v29 = vadd.f32 %v18239_v24, %v2624_v17  ;;  %v2626_v47 = vpop.f32.mrb[87].mxu0 }
 0x1e2   :  { %4065 = vmatprep.mubr.bf16.mxu1 %v18240_v22  ;;  %v18246_v22 = vld [vmem:[#allocation31_spill] sm:$0xff] }
 0x1e3   :  { %10900 = vmatmul.mubr.bf16.vlgmr.msra.gmra.mrb[192].mxu0 %v18241_v52 }
 0x1e4   :  { %v3239_v33 = vpop.f32.mrb[96].mxu1  ;;  %10903 = vmatprep.mubr.bf16.mxu0 %v18242_v2 }
 0x1e5   :  { %v13112_v46 = vadd.f32 %v3239_v33, %v18243_v34  ;;  %v3241_v40 = vpop.f32.mrb[97].mxu1  ;;  %v18247_v33 = vld [vmem:[#allocation30_spill] sm:$0xff]  ;;  %v18248_v34 = vld [vmem:[#allocation11_spill] sm:$0xff] }
 0x1e6   :  { %v3242_v23 = vpop.f32.mrb[98].mxu1  ;;  %v2629_v61 = vpop.f32.mrb[88].mxu0 }
 0x1e7   :  { %18244 = vst [vmem:[#allocation13_spill] sm:$0xff] %v13112_v46  ;;  %v13115_v12 = vadd.f32 %v3242_v23, %v12873_v45  ;;  %v3244_v25 = vpop.f32.mrb[99].mxu1  ;;  %v13118_v24 = vadd.f32 %v12883_v57, %v2629_v61  ;;  %v2631_v17 = vpop.f32.mrb[89].mxu0  ;;  %v18249_v46 = vld [vmem:[#allocation12_spill] sm:$0xff] }
 0x1e8   :  { %v2632_v47 = vpop.f32.mrb[90].mxu0 }
 0x1e9   :  { %18245 = vst [vmem:[#allocation54_spill] sm:$0xff] %v13115_v12  ;;  %4066 = vmatmul.mubr.bf16.gmra.mrb[204].mxu1 %v18246_v22  ;;  %v13122_v52 = vadd.f32 %v12891_v18, %v2632_v47  ;;  %v2634_v2 = vpop.f32.mrb[91].mxu0  ;;  %v18250_v18 = vld [vmem:[#allocation107_spill] sm:$0xff] }
 0x1ea   :  { %4073 = vmatprep.mubr.bf16.mxu1 %v18247_v33  ;;  %v18251_v33 = vld [vmem:[#allocation33_spill] sm:$0xff] }
 0x1eb   :  { %10904 = vmatmul.mubr.bf16.gmra.mrb[196].mxu0 %v18248_v34  ;;  %v18252_v34 = vld [vmem:[#allocation108_spill] sm:$0xff] }
 0x1ec   :  { %v3247_v40 = vpop.f32.mrb[100].mxu1  ;;  %10907 = vmatprep.mubr.bf16.mxu0 %v18249_v46 }
 0x1ed   :  { %v13128_v45 = vadd.f32 %v3247_v40, %v12907_v7  ;;  %v3249_v57 = vpop.f32.mrb[101].mxu1  ;;  %v18253_v7 = vld [vmem:[#allocation32_spill] sm:$0xff]  ;;  %v18254_v40 = vld [vmem:[#allocation15_spill] sm:$0xff] }
 0x1ee   :  { %v3250_v23 = vpop.f32.mrb[102].mxu1  ;;  %v2637_v61 = vpop.f32.mrb[92].mxu0 }
 0x1ef   :  { %v13131_v25 = vadd.f32 %v3250_v23, %v12912_v44  ;;  %v3252_v17 = vpop.f32.mrb[103].mxu1  ;;  %v13134_v47 = vadd.f32 %v18250_v18, %v2637_v61  ;;  %v2639_v22 = vpop.f32.mrb[93].mxu0 }
 0x1f0   :  { %v2640_v2 = vpop.f32.mrb[94].mxu0 }
 0x1f1   :  { %4074 = vmatmul.mubr.bf16.gmra.mrb[208].mxu1 %v18251_v33  ;;  %v13138_v12 = vadd.f32 %v18252_v34, %v2640_v2  ;;  %v2642_v46 = vpop.f32.mrb[95].mxu0 }
 0x1f2   :  { %4081 = vmatprep.mubr.bf16.mxu1 %v18253_v7  ;;  %v18255_v46 = vld [vmem:[#allocation38_spill] sm:$0xff] }
 0x1f3   :  { %10908 = vmatmul.mubr.bf16.gmra.mrb[200].mxu0 %v18254_v40  ;;  %v18256_v7 = vld [vmem:[#allocation110_spill] sm:$0xff] }
 0x1f4   :  { %v3255_v57 = vpop.f32.mrb[104].mxu1  ;;  %10911 = vmatprep.mubr.bf16.mxu0 %v18172_v42 }
 0x1f5   :  { %v13144_v44 = vadd.f32 %v3255_v57, %v12920_v39  ;;  %v3257_v23 = vpop.f32.mrb[105].mxu1  ;;  %v18257_v39 = vld [vmem:[#allocation39_spill] sm:$0xff] }
 0x1f6   :  { %v3258_v61 = vpop.f32.mrb[106].mxu1  ;;  %v2645_v17 = vpop.f32.mrb[96].mxu0 }
 0x1f7   :  { %v13147_v18 = vadd.f32 %v3258_v61, %v12925_v38  ;;  %v3260_v22 = vpop.f32.mrb[107].mxu1  ;;  %v13150_v2 = vadd.f32 %v12901_v36, %v2645_v17  ;;  %v2647_v33 = vpop.f32.mrb[97].mxu0 }
 0x1f8   :  { %v2648_v34 = vpop.f32.mrb[98].mxu0  ;;  %v18258_v33 = vld [vmem:[#allocation109_spill] sm:$0xff] }
 0x1f9   :  { %4082 = vmatmul.mubr.bf16.gmra.mrb[212].mxu1 %v18255_v46  ;;  %v13154_v40 = vadd.f32 %v18256_v7, %v2648_v34  ;;  %v2650_v42 = vpop.f32.mrb[99].mxu0 }
 0x1fa   :  { %4089 = vmatprep.mubr.bf16.mxu1 %v18257_v39  ;;  %v18259_v42 = vld [vmem:[#allocation42_spill] sm:$0xff] }
 0x1fb   :  { %10912 = vmatmul.mubr.bf16.gmra.mrb[204].mxu0 %v18175_v48  ;;  %v18260_v48 = vld [vmem:[#allocation16_spill] sm:$0xff] }
 0x1fc   :  { %v3263_v57 = vpop.f32.mrb[108].mxu1  ;;  %10915 = vmatprep.mubr.bf16.mxu0 %v18176_v13 }
 0x1fd   :  { %v13160_v38 = vadd.f32 %v3263_v57, %v12940_v9  ;;  %v3265_v36 = vpop.f32.mrb[109].mxu1  ;;  %v18261_v9 = vld [vmem:[#allocation41_spill] sm:$0xff] }
 0x1fe   :  { %v3266_v23 = vpop.f32.mrb[110].mxu1  ;;  %v2653_v61 = vpop.f32.mrb[100].mxu0 }
 0x1ff   :  { %v13163_v17 = vadd.f32 %v3266_v23, %v12948_v60  ;;  %v3268_v22 = vpop.f32.mrb[111].mxu1  ;;  %v13166_v34 = vadd.f32 %v18258_v33, %v2653_v61  ;;  %v2655_v46 = vpop.f32.mrb[101].mxu0 }
 0x200   :  { %v2656_v7 = vpop.f32.mrb[102].mxu0  ;;  %v18262_v46 = vld [vmem:[#allocation18_spill] sm:$0xff] }
 0x201   :  { %4090 = vmatmul.mubr.bf16.gmra.mrb[216].mxu1 %v18259_v42  ;;  %v13170_v39 = vadd.f32 %v18260_v48, %v2656_v7  ;;  %v2658_v13 = vpop.f32.mrb[103].mxu0 }
 0x202   :  { %4097 = vmatprep.mubr.bf16.mxu1 %v18261_v9  ;;  %v18263_v13 = vld [vmem:[#allocation44_spill] sm:$0xff] }
 0x203   :  { %10916 = vmatmul.mubr.bf16.gmra.mrb[208].mxu0 %v18181_v4  ;;  %v18264_v4 = vld [vmem:[#allocation112_spill] sm:$0xff] }
 0x204   :  { %v3271_v57 = vpop.f32.mrb[112].mxu1  ;;  %10919 = vmatprep.mubr.bf16.mxu0 %v18182_v6 }
 0x205   :  { %v13176_v60 = vadd.f32 %v3271_v57, %v12956_v28  ;;  %v3273_v36 = vpop.f32.mrb[113].mxu1  ;;  %v18265_v28 = vld [vmem:[#allocation45_spill] sm:$0xff] }
 0x206   :  { %v3274_v23 = vpop.f32.mrb[114].mxu1  ;;  %v2661_v61 = vpop.f32.mrb[104].mxu0 }
 0x207   :  { %v13179_v22 = vadd.f32 %v3274_v23, %v12960_v30  ;;  %v3276_v33 = vpop.f32.mrb[115].mxu1  ;;  %v13182_v7 = vadd.f32 %v18262_v46, %v2661_v61  ;;  %v2663_v42 = vpop.f32.mrb[105].mxu0 }
 0x208   :  { %v2664_v48 = vpop.f32.mrb[106].mxu0  ;;  %v18266_v42 = vld [vmem:[#allocation17_spill] sm:$0xff] }
 0x209   :  { %4098 = vmatmul.mubr.bf16.gmra.mrb[220].mxu1 %v18263_v13  ;;  %v13186_v9 = vadd.f32 %v18264_v4, %v2664_v48  ;;  %v2666_v6 = vpop.f32.mrb[107].mxu0 }
 0x20a   :  { %4105 = vmatprep.mubr.bf16.mxu1 %v18265_v28  ;;  %v18267_v6 = vld [vmem:[#allocation51_spill] sm:$0xff] }
 0x20b   :  { %10920 = vmatmul.mubr.bf16.gmra.mrb[212].mxu0 %v18186_v3  ;;  %v18268_v3 = vld [vmem:[#allocation111_spill] sm:$0xff] }
 0x20c   :  { %v3279_v57 = vpop.f32.mrb[116].mxu1  ;;  %10923 = vmatprep.mubr.bf16.mxu0 %v18187_v43 }
 0x20d   :  { %v13192_v30 = vadd.f32 %v3279_v57, %v12974_v63  ;;  %v3281_v36 = vpop.f32.mrb[117].mxu1  ;;  %v18269_v63 = vld [vmem:[#allocation50_spill] sm:$0xff] }
 0x20e   :  { %v3282_v23 = vpop.f32.mrb[118].mxu1  ;;  %v2669_v61 = vpop.f32.mrb[108].mxu0  ;;  %v18270_v36 = vld [vmem:[#allocation29_spill] sm:$0xff] }
 0x20f   :  { %v13195_v33 = vadd.f32 %v3282_v23, %v12978_v14  ;;  %v3284_v46 = vpop.f32.mrb[119].mxu1  ;;  %v13198_v48 = vadd.f32 %v18266_v42, %v2669_v61  ;;  %v2671_v13 = vpop.f32.mrb[109].mxu0 }
 0x210   :  { %v2672_v4 = vpop.f32.mrb[110].mxu0 }
 0x211   :  { %4106 = vmatmul.mubr.bf16.gmra.mrb[224].mxu1 %v18267_v6  ;;  %v13202_v28 = vadd.f32 %v18268_v3, %v2672_v4  ;;  %v2674_v43 = vpop.f32.mrb[111].mxu0  ;;  %v18271_v4 = vld [vmem:[#allocation23_spill] sm:$0xff] }
 0x212   :  { %4113 = vmatprep.mubr.bf16.mxu1 %v18269_v63  ;;  %v18273_v63 = vld [vmem:[#allocation52_spill] sm:$0xff] }
 0x213   :  { %10924 = vmatmul.mubr.bf16.gmra.mrb[216].mxu0 %v18188_v59 }
 0x214   :  { %v3287_v57 = vpop.f32.mrb[120].mxu1  ;;  %10927 = vmatprep.mubr.bf16.mxu0 %v18270_v36 }
 0x215   :  { %v13208_v14 = vadd.f32 %v3287_v57, %v12990_v49  ;;  %v3289_v23 = vpop.f32.mrb[121].mxu1  ;;  %v18275_v49 = vld [vmem:[#allocation53_spill] sm:$0xff]  ;;  %v18276_v57 = vmov 0  }
 0x216   :  { %v3290_v61 = vpop.f32.mrb[122].mxu1  ;;  %v2677_v46 = vpop.f32.mrb[112].mxu0 }
 0x217   :  { %v13211_v42 = vadd.f32 %v3290_v61, %v12994_v10  ;;  %v3292_v13 = vpop.f32.mrb[123].mxu1  ;;  %v13214_v6 = vadd.f32 %v18271_v4, %v2677_v46  ;;  %v2679_v3 = vpop.f32.mrb[113].mxu0 }
 0x218   :  { %v2680_v43 = vpop.f32.mrb[114].mxu0 }
 0x219   :  { %18272 = vst [vmem:[#allocation55_spill] sm:$0xff] %v13214_v6  ;;  %4114 = vmatmul.mubr.bf16.gmra.mrb[228].mxu1 %v18273_v63  ;;  %v13218_v59 = vadd.f32 %v12950_v27, %v2680_v43  ;;  %v2682_v36 = vpop.f32.mrb[115].mxu0  ;;  %v18277_v27 = vld [vmem:[#allocation20_spill] sm:$0xff] }
 0x21a   :  { %4121 = vmatprep.mubr.bf16.mxu1 %v18275_v49  ;;  %v18279_v49 = vld [vmem:[#allocation58_spill] sm:$0xff] }
 0x21b   :  { %18274 = vst [vmem:[#allocation14_spill] sm:$0xff] %v13218_v59  ;;  %10928 = vmatmul.mubr.bf16.gmra.mrb[220].mxu0 %v18276_v57  ;;  %v18280_v59 = vld [vmem:[#allocation113_spill] sm:$0xff] }
 0x21c   :  { %v3295_v23 = vpop.f32.mrb[124].mxu1  ;;  %10931 = vmatprep.mubr.bf16.mxu0 %v18194_v55 }
 0x21d   :  { %v13224_v10 = vadd.f32 %v3295_v23, %v13006_v58  ;;  %v3297_v61 = vpop.f32.mrb[125].mxu1  ;;  %v18282_v58 = vld [vmem:[#allocation59_spill] sm:$0xff] }
 0x21e   :  { %v3298_v46 = vpop.f32.mrb[126].mxu1  ;;  %v2685_v13 = vpop.f32.mrb[116].mxu0  ;;  %v18283_v61 = vld [vmem:[#allocation37_spill] sm:$0xff] }
 0x21f   :  { %v13227_v4 = vadd.f32 %v3298_v46, %v13010_v1  ;;  %v3300_v3 = vpop.f32.mrb[127].mxu1  ;;  %v13230_v43 = vadd.f32 %v18277_v27, %v2685_v13  ;;  %v2687_v63 = vpop.f32.mrb[117].mxu0 }
 0x220   :  { %v2688_v36 = vpop.f32.mrb[118].mxu0 }
 0x221   :  { %18278 = vst [vmem:[#allocation19_spill] sm:$0xff] %v13230_v43  ;;  %4122 = vmatmul.mubr.bf16.gmra.mrb[232].mxu1 %v18279_v49  ;;  %v13234_v6 = vadd.f32 %v18280_v59, %v2688_v36  ;;  %v2690_v55 = vpop.f32.mrb[119].mxu0  ;;  %v18284_v59 = vld [vmem:[#allocation27_spill] sm:$0xff] }
 0x222   :  { %4129 = vmatprep.mubr.bf16.mxu1 %v18282_v58  ;;  %v18286_v58 = vld [vmem:[#allocation60_spill] sm:$0xff]  ;;  %v18291_v43 = vld [vmem:[#allocation43_spill] sm:$0xff] }
 0x223   :  { %18281 = vst [vmem:[#allocation56_spill] sm:$0xff] %v13234_v6  ;;  %10932 = vmatmul.mubr.bf16.gmra.mrb[224].mxu0 %v18197_v20  ;;  %v18287_v20 = vld [vmem:[#allocation114_spill] sm:$0xff] }
 0x224   :  { %v3303_v23 = vpop.f32.mrb[128].mxu1  ;;  %10935 = vmatprep.mubr.bf16.mxu0 %v18283_v61 }
 0x225   :  { %v13240_v1 = vadd.f32 %v3303_v23, %v13022_v0  ;;  %v3305_v46 = vpop.f32.mrb[129].mxu1  ;;  %v18289_v0 = vld [vmem:[#allocation61_spill] sm:$0xff]  ;;  %v18290_v23 = vld [vmem:[#allocation40_spill] sm:$0xff] }
 0x226   :  { %v3306_v13 = vpop.f32.mrb[130].mxu1  ;;  %v2693_v3 = vpop.f32.mrb[120].mxu0 }
 0x227   :  { %v13243_v27 = vadd.f32 %v3306_v13, %v13026_v11  ;;  %v3308_v63 = vpop.f32.mrb[131].mxu1  ;;  %v13246_v36 = vadd.f32 %v18284_v59, %v2693_v3  ;;  %v2695_v49 = vpop.f32.mrb[121].mxu0 }
 0x228   :  { %v2696_v55 = vpop.f32.mrb[122].mxu0 }
 0x229   :  { %18285 = vst [vmem:[#allocation22_spill] sm:$0xff] %v13246_v36  ;;  %4130 = vmatmul.mubr.bf16.gmra.mrb[236].mxu1 %v18286_v58  ;;  %v13250_v6 = vadd.f32 %v18287_v20, %v2696_v55  ;;  %v2698_v61 = vpop.f32.mrb[123].mxu0  ;;  %v18292_v55 = vld [vmem:[#allocation26_spill] sm:$0xff]  ;;  %v18299_v36 = vld [vmem:[#allocation47_spill] sm:$0xff] }
 0x22a   :  { %4137 = vmatprep.mubr.bf16.mxu1 %v18289_v0  ;;  %v18294_v0 = vld [vmem:[#allocation64_spill] sm:$0xff] }
 0x22b   :  { %18288 = vst [vmem:[#allocation21_spill] sm:$0xff] %v13250_v6  ;;  %10936 = vmatmul.mubr.bf16.gmra.mrb[228].mxu0 %v18290_v23  ;;  %v18295_v23 = vld [vmem:[#allocation28_spill] sm:$0xff] }
 0x22c   :  { %v3311_v46 = vpop.f32.mrb[132].mxu1  ;;  %10939 = vmatprep.mubr.bf16.mxu0 %v18291_v43 }
 0x22d   :  { %v13256_v11 = vadd.f32 %v3311_v46, %v13038_v8  ;;  %v3313_v13 = vpop.f32.mrb[133].mxu1  ;;  %v18297_v8 = vld [vmem:[#allocation65_spill] sm:$0xff]  ;;  %v18298_v46 = vld [vmem:[#allocation46_spill] sm:$0xff] }
 0x22e   :  { %v3314_v3 = vpop.f32.mrb[134].mxu1  ;;  %v2701_v63 = vpop.f32.mrb[124].mxu0 }
 0x22f   :  { %v13259_v59 = vadd.f32 %v3314_v3, %v13042_v35  ;;  %v3316_v49 = vpop.f32.mrb[135].mxu1  ;;  %v13262_v58 = vadd.f32 %v18292_v55, %v2701_v63  ;;  %v2703_v20 = vpop.f32.mrb[125].mxu0 }
 0x230   :  { %v2704_v61 = vpop.f32.mrb[126].mxu0 }
 0x231   :  { %18293 = vst [vmem:[#allocation70_spill] sm:$0xff] %v13262_v58  ;;  %4138 = vmatmul.mubr.bf16.gmra.mrb[240].mxu1 %v18294_v0  ;;  %v13266_v6 = vadd.f32 %v18295_v23, %v2704_v61  ;;  %v2706_v43 = vpop.f32.mrb[127].mxu0  ;;  %v18300_v61 = vld [vmem:[#allocation36_spill] sm:$0xff]  ;;  %v18305_v58 = vld [vmem:[#allocation35_spill] sm:$0xff] }
 0x232   :  { %4145 = vmatprep.mubr.bf16.mxu1 %v18297_v8  ;;  %v18301_v43 = vld [vmem:[#allocation34_spill] sm:$0xff] }
 0x233   :  { %18296 = vst [vmem:[#allocation7_spill] sm:$0xff] %v13266_v6  ;;  %10940 = vmatmul.mubr.bf16.gmra.mrb[232].mxu0 %v18298_v46  ;;  %v18302_v6 = vld [vmem:[#allocation66_spill] sm:$0xff] }
 0x234   :  { %v3319_v13 = vpop.f32.mrb[136].mxu1  ;;  %10943 = vmatprep.mubr.bf16.mxu0 %v18299_v36  ;;  %v18303_v36 = vld [vmem:[#allocation115_spill] sm:$0xff] }
 0x235   :  { %v13272_v35 = vadd.f32 %v3319_v13, %v13054_v51  ;;  %v3321_v3 = vpop.f32.mrb[137].mxu1 }
 0x236   :  { %v3322_v63 = vpop.f32.mrb[138].mxu1  ;;  %v10821_v49 = vpop.f32.mrb[128].mxu0  ;;  %v18304_v3 = vld [vmem:[#allocation67_spill] sm:$0xff] }
 0x237   :  { %v13275_v55 = vadd.f32 %v3322_v63, %v13058_v37  ;;  %v3324_v20 = vpop.f32.mrb[139].mxu1  ;;  %v13278_v0 = vadd.f32 %v10821_v49, %v18300_v61  ;;  %v3464_v23 = vpop.f32.mrb[129].mxu0 }
 0x238   :  { %v13281_v8 = vadd.f32 %v3464_v23, %v18301_v43  ;;  %v10822_v46 = vpop.f32.mrb[130].mxu0 }
 0x239   :  { %4146 = vmatmul.mubr.bf16.gmra.mrb[244].mxu1 %v18302_v6  ;;  %v13285_v51 = vadd.f32 %v10822_v46, %v18303_v36  ;;  %v3467_v13 = vpop.f32.mrb[131].mxu0  ;;  %v18306_v36 = vld [vmem:[#allocation101_spill] sm:$0xff] }
 0x23a   :  { %4153 = vmatprep.mubr.bf16.mxu1 %v18304_v3  ;;  %v13289_v37 = vadd.f32 %v3467_v13, %v18305_v58  ;;  %v18307_v3 = vld [vmem:[#allocation68_spill] sm:$0xff] }
 0x23b   :  { %10944 = vmatmul.mubr.bf16.gmra.mrb[236].mxu0 %v18218_v41 }
 0x23c   :  { %v3327_v63 = vpop.f32.mrb[140].mxu1  ;;  %10947 = vmatprep.mubr.bf16.mxu0 %v18219_v53 }
 0x23d   :  { %v13294_v49 = vadd.f32 %v3327_v63, %v13070_v16  ;;  %v3329_v20 = vpop.f32.mrb[141].mxu1  ;;  %v18308_v63 = vld [vmem:[#allocation103_spill] sm:$0xff] }
 0x23e   :  { %v3330_v61 = vpop.f32.mrb[142].mxu1  ;;  %v10825_v6 = vpop.f32.mrb[132].mxu0 }
 0x23f   :  { %v13297_v23 = vadd.f32 %v3330_v61, %v13074_v5  ;;  %v3332_v43 = vpop.f32.mrb[143].mxu1  ;;  %v13300_v46 = vadd.f32 %v10825_v6, %v13032_v62  ;;  %v3480_v58 = vpop.f32.mrb[133].mxu0 }
 0x240   :  { %v13303_v13 = vadd.f32 %v3480_v58, %v18306_v36  ;;  %v10826_v41 = vpop.f32.mrb[134].mxu0  ;;  %v18309_v36 = vld [vmem:[#allocation96_spill] sm:$0xff] }
 0x241   :  { %4154 = vmatmul.mubr.bf16.gmra.mrb[248].mxu1 %v18307_v3  ;;  %v13307_v53 = vadd.f32 %v10826_v41, %v13035_v32  ;;  %v3483_v16 = vpop.f32.mrb[135].mxu0 }
 0x242   :  { %4161 = vmatprep.mubr.bf16.mxu1 %v18276_v57  ;;  %v13311_v5 = vadd.f32 %v3483_v16, %v18308_v63  ;;  %v18311_v16 = vld [vmem:[#allocation92_spill] sm:$0xff] }
 0x243   :  { %10948 = vmatmul.mubr.bf16.gmra.mrb[240].mxu0 %v18223_v54 }
 0x244   :  { %v3335_v62 = vpop.f32.mrb[144].mxu1  ;;  %10951 = vmatprep.mubr.bf16.mxu0 %v18224_v19 }
 0x245   :  { %v13316_v20 = vadd.f32 %v3335_v62, %v13086_v50  ;;  %v3337_v61 = vpop.f32.mrb[145].mxu1  ;;  %v18313_v62 = vld [vmem:[#allocation71_spill] sm:$0xff] }
 0x246   :  { %v3338_v6 = vpop.f32.mrb[146].mxu1  ;;  %v10829_v43 = vpop.f32.mrb[136].mxu0  ;;  %v18314_v61 = vld [vmem:[#allocation94_spill] sm:$0xff] }
 0x247   :  { %v13319_v32 = vadd.f32 %v3338_v6, %v13090_v15  ;;  %v3340_v58 = vpop.f32.mrb[147].mxu1  ;;  %v13322_v41 = vadd.f32 %v10829_v43, %v18309_v36  ;;  %v3496_v3 = vpop.f32.mrb[137].mxu0  ;;  %v18316_v43 = vld [vmem:[#allocation57_spill] sm:$0xff] }
 0x248   :  { %v13325_v63 = vadd.f32 %v3496_v3, %v18311_v16  ;;  %v10830_v54 = vpop.f32.mrb[138].mxu0 }
 0x249   :  { %18310 = vst [vmem:[#allocation24_spill] sm:$0xff] %v13322_v41  ;;  %4162 = vmatmul.mubr.bf16.gmra.mrb[252].mxu1 %v18276_v57  ;;  %v13329_v19 = vadd.f32 %v10830_v54, %v13067_v21  ;;  %v3499_v50 = vpop.f32.mrb[139].mxu0 }
 0x24a   :  { %4169 = vmatprep.mubr.bf16.mxu1 %v18313_v62  ;;  %v13333_v15 = vadd.f32 %v3499_v50, %v18314_v61  ;;  %v18319_v61 = vld [vmem:[#allocation98_spill] sm:$0xff] }
 0x24b   :  { %18312 = vst [vmem:[#allocation8_spill] sm:$0xff] %v13329_v19  ;;  %10952 = vmatmul.mubr.bf16.gmra.mrb[244].mxu0 %v18228_v56  ;;  %v18317_v19 = vld [vmem:[#allocation49_spill] sm:$0xff] }
 0x24c   :  { %18315 = vst [vmem:[#allocation25_spill] sm:$0xff] %v13333_v15  ;;  %v3343_v6 = vpop.f32.mrb[148].mxu1  ;;  %10955 = vmatprep.mubr.bf16.mxu0 %v18316_v43  ;;  %v18320_v15 = vld [vmem:[#allocation72_spill] sm:$0xff]  ;;  %v18322_v43 = vld [vmem:[#allocation73_spill] sm:$0xff] }
 0x24d   :  { %v13338_v58 = vadd.f32 %v3343_v6, %v13102_v26  ;;  %v3345_v36 = vpop.f32.mrb[149].mxu1 }
 0x24e   :  { %v3346_v3 = vpop.f32.mrb[150].mxu1  ;;  %v10833_v16 = vpop.f32.mrb[140].mxu0  ;;  %v18323_v36 = vld [vmem:[#allocation48_spill] sm:$0xff] }
 0x24f   :  { %v13341_v21 = vadd.f32 %v3346_v3, %v13106_v29  ;;  %v3348_v54 = vpop.f32.mrb[151].mxu1  ;;  %v13344_v62 = vadd.f32 %v10833_v16, %v18317_v19  ;;  %v3512_v50 = vpop.f32.mrb[141].mxu0  ;;  %v18324_v3 = vld [vmem:[#allocation62_spill] sm:$0xff]  ;;  %v18325_v16 = vld [vmem:[#allocation63_spill] sm:$0xff] }
 0x250   :  { %v13347_v41 = vadd.f32 %v3512_v50, %v18319_v61  ;;  %v10834_v56 = vpop.f32.mrb[142].mxu0 }
 0x251   :  { %18318 = vst [vmem:[#allocation9_spill] sm:$0xff] %v13344_v62  ;;  %4170 = vmatmul.mubr.bf16.gmra.mrb[0].mxu1 %v18320_v15  ;;  %v13351_v26 = vadd.f32 %v10834_v56, %v13099_v31  ;;  %v3515_v6 = vpop.f32.mrb[143].mxu0  ;;  %v18327_v62 = vld [vmem:[#allocation74_spill] sm:$0xff] }
 0x252   :  { %4177 = vmatprep.mubr.bf16.mxu1 %v18322_v43  ;;  %v13355_v29 = vadd.f32 %v3515_v6, %v18323_v36  ;;  %v18326_v36 = vld [vmem:[#allocation13_spill] sm:$0xff] }
 0x253   :  { %18321 = vst [vmem:[#allocation10_spill] sm:$0xff] %v13351_v26  ;;  %10956 = vmatmul.mubr.bf16.gmra.mrb[248].mxu0 %v18324_v3 }
 0x254   :  { %v3351_v19 = vpop.f32.mrb[152].mxu1  ;;  %10959 = vmatprep.mubr.bf16.mxu0 %v18325_v16  ;;  %v18328_v16 = vld [vmem:[#allocation75_spill] sm:$0xff] }
 0x255   :  { %v13360_v54 = vadd.f32 %v3351_v19, %v13118_v24  ;;  %v3353_v50 = vpop.f32.mrb[153].mxu1 }
 0x256   :  { %v3354_v61 = vpop.f32.mrb[154].mxu1  ;;  %v10837_v15 = vpop.f32.mrb[144].mxu0  ;;  %v18329_v50 = vld [vmem:[#allocation54_spill] sm:$0xff] }
 0x257   :  { %v13363_v31 = vadd.f32 %v3354_v61, %v13122_v52  ;;  %v3356_v56 = vpop.f32.mrb[155].mxu1  ;;  %v13366_v43 = vadd.f32 %v10837_v15, %v13128_v45  ;;  %v3528_v6 = vpop.f32.mrb[145].mxu0 }
 0x258   :  { %v13369_v26 = vadd.f32 %v3528_v6, %v18326_v36  ;;  %v10838_v3 = vpop.f32.mrb[146].mxu0 }
 0x259   :  { %4178 = vmatmul.mubr.bf16.gmra.mrb[4].mxu1 %v18327_v62  ;;  %v13373_v24 = vadd.f32 %v10838_v3, %v13131_v25  ;;  %v3531_v19 = vpop.f32.mrb[147].mxu0 }
 0x25a   :  { %4185 = vmatprep.mubr.bf16.mxu1 %v18328_v16  ;;  %v13377_v52 = vadd.f32 %v3531_v19, %v18329_v50  ;;  %v18330_v50 = vld [vmem:[#allocation76_spill] sm:$0xff] }
 0x25b   :  { %10960 = vmatmul.mubr.bf16.gmra.mrb[252].mxu0 %v18276_v57 }
 0x25c   :  { %v3359_v45 = vpop.f32.mrb[156].mxu1 }
 0x25d   :  { %v13381_v61 = vadd.f32 %v3359_v45, %v13134_v47  ;;  %v3361_v15 = vpop.f32.mrb[157].mxu1 }
 0x25e   :  { %v3362_v56 = vpop.f32.mrb[158].mxu1  ;;  %v10841_v6 = vpop.f32.mrb[148].mxu0  ;;  %v18331_v15 = vld [vmem:[#allocation77_spill] sm:$0xff] }
 0x25f   :  { %v13384_v62 = vadd.f32 %v3362_v56, %v13138_v12  ;;  %v3364_v25 = vpop.f32.mrb[159].mxu1  ;;  %v13387_v36 = vadd.f32 %v10841_v6, %v13160_v38  ;;  %v3544_v3 = vpop.f32.mrb[149].mxu0 }
 0x260   :  { %v13390_v19 = vadd.f32 %v3544_v3, %v13144_v44  ;;  %v10842_v16 = vpop.f32.mrb[150].mxu0 }
 0x261   :  { %4186 = vmatmul.mubr.bf16.gmra.mrb[8].mxu1 %v18330_v50  ;;  %v13394_v47 = vadd.f32 %v10842_v16, %v13163_v17  ;;  %v3547_v45 = vpop.f32.mrb[151].mxu0 }
 0x262   :  { %4193 = vmatprep.mubr.bf16.mxu1 %v18331_v15  ;;  %v13398_v12 = vadd.f32 %v3547_v45, %v13147_v18  ;;  %v18332_v45 = vld [vmem:[#allocation78_spill] sm:$0xff] }
 0x264   :  { %v3367_v56 = vpop.f32.mrb[160].mxu1 }
 0x265   :  { %v13401_v38 = vadd.f32 %v3367_v56, %v13150_v2  ;;  %v3369_v6 = vpop.f32.mrb[161].mxu1 }
 0x266   :  { %v3370_v25 = vpop.f32.mrb[162].mxu1  ;;  %v10845_v44 = vpop.f32.mrb[152].mxu0  ;;  %v18333_v6 = vld [vmem:[#allocation79_spill] sm:$0xff] }
 0x267   :  { %v13404_v3 = vadd.f32 %v3370_v25, %v13154_v40  ;;  %v3372_v50 = vpop.f32.mrb[163].mxu1  ;;  %v13407_v17 = vadd.f32 %v10845_v44, %v13192_v30  ;;  %v3560_v16 = vpop.f32.mrb[153].mxu0 }
 0x268   :  { %v13410_v15 = vadd.f32 %v3560_v16, %v13176_v60  ;;  %v10846_v18 = vpop.f32.mrb[154].mxu0 }
 0x269   :  { %4194 = vmatmul.mubr.bf16.gmra.mrb[12].mxu1 %v18332_v45  ;;  %v13414_v2 = vadd.f32 %v10846_v18, %v13195_v33  ;;  %v3563_v56 = vpop.f32.mrb[155].mxu0 }
 0x26a   :  { %4201 = vmatprep.mubr.bf16.mxu1 %v18333_v6  ;;  %v13418_v40 = vadd.f32 %v3563_v56, %v13179_v22  ;;  %v18334_v56 = vld [vmem:[#allocation80_spill] sm:$0xff] }
 0x26c   :  { %v3375_v25 = vpop.f32.mrb[164].mxu1 }
 0x26d   :  { %v13421_v30 = vadd.f32 %v3375_v25, %v13166_v34  ;;  %v3377_v44 = vpop.f32.mrb[165].mxu1 }
 0x26e   :  { %v3378_v50 = vpop.f32.mrb[166].mxu1  ;;  %v10849_v60 = vpop.f32.mrb[156].mxu0  ;;  %v18335_v44 = vld [vmem:[#allocation81_spill] sm:$0xff] }
 0x26f   :  { %v13424_v16 = vadd.f32 %v3378_v50, %v13170_v39  ;;  %v3380_v45 = vpop.f32.mrb[167].mxu1  ;;  %v13427_v33 = vadd.f32 %v10849_v60, %v13224_v10  ;;  %v3576_v18 = vpop.f32.mrb[157].mxu0 }
 0x270   :  { %v13430_v6 = vadd.f32 %v3576_v18, %v13208_v14  ;;  %v10850_v22 = vpop.f32.mrb[158].mxu0 }
 0x271   :  { %4202 = vmatmul.mubr.bf16.gmra.mrb[16].mxu1 %v18334_v56  ;;  %v13434_v34 = vadd.f32 %v10850_v22, %v13227_v4  ;;  %v3579_v25 = vpop.f32.mrb[159].mxu0 }
 0x272   :  { %4209 = vmatprep.mubr.bf16.mxu1 %v18335_v44  ;;  %v13438_v39 = vadd.f32 %v3579_v25, %v13211_v42  ;;  %v18336_v25 = vld [vmem:[#allocation82_spill] sm:$0xff] }
 0x274   :  { %v3383_v50 = vpop.f32.mrb[168].mxu1 }
 0x275   :  { %v13441_v10 = vadd.f32 %v3383_v50, %v13182_v7  ;;  %v3385_v60 = vpop.f32.mrb[169].mxu1 }
 0x276   :  { %v3386_v45 = vpop.f32.mrb[170].mxu1  ;;  %v10853_v14 = vpop.f32.mrb[160].mxu0  ;;  %v18337_v60 = vld [vmem:[#allocation83_spill] sm:$0xff] }
 0x277   :  { %v13444_v18 = vadd.f32 %v3386_v45, %v13186_v9  ;;  %v3388_v56 = vpop.f32.mrb[171].mxu1  ;;  %v13447_v4 = vadd.f32 %v10853_v14, %v13256_v11  ;;  %v3592_v22 = vpop.f32.mrb[161].mxu0 }
 0x278   :  { %v13450_v44 = vadd.f32 %v3592_v22, %v13240_v1  ;;  %v10854_v42 = vpop.f32.mrb[162].mxu0 }
 0x279   :  { %4210 = vmatmul.mubr.bf16.gmra.mrb[20].mxu1 %v18336_v25  ;;  %v13454_v7 = vadd.f32 %v10854_v42, %v13259_v59  ;;  %v3595_v50 = vpop.f32.mrb[163].mxu0 }
 0x27a   :  { %4217 = vmatprep.mubr.bf16.mxu1 %v18337_v60  ;;  %v13458_v9 = vadd.f32 %v3595_v50, %v13243_v27  ;;  %v18340_v50 = vld [vmem:[#allocation84_spill] sm:$0xff] }
 0x27c   :  { %v3391_v45 = vpop.f32.mrb[172].mxu1 }
 0x27d   :  { %v13461_v11 = vadd.f32 %v3391_v45, %v13198_v48  ;;  %v3393_v14 = vpop.f32.mrb[173].mxu1 }
 0x27e   :  { %v3394_v56 = vpop.f32.mrb[174].mxu1  ;;  %v10857_v1 = vpop.f32.mrb[164].mxu0  ;;  %v18342_v14 = vld [vmem:[#allocation85_spill] sm:$0xff] }
 0x27f   :  { %v13464_v22 = vadd.f32 %v3394_v56, %v13202_v28  ;;  %v3396_v25 = vpop.f32.mrb[175].mxu1  ;;  %v13467_v59 = vadd.f32 %v10857_v1, %v13294_v49  ;;  %v3608_v42 = vpop.f32.mrb[165].mxu0 }
 0x280   :  { %v13470_v60 = vadd.f32 %v3608_v42, %v13272_v35  ;;  %v10858_v27 = vpop.f32.mrb[166].mxu0  ;;  %v18343_v25 = vld [vmem:[#allocation55_spill] sm:$0xff]  ;;  %v18344_v42 = vld [vmem:[#allocation14_spill] sm:$0xff] }
 0x281   :  { %18338 = vst [vmem:[#allocation106_spill] sm:$0xff] %v13467_v59  ;;  %4218 = vmatmul.mubr.bf16.gmra.mrb[24].mxu1 %v18340_v50  ;;  %v13474_v48 = vadd.f32 %v10858_v27, %v13297_v23  ;;  %v3611_v45 = vpop.f32.mrb[167].mxu0 }
 0x282   :  { %18339 = vst [vmem:[#allocation31_spill] sm:$0xff] %v13470_v60  ;;  %4225 = vmatprep.mubr.bf16.mxu1 %v18342_v14  ;;  %v13478_v28 = vadd.f32 %v3611_v45, %v13275_v55  ;;  %v18347_v45 = vld [vmem:[#allocation86_spill] sm:$0xff] }
 0x283   :  { %18341 = vst [vmem:[#allocation30_spill] sm:$0xff] %v13474_v48 }
 0x284   :  { %v3399_v56 = vpop.f32.mrb[176].mxu1 }
 0x285   :  { %v13481_v49 = vadd.f32 %v3399_v56, %v18343_v25  ;;  %v3401_v1 = vpop.f32.mrb[177].mxu1 }
 0x286   :  { %v3402_v59 = vpop.f32.mrb[178].mxu1  ;;  %v10861_v35 = vpop.f32.mrb[168].mxu0  ;;  %v18349_v1 = vld [vmem:[#allocation87_spill] sm:$0xff] }
 0x287   :  { %v13484_v60 = vadd.f32 %v3402_v59, %v18344_v42  ;;  %v3404_v50 = vpop.f32.mrb[179].mxu1  ;;  %v13487_v23 = vadd.f32 %v10861_v35, %v13338_v58  ;;  %v3624_v27 = vpop.f32.mrb[169].mxu0 }
 0x288   :  { %v13490_v14 = vadd.f32 %v3624_v27, %v13316_v20  ;;  %v10862_v55 = vpop.f32.mrb[170].mxu0  ;;  %v18350_v50 = vld [vmem:[#allocation19_spill] sm:$0xff]  ;;  %v18351_v20 = vld [vmem:[#allocation56_spill] sm:$0xff] }
 0x289   :  { %18345 = vst [vmem:[#allocation11_spill] sm:$0xff] %v13487_v23  ;;  %4226 = vmatmul.mubr.bf16.gmra.mrb[28].mxu1 %v18347_v45  ;;  %v13494_v56 = vadd.f32 %v10862_v55, %v13341_v21  ;;  %v3627_v25 = vpop.f32.mrb[171].mxu0 }
 0x28a   :  { %18346 = vst [vmem:[#allocation12_spill] sm:$0xff] %v13490_v14  ;;  %4233 = vmatprep.mubr.bf16.mxu1 %v18349_v1  ;;  %v13498_v59 = vadd.f32 %v3627_v25, %v13319_v32 }
 0x28b   :  { %18348 = vst [vmem:[#allocation107_spill] sm:$0xff] %v13494_v56  ;;  %v18353_v56 = vld [vmem:[#allocation88_spill] sm:$0xff] }
 0x28c   :  { %v3407_v42 = vpop.f32.mrb[180].mxu1 }
 0x28d   :  { %v3408_v58 = vadd.f32 %v3407_v42, %v18350_v50  ;;  %v3409_v35 = vpop.f32.mrb[181].mxu1  ;;  %v18355_v42 = vld [vmem:[#allocation89_spill] sm:$0xff] }
 0x28e   :  { %v3410_v23 = vpop.f32.mrb[182].mxu1  ;;  %v10865_v48 = vpop.f32.mrb[172].mxu0 }
 0x28f   :  { %v3411_v27 = vadd.f32 %v3410_v23, %v18351_v20  ;;  %v3412_v14 = vpop.f32.mrb[183].mxu1  ;;  %v13503_v45 = vadd.f32 %v10865_v48, %v13381_v61  ;;  %v3640_v21 = vpop.f32.mrb[173].mxu0 }
 0x290   :  { %v13506_v55 = vadd.f32 %v3640_v21, %v13360_v54  ;;  %v10866_v1 = vpop.f32.mrb[174].mxu0  ;;  %v18356_v14 = vld [vmem:[#allocation22_spill] sm:$0xff]  ;;  %v18357_v54 = vld [vmem:[#allocation21_spill] sm:$0xff] }
 0x291   :  { %18352 = vst [vmem:[#allocation33_spill] sm:$0xff] %v13503_v45  ;;  %4234 = vmatmul.mubr.bf16.gmra.mrb[32].mxu1 %v18353_v56  ;;  %v13510_v32 = vadd.f32 %v10866_v1, %v13384_v62  ;;  %v3643_v25 = vpop.f32.mrb[175].mxu0 }
 0x292   :  { %4241 = vmatprep.mubr.bf16.mxu1 %v18355_v42  ;;  %v13514_v50 = vadd.f32 %v3643_v25, %v13363_v31 }
 0x293   :  { %18354 = vst [vmem:[#allocation108_spill] sm:$0xff] %v13510_v32  ;;  %v18359_v32 = vld [vmem:[#allocation90_spill] sm:$0xff] }
 0x294   :  { %v3415_v23 = vpop.f32.mrb[184].mxu1 }
 0x295   :  { %v3416_v61 = vadd.f32 %v3415_v23, %v18356_v14  ;;  %v3417_v48 = vpop.f32.mrb[185].mxu1  ;;  %v18361_v23 = vld [vmem:[#allocation91_spill] sm:$0xff] }
 0x296   :  { %v3418_v35 = vpop.f32.mrb[186].mxu1  ;;  %v10869_v20 = vpop.f32.mrb[176].mxu0  ;;  %v18362_v48 = vld [vmem:[#allocation70_spill] sm:$0xff] }
 0x297   :  { %v3419_v21 = vadd.f32 %v3418_v35, %v18357_v54  ;;  %v3420_v45 = vpop.f32.mrb[187].mxu1  ;;  %v13519_v56 = vadd.f32 %v10869_v20, %v13421_v30  ;;  %v3656_v62 = vpop.f32.mrb[177].mxu0 }
 0x298   :  { %v13522_v1 = vadd.f32 %v3656_v62, %v13401_v38  ;;  %v10870_v42 = vpop.f32.mrb[178].mxu0  ;;  %v18363_v38 = vld [vmem:[#allocation7_spill] sm:$0xff] }
 0x299   :  { %18358 = vst [vmem:[#allocation32_spill] sm:$0xff] %v13519_v56  ;;  %4242 = vmatmul.mubr.bf16.gmra.mrb[36].mxu1 %v18359_v32  ;;  %v13526_v31 = vadd.f32 %v10870_v42, %v13424_v16  ;;  %v3659_v25 = vpop.f32.mrb[179].mxu0 }
 0x29a   :  { %4249 = vmatprep.mubr.bf16.mxu1 %v18361_v23  ;;  %v13530_v14 = vadd.f32 %v3659_v25, %v13404_v3 }
 0x29b   :  { %18360 = vst [vmem:[#allocation15_spill] sm:$0xff] %v13526_v31  ;;  %v18365_v31 = vld [vmem:[#allocation93_spill] sm:$0xff] }
 0x29c   :  { %v3423_v45 = vpop.f32.mrb[188].mxu1 }
 0x29d   :  { %v3424_v30 = vadd.f32 %v3423_v45, %v18362_v48  ;;  %v3425_v35 = vpop.f32.mrb[189].mxu1  ;;  %v18367_v45 = vld [vmem:[#allocation95_spill] sm:$0xff] }
 0x29e   :  { %v3426_v20 = vpop.f32.mrb[190].mxu1  ;;  %v10873_v54 = vpop.f32.mrb[180].mxu0 }
 0x29f   :  { %v3427_v62 = vadd.f32 %v3426_v20, %v18363_v38  ;;  %v3428_v56 = vpop.f32.mrb[191].mxu1  ;;  %v13535_v32 = vadd.f32 %v10873_v54, %v13461_v11  ;;  %v3672_v16 = vpop.f32.mrb[181].mxu0 }
 0x2a0   :  { %v13538_v42 = vadd.f32 %v3672_v16, %v13441_v10  ;;  %v10874_v23 = vpop.f32.mrb[182].mxu0 }
 0x2a1   :  { %18364 = vst [vmem:[#allocation38_spill] sm:$0xff] %v13535_v32  ;;  %4250 = vmatmul.mubr.bf16.gmra.mrb[40].mxu1 %v18365_v31  ;;  %v13542_v3 = vadd.f32 %v10874_v23, %v13464_v22  ;;  %v3675_v25 = vpop.f32.mrb[183].mxu0  ;;  %v18371_v22 = vld [vmem:[#allocation97_spill] sm:$0xff] }
 0x2a2   :  { %4257 = vmatprep.mubr.bf16.mxu1 %v18367_v45  ;;  %v13546_v48 = vadd.f32 %v3675_v25, %v13444_v18 }
 0x2a3   :  { %18366 = vst [vmem:[#allocation110_spill] sm:$0xff] %v13542_v3  ;;  %v18373_v3 = vld [vmem:[#allocation99_spill] sm:$0xff] }
 0x2a4   :  { %18368 = vst [vmem:[#allocation39_spill] sm:$0xff] %v13546_v48  ;;  %v4043_v56 = vpop.f32.mrb[192].mxu1 }
 0x2a5   :  { %v4045_v35 = vpop.f32.mrb[193].mxu1 }
 0x2a6   :  { %v4046_v11 = vpop.f32.mrb[194].mxu1  ;;  %v10877_v20 = vpop.f32.mrb[184].mxu0 }
 0x2a7   :  { %v4048_v54 = vpop.f32.mrb[195].mxu1  ;;  %v13548_v38 = vadd.f32 %v10877_v20, %v3408_v58  ;;  %v3688_v10 = vpop.f32.mrb[185].mxu0 }
 0x2a8   :  { %v13551_v16 = vadd.f32 %v3688_v10, %v13481_v49  ;;  %v10878_v31 = vpop.f32.mrb[186].mxu0 }
 0x2a9   :  { %18369 = vst [vmem:[#allocation109_spill] sm:$0xff] %v13548_v38  ;;  %4258 = vmatmul.mubr.bf16.gmra.mrb[44].mxu1 %v18371_v22  ;;  %v13554_v23 = vadd.f32 %v10878_v31, %v3411_v27  ;;  %v3691_v45 = vpop.f32.mrb[187].mxu0  ;;  %v18377_v22 = vld [vmem:[#allocation100_spill] sm:$0xff] }
 0x2aa   :  { %18370 = vst [vmem:[#allocation42_spill] sm:$0xff] %v13551_v16  ;;  %4265 = vmatprep.mubr.bf16.mxu1 %v18373_v3  ;;  %v13558_v18 = vadd.f32 %v3691_v45, %v13484_v60  ;;  %v18379_v3 = vld [vmem:[#allocation102_spill] sm:$0xff] }
 0x2ab   :  { %18372 = vst [vmem:[#allocation16_spill] sm:$0xff] %v13554_v23 }
 0x2ac   :  { %18374 = vst [vmem:[#allocation41_spill] sm:$0xff] %v13558_v18  ;;  %v4051_v25 = vpop.f32.mrb[196].mxu1 }
 0x2ad   :  { %v4053_v35 = vpop.f32.mrb[197].mxu1 }
 0x2ae   :  { %v4054_v54 = vpop.f32.mrb[198].mxu1  ;;  %v10881_v58 = vpop.f32.mrb[188].mxu0 }
 0x2af   :  { %v4056_v20 = vpop.f32.mrb[199].mxu1  ;;  %v13560_v38 = vadd.f32 %v10881_v58, %v3424_v30  ;;  %v3704_v49 = vpop.f32.mrb[189].mxu0 }
 0x2b0   :  { %v13562_v10 = vadd.f32 %v3704_v49, %v3416_v61  ;;  %v10882_v16 = vpop.f32.mrb[190].mxu0  ;;  %v18381_v49 = vld [vmem:[#allocation104_spill] sm:$0xff] }
 0x2b1   :  { %18375 = vst [vmem:[#allocation18_spill] sm:$0xff] %v13560_v38  ;;  %4266 = vmatmul.mubr.bf16.gmra.mrb[48].mxu1 %v18377_v22  ;;  %v13565_v27 = vadd.f32 %v10882_v16, %v3427_v62  ;;  %v3707_v31 = vpop.f32.mrb[191].mxu0 }
 0x2b2   :  { %18376 = vst [vmem:[#allocation44_spill] sm:$0xff] %v13562_v10  ;;  %4273 = vmatprep.mubr.bf16.mxu1 %v18379_v3  ;;  %v13568_v60 = vadd.f32 %v3707_v31, %v3419_v21 }
 0x2b3   :  { %18378 = vst [vmem:[#allocation112_spill] sm:$0xff] %v13565_v27  ;;  %v18383_v27 = vld [vmem:[#allocation105_spill] sm:$0xff] }
 0x2b4   :  { %18380 = vst [vmem:[#allocation45_spill] sm:$0xff] %v13568_v60  ;;  %v4059_v45 = vpop.f32.mrb[200].mxu1 }
 0x2b5   :  { %v4061_v35 = vpop.f32.mrb[201].mxu1 }
 0x2b6   :  { %v4062_v23 = vpop.f32.mrb[202].mxu1  ;;  %v10901_v18 = vpop.f32.mrb[192].mxu0 }
 0x2b7   :  { %v4064_v20 = vpop.f32.mrb[203].mxu1  ;;  %v4341_v30 = vadd.f32 %v10901_v18, %v4051_v25  ;;  %v4332_v58 = vpop.f32.mrb[193].mxu0 }
 0x2b8   :  { %v4333_v38 = vadd.f32 %v4332_v58, %v4043_v56  ;;  %v10902_v61 = vpop.f32.mrb[194].mxu0 }
 0x2b9   :  { %4274 = vmatmul.mubr.bf16.gmra.mrb[52].mxu1 %v18381_v49  ;;  %v13572_v22 = vadd.f32 %v4341_v30, %v13278_v0  ;;  %v4344_v62 = vadd.f32 %v10902_v61, %v4054_v54  ;;  %v4335_v16 = vpop.f32.mrb[195].mxu0 }
 0x2ba   :  { %4281 = vmatprep.mubr.bf16.mxu1 %v18383_v27  ;;  %v13576_v21 = vadd.f32 %v4333_v38, %v13281_v8  ;;  %v4336_v31 = vadd.f32 %v4335_v16, %v4046_v11  ;;  %v18387_v27 = vld [vmem:[#allocation69_spill] sm:$0xff] }
 0x2bb   :  { %18382 = vst [vmem:[#allocation17_spill] sm:$0xff] %v13572_v22  ;;  %v13579_v3 = vadd.f32 %v4344_v62, %v13285_v51 }
 0x2bc   :  { %18384 = vst [vmem:[#allocation51_spill] sm:$0xff] %v13576_v21  ;;  %v4067_v18 = vpop.f32.mrb[204].mxu1  ;;  %v13582_v56 = vadd.f32 %v4336_v31, %v13289_v37 }
 0x2bd   :  { %18385 = vst [vmem:[#allocation111_spill] sm:$0xff] %v13579_v3  ;;  %v4069_v25 = vpop.f32.mrb[205].mxu1 }
 0x2be   :  { %18386 = vst [vmem:[#allocation50_spill] sm:$0xff] %v13582_v56  ;;  %v4070_v35 = vpop.f32.mrb[206].mxu1  ;;  %v10905_v20 = vpop.f32.mrb[196].mxu0 }
 0x2bf   :  { %v4072_v0 = vpop.f32.mrb[207].mxu1  ;;  %v4357_v30 = vadd.f32 %v10905_v20, %v4067_v18  ;;  %v4348_v54 = vpop.f32.mrb[197].mxu0 }
 0x2c0   :  { %v4349_v58 = vadd.f32 %v4348_v54, %v4059_v45  ;;  %v10906_v61 = vpop.f32.mrb[198].mxu0 }
 0x2c1   :  { %4282 = vmatmul.mubr.bf16.gmra.mrb[56].mxu1 %v18387_v27  ;;  %v13586_v8 = vadd.f32 %v4357_v30, %v13300_v46  ;;  %v4360_v11 = vadd.f32 %v10906_v61, %v4070_v35  ;;  %v4351_v51 = vpop.f32.mrb[199].mxu0  ;;  %v18393_v30 = vld [vmem:[#allocation25_spill] sm:$0xff] }
 0x2c2   :  { %4289 = vmatprep.mubr.bf16.mxu1 %v18276_v57  ;;  %v13590_v37 = vadd.f32 %v4349_v58, %v13303_v13  ;;  %v4352_v38 = vadd.f32 %v4351_v51, %v4062_v23  ;;  %v18395_v51 = vld [vmem:[#allocation24_spill] sm:$0xff] }
 0x2c3   :  { %18388 = vst [vmem:[#allocation29_spill] sm:$0xff] %v13586_v8  ;;  %v13593_v49 = vadd.f32 %v4360_v11, %v13307_v53 }
 0x2c4   :  { %18389 = vst [vmem:[#allocation23_spill] sm:$0xff] %v13590_v37  ;;  %v4075_v62 = vpop.f32.mrb[208].mxu1  ;;  %v13596_v45 = vadd.f32 %v4352_v38, %v13311_v5 }
 0x2c5   :  { %18390 = vst [vmem:[#allocation52_spill] sm:$0xff] %v13593_v49  ;;  %v4077_v16 = vpop.f32.mrb[209].mxu1 }
 0x2c6   :  { %18391 = vst [vmem:[#allocation53_spill] sm:$0xff] %v13596_v45  ;;  %v4078_v31 = vpop.f32.mrb[210].mxu1  ;;  %v10909_v18 = vpop.f32.mrb[200].mxu0 }
 0x2c7   :  { %v4080_v46 = vpop.f32.mrb[211].mxu1  ;;  %v4364_v25 = vpop.f32.mrb[201].mxu0 }
 0x2c8   :  { %v4365_v35 = vadd.f32 %v4364_v25, %v4075_v62  ;;  %v10910_v20 = vpop.f32.mrb[202].mxu0  ;;  %v18397_v25 = vld [vmem:[#allocation8_spill] sm:$0xff] }
 0x2c9   :  { %4290 = vmatmul.mubr.bf16.gmra.mrb[60].mxu1 %v18276_v57  ;;  %v4367_v0 = vpop.f32.mrb[203].mxu0 }
 0x2ca   :  { %v13600_v13 = vadd.f32 %v4365_v35, %v13325_v63  ;;  %v4368_v23 = vadd.f32 %v4367_v0, %v4078_v31  ;;  %v4721_v31 = vmul.f32 %v13582_v56, %v13582_v56  ;;  %v4720_v35 = vmul.f32 %v13576_v21, %v13576_v21 }
 0x2cb   :  { %v4651_v0 = vadd.f32 %v13582_v56, %v13576_v21  ;;  %v4726_v21 = vmul.f32 %v13586_v8, %v13586_v8 }
 0x2cc   :  { %18392 = vst [vmem:[#allocation20_spill] sm:$0xff] %v13600_v13  ;;  %v4083_v53 = vpop.f32.mrb[212].mxu1  ;;  %v13603_v54 = vadd.f32 %v4368_v23, %v18393_v30  ;;  %v4784_v30 = vadd.f32 %v4721_v31, %v4720_v35  ;;  %v4723_v31 = vmul.f32 %v13579_v3, %v13579_v3 }
 0x2cd   :  { %v4085_v5 = vpop.f32.mrb[213].mxu1  ;;  %v4373_v58 = vadd.f32 %v10909_v18, %v4083_v53  ;;  %v4652_v10 = vadd.f32 %v4651_v0, %v13572_v22  ;;  %v4724_v0 = vmul.f32 %v13590_v37, %v13590_v37 }
 0x2ce   :  { %18394 = vst [vmem:[#allocation58_spill] sm:$0xff] %v13603_v54  ;;  %v4086_v61 = vpop.f32.mrb[214].mxu1  ;;  %v10913_v27 = vpop.f32.mrb[204].mxu0 }
 0x2cf   :  { %v4088_v11 = vpop.f32.mrb[215].mxu1  ;;  %v13606_v38 = vadd.f32 %v4373_v58, %v18395_v51  ;;  %v4376_v62 = vadd.f32 %v10910_v20, %v4086_v61  ;;  %v4380_v16 = vpop.f32.mrb[205].mxu0 }
 0x2d0   :  { %v10914_v46 = vpop.f32.mrb[206].mxu0 }
 0x2d1   :  { %18396 = vst [vmem:[#allocation113_spill] sm:$0xff] %v13606_v38  ;;  %v13609_v60 = vadd.f32 %v4376_v62, %v18397_v25  ;;  %v4383_v63 = vpop.f32.mrb[207].mxu0  ;;  %v4722_v62 = vmul.f32 %v13572_v22, %v13572_v22 }
 0x2d3   :  { %18398 = vst [vmem:[#allocation59_spill] sm:$0xff] %v13609_v60 }
 0x2d4   :  { %v4091_v18 = vpop.f32.mrb[216].mxu1 }
 0x2d5   :  { %v4093_v23 = vpop.f32.mrb[217].mxu1  ;;  %v4381_v53 = vadd.f32 %v4380_v16, %v4091_v18  ;;  %v4785_v16 = vadd.f32 %v4784_v30, %v4722_v62  ;;  %v18401_v30 = vld [vmem:[#allocation9_spill] sm:$0xff] }
 0x2d6   :  { %v4094_v20 = vpop.f32.mrb[218].mxu1  ;;  %v10917_v5 = vpop.f32.mrb[208].mxu0 }
 0x2d7   :  { %v4096_v58 = vpop.f32.mrb[219].mxu1  ;;  %v13618_v61 = vadd.f32 %v4381_v53, %v13347_v41  ;;  %v4384_v11 = vadd.f32 %v4383_v63, %v4094_v20  ;;  %v4396_v51 = vpop.f32.mrb[209].mxu0  ;;  %v4653_v41 = vadd.f32 %v4652_v10, %v13579_v3  ;;  %v11279_v53 = vld [vmem:[%s17653_s2 + $0x140] sm:$0xff]   ;;  %v4786_v20 = vadd.f32 %v4785_v16, %v4723_v31 }
 0x2d8   :  { %v10918_v25 = vpop.f32.mrb[210].mxu0  ;;  %10963 = vmatprep.subr.bf16.mxu1 %v11279_v53  ;;  %v4725_v3 = vmul.f32 %v13596_v45, %v13596_v45 }
 0x2d9   :  { %18399 = vst [vmem:[#allocation37_spill] sm:$0xff] %v13618_v61  ;;  %v13624_v32 = vadd.f32 %v4384_v11, %v13355_v29  ;;  %v4399_v23 = vpop.f32.mrb[211].mxu0  ;;  %10964 = vmatpush3.bf16.msra.mxu1 %v11279_v53 }
 0x2db   :  { %18400 = vst [vmem:[#allocation27_spill] sm:$0xff] %v13624_v32 }
 0x2dc   :  { %v4099_v35 = vpop.f32.mrb[220].mxu1 }
 0x2dd   :  { %v4389_v18 = vadd.f32 %v10913_v27, %v4099_v35  ;;  %v4101_v63 = vpop.f32.mrb[221].mxu1  ;;  %v4654_v27 = vadd.f32 %v4653_v41, %v13590_v37  ;;  %v18403_v35 = vld [vmem:[#allocation10_spill] sm:$0xff] }
 0x2de   :  { %v4102_v29 = vpop.f32.mrb[222].mxu1  ;;  %v13634_v58 = vpop.f32.mrb[212].mxu0  ;;  %v4787_v63 = vadd.f32 %v4786_v20, %v4724_v0 }
 0x2df   :  { %v13637_v11 = vadd.f32 %v4389_v18, %v18401_v30  ;;  %v4392_v62 = vadd.f32 %v10914_v46, %v4102_v29  ;;  %v4104_v22 = vpop.f32.mrb[223].mxu1  ;;  %v4412_v56 = vpop.f32.mrb[213].mxu0  ;;  %v11280_v46 = vld [vmem:[%s17653_s2 + $0xc0] sm:$0xff]   ;;  %v4655_v18 = vadd.f32 %v4654_v27, %v13596_v45 }
 0x2e0   :  { %v13639_v10 = vpop.f32.mrb[214].mxu0  ;;  %7309 = vmatpush1.bf16.msra.mxu0 %v11280_v46  ;;  %v4788_v53 = vadd.f32 %v4787_v63, %v4725_v3 }
 0x2e1   :  { %18402 = vst [vmem:[#allocation60_spill] sm:$0xff] %v13637_v11  ;;  %v13643_v16 = vadd.f32 %v4392_v62, %v18403_v35  ;;  %v4415_v31 = vpop.f32.mrb[215].mxu0  ;;  %7310 = vmatprep.subr.bf16.mxu0 %v18276_v57 }
 0x2e2   :  { %v4789_v46 = vadd.f32 %v4788_v53, %v4726_v21 }
 0x2e3   :  { %18404 = vst [vmem:[#allocation114_spill] sm:$0xff] %v13643_v16 }
 0x2e4   :  { %v4107_v22 = vpop.f32.mrb[224].mxu1 }
 0x2e5   :  { %v4397_v29 = vadd.f32 %v4396_v51, %v4107_v22  ;;  %v4109_v30 = vpop.f32.mrb[225].mxu1  ;;  %v4656_v51 = vadd.f32 %v4655_v18, %v13586_v8 }
 0x2e6   :  { %v4110_v41 = vpop.f32.mrb[226].mxu1  ;;  %v13651_v37 = vpop.f32.mrb[216].mxu0 }
 0x2e7   :  { %v13655_v20 = vadd.f32 %v4397_v29, %v13369_v26  ;;  %v4400_v0 = vadd.f32 %v4399_v23, %v4110_v41  ;;  %v4112_v62 = vpop.f32.mrb[227].mxu1  ;;  %v13657_v35 = vpop.f32.mrb[217].mxu0  ;;  %v11281_v26 = vld [vmem:[%s17653_s2 + $0xc8] sm:$0xff]   ;;  %v4727_v23 = vmul.f32 %v13593_v49, %v13593_v49  ;;  %v4657_v29 = vadd.f32 %v4656_v51, %v13593_v49 }
 0x2e8   :  { %v13661_v27 = vpop.f32.mrb[218].mxu0  ;;  %7311 = vmatpush1.bf16.msra.mxu0 %v11281_v26  ;;  %v4730_v49 = vmul.f32 %v13606_v38, %v13606_v38 }
 0x2e9   :  { %18405 = vst [vmem:[#allocation61_spill] sm:$0xff] %v13655_v20  ;;  %v13665_v3 = vadd.f32 %v4400_v0, %v13377_v52  ;;  %v13667_v63 = vpop.f32.mrb[219].mxu0  ;;  %v4790_v18 = vadd.f32 %v4789_v46, %v4727_v23  ;;  %v4728_v52 = vmul.f32 %v13600_v13, %v13600_v13  ;;  %7312 = vmatprep.subr.bf16.mxu0 %v18276_v57 }
 0x2eb   :  { %v4791_v23 = vadd.f32 %v4790_v18, %v4728_v52 }
 0x2ec   :  { %v4115_v22 = vpop.f32.mrb[228].mxu1 }
 0x2ed   :  { %v4405_v30 = vadd.f32 %v10917_v5, %v4115_v22  ;;  %v4117_v41 = vpop.f32.mrb[229].mxu1  ;;  %v4658_v5 = vadd.f32 %v4657_v29, %v13600_v13  ;;  %v4729_v22 = vmul.f32 %v13603_v54, %v13603_v54 }
 0x2ee   :  { %v4118_v0 = vpop.f32.mrb[230].mxu1  ;;  %v13677_v62 = vpop.f32.mrb[220].mxu0 }
 0x2ef   :  { %v13681_v21 = vadd.f32 %v4405_v30, %v13366_v43  ;;  %v4408_v53 = vadd.f32 %v10918_v25, %v4118_v0  ;;  %v4120_v8 = vpop.f32.mrb[231].mxu1  ;;  %v13683_v45 = vpop.f32.mrb[221].mxu0  ;;  %v11282_v43 = vld [vmem:[%s17653_s2 + $0xd0] sm:$0xff]   ;;  %v4659_v25 = vadd.f32 %v4658_v5, %v13603_v54  ;;  %v4792_v29 = vadd.f32 %v4791_v23, %v4729_v22 }
 0x2f0   :  { %v13685_v51 = vpop.f32.mrb[222].mxu0  ;;  %7313 = vmatpush1.bf16.msra.mxu0 %v11282_v43 }
 0x2f1   :  { %18406 = vst [vmem:[#allocation40_spill] sm:$0xff] %v13681_v21  ;;  %v13689_v46 = vadd.f32 %v4408_v53, %v13373_v24  ;;  %v13691_v26 = vpop.f32.mrb[223].mxu0  ;;  %7314 = vmatprep.subr.bf16.mxu0 %v18276_v57  ;;  %v4793_v43 = vadd.f32 %v4792_v29, %v4730_v49  ;;  %v4732_v49 = vmul.f32 %v13618_v61, %v13618_v61 }
 0x2f3   :  { %18407 = vst [vmem:[#allocation43_spill] sm:$0xff] %v13689_v46 }
 0x2f4   :  { %v4123_v8 = vpop.f32.mrb[232].mxu1 }
 0x2f5   :  { %v4413_v30 = vadd.f32 %v4412_v56, %v4123_v8  ;;  %v4125_v41 = vpop.f32.mrb[233].mxu1  ;;  %v4660_v56 = vadd.f32 %v4659_v25, %v13606_v38 }
 0x2f6   :  { %v4126_v0 = vpop.f32.mrb[234].mxu1  ;;  %v13699_v24 = vpop.f32.mrb[224].mxu0 }
 0x2f7   :  { %v13703_v18 = vadd.f32 %v4413_v30, %v13390_v19  ;;  %v4416_v52 = vadd.f32 %v4415_v31, %v4126_v0  ;;  %v4128_v53 = vpop.f32.mrb[235].mxu1  ;;  %v13705_v13 = vpop.f32.mrb[225].mxu0  ;;  %v11283_v19 = vld [vmem:[%s17653_s2 + $0xd8] sm:$0xff]   ;;  %v4731_v31 = vmul.f32 %v13609_v60, %v13609_v60  ;;  %v4661_v30 = vadd.f32 %v4660_v56, %v13609_v60 }
 0x2f8   :  { %v13709_v5 = vpop.f32.mrb[226].mxu0  ;;  %7315 = vmatpush1.bf16.msra.mxu0 %v11283_v19 }
 0x2f9   :  { %18408 = vst [vmem:[#allocation26_spill] sm:$0xff] %v13703_v18  ;;  %v13713_v23 = vadd.f32 %v4416_v52, %v13398_v12  ;;  %v13715_v22 = vpop.f32.mrb[227].mxu0  ;;  %v11284_v12 = vld [vmem:[%s17653_s2 + $0x148] sm:$0xff]   ;;  %v4794_v25 = vadd.f32 %v4793_v43, %v4731_v31  ;;  %7316 = vmatprep.subr.bf16.mxu0 %v18276_v57  ;;  %v4662_v43 = vadd.f32 %v4661_v30, %v13618_v61 }
 0x2fa   :  { %10965 = vmatprep.subr.bf16.mxu1 %v11284_v12 }
 0x2fb   :  { %18409 = vst [vmem:[#allocation64_spill] sm:$0xff] %v13713_v23  ;;  %10966 = vmatpush3.bf16.msra.mxu1 %v11284_v12  ;;  %v4795_v60 = vadd.f32 %v4794_v25, %v4732_v49 }
 0x2fc   :  { %v4131_v8 = vpop.f32.mrb[236].mxu1 }
 0x2fd   :  { %v4421_v41 = vadd.f32 %v13634_v58, %v4131_v8  ;;  %v4133_v0 = vpop.f32.mrb[237].mxu1 }
 0x2fe   :  { %v4134_v29 = vpop.f32.mrb[238].mxu1  ;;  %v13729_v52 = vpop.f32.mrb[228].mxu0 }
 0x2ff   :  { %v13733_v53 = vadd.f32 %v4421_v41, %v13387_v36  ;;  %v4424_v58 = vadd.f32 %v13639_v10, %v4134_v29  ;;  %v4136_v56 = vpop.f32.mrb[239].mxu1  ;;  %v13736_v19 = vpop.f32.mrb[229].mxu0  ;;  %v4733_v36 = vmul.f32 %v13624_v32, %v13624_v32  ;;  %v11285_v10 = vld [vmem:[%s17653_s2 + $0xe0] sm:$0xff]   ;;  %v4663_v29 = vadd.f32 %v4662_v43, %v13624_v32 }
 0x300   :  { %v13738_v8 = vpop.f32.mrb[230].mxu0  ;;  %7317 = vmatpush1.bf16.msra.mxu0 %v11285_v10  ;;  %v4734_v43 = vmul.f32 %v13637_v11, %v13637_v11 }
 0x301   :  { %18410 = vst [vmem:[#allocation28_spill] sm:$0xff] %v13733_v53  ;;  %v13742_v31 = vadd.f32 %v4424_v58, %v13394_v47  ;;  %v13744_v0 = vpop.f32.mrb[231].mxu0  ;;  %v4796_v30 = vadd.f32 %v4795_v60, %v4733_v36  ;;  %7318 = vmatprep.subr.bf16.mxu0 %v18276_v57  ;;  %v4664_v60 = vadd.f32 %v4663_v29, %v13637_v11 }
 0x303   :  { %18411 = vst [vmem:[#allocation65_spill] sm:$0xff] %v13742_v31 }
 0x304   :  { %v4139_v41 = vpop.f32.mrb[240].mxu1 }
 0x305   :  { %v4429_v12 = vadd.f32 %v13657_v35, %v4139_v41  ;;  %v4141_v56 = vpop.f32.mrb[241].mxu1  ;;  %v4797_v41 = vadd.f32 %v4796_v30, %v4734_v43 }
 0x306   :  { %v4142_v47 = vpop.f32.mrb[242].mxu1  ;;  %v13753_v58 = vpop.f32.mrb[232].mxu0 }
 0x307   :  { %v13757_v25 = vadd.f32 %v4429_v12, %v13410_v15  ;;  %v4432_v49 = vadd.f32 %v13667_v63, %v4142_v47  ;;  %v4144_v61 = vpop.f32.mrb[243].mxu1  ;;  %v13760_v38 = vpop.f32.mrb[233].mxu0  ;;  %v11286_v15 = vld [vmem:[%s17653_s2 + $0xe8] sm:$0xff]   ;;  %v4665_v12 = vadd.f32 %v4664_v60, %v13643_v16 }
 0x308   :  { %v13764_v35 = vpop.f32.mrb[234].mxu0  ;;  %v4735_v61 = vmul.f32 %v13643_v16, %v13643_v16  ;;  %7319 = vmatpush1.bf16.msra.mxu0 %v11286_v15 }
 0x309   :  { %18412 = vst [vmem:[#allocation46_spill] sm:$0xff] %v13757_v25  ;;  %v13768_v36 = vadd.f32 %v4432_v49, %v13418_v40  ;;  %v13770_v10 = vpop.f32.mrb[235].mxu0  ;;  %v4736_v40 = vmul.f32 %v13655_v20, %v13655_v20  ;;  %7320 = vmatprep.subr.bf16.mxu0 %v18276_v57 }
 0x30a   :  { %v4798_v29 = vadd.f32 %v4797_v41, %v4735_v61  ;;  %v4666_v41 = vadd.f32 %v4665_v12, %v13655_v20 }
 0x30b   :  { %18413 = vst [vmem:[#allocation47_spill] sm:$0xff] %v13768_v36 }
 0x30c   :  { %v4147_v63 = vpop.f32.mrb[244].mxu1 }
 0x30d   :  { %v4437_v56 = vadd.f32 %v13651_v37, %v4147_v63  ;;  %v4149_v47 = vpop.f32.mrb[245].mxu1  ;;  %v4799_v63 = vadd.f32 %v4798_v29, %v4736_v40 }
 0x30e   :  { %v4150_v49 = vpop.f32.mrb[246].mxu1  ;;  %v13781_v30 = vpop.f32.mrb[236].mxu0  ;;  %v4737_v47 = vmul.f32 %v13665_v3, %v13665_v3 }
 0x30f   :  { %v13785_v43 = vadd.f32 %v4437_v56, %v13407_v17  ;;  %v4440_v11 = vadd.f32 %v13661_v27, %v4150_v49  ;;  %v4152_v32 = vpop.f32.mrb[247].mxu1  ;;  %v13788_v60 = vpop.f32.mrb[237].mxu0  ;;  %v11287_v17 = vld [vmem:[%s17653_s2 + $0xf0] sm:$0xff]   ;;  %v4667_v56 = vadd.f32 %v4666_v41, %v13665_v3 }
 0x310   :  { %v13790_v37 = vpop.f32.mrb[238].mxu0  ;;  %v4738_v32 = vmul.f32 %v13681_v21, %v13681_v21  ;;  %7321 = vmatpush1.bf16.msra.mxu0 %v11287_v17 }
 0x311   :  { %18414 = vst [vmem:[#allocation36_spill] sm:$0xff] %v13785_v43  ;;  %v13794_v15 = vadd.f32 %v4440_v11, %v13414_v2  ;;  %v13796_v61 = vpop.f32.mrb[239].mxu0  ;;  %v4800_v11 = vadd.f32 %v4799_v63, %v4737_v47  ;;  %7322 = vmatprep.subr.bf16.mxu0 %v18276_v57  ;;  %v4668_v40 = vadd.f32 %v4667_v56, %v13681_v21 }
 0x313   :  { %v4801_v41 = vadd.f32 %v4800_v11, %v4738_v32  ;;  %v4741_v11 = vmul.f32 %v13713_v23, %v13713_v23 }
 0x314   :  { %v4155_v27 = vpop.f32.mrb[248].mxu1 }
 0x315   :  { %v4445_v12 = vadd.f32 %v13683_v45, %v4155_v27  ;;  %v4157_v2 = vpop.f32.mrb[249].mxu1  ;;  %v4739_v45 = vmul.f32 %v13689_v46, %v13689_v46  ;;  %v4669_v27 = vadd.f32 %v4668_v40, %v13689_v46 }
 0x316   :  { %v4158_v49 = vpop.f32.mrb[250].mxu1  ;;  %v13807_v29 = vpop.f32.mrb[240].mxu0 }
 0x317   :  { %v13812_v20 = vadd.f32 %v4445_v12, %v13430_v6  ;;  %v4448_v16 = vadd.f32 %v13691_v26, %v4158_v49  ;;  %v4160_v54 = vpop.f32.mrb[251].mxu1  ;;  %v13815_v48 = vpop.f32.mrb[241].mxu0  ;;  %v4740_v6 = vmul.f32 %v13703_v18, %v13703_v18  ;;  %v4802_v26 = vadd.f32 %v4801_v41, %v4739_v45 }
 0x318   :  { %v13819_v63 = vpop.f32.mrb[242].mxu0  ;;  %v11288_v54 = vld [vmem:[%s17653_s2 + $0xf8] sm:$0xff]   ;;  %v4670_v56 = vadd.f32 %v4669_v27, %v13703_v18 }
 0x319   :  { %v13822_v47 = vadd.f32 %v4448_v16, %v13438_v39  ;;  %v13824_v17 = vpop.f32.mrb[243].mxu0  ;;  %7323 = vmatpush1.bf16.msra.mxu0 %v11288_v54  ;;  %v11289_v39 = vld [vmem:[%s17653_s2 + $0x150] sm:$0xff]   ;;  %v4803_v16 = vadd.f32 %v4802_v26, %v4740_v6  ;;  %v4742_v6 = vmul.f32 %v13733_v53, %v13733_v53 }
 0x31a   :  { %7324 = vmatprep.subr.bf16.mxu0 %v18276_v57  ;;  %10967 = vmatprep.subr.bf16.mxu1 %v11289_v39  ;;  %v4671_v26 = vadd.f32 %v4670_v56, %v13713_v23 }
 0x31b   :  { %10968 = vmatpush3.bf16.msra.mxu1 %v11289_v39 }
 0x31c   :  { %v4163_v32 = vpop.f32.mrb[252].mxu1 }
 0x31d   :  { %v4453_v12 = vadd.f32 %v13677_v62, %v4163_v32  ;;  %v4165_v2 = vpop.f32.mrb[253].mxu1 }
 0x31e   :  { %v4166_v49 = vpop.f32.mrb[254].mxu1  ;;  %v13839_v40 = vpop.f32.mrb[244].mxu0 }
 0x31f   :  { %v13843_v41 = vadd.f32 %v4453_v12, %v13427_v33  ;;  %v4456_v62 = vadd.f32 %v13685_v51, %v4166_v49  ;;  %v4168_v45 = vpop.f32.mrb[255].mxu1  ;;  %v13846_v27 = vpop.f32.mrb[245].mxu0  ;;  %v4804_v33 = vadd.f32 %v4803_v16, %v4741_v11  ;;  %v4672_v51 = vadd.f32 %v4671_v26, %v13733_v53  ;;  %v11290_v12 = vld [vmem:[%s17653_s2 + $0x100] sm:$0xff]  }
 0x320   :  { %v13850_v54 = vpop.f32.mrb[246].mxu0  ;;  %v4743_v45 = vmul.f32 %v13742_v31, %v13742_v31  ;;  %7325 = vmatpush1.bf16.msra.mxu0 %v11290_v12 }
 0x321   :  { %v13854_v32 = vadd.f32 %v4456_v62, %v13434_v34  ;;  %v13856_v2 = vpop.f32.mrb[247].mxu0  ;;  %v4805_v49 = vadd.f32 %v4804_v33, %v4742_v6  ;;  %v4744_v34 = vmul.f32 %v13757_v25, %v13757_v25  ;;  %7326 = vmatprep.subr.bf16.mxu0 %v18276_v57  ;;  %v4673_v11 = vadd.f32 %v4672_v51, %v13742_v31 }
 0x323   :  { %v4674_v12 = vadd.f32 %v4673_v11, %v13757_v25 }
 0x324   :  { %v4171_v18 = vpop.f32.mrb[0].mxu1 }
 0x325   :  { %v4461_v39 = vadd.f32 %v13705_v13, %v4171_v18  ;;  %v4173_v56 = vpop.f32.mrb[1].mxu1  ;;  %v4806_v13 = vadd.f32 %v4805_v49, %v4743_v45 }
 0x326   :  { %v4174_v62 = vpop.f32.mrb[2].mxu1  ;;  %v13867_v16 = vpop.f32.mrb[248].mxu0 }
 0x327   :  { %v13872_v6 = vadd.f32 %v4461_v39, %v13450_v44  ;;  %v4464_v26 = vadd.f32 %v13715_v22, %v4174_v62  ;;  %v4176_v33 = vpop.f32.mrb[3].mxu1  ;;  %v13875_v53 = vpop.f32.mrb[249].mxu0  ;;  %v4807_v46 = vadd.f32 %v4806_v13, %v4744_v34  ;;  %v4745_v44 = vmul.f32 %v13768_v36, %v13768_v36 }
 0x328   :  { %v13877_v18 = vpop.f32.mrb[250].mxu0  ;;  %v4746_v22 = vmul.f32 %v13785_v43, %v13785_v43  ;;  %v4675_v39 = vadd.f32 %v4674_v12, %v13768_v36  ;;  %v4747_v12 = vmul.f32 %v13794_v15, %v13794_v15 }
 0x329   :  { %v13881_v56 = vadd.f32 %v4464_v26, %v13458_v9  ;;  %v13883_v23 = vpop.f32.mrb[251].mxu0  ;;  %v4808_v62 = vadd.f32 %v4807_v46, %v4745_v44 }
 0x32a   :  { %v4676_v9 = vadd.f32 %v4675_v39, %v13785_v43 }
 0x32b   :  { %v4809_v31 = vadd.f32 %v4808_v62, %v4746_v22 }
 0x32c   :  { %v4179_v51 = vpop.f32.mrb[4].mxu1 }
 0x32d   :  { %v4469_v49 = vadd.f32 %v13699_v24, %v4179_v51  ;;  %v4181_v45 = vpop.f32.mrb[5].mxu1  ;;  %v4677_v51 = vadd.f32 %v4676_v9, %v13794_v15 }
 0x32e   :  { %v4182_v11 = vpop.f32.mrb[6].mxu1  ;;  %v13891_v33 = vpop.f32.mrb[252].mxu0 }
 0x32f   :  { %v13895_v34 = vadd.f32 %v4469_v49, %v13447_v4  ;;  %v4472_v26 = vadd.f32 %v13709_v5, %v4182_v11  ;;  %v4184_v13 = vpop.f32.mrb[7].mxu1  ;;  %v13898_v25 = vpop.f32.mrb[253].mxu0  ;;  %v4748_v4 = vmul.f32 %v13812_v20, %v13812_v20  ;;  %v4810_v5 = vadd.f32 %v4809_v31, %v4747_v12 }
 0x330   :  { %v13902_v24 = vpop.f32.mrb[254].mxu0  ;;  %v4678_v49 = vadd.f32 %v4677_v51, %v13812_v20  ;;  %v4749_v11 = vmul.f32 %v13822_v47, %v13822_v47  ;;  %v4750_v31 = vmul.f32 %v13843_v41, %v13843_v41 }
 0x331   :  { %v13905_v46 = vadd.f32 %v4472_v26, %v13454_v7  ;;  %v13907_v44 = vpop.f32.mrb[255].mxu0  ;;  %v4811_v62 = vadd.f32 %v4810_v5, %v4748_v4  ;;  %v18415_v26 = vld [vmem:[#allocation31_spill] sm:$0xff]  ;;  %v4751_v5 = vmul.f32 %v13854_v32, %v13854_v32 }
 0x332   :  { %v4679_v9 = vadd.f32 %v4678_v49, %v13822_v47 }
 0x334   :  { %v4187_v39 = vpop.f32.mrb[8].mxu1  ;;  %v4680_v4 = vadd.f32 %v4679_v9, %v13843_v41 }
 0x335   :  { %v4477_v22 = vadd.f32 %v13736_v19, %v4187_v39  ;;  %v4189_v45 = vpop.f32.mrb[9].mxu1  ;;  %v4812_v19 = vadd.f32 %v4811_v62, %v4749_v11 }
 0x336   :  { %v4190_v7 = vpop.f32.mrb[10].mxu1  ;;  %v4681_v49 = vadd.f32 %v4680_v4, %v13854_v32 }
 0x337   :  { %v13917_v13 = vadd.f32 %v4477_v22, %v18415_v26  ;;  %v4480_v43 = vadd.f32 %v13744_v0, %v4190_v7  ;;  %v4192_v36 = vpop.f32.mrb[11].mxu1  ;;  %v4813_v51 = vadd.f32 %v4812_v19, %v4750_v31  ;;  %v18416_v7 = vld [vmem:[#allocation106_spill] sm:$0xff]  ;;  %v4753_v19 = vmul.f32 %v13881_v56, %v13881_v56 }
 0x338   :  { %v4752_v36 = vmul.f32 %v13872_v6, %v13872_v6  ;;  %v4682_v26 = vadd.f32 %v4681_v49, %v13872_v6  ;;  %v18417_v31 = vld [vmem:[#allocation30_spill] sm:$0xff]  ;;  %v18418_v49 = vld [vmem:[#allocation12_spill] sm:$0xff] }
 0x339   :  { %v13924_v12 = vadd.f32 %v4480_v43, %v13478_v28  ;;  %v4814_v11 = vadd.f32 %v4813_v51, %v4751_v5 }
 0x33c   :  { %v4195_v39 = vpop.f32.mrb[12].mxu1 }
 0x33d   :  { %v4485_v22 = vadd.f32 %v13729_v52, %v4195_v39  ;;  %v4197_v0 = vpop.f32.mrb[13].mxu1  ;;  %v4815_v52 = vadd.f32 %v4814_v11, %v4752_v36  ;;  %v4754_v39 = vmul.f32 %v13895_v34, %v13895_v34  ;;  %v4755_v11 = vmul.f32 %v13905_v46, %v13905_v46 }
 0x33e   :  { %v4198_v45 = vpop.f32.mrb[14].mxu1 }
 0x33f   :  { %v13934_v28 = vadd.f32 %v4485_v22, %v18416_v7  ;;  %v4488_v43 = vadd.f32 %v13738_v8, %v4198_v45  ;;  %v4200_v62 = vpop.f32.mrb[15].mxu1  ;;  %v4683_v22 = vadd.f32 %v4682_v26, %v13881_v56  ;;  %v4816_v45 = vadd.f32 %v4815_v52, %v4753_v19 }
 0x341   :  { %v13939_v9 = vadd.f32 %v4488_v43, %v18417_v31  ;;  %v4684_v5 = vadd.f32 %v4683_v22, %v13895_v34  ;;  %v4817_v62 = vadd.f32 %v4816_v45, %v4754_v39  ;;  %v4757_v39 = vmul.f32 %v13924_v12, %v13924_v12  ;;  %v18419_v45 = vld [vmem:[#allocation11_spill] sm:$0xff] }
 0x343   :  { %v4685_v26 = vadd.f32 %v4684_v5, %v13905_v46  ;;  %v4818_v52 = vadd.f32 %v4817_v62, %v4755_v11  ;;  %v4758_v5 = vmul.f32 %v13934_v28, %v13934_v28 }
 0x344   :  { %v4203_v4 = vpop.f32.mrb[16].mxu1 }
 0x345   :  { %v4493_v0 = vadd.f32 %v13760_v38, %v4203_v4  ;;  %v4205_v8 = vpop.f32.mrb[17].mxu1  ;;  %v4756_v38 = vmul.f32 %v13917_v13, %v13917_v13  ;;  %v4686_v4 = vadd.f32 %v4685_v26, %v13917_v13  ;;  %v4759_v26 = vmul.f32 %v13939_v9, %v13939_v9 }
 0x346   :  { %v4206_v51 = vpop.f32.mrb[18].mxu1 }
 0x347   :  { %v13949_v7 = vadd.f32 %v4493_v0, %v18418_v49  ;;  %v4496_v36 = vadd.f32 %v13770_v10, %v4206_v51  ;;  %v4208_v43 = vpop.f32.mrb[19].mxu1  ;;  %v4819_v0 = vadd.f32 %v4818_v52, %v4756_v38 }
 0x348   :  { %v18420_v43 = vld [vmem:[#allocation107_spill] sm:$0xff] }
 0x349   :  { %v13955_v31 = vadd.f32 %v4496_v36, %v13498_v59  ;;  %v4687_v36 = vadd.f32 %v4686_v4, %v13924_v12 }
 0x34b   :  { %v4688_v11 = vadd.f32 %v4687_v36, %v13934_v28 }
 0x34c   :  { %v4211_v19 = vpop.f32.mrb[20].mxu1 }
 0x34d   :  { %v4501_v22 = vadd.f32 %v13753_v58, %v4211_v19  ;;  %v4213_v10 = vpop.f32.mrb[21].mxu1  ;;  %v4820_v58 = vadd.f32 %v4819_v0, %v4757_v39  ;;  %v4689_v4 = vadd.f32 %v4688_v11, %v13939_v9 }
 0x34e   :  { %v4214_v8 = vpop.f32.mrb[22].mxu1 }
 0x34f   :  { %v13965_v59 = vadd.f32 %v4501_v22, %v18419_v45  ;;  %v4504_v51 = vadd.f32 %v13764_v35, %v4214_v8  ;;  %v4216_v49 = vpop.f32.mrb[23].mxu1  ;;  %v4821_v38 = vadd.f32 %v4820_v58, %v4758_v5  ;;  %v4760_v22 = vmul.f32 %v13949_v7, %v13949_v7 }
 0x350   :  { %v4761_v5 = vmul.f32 %v13955_v31, %v13955_v31 }
 0x351   :  { %v13972_v62 = vadd.f32 %v4504_v51, %v18420_v43  ;;  %v4822_v45 = vadd.f32 %v4821_v38, %v4759_v26  ;;  %v4690_v51 = vadd.f32 %v4689_v4, %v13949_v7  ;;  %v4762_v36 = vmul.f32 %v13965_v59, %v13965_v59  ;;  %v18422_v4 = vld [vmem:[#allocation108_spill] sm:$0xff] }
 0x354   :  { %v4219_v52 = vpop.f32.mrb[24].mxu1 }
 0x355   :  { %v4509_v19 = vadd.f32 %v13788_v60, %v4219_v52  ;;  %v4221_v35 = vpop.f32.mrb[25].mxu1  ;;  %v4823_v60 = vadd.f32 %v4822_v45, %v4760_v22  ;;  %v18421_v52 = vld [vmem:[#allocation33_spill] sm:$0xff] }
 0x356   :  { %v4222_v10 = vpop.f32.mrb[26].mxu1 }
 0x357   :  { %v13982_v8 = vadd.f32 %v4509_v19, %v13506_v55  ;;  %v4512_v0 = vadd.f32 %v13796_v61, %v4222_v10  ;;  %v4224_v39 = vpop.f32.mrb[27].mxu1  ;;  %v4691_v55 = vadd.f32 %v4690_v51, %v13955_v31  ;;  %v4824_v11 = vadd.f32 %v4823_v60, %v4761_v5 }
 0x358   :  { %v4763_v10 = vmul.f32 %v13972_v62, %v13972_v62 }
 0x359   :  { %v13987_v49 = vadd.f32 %v4512_v0, %v13514_v50  ;;  %v4692_v26 = vadd.f32 %v4691_v55, %v13965_v59  ;;  %v4825_v22 = vadd.f32 %v4824_v11, %v4762_v36 }
 0x35b   :  { %v4693_v39 = vadd.f32 %v4692_v26, %v13972_v62  ;;  %v4826_v45 = vadd.f32 %v4825_v22, %v4763_v10  ;;  %v4765_v36 = vmul.f32 %v13987_v49, %v13987_v49  ;;  %v11291_v26 = vld [vmem:[%s17653_s2 + $0x108] sm:$0xff]   ;;  %v11292_v10 = vld [vmem:[%s17653_s2 + $0x110] sm:$0xff]  }
 0x35c   :  { %v4227_v43 = vpop.f32.mrb[28].mxu1  ;;  %7327 = vmatpush1.bf16.msra.mxu0 %v11291_v26 }
 0x35d   :  { %v4517_v58 = vadd.f32 %v13781_v30, %v4227_v43  ;;  %v4229_v61 = vpop.f32.mrb[29].mxu1  ;;  %v4764_v30 = vmul.f32 %v13982_v8, %v13982_v8  ;;  %v4694_v60 = vadd.f32 %v4693_v39, %v13982_v8  ;;  %7328 = vmatprep.subr.bf16.mxu0 %v18276_v57 }
 0x35e   :  { %v4230_v38 = vpop.f32.mrb[30].mxu1 }
 0x35f   :  { %v13997_v50 = vadd.f32 %v4517_v58, %v18421_v52  ;;  %v4520_v19 = vadd.f32 %v13790_v37, %v4230_v38  ;;  %v4232_v35 = vpop.f32.mrb[31].mxu1  ;;  %v4827_v43 = vadd.f32 %v4826_v45, %v4764_v30 }
 0x360   :  { %7329 = vmatpush1.bf16.msra.mxu0 %v11292_v10 }
 0x361   :  { %v14003_v0 = vadd.f32 %v4520_v19, %v18422_v4  ;;  %v4766_v38 = vmul.f32 %v13997_v50, %v13997_v50  ;;  %v4828_v19 = vadd.f32 %v4827_v43, %v4765_v36  ;;  %7330 = vmatprep.subr.bf16.mxu0 %v18276_v57  ;;  %v11294_v36 = vld [vmem:[%s17653_s2 + $0x158] sm:$0xff]  }
 0x362   :  { %10969 = vmatprep.subr.bf16.mxu1 %v11294_v36 }
 0x363   :  { %v4767_v35 = vmul.f32 %v14003_v0, %v14003_v0  ;;  %10970 = vmatpush3.bf16.msra.mxu1 %v11294_v36 }
 0x364   :  { %v4235_v51 = vpop.f32.mrb[32].mxu1 }
 0x365   :  { %v4525_v5 = vadd.f32 %v13815_v48, %v4235_v51  ;;  %v4237_v37 = vpop.f32.mrb[33].mxu1  ;;  %v4695_v48 = vadd.f32 %v4694_v60, %v13987_v49  ;;  %v18424_v51 = vld [vmem:[#allocation32_spill] sm:$0xff] }
 0x366   :  { %v4238_v55 = vpop.f32.mrb[34].mxu1 }
 0x367   :  { %v14013_v58 = vadd.f32 %v4525_v5, %v13522_v1  ;;  %v4528_v61 = vadd.f32 %v13824_v17, %v4238_v55  ;;  %v4240_v11 = vpop.f32.mrb[35].mxu1  ;;  %v4696_v1 = vadd.f32 %v4695_v48, %v13997_v50  ;;  %v4829_v17 = vadd.f32 %v4828_v19, %v4766_v38  ;;  %v11295_v19 = vld [vmem:[%s17653_s2 + $0x120] sm:$0xff]  }
 0x369   :  { %v14023_v52 = vadd.f32 %v4528_v61, %v13530_v14  ;;  %v4768_v14 = vmul.f32 %v14013_v58, %v14013_v58  ;;  %v4697_v45 = vadd.f32 %v4696_v1, %v14003_v0  ;;  %v4830_v43 = vadd.f32 %v4829_v17, %v4767_v35  ;;  %v18425_v61 = vld [vmem:[#allocation15_spill] sm:$0xff] }
 0x36a   :  { %v11298_v1 = vld [vmem:[%s17653_s2 + $0x160] sm:$0xff]  }
 0x36b   :  { %18423 = vst [vmem:[#allocation34_spill] sm:$0xff] %v14023_v52  ;;  %v4698_v55 = vadd.f32 %v4697_v45, %v14013_v58  ;;  %v4831_v38 = vadd.f32 %v4830_v43, %v4768_v14  ;;  %10971 = vmatprep.subr.bf16.mxu1 %v11298_v1  ;;  %v11299_v14 = vld [vmem:[%s17653_s2 + $0x168] sm:$0xff]   ;;  %v11301_v43 = vld [vmem:[%s17653_s2 + $0x170] sm:$0xff]  }
 0x36c   :  { %v4243_v22 = vpop.f32.mrb[36].mxu1  ;;  %10972 = vmatpush3.bf16.msra.mxu1 %v11298_v1 }
 0x36d   :  { %v4533_v4 = vadd.f32 %v13807_v29, %v4243_v22  ;;  %v4245_v30 = vpop.f32.mrb[37].mxu1  ;;  %v11293_v29 = vld [vmem:[%s17653_s2 + $0x118] sm:$0xff]   ;;  %v4699_v17 = vadd.f32 %v4698_v55, %v14023_v52  ;;  %10973 = vmatprep.subr.bf16.mxu1 %v11299_v14 }
 0x36e   :  { %v4246_v39 = vpop.f32.mrb[38].mxu1  ;;  %7331 = vmatpush1.bf16.msra.mxu0 %v11293_v29  ;;  %v11296_v30 = vld [vmem:[%s17653_s2 + $0x128] sm:$0xff]   ;;  %v18426_v29 = vld [vmem:[#allocation39_spill] sm:$0xff] }
 0x36f   :  { %v14037_v60 = vadd.f32 %v4533_v4, %v18424_v51  ;;  %v4536_v5 = vadd.f32 %v13819_v63, %v4246_v39  ;;  %v4248_v37 = vpop.f32.mrb[39].mxu1  ;;  %v4769_v63 = vmul.f32 %v14023_v52, %v14023_v52  ;;  %7332 = vmatprep.subr.bf16.mxu0 %v18276_v57 }
 0x370   :  { %10974 = vmatpush3.bf16.msra.mxu1 %v11299_v14 }
 0x371   :  { %v14049_v11 = vadd.f32 %v4536_v5, %v18425_v61  ;;  %v4770_v26 = vmul.f32 %v14037_v60, %v14037_v60  ;;  %v4832_v10 = vadd.f32 %v4831_v38, %v4769_v63  ;;  %v4700_v39 = vadd.f32 %v4699_v17, %v14037_v60  ;;  %10975 = vmatprep.subr.bf16.mxu1 %v11301_v43  ;;  %v11302_v63 = vld [vmem:[%s17653_s2 + $0x178] sm:$0xff]  }
 0x372   :  { %7333 = vmatpush1.bf16.msra.mxu0 %v11295_v19 }
 0x373   :  { %7334 = vmatprep.subr.bf16.mxu0 %v18276_v57  ;;  %v4833_v5 = vadd.f32 %v4832_v10, %v4770_v26  ;;  %v4771_v37 = vmul.f32 %v14049_v11, %v14049_v11  ;;  %v4701_v55 = vadd.f32 %v4700_v39, %v14049_v11  ;;  %v18427_v10 = vld [vmem:[#allocation38_spill] sm:$0xff] }
 0x374   :  { %v4251_v48 = vpop.f32.mrb[40].mxu1  ;;  %10976 = vmatpush3.bf16.msra.mxu1 %v11301_v43 }
 0x375   :  { %v4541_v35 = vadd.f32 %v13846_v27, %v4251_v48  ;;  %v4253_v22 = vpop.f32.mrb[41].mxu1  ;;  %v4834_v61 = vadd.f32 %v4833_v5, %v4771_v37  ;;  %10977 = vmatprep.subr.bf16.mxu1 %v11302_v63  ;;  %v14115_v5 = vld [vmem:[%s17653_s2 + $0x80] sm:$0xff]  }
 0x376   :  { %v4254_v4 = vpop.f32.mrb[42].mxu1  ;;  %7335 = vmatpush1.bf16.msra.mxu0 %v11296_v30  ;;  %18429 = vst [vmem:[#allocation66_spill] sm:$0xff] %v14115_v5 }
 0x377   :  { %v14072_v45 = vadd.f32 %v4541_v35, %v13538_v42  ;;  %v4544_v27 = vadd.f32 %v13856_v2, %v4254_v4  ;;  %v4256_v51 = vpop.f32.mrb[43].mxu1  ;;  %v11297_v2 = vld [vmem:[%s17653_s2 + $0x130] sm:$0xff]   ;;  %7336 = vmatprep.subr.bf16.mxu0 %v18276_v57  ;;  %v11300_v35 = vld [vmem:[%s17653_s2 + $0x138] sm:$0xff]  }
 0x378   :  { %10978 = vmatpush3.bf16.msra.mxu1 %v11302_v63 }
 0x379   :  { %v14082_v36 = vadd.f32 %v4544_v27, %v18426_v29  ;;  %v4772_v42 = vmul.f32 %v14072_v45, %v14072_v45  ;;  %v4702_v26 = vadd.f32 %v4701_v55, %v14072_v45  ;;  %v18428_v27 = vld [vmem:[#allocation110_spill] sm:$0xff]  ;;  %8030 = vmatprep.subr.bf16.mxu1 %v18276_v57 }
 0x37a   :  { %7337 = vmatpush1.bf16.msra.mxu0 %v11297_v2 }
 0x37b   :  { %v4835_v1 = vadd.f32 %v4834_v61, %v4772_v42  ;;  %v4773_v22 = vmul.f32 %v14082_v36, %v14082_v36  ;;  %7338 = vmatprep.subr.bf16.mxu0 %v18276_v57  ;;  %v18457_v57 = vld [vmem:[#allocation26_spill] sm:$0xff] }
 0x37c   :  { %v4259_v38 = vpop.f32.mrb[44].mxu1 }
 0x37d   :  { %v4549_v48 = vadd.f32 %v13839_v40, %v4259_v38  ;;  %v4261_v19 = vpop.f32.mrb[45].mxu1  ;;  %v4703_v40 = vadd.f32 %v4702_v26, %v14082_v36  ;;  %v18430_v26 = vld [vmem:[#allocation42_spill] sm:$0xff] }
 0x37e   :  { %v4262_v17 = vpop.f32.mrb[46].mxu1  ;;  %7339 = vmatpush1.bf16.msra.mxu0 %v11300_v35 }
 0x37f   :  { %v14102_v4 = vadd.f32 %v4549_v48, %v18427_v10  ;;  %v4552_v30 = vadd.f32 %v13850_v54, %v4262_v17  ;;  %v4264_v14 = vpop.f32.mrb[47].mxu1  ;;  %v4836_v54 = vadd.f32 %v4835_v1, %v4773_v22  ;;  %11043 = vmatprep.subr.bf16.mxu0 %v14115_v5  ;;  %v18432_v22 = vld [vmem:[#allocation41_spill] sm:$0xff]  ;;  %v18458_v5 = vld [vmem:[#allocation64_spill] sm:$0xff] }
 0x381   :  { %v4774_v39 = vmul.f32 %v14102_v4, %v14102_v4  ;;  %v14110_v51 = vadd.f32 %v4552_v30, %v18428_v27  ;;  %v4704_v37 = vadd.f32 %v4703_v40, %v14102_v4 }
 0x383   :  { %v4837_v29 = vadd.f32 %v4836_v54, %v4774_v39  ;;  %v4775_v42 = vmul.f32 %v14110_v51, %v14110_v51  ;;  %v4705_v38 = vadd.f32 %v4704_v37, %v14110_v51  ;;  %v18433_v37 = vld [vmem:[#allocation109_spill] sm:$0xff] }
 0x384   :  { %v4267_v43 = vpop.f32.mrb[48].mxu1 }
 0x385   :  { %v4557_v2 = vadd.f32 %v13875_v53, %v4267_v43  ;;  %v4269_v55 = vpop.f32.mrb[49].mxu1  ;;  %v4838_v1 = vadd.f32 %v4837_v29, %v4775_v42 }
 0x386   :  { %v4270_v61 = vpop.f32.mrb[50].mxu1 }
 0x387   :  { %v14125_v48 = vadd.f32 %v4557_v2, %v18430_v26  ;;  %v4560_v63 = vadd.f32 %v13883_v23, %v4270_v61  ;;  %v4272_v19 = vpop.f32.mrb[51].mxu1  ;;  %v18434_v61 = vld [vmem:[#allocation16_spill] sm:$0xff] }
 0x389   :  { %18431 = vst [vmem:[#allocation115_spill] sm:$0xff] %v14125_v48  ;;  %v4706_v17 = vadd.f32 %v4705_v38, %v14125_v48  ;;  %v4776_v35 = vmul.f32 %v14125_v48, %v14125_v48  ;;  %v14132_v10 = vadd.f32 %v4560_v63, %v18432_v22  ;;  %v18435_v22 = vld [vmem:[#allocation44_spill] sm:$0xff] }
 0x38b   :  { %v4839_v53 = vadd.f32 %v4838_v1, %v4776_v35  ;;  %v4707_v30 = vadd.f32 %v4706_v17, %v14132_v10  ;;  %v4777_v14 = vmul.f32 %v14132_v10, %v14132_v10 }
 0x38c   :  { %v4275_v40 = vpop.f32.mrb[52].mxu1 }
 0x38d   :  { %v4840_v39 = vadd.f32 %v4839_v53, %v4777_v14  ;;  %v4565_v23 = vadd.f32 %v13867_v16, %v4275_v40  ;;  %v4277_v27 = vpop.f32.mrb[53].mxu1 }
 0x38e   :  { %v4278_v54 = vpop.f32.mrb[54].mxu1 }
 0x38f   :  { %v14139_v43 = vadd.f32 %v4565_v23, %v18433_v37  ;;  %v4568_v29 = vadd.f32 %v13877_v18, %v4278_v54  ;;  %v4280_v42 = vpop.f32.mrb[55].mxu1  ;;  %v18436_v23 = vld [vmem:[#allocation45_spill] sm:$0xff] }
 0x391   :  { %v4708_v2 = vadd.f32 %v4707_v30, %v14139_v43  ;;  %v4778_v55 = vmul.f32 %v14139_v43, %v14139_v43  ;;  %v14146_v38 = vadd.f32 %v4568_v29, %v18434_v61  ;;  %v18437_v61 = vld [vmem:[#allocation18_spill] sm:$0xff] }
 0x393   :  { %v4841_v26 = vadd.f32 %v4840_v39, %v4778_v55  ;;  %v4709_v63 = vadd.f32 %v4708_v2, %v14146_v38  ;;  %v4779_v16 = vmul.f32 %v14146_v38, %v14146_v38 }
 0x394   :  { %v4283_v19 = vpop.f32.mrb[56].mxu1 }
 0x395   :  { %v4842_v1 = vadd.f32 %v4841_v26, %v4779_v16  ;;  %v4573_v17 = vadd.f32 %v13898_v25, %v4283_v19  ;;  %v4285_v18 = vpop.f32.mrb[57].mxu1 }
 0x396   :  { %v4286_v35 = vpop.f32.mrb[58].mxu1 }
 0x397   :  { %v14153_v53 = vadd.f32 %v4573_v17, %v18435_v22  ;;  %v4576_v30 = vadd.f32 %v13907_v44, %v4286_v35  ;;  %v4288_v14 = vpop.f32.mrb[59].mxu1  ;;  %v18438_v17 = vld [vmem:[#allocation112_spill] sm:$0xff] }
 0x399   :  { %v4710_v40 = vadd.f32 %v4709_v63, %v14153_v53  ;;  %v4780_v39 = vmul.f32 %v14153_v53, %v14153_v53  ;;  %v14160_v27 = vadd.f32 %v4576_v30, %v18436_v23 }
 0x39b   :  { %v4843_v54 = vadd.f32 %v4842_v1, %v4780_v39  ;;  %v4711_v37 = vadd.f32 %v4710_v40, %v14160_v27  ;;  %v4781_v25 = vmul.f32 %v14160_v27, %v14160_v27 }
 0x39c   :  { %v4291_v29 = vpop.f32.mrb[60].mxu1 }
 0x39d   :  { %v4844_v42 = vadd.f32 %v4843_v54, %v4781_v25  ;;  %v4581_v2 = vadd.f32 %v13891_v33, %v4291_v29  ;;  %v4293_v44 = vpop.f32.mrb[61].mxu1 }
 0x39e   :  { %v4294_v55 = vpop.f32.mrb[62].mxu1 }
 0x39f   :  { %v14167_v26 = vadd.f32 %v4581_v2, %v18437_v61  ;;  %v4584_v63 = vadd.f32 %v13902_v24, %v4294_v55  ;;  %v4296_v16 = vpop.f32.mrb[63].mxu1 }
 0x3a1   :  { %v4712_v19 = vadd.f32 %v4711_v37, %v14167_v26  ;;  %v4782_v1 = vmul.f32 %v14167_v26, %v14167_v26  ;;  %v14174_v18 = vadd.f32 %v4584_v63, %v18438_v17 }
 0x3a3   :  { %v4845_v35 = vadd.f32 %v4844_v42, %v4782_v1  ;;  %v4713_v22 = vadd.f32 %v4712_v19, %v14174_v18  ;;  %v4783_v33 = vmul.f32 %v14174_v18, %v14174_v18  ;;  %v18439_v1 = vld [vmem:[#allocation51_spill] sm:$0xff] }
 0x3a4   :  { %v18462_v19 = vld [vmem:[#allocation47_spill] sm:$0xff] }
 0x3a5   :  { %v4714_v30 = vrot.slane %v4713_v22, 4  ;;  %v4846_v14 = vadd.f32 %v4845_v35, %v4783_v33  ;;  %v18440_v35 = vld [vmem:[#allocation50_spill] sm:$0xff]  ;;  %v18441_v33 = vld [vmem:[#allocation17_spill] sm:$0xff] }
 0x3a7   :  { %v4715_v40 = vadd.f32 %v4714_v30, %v4713_v22  ;;  %v4847_v39 = vrot.slane %v4846_v14, 4  ;;  %v18460_v30 = vld [vmem:[#allocation65_spill] sm:$0xff] }
 0x3a9   :  { %v4716_v24 = vrot.slane %v4715_v40, 2  ;;  %v4848_v23 = vadd.f32 %v4847_v39, %v4846_v14  ;;  %v18442_v14 = vld [vmem:[#allocation111_spill] sm:$0xff] }
 0x3ab   :  { %v4717_v54 = vadd.f32 %v4716_v24, %v4715_v40  ;;  %v4849_v37 = vrot.slane %v4848_v23, 2  ;;  %v18443_v24 = vld [vmem:[#allocation23_spill] sm:$0xff] }
 0x3ad   :  { %v4718_v25 = vrot.slane %v4717_v54, 1  ;;  %v4850_v29 = vadd.f32 %v4849_v37, %v4848_v23  ;;  %v18450_v23 = vld [vmem:[#allocation59_spill] sm:$0xff]  ;;  %v18451_v37 = vld [vmem:[#allocation37_spill] sm:$0xff] }
 0x3af   :  { %v4719_v2 = vadd.f32 %v4718_v25, %v4717_v54  ;;  %v4851_v44 = vrot.slane %v4850_v29, 1  ;;  %v18444_v54 = vld [vmem:[#allocation53_spill] sm:$0xff] }
 0x3b0   :  { %v18445_v25 = vld [vmem:[#allocation29_spill] sm:$0xff] }
 0x3b1   :  { %v4852_v55 = vadd.f32 %v4851_v44, %v4850_v29  ;;  %v14179_v61 = vmul.f32 0.001953125, %v4719_v2  ;;  %v18446_v2 = vld [vmem:[#allocation52_spill] sm:$0xff] }
 0x3b3   :  { %v4854_v42 = vmul.f32 0.001953125, %v4852_v55  ;;  %v4855_v63 = vmul.f32 %v14179_v61, %v14179_v61  ;;  %v18459_v55 = vld [vmem:[#allocation28_spill] sm:$0xff]  ;;  %v18464_v29 = vsub.f32 %v14167_v26, %v14179_v61  ;;  %v18465_v44 = vsub.f32 %v14174_v18, %v14179_v61 }
 0x3b4   :  { %v18467_v16 = vsub.f32 %v18440_v35, %v14179_v61  ;;  %v18468_v18 = vsub.f32 %v18441_v33, %v14179_v61  ;;  %v18471_v33 = vsub.f32 %v18444_v54, %v14179_v61 }
 0x3b5   :  { %v4856_v39 = vsub.f32 %v4854_v42, %v4855_v63  ;;  %v18449_v42 = vld [vmem:[#allocation113_spill] sm:$0xff]  ;;  %v18463_v63 = vld [vmem:[#allocation36_spill] sm:$0xff] }
 0x3b7   :  { %v4921_v40 = vadd.f32 1e-05, %v4856_v39  ;;  %v18466_v39 = vsub.f32 %v18439_v1, %v14179_v61 }
 0x3b9   :  { %11351 = vrsqrt.f32 %v4921_v40  ;;  %v18461_v40 = vld [vmem:[#allocation46_spill] sm:$0xff] }
 0x3c3   :  { %v14301_v52 = vpop.eup %11351 }
 0x3c4   :  { %v4985_v22 = vmul.f32 %v14301_v52, %v18464_v29  ;;  %v4986_v48 = vmul.f32 %v14301_v52, %v18465_v44  ;;  %v14325_v21 = vmul.f32 %v14301_v52, %v18466_v39  ;;  %v14331_v26 = vmul.f32 %v14301_v52, %v18467_v16 }
 0x3c5   :  { %v14337_v29 = vmul.f32 %v14301_v52, %v18468_v18  ;;  %v18469_v44 = vsub.f32 %v18442_v14, %v14179_v61  ;;  %v18470_v39 = vsub.f32 %v18443_v24, %v14179_v61  ;;  %v14355_v18 = vmul.f32 %v14301_v52, %v18471_v33  ;;  %v18478_v33 = vld [vmem:[#allocation58_spill] sm:$0xff] }
 0x3c6   :  { %v5049_v16 = vmax.f32 %v4985_v22, 0.0  ;;  %v5050_v17 = vmax.f32 %v4986_v48, 0.0  ;;  %v18473_v14 = vsub.f32 %v18445_v25, %v14179_v61  ;;  %v18474_v24 = vsub.f32 %v18446_v2, %v14179_v61  ;;  %v18476_v22 = vld [vmem:[#allocation20_spill] sm:$0xff] }
 0x3c7   :  { %v14343_v1 = vmul.f32 %v14301_v52, %v18469_v44  ;;  %v14349_v35 = vmul.f32 %v14301_v52, %v18470_v39  ;;  %18472 = vst [vmem:[#allocation67_spill] sm:$0xff] %v14355_v18  ;;  %v18477_v48 = vsub.f32 %v18476_v22, %v14179_v61  ;;  %v18479_v18 = vsub.f32 %v18478_v33, %v14179_v61 }
 0x3c8   :  { %v14361_v44 = vmul.f32 %v14301_v52, %v18473_v14  ;;  %v14367_v39 = vmul.f32 %v14301_v52, %v18474_v24  ;;  %v18481_v14 = vsub.f32 %v18449_v42, %v14179_v61  ;;  %v5082_v24 = vpack.c.bf16 %v5050_v17, %v5049_v16  ;;  %v18491_v16 = vld [vmem:[#allocation114_spill] sm:$0xff] }
 0x3c9   :  { %v14373_v54 = vmul.f32 %v14301_v52, %v18477_v48  ;;  %v14379_v25 = vmul.f32 %v14301_v52, %v18479_v18  ;;  %v18483_v48 = vsub.f32 %v18451_v37, %v14179_v61  ;;  %v18485_v18 = vld [vmem:[#allocation27_spill] sm:$0xff] }
 0x3ca   :  { %18475 = vst [vmem:[#allocation35_spill] sm:$0xff] %v14367_v39  ;;  %v14385_v2 = vmul.f32 %v14301_v52, %v18481_v14  ;;  %v18482_v39 = vsub.f32 %v18450_v23, %v14179_v61  ;;  %v18488_v14 = vld [vmem:[#allocation60_spill] sm:$0xff] }
 0x3cb   :  { %18480 = vst [vmem:[#allocation101_spill] sm:$0xff] %v14379_v25  ;;  %v14397_v33 = vmul.f32 %v14301_v52, %v18483_v48  ;;  %v18486_v25 = vsub.f32 %v18485_v18, %v14179_v61  ;;  %v18489_v17 = vsub.f32 %v18488_v14, %v14179_v61  ;;  %v18494_v48 = vld [vmem:[#allocation61_spill] sm:$0xff] }
 0x3cc   :  { %v14391_v22 = vmul.f32 %v14301_v52, %v18482_v39  ;;  %v18492_v39 = vsub.f32 %v18491_v16, %v14179_v61 }
 0x3cd   :  { %18484 = vst [vmem:[#allocation68_spill] sm:$0xff] %v14397_v33  ;;  %v14403_v42 = vmul.f32 %v14301_v52, %v18486_v25  ;;  %v14409_v23 = vmul.f32 %v14301_v52, %v18489_v17  ;;  %v18495_v33 = vsub.f32 %v18494_v48, %v14179_v61  ;;  %v18496_v25 = vsub.f32 %v13665_v3, %v14179_v61 }
 0x3ce   :  { %v14415_v37 = vmul.f32 %v14301_v52, %v18492_v39  ;;  %v5146_v17 = vrot.slane %v5082_v24, 4  ;;  %v18499_v39 = vld [vmem:[#allocation43_spill] sm:$0xff]  ;;  %v18502_v24 = vsub.f32 %v18458_v5, %v14179_v61 }
 0x3cf   :  { %18487 = vst [vmem:[#allocation103_spill] sm:$0xff] %v14403_v42  ;;  %18490 = vst [vmem:[#allocation96_spill] sm:$0xff] %v14409_v23  ;;  %v14421_v18 = vmul.f32 %v14301_v52, %v18495_v33  ;;  %v14427_v14 = vmul.f32 %v14301_v52, %v18496_v25  ;;  %v18497_v23 = vld [vmem:[#allocation40_spill] sm:$0xff]  ;;  %v18501_v33 = vsub.f32 %v18457_v57, %v14179_v61 }
 0x3d0   :  { %18493 = vst [vmem:[#allocation92_spill] sm:$0xff] %v14415_v37  ;;  %v18498_v42 = vsub.f32 %v18497_v23, %v14179_v61  ;;  %v18500_v37 = vsub.f32 %v18499_v39, %v14179_v61  ;;  %v14451_v23 = vmul.f32 %v14301_v52, %v18502_v24  ;;  %v18505_v39 = vsub.f32 %v18461_v40, %v14179_v61 }
 0x3d1   :  { %v14445_v3 = vmul.f32 %v14301_v52, %v18501_v33  ;;  %5241 = vst [vmem:[#allocation2 + $0x228] ss:$-4 sps:$4 sm:$0xff] %v5146_v17   ;;  %v18506_v33 = vsub.f32 %v18462_v19, %v14179_v61  ;;  %v18507_v24 = vsub.f32 %v18463_v63, %v14179_v61  ;;  %v18509_v17 = vsub.f32 %v13812_v20, %v14179_v61 }
 0x3d2   :  { %v14433_v16 = vmul.f32 %v14301_v52, %v18498_v42  ;;  %v14439_v48 = vmul.f32 %v14301_v52, %v18500_v37  ;;  %v18503_v42 = vsub.f32 %v18459_v55, %v14179_v61  ;;  %v18504_v37 = vsub.f32 %v18460_v30, %v14179_v61 }
 0x3d3   :  { %v14469_v5 = vmul.f32 %v14301_v52, %v18505_v39  ;;  %v14475_v55 = vmul.f32 %v14301_v52, %v18506_v33  ;;  %v14481_v30 = vmul.f32 %v14301_v52, %v18507_v24  ;;  %v14493_v19 = vmul.f32 %v14301_v52, %v18509_v17 }
 0x3d4   :  { %v14457_v25 = vmul.f32 %v14301_v52, %v18503_v42  ;;  %v14463_v57 = vmul.f32 %v14301_v52, %v18504_v37  ;;  %v18508_v42 = vsub.f32 %v13794_v15, %v14179_v61  ;;  %v18510_v37 = vsub.f32 %v13822_v47, %v14179_v61 }
 0x3d5   :  { %v18511_v39 = vsub.f32 %v13843_v41, %v14179_v61  ;;  %v18512_v33 = vsub.f32 %v13854_v32, %v14179_v61  ;;  %v18513_v24 = vsub.f32 %v13872_v6, %v14179_v61  ;;  %v18515_v17 = vsub.f32 %v13895_v34, %v14179_v61 }
 0x3d6   :  { %v14487_v40 = vmul.f32 %v14301_v52, %v18508_v42  ;;  %v14499_v63 = vmul.f32 %v14301_v52, %v18510_v37  ;;  %v18514_v42 = vsub.f32 %v13881_v56, %v14179_v61  ;;  %v18516_v37 = vsub.f32 %v13905_v46, %v14179_v61 }
 0x3d7   :  { %v14505_v15 = vmul.f32 %v14301_v52, %v18511_v39  ;;  %v14511_v20 = vmul.f32 %v14301_v52, %v18512_v33  ;;  %v14517_v47 = vmul.f32 %v14301_v52, %v18513_v24  ;;  %v14529_v32 = vmul.f32 %v14301_v52, %v18515_v17 }
 0x3d8   :  { %v14523_v41 = vmul.f32 %v14301_v52, %v18514_v42  ;;  %v14535_v6 = vmul.f32 %v14301_v52, %v18516_v37  ;;  %v18517_v39 = vsub.f32 %v13917_v13, %v14179_v61  ;;  %v18518_v33 = vsub.f32 %v13924_v12, %v14179_v61 }
 0x3d9   :  { %v18519_v24 = vsub.f32 %v13934_v28, %v14179_v61  ;;  %v18520_v42 = vsub.f32 %v13939_v9, %v14179_v61  ;;  %v18521_v17 = vsub.f32 %v13949_v7, %v14179_v61  ;;  %v18522_v37 = vsub.f32 %v13955_v31, %v14179_v61 }
 0x3da   :  { %v14541_v56 = vmul.f32 %v14301_v52, %v18517_v39  ;;  %v14547_v34 = vmul.f32 %v14301_v52, %v18518_v33  ;;  %v18523_v39 = vsub.f32 %v13965_v59, %v14179_v61  ;;  %v18524_v33 = vsub.f32 %v13972_v62, %v14179_v61 }
 0x3db   :  { %v14553_v46 = vmul.f32 %v14301_v52, %v18519_v24  ;;  %v14559_v13 = vmul.f32 %v14301_v52, %v18520_v42  ;;  %v14565_v12 = vmul.f32 %v14301_v52, %v18521_v17  ;;  %v14571_v28 = vmul.f32 %v14301_v52, %v18522_v37 }
 0x3dc   :  { %v14577_v9 = vmul.f32 %v14301_v52, %v18523_v39  ;;  %v14583_v7 = vmul.f32 %v14301_v52, %v18524_v33  ;;  %v18525_v24 = vsub.f32 %v13982_v8, %v14179_v61  ;;  %v18526_v42 = vsub.f32 %v13987_v49, %v14179_v61  ;;  %v18530_v33 = vld [vmem:[#allocation34_spill] sm:$0xff] }
 0x3dd   :  { %v18527_v17 = vsub.f32 %v13997_v50, %v14179_v61  ;;  %v18528_v37 = vsub.f32 %v14003_v0, %v14179_v61  ;;  %v18529_v39 = vsub.f32 %v14013_v58, %v14179_v61 }
 0x3de   :  { %v14589_v31 = vmul.f32 %v14301_v52, %v18525_v24  ;;  %v14595_v59 = vmul.f32 %v14301_v52, %v18526_v42  ;;  %v18531_v24 = vsub.f32 %v18530_v33, %v14179_v61  ;;  %v18532_v42 = vsub.f32 %v14037_v60, %v14179_v61 }
 0x3df   :  { %v14601_v62 = vmul.f32 %v14301_v52, %v18527_v17  ;;  %v14607_v8 = vmul.f32 %v14301_v52, %v18528_v37  ;;  %v14613_v49 = vmul.f32 %v14301_v52, %v18529_v39  ;;  %v18533_v17 = vsub.f32 %v14049_v11, %v14179_v61 }
 0x3e0   :  { %v14619_v50 = vmul.f32 %v14301_v52, %v18531_v24  ;;  %v14625_v0 = vmul.f32 %v14301_v52, %v18532_v42  ;;  %v18534_v37 = vsub.f32 %v14072_v45, %v14179_v61  ;;  %v18535_v33 = vsub.f32 %v14082_v36, %v14179_v61 }
 0x3e1   :  { %v14631_v58 = vmul.f32 %v14301_v52, %v18533_v17  ;;  %v18536_v24 = vsub.f32 %v14102_v4, %v14179_v61  ;;  %v18538_v42 = vsub.f32 %v14110_v51, %v14179_v61  ;;  %v18540_v17 = vld [vmem:[#allocation115_spill] sm:$0xff] }
 0x3e2   :  { %v14637_v39 = vmul.f32 %v14301_v52, %v18534_v37  ;;  %v14643_v60 = vmul.f32 %v14301_v52, %v18535_v33  ;;  %v18541_v37 = vsub.f32 %v18540_v17, %v14179_v61  ;;  %v18543_v33 = vsub.f32 %v14132_v10, %v14179_v61 }
 0x3e3   :  { %v14649_v11 = vmul.f32 %v14301_v52, %v18536_v24  ;;  %v14655_v45 = vmul.f32 %v14301_v52, %v18538_v42  ;;  %v18545_v24 = vsub.f32 %v14139_v43, %v14179_v61  ;;  %v18547_v42 = vsub.f32 %v14146_v38, %v14179_v61 }
 0x3e4   :  { %v14661_v36 = vmul.f32 %v14301_v52, %v18541_v37  ;;  %v14667_v4 = vmul.f32 %v14301_v52, %v18543_v33  ;;  %v18549_v37 = vsub.f32 %v14153_v53, %v14179_v61  ;;  %v18551_v33 = vsub.f32 %v14160_v27, %v14179_v61  ;;  %v18553_v53 = vld [vmem:[#allocation67_spill] sm:$0xff] }
 0x3e5   :  { %18537 = vst [vmem:[#allocation71_spill] sm:$0xff] %v14649_v11  ;;  %18539 = vst [vmem:[#allocation94_spill] sm:$0xff] %v14655_v45  ;;  %v14673_v51 = vmul.f32 %v14301_v52, %v18545_v24  ;;  %v14679_v17 = vmul.f32 %v14301_v52, %v18547_v42  ;;  %v4987_v24 = vmax.f32 %v14325_v21, 0.0  ;;  %v4989_v38 = vmax.f32 %v14337_v29, 0.0  ;;  %v18558_v45 = vld [vmem:[#allocation96_spill] sm:$0xff] }
 0x3e6   :  { %18542 = vst [vmem:[#allocation57_spill] sm:$0xff] %v14661_v36  ;;  %18544 = vst [vmem:[#allocation49_spill] sm:$0xff] %v14667_v4  ;;  %v14685_v10 = vmul.f32 %v14301_v52, %v18549_v37  ;;  %v14691_v43 = vmul.f32 %v14301_v52, %v18551_v33  ;;  %v4990_v42 = vmax.f32 %v14343_v1, 0.0  ;;  %v4992_v4 = vmax.f32 %v18553_v53, 0.0  ;;  %v18555_v52 = vld [vmem:[#allocation101_spill] sm:$0xff]  ;;  %v18556_v33 = vld [vmem:[#allocation68_spill] sm:$0xff] }
 0x3e7   :  { %18546 = vst [vmem:[#allocation98_spill] sm:$0xff] %v14673_v51  ;;  %18548 = vst [vmem:[#allocation72_spill] sm:$0xff] %v14679_v17  ;;  %v4988_v51 = vmax.f32 %v14331_v26, 0.0  ;;  %v4991_v17 = vmax.f32 %v14349_v35, 0.0  ;;  %v4993_v37 = vmax.f32 %v14361_v44, 0.0  ;;  %v4995_v27 = vmax.f32 %v14373_v54, 0.0 }
 0x3e8   :  { %18550 = vst [vmem:[#allocation73_spill] sm:$0xff] %v14685_v10  ;;  %18552 = vst [vmem:[#allocation48_spill] sm:$0xff] %v14691_v43  ;;  %v18554_v10 = vld [vmem:[#allocation35_spill] sm:$0xff]  ;;  %v4996_v61 = vmax.f32 %v18555_v52, 0.0  ;;  %v4997_v21 = vmax.f32 %v14385_v2, 0.0  ;;  %v4998_v26 = vmax.f32 %v14391_v22, 0.0 }
 0x3e9   :  { %v4994_v36 = vmax.f32 %v18554_v10, 0.0  ;;  %v4999_v29 = vmax.f32 %v18556_v33, 0.0  ;;  %v18557_v43 = vld [vmem:[#allocation103_spill] sm:$0xff]  ;;  %v5001_v35 = vmax.f32 %v18558_v45, 0.0  ;;  %v18559_v11 = vld [vmem:[#allocation92_spill] sm:$0xff]  ;;  %v5003_v44 = vmax.f32 %v14421_v18, 0.0 }
 0x3ea   :  { %v5000_v1 = vmax.f32 %v18557_v43, 0.0  ;;  %v5002_v53 = vmax.f32 %v18559_v11, 0.0  ;;  %v5004_v10 = vmax.f32 %v14427_v14, 0.0  ;;  %v5005_v54 = vmax.f32 %v14433_v16, 0.0 }
 0x3eb   :  { %v5006_v52 = vmax.f32 %v14439_v48, 0.0  ;;  %v5007_v2 = vmax.f32 %v14445_v3, 0.0  ;;  %v5008_v22 = vmax.f32 %v14451_v23, 0.0  ;;  %v5009_v33 = vmax.f32 %v14457_v25, 0.0 }
 0x3ec   :  { %v5010_v43 = vmax.f32 %v14463_v57, 0.0  ;;  %v5011_v45 = vmax.f32 %v14469_v5, 0.0  ;;  %v5012_v11 = vmax.f32 %v14475_v55, 0.0  ;;  %v5013_v18 = vmax.f32 %v14481_v30, 0.0 }
 0x3ed   :  { %v5014_v14 = vmax.f32 %v14487_v40, 0.0  ;;  %v5015_v16 = vmax.f32 %v14493_v19, 0.0  ;;  %v5016_v48 = vmax.f32 %v14499_v63, 0.0  ;;  %v5017_v3 = vmax.f32 %v14505_v15, 0.0 }
 0x3ee   :  { %v5018_v23 = vmax.f32 %v14511_v20, 0.0  ;;  %v5019_v25 = vmax.f32 %v14517_v47, 0.0  ;;  %v5020_v57 = vmax.f32 %v14523_v41, 0.0  ;;  %v5021_v5 = vmax.f32 %v14529_v32, 0.0 }
 0x3ef   :  { %v5022_v55 = vmax.f32 %v14535_v6, 0.0  ;;  %v5023_v30 = vmax.f32 %v14541_v56, 0.0  ;;  %v5024_v40 = vmax.f32 %v14547_v34, 0.0  ;;  %v5025_v19 = vmax.f32 %v14553_v46, 0.0 }
 0x3f0   :  { %v5026_v63 = vmax.f32 %v14559_v13, 0.0  ;;  %v5027_v15 = vmax.f32 %v14565_v12, 0.0  ;;  %v5028_v20 = vmax.f32 %v14571_v28, 0.0  ;;  %v5029_v47 = vmax.f32 %v14577_v9, 0.0 }
 0x3f1   :  { %v5030_v41 = vmax.f32 %v14583_v7, 0.0  ;;  %v5031_v32 = vmax.f32 %v14589_v31, 0.0  ;;  %v5032_v6 = vmax.f32 %v14595_v59, 0.0  ;;  %v5033_v56 = vmax.f32 %v14601_v62, 0.0  ;;  %v18560_v31 = vld [vmem:[#allocation71_spill] sm:$0xff]  ;;  %v18561_v62 = vld [vmem:[#allocation94_spill] sm:$0xff] }
 0x3f2   :  { %v5034_v34 = vmax.f32 %v14607_v8, 0.0  ;;  %v5035_v46 = vmax.f32 %v14613_v49, 0.0  ;;  %v5036_v13 = vmax.f32 %v14619_v50, 0.0  ;;  %v5037_v12 = vmax.f32 %v14625_v0, 0.0  ;;  %v18562_v49 = vld [vmem:[#allocation57_spill] sm:$0xff] }
 0x3f3   :  { %v5038_v28 = vmax.f32 %v14631_v58, 0.0  ;;  %v5039_v9 = vmax.f32 %v14637_v39, 0.0  ;;  %v5040_v7 = vmax.f32 %v14643_v60, 0.0  ;;  %v5041_v59 = vmax.f32 %v18560_v31, 0.0  ;;  %v18563_v0 = vld [vmem:[#allocation49_spill] sm:$0xff]  ;;  %v18564_v39 = vld [vmem:[#allocation98_spill] sm:$0xff] }
 0x3f4   :  { %v5042_v8 = vmax.f32 %v18561_v62, 0.0  ;;  %v5043_v50 = vmax.f32 %v18562_v49, 0.0  ;;  %v5044_v58 = vmax.f32 %v18563_v0, 0.0  ;;  %v5045_v60 = vmax.f32 %v18564_v39, 0.0  ;;  %v18565_v31 = vld [vmem:[#allocation72_spill] sm:$0xff]  ;;  %v18566_v49 = vld [vmem:[#allocation73_spill] sm:$0xff] }
 0x3f5   :  { %v5046_v62 = vmax.f32 %v18565_v31, 0.0  ;;  %v5047_v0 = vmax.f32 %v18566_v49, 0.0  ;;  %v18567_v39 = vld [vmem:[#allocation48_spill] sm:$0xff]  ;;  %v5051_v49 = vpack.c.bf16 %v4988_v51, %v4987_v24  ;;  %v5053_v24 = vpack.c.bf16 %v4992_v4, %v4991_v17 }
 0x3f6   :  { %v5048_v31 = vmax.f32 %v18567_v39, 0.0  ;;  %v5052_v39 = vpack.c.bf16 %v4990_v42, %v4989_v38  ;;  %v5054_v51 = vpack.c.bf16 %v4994_v36, %v4993_v37  ;;  %v5055_v38 = vpack.c.bf16 %v4996_v61, %v4995_v27 }
 0x3f7   :  { %v5056_v42 = vpack.c.bf16 %v4998_v26, %v4997_v21  ;;  %v5057_v4 = vpack.c.bf16 %v5000_v1, %v4999_v29  ;;  %v5058_v17 = vpack.c.bf16 %v5002_v53, %v5001_v35  ;;  %v5059_v36 = vpack.c.bf16 %v5004_v10, %v5003_v44 }
 0x3f8   :  { %v5060_v37 = vpack.c.bf16 %v5006_v52, %v5005_v54  ;;  %v5061_v27 = vpack.c.bf16 %v5008_v22, %v5007_v2  ;;  %v5062_v61 = vpack.c.bf16 %v5010_v43, %v5009_v33  ;;  %v5063_v21 = vpack.c.bf16 %v5012_v11, %v5011_v45 }
 0x3f9   :  { %v5064_v26 = vpack.c.bf16 %v5014_v14, %v5013_v18  ;;  %v5065_v1 = vpack.c.bf16 %v5016_v48, %v5015_v16  ;;  %v5066_v29 = vpack.c.bf16 %v5018_v23, %v5017_v3  ;;  %v5067_v35 = vpack.c.bf16 %v5020_v57, %v5019_v25 }
 0x3fa   :  { %v5068_v53 = vpack.c.bf16 %v5022_v55, %v5021_v5  ;;  %v5069_v10 = vpack.c.bf16 %v5024_v40, %v5023_v30  ;;  %v5070_v44 = vpack.c.bf16 %v5026_v63, %v5025_v19  ;;  %v5071_v52 = vpack.c.bf16 %v5028_v20, %v5027_v15 }
 0x3fb   :  { %v5072_v54 = vpack.c.bf16 %v5030_v41, %v5029_v47  ;;  %v5073_v2 = vpack.c.bf16 %v5032_v6, %v5031_v32  ;;  %v5074_v22 = vpack.c.bf16 %v5034_v34, %v5033_v56  ;;  %v5075_v33 = vpack.c.bf16 %v5036_v13, %v5035_v46 }
 0x3fc   :  { %v5076_v43 = vpack.c.bf16 %v5038_v28, %v5037_v12  ;;  %v5077_v11 = vpack.c.bf16 %v5040_v7, %v5039_v9  ;;  %v5078_v45 = vpack.c.bf16 %v5042_v8, %v5041_v59  ;;  %v5079_v14 = vpack.c.bf16 %v5044_v58, %v5043_v50 }
 0x3fd   :  { %v5080_v18 = vpack.c.bf16 %v5046_v62, %v5045_v60  ;;  %v14755_v16 = vpack.c.bf16 %v5048_v31, %v5047_v0  ;;  %v5115_v48 = vrot.slane %v5051_v49, 4  ;;  %v5116_v3 = vrot.slane %v5052_v39, 4 }
 0x3fe   :  { %v5117_v23 = vrot.slane %v5053_v24, 4  ;;  %v5118_v25 = vrot.slane %v5054_v51, 4  ;;  %v5119_v57 = vrot.slane %v5055_v38, 4  ;;  %v5120_v5 = vrot.slane %v5056_v42, 4 }
 0x3ff   :  { %v5121_v55 = vrot.slane %v5057_v4, 4  ;;  %v5122_v30 = vrot.slane %v5058_v17, 4  ;;  %v5123_v40 = vrot.slane %v5059_v36, 4  ;;  %v5124_v19 = vrot.slane %v5060_v37, 4  ;;  %5179 = vst [vmem:[#allocation2 + $0x18] ss:$-4 sps:$4 sm:$0xff] %v5115_v48  }
 0x400   :  { %5181 = vst [vmem:[#allocation2 + $0x28] ss:$-4 sps:$4 sm:$0xff] %v5116_v3   ;;  %v5125_v63 = vrot.slane %v5061_v27, 4  ;;  %v5126_v15 = vrot.slane %v5062_v61, 4  ;;  %v5127_v20 = vrot.slane %v5063_v21, 4  ;;  %v5128_v47 = vrot.slane %v5064_v26, 4 }
 0x401   :  { %5183 = vst [vmem:[#allocation2 + $0x38] ss:$-4 sps:$4 sm:$0xff] %v5117_v23   ;;  %5185 = vst [vmem:[#allocation2 + $0x48] ss:$-4 sps:$4 sm:$0xff] %v5118_v25   ;;  %v5129_v41 = vrot.slane %v5065_v1, 4  ;;  %v5130_v32 = vrot.slane %v5066_v29, 4 }
 0x402   :  { %5187 = vst [vmem:[#allocation2 + $0x58] ss:$-4 sps:$4 sm:$0xff] %v5119_v57   ;;  %5189 = vst [vmem:[#allocation2 + $0x68] ss:$-4 sps:$4 sm:$0xff] %v5120_v5   ;;  %v5131_v6 = vrot.slane %v5067_v35, 4  ;;  %v5132_v56 = vrot.slane %v5068_v53, 4 }
 0x403   :  { %5191 = vst [vmem:[#allocation2 + $0x78] ss:$-4 sps:$4 sm:$0xff] %v5121_v55   ;;  %5193 = vst [vmem:[#allocation2 + $0x88] ss:$-4 sps:$4 sm:$0xff] %v5122_v30   ;;  %v5133_v34 = vrot.slane %v5069_v10, 4  ;;  %v5134_v46 = vrot.slane %v5070_v44, 4 }
 0x404   :  { %5195 = vst [vmem:[#allocation2 + $0x98] ss:$-4 sps:$4 sm:$0xff] %v5123_v40   ;;  %5197 = vst [vmem:[#allocation2 + $0xa8] ss:$-4 sps:$4 sm:$0xff] %v5124_v19   ;;  %v5135_v13 = vrot.slane %v5071_v52, 4  ;;  %v5136_v12 = vrot.slane %v5072_v54, 4 }
 0x405   :  { %5199 = vst [vmem:[#allocation2 + $0xb8] ss:$-4 sps:$4 sm:$0xff] %v5125_v63   ;;  %5201 = vst [vmem:[#allocation2 + $0xc8] ss:$-4 sps:$4 sm:$0xff] %v5126_v15   ;;  %v5137_v28 = vrot.slane %v5073_v2, 4  ;;  %v5138_v9 = vrot.slane %v5074_v22, 4 }
 0x406   :  { %5203 = vst [vmem:[#allocation2 + $0xd8] ss:$-4 sps:$4 sm:$0xff] %v5127_v20   ;;  %5205 = vst [vmem:[#allocation2 + $0xe8] ss:$-4 sps:$4 sm:$0xff] %v5128_v47   ;;  %v5139_v7 = vrot.slane %v5075_v33, 4  ;;  %v5140_v59 = vrot.slane %v5076_v43, 4 }
 0x407   :  { %5207 = vst [vmem:[#allocation2 + $0xf8] ss:$-4 sps:$4 sm:$0xff] %v5129_v41   ;;  %5209 = vst [vmem:[#allocation2 + $0x108] ss:$-4 sps:$4 sm:$0xff] %v5130_v32   ;;  %v5141_v8 = vrot.slane %v5077_v11, 4  ;;  %v5142_v50 = vrot.slane %v5078_v45, 4 }
 0x408   :  { %5211 = vst [vmem:[#allocation2 + $0x138] ss:$-4 sps:$4 sm:$0xff] %v5131_v6   ;;  %5213 = vst [vmem:[#allocation2 + $0x148] ss:$-4 sps:$4 sm:$0xff] %v5132_v56   ;;  %v5143_v58 = vrot.slane %v5079_v14, 4  ;;  %v5144_v60 = vrot.slane %v5080_v18, 4 }
 0x409   :  { %5215 = vst [vmem:[#allocation2 + $0x158] ss:$-4 sps:$4 sm:$0xff] %v5133_v34   ;;  %5217 = vst [vmem:[#allocation2 + $0x168] ss:$-4 sps:$4 sm:$0xff] %v5134_v46   ;;  %v5145_v62 = vrot.slane %v14755_v16, 4  ;;  %v11304_v16 = vld [vmem:[%s17653_s2 + $0x88] sm:$0xff]  }
 0x40a   :  { %5219 = vst [vmem:[#allocation2 + $0x178] ss:$-4 sps:$4 sm:$0xff] %v5135_v13   ;;  %5221 = vst [vmem:[#allocation2 + $0x188] ss:$-4 sps:$4 sm:$0xff] %v5136_v12   ;;  %v5915_v0 = vld [vmem:[#allocation2 + $0x10] sm:$0xf0] }
 0x40b   :  { %5223 = vst [vmem:[#allocation2 + $0x198] ss:$-4 sps:$4 sm:$0xff] %v5137_v28   ;;  %5225 = vst [vmem:[#allocation2 + $0x1a8] ss:$-4 sps:$4 sm:$0xff] %v5138_v9   ;;  %v5916_v31 = vld [vmem:[#allocation2 + $0x18] sm:$0xf] }
 0x40c   :  { %5227 = vst [vmem:[#allocation2 + $0x1b8] ss:$-4 sps:$4 sm:$0xff] %v5139_v7   ;;  %5229 = vst [vmem:[#allocation2 + $0x1c8] ss:$-4 sps:$4 sm:$0xff] %v5140_v59   ;;  %v5243_v49 = vld [vmem:[#allocation2 + $0x10] sm:$0xf8] }
 0x40d   :  { %5231 = vst [vmem:[#allocation2 + $0x1d8] ss:$-4 sps:$4 sm:$0xff] %v5141_v8   ;;  %5233 = vst [vmem:[#allocation2 + $0x1e8] ss:$-4 sps:$4 sm:$0xff] %v5142_v50   ;;  %v6043_v39 = vrot.slane %v5915_v0, 4  ;;  %v6044_v24 = vrot.slane %v5916_v31, 4 }
 0x40e   :  { %5235 = vst [vmem:[#allocation2 + $0x1f8] ss:$-4 sps:$4 sm:$0xff] %v5143_v58   ;;  %5237 = vst [vmem:[#allocation2 + $0x208] ss:$-4 sps:$4 sm:$0xff] %v5144_v60   ;;  %v5244_v51 = vld [vmem:[#allocation2 + $0x18] sm:$0xf] }
 0x40f   :  { %5239 = vst [vmem:[#allocation2 + $0x218] ss:$-4 sps:$4 sm:$0xff] %v5145_v62   ;;  %v5308_v38 = vshrl.u32 %v5243_v49, 16  ;;  %v5311_v42 = vshll.u32 %v5243_v49, 16  ;;  %v5316_v4 = vshrl.u32 %v5244_v51, 16  ;;  %v5319_v17 = vshll.u32 %v5244_v51, 16 }
 0x410   :  { %v6203_v36 = vld [vmem:[#allocation2 + $0x10] sm:$0xf0]  ;;  %v6204_v37 = vld [vmem:[#allocation2 + $0x18] sm:$0x1f]  ;;  %v14759_v27 = vsel %vm1152_vm1, %v6043_v39, %v6044_v24  ;;  %v5917_v1 = vld [vmem:[#allocation2 + $0x20] sm:$0xf0] }
 0x411   :  { %v5310_v61 = vrot.slane %v5308_v38, 3  ;;  %v5313_v21 = vrot.slane %v5311_v42, 4  ;;  %v6268_v26 = vshrl.u32 %v6203_v36, 16  ;;  %7340 = vmatprep.mubr.bf16.mxu0 %v14759_v27  ;;  %v5318_v29 = vrot.slane %v5316_v4, 3  ;;  %v5918_v44 = vld [vmem:[#allocation2 + $0x28] sm:$0xf] }
 0x412   :  { %v5321_v35 = vrot.slane %v5319_v17, 4  ;;  %v6271_v53 = vshll.u32 %v6203_v36, 16  ;;  %v6276_v10 = vshrl.u32 %v6204_v37, 16  ;;  %v6279_v2 = vshll.u32 %v6204_v37, 16  ;;  %v6205_v33 = vld [vmem:[#allocation2 + $0x20] sm:$0xf0] }
 0x413   :  { %v5314_v52 = vor.u32 %v5313_v21, %v5310_v61  ;;  %v6270_v54 = vrot.slane %v6268_v26, 4  ;;  %v6046_v22 = vrot.slane %v5917_v1, 4  ;;  %v6047_v14 = vrot.slane %v5918_v44, 4  ;;  %v6206_v18 = vld [vmem:[#allocation2 + $0x28] sm:$0x1f]  ;;  %v11305_v32 = vld [vmem:[%s17653_s2 + $0x90] sm:$0xff]  }
 0x414   :  { %v5322_v43 = vor.u32 %v5321_v35, %v5318_v29  ;;  %v6273_v11 = vrot.slane %v6271_v53, 5  ;;  %v6278_v45 = vrot.slane %v6276_v10, 4  ;;  %v6281_v48 = vrot.slane %v6279_v2, 5  ;;  %v6207_v57 = vld [vmem:[#allocation2 + $0x30] sm:$0xf0]  ;;  %v18569_v56 = vld [vmem:[#allocation66_spill] sm:$0xff] }
 0x415   :  { %v6285_v3 = vshrl.u32 %v6205_v33, 16  ;;  %v6288_v23 = vshll.u32 %v6205_v33, 16  ;;  %v6293_v25 = vshrl.u32 %v6206_v18, 16  ;;  %v14769_v30 = vsel %vm1152_vm1, %v6046_v22, %v6047_v14  ;;  %v6208_v19 = vld [vmem:[#allocation2 + $0x38] sm:$0x1f]  ;;  %v11306_v49 = vld [vmem:[%s17653_s2] sm:$0xff]  }
 0x416   :  { %v14766_v5 = vsel %vm414_vm2, %v5314_v52, %v5322_v43  ;;  %v6274_v55 = vor.u32 %v6273_v11, %v6270_v54  ;;  %18568 = vst [vmem:[#allocation62_spill] sm:$0xff] %v14769_v30  ;;  %v6296_v40 = vshll.u32 %v6206_v18, 16  ;;  %v5245_v63 = vld [vmem:[#allocation2 + $0x20] sm:$0xf8]  ;;  %v6282_v15 = vor.u32 %v6281_v48, %v6278_v45  ;;  %v5246_v12 = vld [vmem:[#allocation2 + $0x28] sm:$0xf] }
 0x417   :  { %7341 = vmatmul.mubr.bf16.vlgmr.msra.gmra.mrb[0].mxu0 %v14766_v5  ;;  %v6287_v20 = vrot.slane %v6285_v3, 4  ;;  %v6290_v47 = vrot.slane %v6288_v23, 5  ;;  %v6295_v41 = vrot.slane %v6293_v25, 4  ;;  %v6302_v34 = vshrl.u32 %v6207_v57, 16  ;;  %v5919_v8 = vld [vmem:[#allocation2 + $0x30] sm:$0xf0] }
 0x418   :  { %7348 = vmatprep.mubr.bf16.mxu0 %v14769_v30  ;;  %v6298_v6 = vrot.slane %v6296_v40, 5  ;;  %11044 = vmatpush3.bf16.msra.mxu0 %v18569_v56  ;;  %v6305_v46 = vshll.u32 %v6207_v57, 16  ;;  %v6310_v13 = vshrl.u32 %v6208_v19, 16  ;;  %v14778_v28 = vsel %vm1377_vm0, %v6274_v55, %v6282_v15  ;;  %v5920_v50 = vld [vmem:[#allocation2 + $0x38] sm:$0xf]  ;;  %v11307_v61 = vld [vmem:[%s17653_s2 + $0x8] sm:$0xff]  }
 0x419   :  { %v6291_v9 = vor.u32 %v6290_v47, %v6287_v20  ;;  %v6313_v7 = vshll.u32 %v6208_v19, 16  ;;  %v5325_v59 = vshrl.u32 %v5245_v63, 16  ;;  %11045 = vmatprep.subr.bf16.mxu0 %v11304_v16  ;;  %10979 = vmatprep.mubr.bf16.mxu1 %v14778_v28  ;;  %v6304_v60 = vrot.slane %v6302_v34, 4  ;;  %v6209_v31 = vld [vmem:[#allocation2 + $0x40] sm:$0xf0]  ;;  %v11314_v53 = vld [vmem:[%s17653_s2 + $0x98] sm:$0xff]  }
 0x41a   :  { %v6299_v58 = vor.u32 %v6298_v6, %v6295_v41  ;;  %v6307_v62 = vrot.slane %v6305_v46, 5  ;;  %v6312_v0 = vrot.slane %v6310_v13, 4  ;;  %v5328_v51 = vshll.u32 %v5245_v63, 16  ;;  %v6210_v42 = vld [vmem:[#allocation2 + $0x48] sm:$0x1f]  ;;  %v11308_v13 = vld [vmem:[%s17653_s2 + $0x10] sm:$0xff]  }
 0x41b   :  { %v6315_v39 = vrot.slane %v6313_v7, 5  ;;  %v5327_v24 = vrot.slane %v5325_v59, 3  ;;  %v5333_v38 = vshrl.u32 %v5246_v12, 16  ;;  %v5336_v36 = vshll.u32 %v5246_v12, 16  ;;  %v6211_v35 = vld [vmem:[#allocation2 + $0x50] sm:$0xf0] }
 0x41c   :  { %v14785_v4 = vsel %vm1377_vm0, %v6291_v9, %v6299_v58  ;;  %v6308_v17 = vor.u32 %v6307_v62, %v6304_v60  ;;  %v6049_v37 = vrot.slane %v5919_v8, 4  ;;  %11046 = vmatpush3.bf16.msra.mxu0 %v11304_v16  ;;  %v5330_v26 = vrot.slane %v5328_v51, 4  ;;  %v6212_v2 = vld [vmem:[#allocation2 + $0x58] sm:$0x1f]  ;;  %v5247_v45 = vld [vmem:[#allocation2 + $0x30] sm:$0xf8] }
 0x41d   :  { %10980 = vmatmul.mubr.bf16.vlgmr.msra.gmra.mrb[64].mxu1 %v14785_v4  ;;  %v6316_v21 = vor.u32 %v6315_v39, %v6312_v0  ;;  %v5335_v1 = vrot.slane %v5333_v38, 3  ;;  %v6050_v29 = vrot.slane %v5920_v50, 4  ;;  %11047 = vmatprep.subr.bf16.mxu0 %v11305_v32  ;;  %v5338_v10 = vrot.slane %v5336_v36, 4  ;;  %v5248_v40 = vld [vmem:[#allocation2 + $0x38] sm:$0xf] }
 0x41e   :  { %v6319_v44 = vshrl.u32 %v6209_v31, 16  ;;  %v6322_v52 = vshll.u32 %v6209_v31, 16  ;;  %v6327_v54 = vshrl.u32 %v6210_v42, 16  ;;  %8031 = vmatpush1.bf16.msra.mxu1 %v11306_v49  ;;  %v5331_v33 = vor.u32 %v5330_v26, %v5327_v24  ;;  %v5921_v47 = vld [vmem:[#allocation2 + $0x40] sm:$0xf0]  ;;  %v11309_v51 = vld [vmem:[%s17653_s2 + $0x18] sm:$0xff]  }
 0x41f   :  { %v14795_v22 = vsel %vm1377_vm0, %v6308_v17, %v6316_v21  ;;  %v14798_v43 = vsel %vm1152_vm1, %v6049_v37, %v6050_v29  ;;  %v6330_v11 = vshll.u32 %v6210_v42, 16  ;;  %v18571_v14 = vmov 0   ;;  %v5922_v41 = vld [vmem:[#allocation2 + $0x48] sm:$0xf]  ;;  %v6213_v46 = vld [vmem:[#allocation2 + $0x60] sm:$0xf0] }
 0x420   :  { %18570 = vst [vmem:[#allocation63_spill] sm:$0xff] %v14798_v43  ;;  %8032 = vmatprep.subr.bf16.mxu1 %v18571_v14  ;;  %10983 = vmatprep.mubr.bf16.mxu1 %v14795_v22  ;;  %v5339_v18 = vor.u32 %v5338_v10, %v5335_v1  ;;  %v6321_v16 = vrot.slane %v6319_v44, 4  ;;  %v6324_v48 = vrot.slane %v6322_v52, 5  ;;  %v6329_v3 = vrot.slane %v6327_v54, 4  ;;  %v6214_v8 = vld [vmem:[#allocation2 + $0x68] sm:$0x1f] }
 0x421   :  { %11048 = vmatpush3.bf16.msra.mxu0 %v11305_v32  ;;  %v6332_v23 = vrot.slane %v6330_v11, 5  ;;  %v6336_v25 = vshrl.u32 %v6211_v35, 16  ;;  %v6339_v57 = vshll.u32 %v6211_v35, 16  ;;  %v6344_v55 = vshrl.u32 %v6212_v2, 16  ;;  %v6215_v24 = vld [vmem:[#allocation2 + $0x70] sm:$0xf0] }
 0x422   :  { %11049 = vmatprep.subr.bf16.mxu0 %v11314_v53  ;;  %v14803_v19 = vsel %vm414_vm2, %v5331_v33, %v5339_v18  ;;  %v6325_v63 = vor.u32 %v6324_v48, %v6321_v16  ;;  %v6347_v15 = vshll.u32 %v6212_v2, 16  ;;  %v5342_v20 = vshrl.u32 %v5247_v45, 16  ;;  %8033 = vmatpush1.bf16.msra.mxu1 %v11307_v61  ;;  %v6216_v37 = vld [vmem:[#allocation2 + $0x78] sm:$0x1f]  ;;  %v5249_v29 = vld [vmem:[#allocation2 + $0x40] sm:$0xf8] }
 0x423   :  { %18572 = vst [vmem:[#allocation13_spill] sm:$0xff] %v14803_v19  ;;  %7349 = vmatmul.mubr.bf16.gmra.mrb[4].mxu0 %v14803_v19  ;;  %v6333_v6 = vor.u32 %v6332_v23, %v6329_v3  ;;  %v6338_v56 = vrot.slane %v6336_v25, 4  ;;  %v6341_v32 = vrot.slane %v6339_v57, 5  ;;  %v6346_v34 = vrot.slane %v6344_v55, 4  ;;  %8034 = vmatprep.subr.bf16.mxu1 %v18571_v14  ;;  %v11323_v52 = vld [vmem:[%s17653_s2 + $0xa0] sm:$0xff]  }
 0x424   :  { %7356 = vmatprep.mubr.bf16.mxu0 %v14798_v43  ;;  %v6349_v12 = vrot.slane %v6347_v15, 5  ;;  %v5344_v9 = vrot.slane %v5342_v20, 3  ;;  %v5345_v7 = vshll.u32 %v5247_v45, 16  ;;  %v5350_v59 = vshrl.u32 %v5248_v40, 16  ;;  %v5250_v45 = vld [vmem:[#allocation2 + $0x48] sm:$0xf] }
 0x425   :  { %11050 = vmatpush3.bf16.msra.mxu0 %v11314_v53  ;;  %v14812_v50 = vsel %vm1377_vm0, %v6325_v63, %v6333_v6  ;;  %v6342_v58 = vor.u32 %v6341_v32, %v6338_v56  ;;  %v5353_v60 = vshll.u32 %v5248_v40, 16  ;;  %v6052_v62 = vrot.slane %v5921_v47, 4  ;;  %v5923_v23 = vld [vmem:[#allocation2 + $0x50] sm:$0xf0]  ;;  %v5924_v25 = vld [vmem:[#allocation2 + $0x58] sm:$0xf] }
 0x426   :  { %10984 = vmatmul.mubr.bf16.gmra.mrb[68].mxu1 %v14812_v50  ;;  %v6350_v0 = vor.u32 %v6349_v12, %v6346_v34  ;;  %v5347_v31 = vrot.slane %v5345_v7, 4  ;;  %v5352_v49 = vrot.slane %v5350_v59, 3  ;;  %v6053_v39 = vrot.slane %v5922_v41, 4  ;;  %11051 = vmatprep.subr.bf16.mxu0 %v11323_v52  ;;  %v6217_v15 = vld [vmem:[#allocation2 + $0x80] sm:$0xf0] }
 0x427   :  { %v5355_v38 = vrot.slane %v5353_v60, 4  ;;  %v6353_v42 = vshrl.u32 %v6213_v46, 16  ;;  %v6356_v17 = vshll.u32 %v6213_v46, 16  ;;  %v6361_v36 = vshrl.u32 %v6214_v8, 16  ;;  %8035 = vmatpush1.bf16.msra.mxu1 %v11308_v13  ;;  %v11310_v20 = vld [vmem:[%s17653_s2 + $0x20] sm:$0xff]   ;;  %v11311_v60 = vld [vmem:[%s17653_s2 + $0x28] sm:$0xff]  }
 0x428   :  { %v14819_v61 = vsel %vm1377_vm0, %v6342_v58, %v6350_v0  ;;  %v5348_v21 = vor.u32 %v5347_v31, %v5344_v9  ;;  %v14822_v26 = vsel %vm1152_vm1, %v6052_v62, %v6053_v39  ;;  %v6364_v1 = vshll.u32 %v6214_v8, 16  ;;  %8036 = vmatprep.subr.bf16.mxu1 %v18571_v14  ;;  %v6218_v32 = vld [vmem:[#allocation2 + $0x88] sm:$0x1f]  ;;  %v6219_v58 = vld [vmem:[#allocation2 + $0x90] sm:$0xf0] }
 0x429   :  { %18573 = vst [vmem:[#allocation74_spill] sm:$0xff] %v14819_v61  ;;  %18574 = vst [vmem:[#allocation75_spill] sm:$0xff] %v14822_v26  ;;  %10987 = vmatprep.mubr.bf16.mxu1 %v14819_v61  ;;  %v5356_v35 = vor.u32 %v5355_v38, %v5352_v49  ;;  %v6355_v53 = vrot.slane %v6353_v42, 4  ;;  %v6358_v10 = vrot.slane %v6356_v17, 5  ;;  %v6363_v44 = vrot.slane %v6361_v36, 4  ;;  %11052 = vmatpush3.bf16.msra.mxu0 %v11323_v52 }
 0x42a   :  { %v6366_v54 = vrot.slane %v6364_v1, 5  ;;  %v6370_v2 = vshrl.u32 %v6215_v24, 16  ;;  %v6373_v33 = vshll.u32 %v6215_v24, 16  ;;  %v6378_v11 = vshrl.u32 %v6216_v37, 16  ;;  %v6220_v39 = vld [vmem:[#allocation2 + $0x98] sm:$0x1f] }
 0x42b   :  { %v14830_v18 = vsel %vm414_vm2, %v5348_v21, %v5356_v35  ;;  %v6359_v16 = vor.u32 %v6358_v10, %v6355_v53  ;;  %v6381_v48 = vshll.u32 %v6216_v37, 16  ;;  %v5359_v3 = vshrl.u32 %v5249_v29, 16  ;;  %8037 = vmatpush1.bf16.msra.mxu1 %v11309_v51  ;;  %v5251_v17 = vld [vmem:[#allocation2 + $0x50] sm:$0xf8] }
 0x42c   :  { %18575 = vst [vmem:[#allocation54_spill] sm:$0xff] %v14830_v18  ;;  %7357 = vmatmul.mubr.bf16.gmra.mrb[8].mxu0 %v14830_v18  ;;  %v6367_v57 = vor.u32 %v6366_v54, %v6363_v44  ;;  %v6372_v55 = vrot.slane %v6370_v2, 4  ;;  %v6375_v40 = vrot.slane %v6373_v33, 5  ;;  %v6380_v63 = vrot.slane %v6378_v11, 4  ;;  %8038 = vmatprep.subr.bf16.mxu1 %v18571_v14  ;;  %v5252_v44 = vld [vmem:[#allocation2 + $0x58] sm:$0xf] }
 0x42d   :  { %7364 = vmatprep.mubr.bf16.mxu0 %v14822_v26  ;;  %v6383_v47 = vrot.slane %v6381_v48, 5  ;;  %v5361_v41 = vrot.slane %v5359_v3, 3  ;;  %v5362_v6 = vshll.u32 %v5249_v29, 16  ;;  %v5367_v56 = vshrl.u32 %v5250_v45, 16  ;;  %v5925_v11 = vld [vmem:[#allocation2 + $0x60] sm:$0xf0] }
 0x42e   :  { %v14839_v34 = vsel %vm1377_vm0, %v6359_v16, %v6367_v57  ;;  %v6376_v46 = vor.u32 %v6375_v40, %v6372_v55  ;;  %v5370_v13 = vshll.u32 %v5250_v45, 16  ;;  %v6055_v12 = vrot.slane %v5923_v23, 4  ;;  %v5926_v45 = vld [vmem:[#allocation2 + $0x68] sm:$0xf]  ;;  %v11312_v57 = vld [vmem:[%s17653_s2 + $0x30] sm:$0xff]  }
 0x42f   :  { %18576 = vst [vmem:[#allocation76_spill] sm:$0xff] %v14839_v34  ;;  %10988 = vmatmul.mubr.bf16.gmra.mrb[72].mxu1 %v14839_v34  ;;  %v6384_v9 = vor.u32 %v6383_v47, %v6380_v63  ;;  %v5364_v7 = vrot.slane %v5362_v6, 4  ;;  %v5369_v59 = vrot.slane %v5367_v56, 3  ;;  %v6056_v8 = vrot.slane %v5924_v25, 4  ;;  %v6221_v25 = vld [vmem:[#allocation2 + $0xa0] sm:$0xf0] }
 0x430   :  { %v5372_v62 = vrot.slane %v5370_v13, 4  ;;  %v6387_v0 = vshrl.u32 %v6217_v15, 16  ;;  %v6390_v31 = vshll.u32 %v6217_v15, 16  ;;  %v6395_v49 = vshrl.u32 %v6218_v32, 16  ;;  %8039 = vmatpush1.bf16.msra.mxu1 %v11310_v20  ;;  %v6222_v20 = vld [vmem:[#allocation2 + $0xa8] sm:$0x1f] }
 0x431   :  { %v14846_v24 = vsel %vm1377_vm0, %v6376_v46, %v6384_v9  ;;  %v5365_v51 = vor.u32 %v5364_v7, %v5361_v41  ;;  %v14849_v38 = vsel %vm1152_vm1, %v6055_v12, %v6056_v8  ;;  %v6398_v42 = vshll.u32 %v6218_v32, 16  ;;  %8040 = vmatprep.subr.bf16.mxu1 %v18571_v14  ;;  %v6223_v9 = vld [vmem:[#allocation2 + $0xb0] sm:$0xf0]  ;;  %v11313_v7 = vld [vmem:[%s17653_s2 + $0x38] sm:$0xff]  }
 0x432   :  { %18577 = vst [vmem:[#allocation77_spill] sm:$0xff] %v14846_v24  ;;  %18578 = vst [vmem:[#allocation78_spill] sm:$0xff] %v14849_v38  ;;  %10991 = vmatprep.mubr.bf16.mxu1 %v14846_v24  ;;  %v5373_v36 = vor.u32 %v5372_v62, %v5369_v59  ;;  %v6389_v37 = vrot.slane %v6387_v0, 4  ;;  %v6392_v21 = vrot.slane %v6390_v31, 5  ;;  %v6397_v1 = vrot.slane %v6395_v49, 4 }
 0x433   :  { %v6400_v29 = vrot.slane %v6398_v42, 5  ;;  %v6404_v35 = vshrl.u32 %v6219_v58, 16  ;;  %v6407_v53 = vshll.u32 %v6219_v58, 16  ;;  %v6412_v10 = vshrl.u32 %v6220_v39, 16  ;;  %v6224_v62 = vld [vmem:[#allocation2 + $0xb8] sm:$0x1f] }
 0x434   :  { %v14854_v52 = vsel %vm414_vm2, %v5365_v51, %v5373_v36  ;;  %v6393_v54 = vor.u32 %v6392_v21, %v6389_v37  ;;  %v6415_v2 = vshll.u32 %v6220_v39, 16  ;;  %v5376_v33 = vshrl.u32 %v5251_v17, 16  ;;  %8041 = vmatpush1.bf16.msra.mxu1 %v11311_v60  ;;  %v5253_v51 = vld [vmem:[#allocation2 + $0x60] sm:$0xf8] }
 0x435   :  { %18579 = vst [vmem:[#allocation79_spill] sm:$0xff] %v14854_v52  ;;  %7365 = vmatmul.mubr.bf16.gmra.mrb[12].mxu0 %v14854_v52  ;;  %v6401_v16 = vor.u32 %v6400_v29, %v6397_v1  ;;  %v6406_v48 = vrot.slane %v6404_v35, 4  ;;  %v6409_v3 = vrot.slane %v6407_v53, 5  ;;  %v6414_v23 = vrot.slane %v6412_v10, 4  ;;  %8042 = vmatprep.subr.bf16.mxu1 %v18571_v14  ;;  %v5254_v53 = vld [vmem:[#allocation2 + $0x68] sm:$0xf] }
 0x436   :  { %7372 = vmatprep.mubr.bf16.mxu0 %v14849_v38  ;;  %v6417_v55 = vrot.slane %v6415_v2, 5  ;;  %v5378_v40 = vrot.slane %v5376_v33, 3  ;;  %v5379_v63 = vshll.u32 %v5251_v17, 16  ;;  %v5384_v15 = vshrl.u32 %v5252_v44, 16  ;;  %v5927_v33 = vld [vmem:[#allocation2 + $0x70] sm:$0xf0] }
 0x437   :  { %v14863_v47 = vsel %vm1377_vm0, %v6393_v54, %v6401_v16  ;;  %v6410_v41 = vor.u32 %v6409_v3, %v6406_v48  ;;  %v5387_v6 = vshll.u32 %v5252_v44, 16  ;;  %v6058_v56 = vrot.slane %v5925_v11, 4  ;;  %v5928_v11 = vld [vmem:[#allocation2 + $0x78] sm:$0xf] }
 0x438   :  { %18580 = vst [vmem:[#allocation80_spill] sm:$0xff] %v14863_v47  ;;  %10992 = vmatmul.mubr.bf16.gmra.mrb[76].mxu1 %v14863_v47  ;;  %v6418_v32 = vor.u32 %v6417_v55, %v6414_v23  ;;  %v5381_v46 = vrot.slane %v5379_v63, 4  ;;  %v5386_v13 = vrot.slane %v5384_v15, 3  ;;  %v6059_v12 = vrot.slane %v5926_v45, 4  ;;  %v6225_v23 = vld [vmem:[#allocation2 + $0xc0] sm:$0xf0] }
 0x439   :  { %v5389_v59 = vrot.slane %v5387_v6, 4  ;;  %v6421_v8 = vshrl.u32 %v6221_v25, 16  ;;  %v6424_v58 = vshll.u32 %v6221_v25, 16  ;;  %v6429_v60 = vshrl.u32 %v6222_v20, 16  ;;  %8043 = vmatpush1.bf16.msra.mxu1 %v11312_v57  ;;  %v11315_v25 = vld [vmem:[%s17653_s2 + $0x40] sm:$0xff]  }
 0x43a   :  { %v14870_v0 = vsel %vm1377_vm0, %v6410_v41, %v6418_v32  ;;  %v5382_v31 = vor.u32 %v5381_v46, %v5378_v40  ;;  %v14873_v49 = vsel %vm1152_vm1, %v6058_v56, %v6059_v12  ;;  %v6432_v39 = vshll.u32 %v6222_v20, 16  ;;  %8044 = vmatprep.subr.bf16.mxu1 %v18571_v14  ;;  %v6226_v15 = vld [vmem:[#allocation2 + $0xc8] sm:$0x1f] }
 0x43b   :  { %18581 = vst [vmem:[#allocation81_spill] sm:$0xff] %v14870_v0  ;;  %18582 = vst [vmem:[#allocation82_spill] sm:$0xff] %v14873_v49  ;;  %10995 = vmatprep.mubr.bf16.mxu1 %v14870_v0  ;;  %v5390_v42 = vor.u32 %v5389_v59, %v5386_v13  ;;  %v6423_v17 = vrot.slane %v6421_v8, 4  ;;  %v6426_v36 = vrot.slane %v6424_v58, 5  ;;  %v6431_v37 = vrot.slane %v6429_v60, 4 }
 0x43c   :  { %v6434_v21 = vrot.slane %v6432_v39, 5  ;;  %v6438_v1 = vshrl.u32 %v6223_v9, 16  ;;  %v6441_v29 = vshll.u32 %v6223_v9, 16  ;;  %v6446_v35 = vshrl.u32 %v6224_v62, 16  ;;  %v6227_v9 = vld [vmem:[#allocation2 + $0xd0] sm:$0xf0] }
 0x43d   :  { %v14878_v10 = vsel %vm414_vm2, %v5382_v31, %v5390_v42  ;;  %v6427_v44 = vor.u32 %v6426_v36, %v6423_v17  ;;  %v6449_v54 = vshll.u32 %v6224_v62, 16  ;;  %v5393_v2 = vshrl.u32 %v5253_v51, 16  ;;  %8045 = vmatpush1.bf16.msra.mxu1 %v11313_v7  ;;  %v11316_v7 = vld [vmem:[%s17653_s2 + $0x48] sm:$0xff]   ;;  %v6228_v62 = vld [vmem:[#allocation2 + $0xd8] sm:$0x1f] }
 0x43e   :  { %18583 = vst [vmem:[#allocation83_spill] sm:$0xff] %v14878_v10  ;;  %7373 = vmatmul.mubr.bf16.gmra.mrb[16].mxu0 %v14878_v10  ;;  %v6435_v45 = vor.u32 %v6434_v21, %v6431_v37  ;;  %v6440_v16 = vrot.slane %v6438_v1, 4  ;;  %v6443_v48 = vrot.slane %v6441_v29, 5  ;;  %v6448_v3 = vrot.slane %v6446_v35, 4  ;;  %8046 = vmatprep.subr.bf16.mxu1 %v18571_v14  ;;  %v5255_v17 = vld [vmem:[#allocation2 + $0x70] sm:$0xf8] }
 0x43f   :  { %7380 = vmatprep.mubr.bf16.mxu0 %v14873_v49  ;;  %v6451_v57 = vrot.slane %v6449_v54, 5  ;;  %v5395_v55 = vrot.slane %v5393_v2, 3  ;;  %v5396_v40 = vshll.u32 %v5253_v51, 16  ;;  %v5401_v63 = vshrl.u32 %v5254_v53, 16  ;;  %v5256_v54 = vld [vmem:[#allocation2 + $0x78] sm:$0xf] }
 0x440   :  { %v14887_v20 = vsel %vm1377_vm0, %v6427_v44, %v6435_v45  ;;  %v6444_v41 = vor.u32 %v6443_v48, %v6440_v16  ;;  %v5404_v6 = vshll.u32 %v5254_v53, 16  ;;  %v6061_v56 = vrot.slane %v5927_v33, 4  ;;  %v5929_v16 = vld [vmem:[#allocation2 + $0x80] sm:$0xf0]  ;;  %v5930_v48 = vld [vmem:[#allocation2 + $0x88] sm:$0xf] }
 0x441   :  { %18584 = vst [vmem:[#allocation84_spill] sm:$0xff] %v14887_v20  ;;  %10996 = vmatmul.mubr.bf16.gmra.mrb[80].mxu1 %v14887_v20  ;;  %v6452_v32 = vor.u32 %v6451_v57, %v6448_v3  ;;  %v5398_v46 = vrot.slane %v5396_v40, 4  ;;  %v5403_v13 = vrot.slane %v5401_v63, 3  ;;  %v6062_v12 = vrot.slane %v5928_v11, 4  ;;  %v11317_v40 = vld [vmem:[%s17653_s2 + $0x50] sm:$0xff]  }
 0x442   :  { %v5406_v59 = vrot.slane %v5404_v6, 4  ;;  %v6455_v8 = vshrl.u32 %v6225_v23, 16  ;;  %v6458_v58 = vshll.u32 %v6225_v23, 16  ;;  %v6463_v60 = vshrl.u32 %v6226_v15, 16  ;;  %8047 = vmatpush1.bf16.msra.mxu1 %v11315_v25 }
 0x443   :  { %v14894_v31 = vsel %vm1377_vm0, %v6444_v41, %v6452_v32  ;;  %v5399_v39 = vor.u32 %v5398_v46, %v5395_v55  ;;  %v14897_v51 = vsel %vm1152_vm1, %v6061_v56, %v6062_v12  ;;  %v6466_v42 = vshll.u32 %v6226_v15, 16  ;;  %8048 = vmatprep.subr.bf16.mxu1 %v18571_v14  ;;  %v6229_v55 = vld [vmem:[#allocation2 + $0xe0] sm:$0xf0]  ;;  %v6230_v56 = vld [vmem:[#allocation2 + $0xe8] sm:$0x1f] }
 0x444   :  { %18585 = vst [vmem:[#allocation85_spill] sm:$0xff] %v14894_v31  ;;  %18586 = vst [vmem:[#allocation55_spill] sm:$0xff] %v14897_v51  ;;  %10999 = vmatprep.mubr.bf16.mxu1 %v14894_v31  ;;  %v5407_v36 = vor.u32 %v5406_v59, %v5403_v13  ;;  %v6457_v37 = vrot.slane %v6455_v8, 4  ;;  %v6460_v21 = vrot.slane %v6458_v58, 5  ;;  %v6465_v1 = vrot.slane %v6463_v60, 4 }
 0x445   :  { %v6468_v29 = vrot.slane %v6466_v42, 5  ;;  %v6472_v35 = vshrl.u32 %v6227_v9, 16  ;;  %v6475_v53 = vshll.u32 %v6227_v9, 16  ;;  %v6480_v44 = vshrl.u32 %v6228_v62, 16  ;;  %v11318_v9 = vld [vmem:[%s17653_s2 + $0x58] sm:$0xff]  }
 0x446   :  { %v14902_v2 = vsel %vm414_vm2, %v5399_v39, %v5407_v36  ;;  %v6461_v33 = vor.u32 %v6460_v21, %v6457_v37  ;;  %v6483_v11 = vshll.u32 %v6228_v62, 16  ;;  %v5410_v45 = vshrl.u32 %v5255_v17, 16  ;;  %8049 = vmatpush1.bf16.msra.mxu1 %v11316_v7  ;;  %v6231_v60 = vld [vmem:[#allocation2 + $0xf0] sm:$0xf0]  ;;  %v11324_v62 = vld [vmem:[%s17653_s2 + $0xa8] sm:$0xff]  }
 0x447   :  { %18587 = vst [vmem:[#allocation14_spill] sm:$0xff] %v14902_v2  ;;  %7381 = vmatmul.mubr.bf16.gmra.mrb[20].mxu0 %v14902_v2  ;;  %v6469_v3 = vor.u32 %v6468_v29, %v6465_v1  ;;  %v6474_v23 = vrot.slane %v6472_v35, 4  ;;  %v6477_v25 = vrot.slane %v6475_v53, 5  ;;  %v6482_v57 = vrot.slane %v6480_v44, 4  ;;  %8050 = vmatprep.subr.bf16.mxu1 %v18571_v14  ;;  %v6232_v37 = vld [vmem:[#allocation2 + $0xf8] sm:$0x1f] }
 0x448   :  { %7388 = vmatprep.mubr.bf16.mxu0 %v14897_v51  ;;  %v6485_v63 = vrot.slane %v6483_v11, 5  ;;  %v5412_v15 = vrot.slane %v5410_v45, 3  ;;  %v5413_v41 = vshll.u32 %v5255_v17, 16  ;;  %v5418_v6 = vshrl.u32 %v5256_v54, 16  ;;  %v5257_v53 = vld [vmem:[#allocation2 + $0x80] sm:$0xf8]  ;;  %11053 = vmatprep.subr.bf16.mxu0 %v11324_v62 }
 0x449   :  { %v14911_v32 = vsel %vm1377_vm0, %v6461_v33, %v6469_v3  ;;  %v6478_v46 = vor.u32 %v6477_v25, %v6474_v23  ;;  %v5421_v13 = vshll.u32 %v5256_v54, 16  ;;  %v6064_v12 = vrot.slane %v5929_v16, 4  ;;  %11054 = vmatpush3.bf16.msra.mxu0 %v11324_v62  ;;  %v5258_v23 = vld [vmem:[#allocation2 + $0x88] sm:$0xf] }
 0x44a   :  { %18588 = vst [vmem:[#allocation86_spill] sm:$0xff] %v14911_v32  ;;  %11000 = vmatmul.mubr.bf16.gmra.mrb[84].mxu1 %v14911_v32  ;;  %v6486_v7 = vor.u32 %v6485_v63, %v6482_v57  ;;  %v5415_v59 = vrot.slane %v5413_v41, 4  ;;  %v5420_v8 = vrot.slane %v5418_v6, 3  ;;  %v6065_v58 = vrot.slane %v5930_v48, 4  ;;  %v5931_v63 = vld [vmem:[#allocation2 + $0x90] sm:$0xf0] }
 0x44b   :  { %v5423_v39 = vrot.slane %v5421_v13, 4  ;;  %v6489_v42 = vshrl.u32 %v6229_v55, 16  ;;  %v6492_v17 = vshll.u32 %v6229_v55, 16  ;;  %v6497_v36 = vshrl.u32 %v6230_v56, 16  ;;  %8051 = vmatpush1.bf16.msra.mxu1 %v11317_v40  ;;  %v6233_v13 = vld [vmem:[#allocation2 + $0x100] sm:$0xf0] }
 0x44c   :  { %v14921_v21 = vsel %vm1377_vm0, %v6478_v46, %v6486_v7  ;;  %v5416_v1 = vor.u32 %v5415_v59, %v5412_v15  ;;  %v14924_v29 = vsel %vm1152_vm1, %v6064_v12, %v6065_v58  ;;  %v6500_v35 = vshll.u32 %v6230_v56, 16  ;;  %8052 = vmatprep.subr.bf16.mxu1 %v18571_v14  ;;  %v5932_v15 = vld [vmem:[#allocation2 + $0x98] sm:$0xf]  ;;  %v11319_v12 = vld [vmem:[%s17653_s2 + $0x60] sm:$0xff]  }
 0x44d   :  { %18589 = vst [vmem:[#allocation87_spill] sm:$0xff] %v14921_v21  ;;  %18590 = vst [vmem:[#allocation19_spill] sm:$0xff] %v14924_v29  ;;  %11003 = vmatprep.mubr.bf16.mxu1 %v14921_v21  ;;  %v5424_v44 = vor.u32 %v5423_v39, %v5420_v8  ;;  %v6491_v54 = vrot.slane %v6489_v42, 4  ;;  %v6494_v33 = vrot.slane %v6492_v17, 5  ;;  %v6499_v11 = vrot.slane %v6497_v36, 4 }
 0x44e   :  { %v6502_v45 = vrot.slane %v6500_v35, 5  ;;  %v6506_v16 = vshrl.u32 %v6231_v60, 16  ;;  %v6509_v48 = vshll.u32 %v6231_v60, 16  ;;  %v6514_v3 = vshrl.u32 %v6232_v37, 16  ;;  %v6235_v35 = vld [vmem:[#allocation2 + $0x130] sm:$0xf0] }
 0x44f   :  { %v14929_v25 = vsel %vm414_vm2, %v5416_v1, %v5424_v44  ;;  %v6495_v57 = vor.u32 %v6494_v33, %v6491_v54  ;;  %v6517_v55 = vshll.u32 %v6232_v37, 16  ;;  %v5427_v40 = vshrl.u32 %v5257_v53, 16  ;;  %8053 = vmatpush1.bf16.msra.mxu1 %v11318_v9  ;;  %v6234_v9 = vld [vmem:[#allocation2 + $0x108] sm:$0x1f] }
 0x450   :  { %18591 = vst [vmem:[#allocation56_spill] sm:$0xff] %v14929_v25  ;;  %7389 = vmatmul.mubr.bf16.gmra.mrb[24].mxu0 %v14929_v25  ;;  %v6503_v41 = vor.u32 %v6502_v45, %v6499_v11  ;;  %v6508_v6 = vrot.slane %v6506_v16, 4  ;;  %v6511_v56 = vrot.slane %v6509_v48, 5  ;;  %v6516_v46 = vrot.slane %v6514_v3, 4  ;;  %8054 = vmatprep.subr.bf16.mxu1 %v18571_v14  ;;  %v11320_v44 = vld [vmem:[%s17653_s2 + $0x68] sm:$0xff]  }
 0x451   :  { %7396 = vmatprep.mubr.bf16.mxu0 %v14924_v29  ;;  %v6519_v7 = vrot.slane %v6517_v55, 5  ;;  %v5429_v59 = vrot.slane %v5427_v40, 3  ;;  %v5430_v8 = vshll.u32 %v5257_v53, 16  ;;  %v5435_v58 = vshrl.u32 %v5258_v23, 16  ;;  %v6236_v45 = vld [vmem:[#allocation2 + $0x138] sm:$0x1f] }
 0x452   :  { %v14938_v60 = vsel %vm1377_vm0, %v6495_v57, %v6503_v41  ;;  %v6512_v62 = vor.u32 %v6511_v56, %v6508_v6  ;;  %v5438_v39 = vshll.u32 %v5258_v23, 16  ;;  %v6067_v42 = vrot.slane %v5931_v63, 4  ;;  %v5259_v57 = vld [vmem:[#allocation2 + $0x90] sm:$0xf8] }
 0x453   :  { %18592 = vst [vmem:[#allocation88_spill] sm:$0xff] %v14938_v60  ;;  %11004 = vmatmul.mubr.bf16.gmra.mrb[88].mxu1 %v14938_v60  ;;  %v6520_v17 = vor.u32 %v6519_v7, %v6516_v46  ;;  %v5432_v36 = vrot.slane %v5430_v8, 4  ;;  %v5437_v37 = vrot.slane %v5435_v58, 3  ;;  %v6068_v1 = vrot.slane %v5932_v15, 4  ;;  %v5933_v58 = vld [vmem:[#allocation2 + $0xa0] sm:$0xf0] }
 0x454   :  { %v5440_v53 = vrot.slane %v5438_v39, 4  ;;  %v6523_v54 = vshrl.u32 %v6233_v13, 16  ;;  %v6526_v33 = vshll.u32 %v6233_v13, 16  ;;  %v6531_v11 = vshrl.u32 %v6234_v9, 16  ;;  %8055 = vmatpush1.bf16.msra.mxu1 %v11319_v12  ;;  %v5260_v13 = vld [vmem:[#allocation2 + $0x98] sm:$0xf] }
 0x455   :  { %v14945_v16 = vsel %vm1377_vm0, %v6512_v62, %v6520_v17  ;;  %v5433_v48 = vor.u32 %v5432_v36, %v5429_v59  ;;  %v14948_v3 = vsel %vm1152_vm1, %v6067_v42, %v6068_v1  ;;  %v6534_v23 = vshll.u32 %v6234_v9, 16  ;;  %8056 = vmatprep.subr.bf16.mxu1 %v18571_v14  ;;  %v5934_v9 = vld [vmem:[#allocation2 + $0xa8] sm:$0xf]  ;;  %v6237_v36 = vld [vmem:[#allocation2 + $0x140] sm:$0xf0] }
 0x456   :  { %18593 = vst [vmem:[#allocation89_spill] sm:$0xff] %v14945_v16  ;;  %18594 = vst [vmem:[#allocation22_spill] sm:$0xff] %v14948_v3  ;;  %11007 = vmatprep.mubr.bf16.mxu1 %v14945_v16  ;;  %v5441_v55 = vor.u32 %v5440_v53, %v5437_v37  ;;  %v6525_v40 = vrot.slane %v6523_v54, 4  ;;  %v6528_v63 = vrot.slane %v6526_v33, 5  ;;  %v6533_v15 = vrot.slane %v6531_v11, 4  ;;  %v11321_v37 = vld [vmem:[%s17653_s2 + $0x70] sm:$0xff]  }
 0x457   :  { %v6536_v41 = vrot.slane %v6534_v23, 5  ;;  %v6540_v6 = vshrl.u32 %v6235_v35, 16  ;;  %v6543_v56 = vshll.u32 %v6235_v35, 16  ;;  %v6548_v46 = vshrl.u32 %v6236_v45, 16  ;;  %v6248_v60 = vld [vmem:[#allocation2 + $0x198] sm:$0x1f] }
 0x458   :  { %v14953_v12 = vsel %vm414_vm2, %v5433_v48, %v5441_v55  ;;  %v6529_v7 = vor.u32 %v6528_v63, %v6525_v40  ;;  %v6551_v59 = vshll.u32 %v6236_v45, 16  ;;  %v5444_v8 = vshrl.u32 %v5259_v57, 16  ;;  %8057 = vmatpush1.bf16.msra.mxu1 %v11320_v44  ;;  %v6238_v44 = vld [vmem:[#allocation2 + $0x148] sm:$0x1f] }
 0x459   :  { %18595 = vst [vmem:[#allocation21_spill] sm:$0xff] %v14953_v12  ;;  %7397 = vmatmul.mubr.bf16.gmra.mrb[28].mxu0 %v14953_v12  ;;  %v6537_v62 = vor.u32 %v6536_v41, %v6533_v15  ;;  %v6542_v39 = vrot.slane %v6540_v6, 4  ;;  %v6545_v42 = vrot.slane %v6543_v56, 5  ;;  %v6550_v17 = vrot.slane %v6548_v46, 4  ;;  %8058 = vmatprep.subr.bf16.mxu1 %v18571_v14  ;;  %v6239_v15 = vld [vmem:[#allocation2 + $0x150] sm:$0xf0] }
 0x45a   :  { %7404 = vmatprep.mubr.bf16.mxu0 %v14948_v3  ;;  %v6553_v1 = vrot.slane %v6551_v59, 5  ;;  %v5446_v35 = vrot.slane %v5444_v8, 3  ;;  %v5447_v53 = vshll.u32 %v5259_v57, 16  ;;  %v5452_v54 = vshrl.u32 %v5260_v13, 16  ;;  %v11322_v41 = vld [vmem:[%s17653_s2 + $0x78] sm:$0xff]  }
 0x45b   :  { %v14962_v33 = vsel %vm1377_vm0, %v6529_v7, %v6537_v62  ;;  %v6546_v11 = vor.u32 %v6545_v42, %v6542_v39  ;;  %v5455_v45 = vshll.u32 %v5260_v13, 16  ;;  %v6070_v48 = vrot.slane %v5933_v58, 4  ;;  %v6240_v7 = vld [vmem:[#allocation2 + $0x158] sm:$0x1f] }
 0x45c   :  { %18596 = vst [vmem:[#allocation90_spill] sm:$0xff] %v14962_v33  ;;  %11008 = vmatmul.mubr.bf16.gmra.mrb[92].mxu1 %v14962_v33  ;;  %v6554_v23 = vor.u32 %v6553_v1, %v6550_v17  ;;  %v5449_v55 = vrot.slane %v5447_v53, 4  ;;  %v5454_v40 = vrot.slane %v5452_v54, 3  ;;  %v6071_v63 = vrot.slane %v5934_v9, 4  ;;  %v5261_v9 = vld [vmem:[#allocation2 + $0xa0] sm:$0xf8] }
 0x45d   :  { %v5457_v57 = vrot.slane %v5455_v45, 4  ;;  %v6557_v6 = vshrl.u32 %v6237_v36, 16  ;;  %v6560_v56 = vshll.u32 %v6237_v36, 16  ;;  %v6565_v46 = vshrl.u32 %v6238_v44, 16  ;;  %8059 = vmatpush1.bf16.msra.mxu1 %v11321_v37  ;;  %v5262_v54 = vld [vmem:[#allocation2 + $0xa8] sm:$0xf] }
 0x45e   :  { %v14969_v13 = vsel %vm1377_vm0, %v6546_v11, %v6554_v23  ;;  %v5450_v59 = vor.u32 %v5449_v55, %v5446_v35  ;;  %v14972_v8 = vsel %vm1152_vm1, %v6070_v48, %v6071_v63  ;;  %v6568_v58 = vshll.u32 %v6238_v44, 16  ;;  %8060 = vmatprep.subr.bf16.mxu1 %v18571_v14  ;;  %v5935_v48 = vld [vmem:[#allocation2 + $0xb0] sm:$0xf0]  ;;  %v5936_v23 = vld [vmem:[#allocation2 + $0xb8] sm:$0xf] }
 0x45f   :  { %18597 = vst [vmem:[#allocation91_spill] sm:$0xff] %v14969_v13  ;;  %18598 = vst [vmem:[#allocation70_spill] sm:$0xff] %v14972_v8  ;;  %11011 = vmatprep.mubr.bf16.mxu1 %v14969_v13  ;;  %v5458_v62 = vor.u32 %v5457_v57, %v5454_v40  ;;  %v6559_v39 = vrot.slane %v6557_v6, 4  ;;  %v6562_v42 = vrot.slane %v6560_v56, 5  ;;  %v6567_v17 = vrot.slane %v6565_v46, 4 }
 0x460   :  { %v6570_v36 = vrot.slane %v6568_v58, 5  ;;  %v6574_v1 = vshrl.u32 %v6239_v15, 16  ;;  %v6577_v37 = vshll.u32 %v6239_v15, 16  ;;  %v6582_v53 = vshrl.u32 %v6240_v7, 16  ;;  %v6241_v6 = vld [vmem:[#allocation2 + $0x160] sm:$0xf0] }
 0x461   :  { %v14977_v35 = vsel %vm414_vm2, %v5450_v59, %v5458_v62  ;;  %v6563_v11 = vor.u32 %v6562_v42, %v6559_v39  ;;  %v6585_v45 = vshll.u32 %v6240_v7, 16  ;;  %v5461_v44 = vshrl.u32 %v5261_v9, 16  ;;  %8061 = vmatpush1.bf16.msra.mxu1 %v11322_v41  ;;  %v6242_v58 = vld [vmem:[#allocation2 + $0x168] sm:$0x1f] }
 0x462   :  { %18599 = vst [vmem:[#allocation7_spill] sm:$0xff] %v14977_v35  ;;  %7405 = vmatmul.mubr.bf16.gmra.mrb[32].mxu0 %v14977_v35  ;;  %v6571_v55 = vor.u32 %v6570_v36, %v6567_v17  ;;  %v6576_v40 = vrot.slane %v6574_v1, 4  ;;  %v6579_v63 = vrot.slane %v6577_v37, 5  ;;  %v6584_v57 = vrot.slane %v6582_v53, 4  ;;  %v6243_v37 = vld [vmem:[#allocation2 + $0x170] sm:$0xf0] }
 0x463   :  { %7412 = vmatprep.mubr.bf16.mxu0 %v14972_v8  ;;  %v6587_v15 = vrot.slane %v6585_v45, 5  ;;  %v5463_v56 = vrot.slane %v5461_v44, 3  ;;  %v5464_v46 = vshll.u32 %v5261_v9, 16  ;;  %v5469_v59 = vshrl.u32 %v5262_v54, 16  ;;  %v6244_v9 = vld [vmem:[#allocation2 + $0x178] sm:$0x1f] }
 0x464   :  { %v14982_v7 = vsel %vm1377_vm0, %v6563_v11, %v6571_v55  ;;  %v6580_v62 = vor.u32 %v6579_v63, %v6576_v40  ;;  %v5472_v39 = vshll.u32 %v5262_v54, 16  ;;  %v6073_v41 = vrot.slane %v5935_v48, 4  ;;  %v5263_v48 = vld [vmem:[#allocation2 + $0xb0] sm:$0xf8] }
 0x465   :  { %18600 = vst [vmem:[#allocation93_spill] sm:$0xff] %v14982_v7  ;;  %11012 = vmatmul.mubr.bf16.gmra.mrb[96].mxu1 %v14982_v7  ;;  %v6588_v42 = vor.u32 %v6587_v15, %v6584_v57  ;;  %v5466_v17 = vrot.slane %v5464_v46, 4  ;;  %v5471_v36 = vrot.slane %v5469_v59, 3  ;;  %v6074_v1 = vrot.slane %v5936_v23, 4  ;;  %v6247_v7 = vld [vmem:[#allocation2 + $0x190] sm:$0xf0] }
 0x466   :  { %v5474_v53 = vrot.slane %v5472_v39, 4  ;;  %v6591_v33 = vshrl.u32 %v6241_v6, 16  ;;  %v6594_v45 = vshll.u32 %v6241_v6, 16  ;;  %v6599_v44 = vshrl.u32 %v6242_v58, 16  ;;  %v5264_v39 = vld [vmem:[#allocation2 + $0xb8] sm:$0xf] }
 0x467   :  { %v14986_v13 = vsel %vm1377_vm0, %v6580_v62, %v6588_v42  ;;  %v5467_v11 = vor.u32 %v5466_v17, %v5463_v56  ;;  %v14989_v55 = vsel %vm1152_vm1, %v6073_v41, %v6074_v1  ;;  %v6602_v54 = vshll.u32 %v6242_v58, 16  ;;  %v5937_v17 = vld [vmem:[#allocation2 + $0xc0] sm:$0xf0]  ;;  %v5938_v58 = vld [vmem:[#allocation2 + $0xc8] sm:$0xf] }
 0x468   :  { %18601 = vst [vmem:[#allocation95_spill] sm:$0xff] %v14986_v13  ;;  %18602 = vst [vmem:[#allocation97_spill] sm:$0xff] %v14989_v55  ;;  %11015 = vmatprep.mubr.bf16.mxu1 %v14986_v13  ;;  %v5475_v40 = vor.u32 %v5474_v53, %v5471_v36  ;;  %v6593_v63 = vrot.slane %v6591_v33, 4  ;;  %v6596_v23 = vrot.slane %v6594_v45, 5  ;;  %v6601_v57 = vrot.slane %v6599_v44, 4 }
 0x469   :  { %v6604_v15 = vrot.slane %v6602_v54, 5  ;;  %v6608_v46 = vshrl.u32 %v6243_v37, 16  ;;  %v6611_v6 = vshll.u32 %v6243_v37, 16  ;;  %v6616_v59 = vshrl.u32 %v6244_v9, 16  ;;  %v6245_v45 = vld [vmem:[#allocation2 + $0x180] sm:$0xf0] }
 0x46a   :  { %v14993_v62 = vsel %vm414_vm2, %v5467_v11, %v5475_v40  ;;  %v6597_v56 = vor.u32 %v6596_v23, %v6593_v63  ;;  %v6619_v42 = vshll.u32 %v6244_v9, 16  ;;  %v5478_v41 = vshrl.u32 %v5263_v48, 16  ;;  %v11325_v37 = vld [vmem:[%s17653_s2 + $0xb0] sm:$0xff]   ;;  %v6246_v40 = vld [vmem:[#allocation2 + $0x188] sm:$0x1f] }
 0x46b   :  { %18603 = vst [vmem:[#allocation99_spill] sm:$0xff] %v14993_v62  ;;  %7413 = vmatmul.mubr.bf16.gmra.mrb[36].mxu0 %v14993_v62  ;;  %v6605_v1 = vor.u32 %v6604_v15, %v6601_v57  ;;  %v6610_v36 = vrot.slane %v6608_v46, 4  ;;  %v6613_v33 = vrot.slane %v6611_v6, 5  ;;  %v6618_v53 = vrot.slane %v6616_v59, 4  ;;  %11055 = vmatprep.subr.bf16.mxu0 %v11325_v37 }
 0x46c   :  { %7420 = vmatprep.mubr.bf16.mxu0 %v14989_v55  ;;  %v6621_v44 = vrot.slane %v6619_v42, 5  ;;  %v5480_v11 = vrot.slane %v5478_v41, 3  ;;  %v5481_v54 = vshll.u32 %v5263_v48, 16  ;;  %v5486_v9 = vshrl.u32 %v5264_v39, 16  ;;  %11056 = vmatpush3.bf16.msra.mxu0 %v11325_v37 }
 0x46d   :  { %v15001_v63 = vsel %vm1377_vm0, %v6597_v56, %v6605_v1  ;;  %v6614_v23 = vor.u32 %v6613_v33, %v6610_v36  ;;  %v5489_v57 = vshll.u32 %v5264_v39, 16  ;;  %v6076_v15 = vrot.slane %v5937_v17, 4  ;;  %v5265_v36 = vld [vmem:[#allocation2 + $0xc0] sm:$0xf8] }
 0x46e   :  { %18604 = vst [vmem:[#allocation100_spill] sm:$0xff] %v15001_v63  ;;  %11016 = vmatmul.mubr.bf16.gmra.mrb[100].mxu1 %v15001_v63  ;;  %v6622_v46 = vor.u32 %v6621_v44, %v6618_v53  ;;  %v5483_v6 = vrot.slane %v5481_v54, 4  ;;  %v5488_v59 = vrot.slane %v5486_v9, 3  ;;  %v6077_v13 = vrot.slane %v5938_v58, 4 }
 0x46f   :  { %v5491_v42 = vrot.slane %v5489_v57, 4  ;;  %v6625_v41 = vshrl.u32 %v6245_v45, 16  ;;  %v6628_v48 = vshll.u32 %v6245_v45, 16  ;;  %v6633_v16 = vshrl.u32 %v6246_v40, 16  ;;  %v5266_v57 = vld [vmem:[#allocation2 + $0xc8] sm:$0xf] }
 0x470   :  { %v15005_v56 = vsel %vm1377_vm0, %v6614_v23, %v6622_v46  ;;  %v5484_v1 = vor.u32 %v5483_v6, %v5480_v11  ;;  %v15008_v39 = vsel %vm1152_vm1, %v6076_v15, %v6077_v13  ;;  %v6636_v17 = vshll.u32 %v6246_v40, 16  ;;  %v5939_v15 = vld [vmem:[#allocation2 + $0xd0] sm:$0xf0]  ;;  %v5940_v40 = vld [vmem:[#allocation2 + $0xd8] sm:$0xf] }
 0x471   :  { %18605 = vst [vmem:[#allocation102_spill] sm:$0xff] %v15005_v56  ;;  %18606 = vst [vmem:[#allocation104_spill] sm:$0xff] %v15008_v39  ;;  %11019 = vmatprep.mubr.bf16.mxu1 %v15005_v56  ;;  %v5492_v33 = vor.u32 %v5491_v42, %v5488_v59  ;;  %v6627_v58 = vrot.slane %v6625_v41, 4  ;;  %v6630_v53 = vrot.slane %v6628_v48, 5  ;;  %v6635_v37 = vrot.slane %v6633_v16, 4 }
 0x472   :  { %v6638_v44 = vrot.slane %v6636_v17, 5  ;;  %v6642_v54 = vshrl.u32 %v6247_v7, 16  ;;  %v6645_v45 = vshll.u32 %v6247_v7, 16  ;;  %v6650_v9 = vshrl.u32 %v6248_v60, 16  ;;  %v6249_v16 = vld [vmem:[#allocation2 + $0x1a0] sm:$0xf0] }
 0x473   :  { %v15012_v23 = vsel %vm414_vm2, %v5484_v1, %v5492_v33  ;;  %v6631_v11 = vor.u32 %v6630_v53, %v6627_v58  ;;  %v6653_v46 = vshll.u32 %v6248_v60, 16  ;;  %v5495_v13 = vshrl.u32 %v5265_v36, 16  ;;  %v6250_v1 = vld [vmem:[#allocation2 + $0x1a8] sm:$0x1f] }
 0x474   :  { %18607 = vst [vmem:[#allocation105_spill] sm:$0xff] %v15012_v23  ;;  %7421 = vmatmul.mubr.bf16.gmra.mrb[40].mxu0 %v15012_v23  ;;  %v6639_v6 = vor.u32 %v6638_v44, %v6635_v37  ;;  %v6644_v59 = vrot.slane %v6642_v54, 4  ;;  %v6647_v42 = vrot.slane %v6645_v45, 5  ;;  %v6652_v41 = vrot.slane %v6650_v9, 4  ;;  %v6251_v9 = vld [vmem:[#allocation2 + $0x1b0] sm:$0xf0] }
 0x475   :  { %7428 = vmatprep.mubr.bf16.mxu0 %v15008_v39  ;;  %v6655_v7 = vrot.slane %v6653_v46, 5  ;;  %v5497_v48 = vrot.slane %v5495_v13, 3  ;;  %v5498_v17 = vshll.u32 %v5265_v36, 16  ;;  %v5503_v56 = vshrl.u32 %v5266_v57, 16  ;;  %v6252_v36 = vld [vmem:[#allocation2 + $0x1b8] sm:$0x1f] }
 0x476   :  { %v15017_v33 = vsel %vm1377_vm0, %v6631_v11, %v6639_v6  ;;  %v6648_v60 = vor.u32 %v6647_v42, %v6644_v59  ;;  %v5506_v58 = vshll.u32 %v5266_v57, 16  ;;  %v6079_v53 = vrot.slane %v5939_v15, 4  ;;  %v5267_v15 = vld [vmem:[#allocation2 + $0xd0] sm:$0xf8] }
 0x477   :  { %18608 = vst [vmem:[#allocation69_spill] sm:$0xff] %v15017_v33  ;;  %11020 = vmatmul.mubr.bf16.gmra.mrb[104].mxu1 %v15017_v33  ;;  %v6656_v37 = vor.u32 %v6655_v7, %v6652_v41  ;;  %v5500_v44 = vrot.slane %v5498_v17, 4  ;;  %v5505_v54 = vrot.slane %v5503_v56, 3  ;;  %v6080_v45 = vrot.slane %v5940_v40, 4 }
 0x478   :  { %v5508_v63 = vrot.slane %v5506_v58, 4  ;;  %v6659_v21 = vshrl.u32 %v6249_v16, 16  ;;  %v6662_v46 = vshll.u32 %v6249_v16, 16  ;;  %v6667_v13 = vshrl.u32 %v6250_v1, 16  ;;  %v5268_v58 = vld [vmem:[#allocation2 + $0xd8] sm:$0xf] }
 0x479   :  { %v15021_v32 = vsel %vm1377_vm0, %v6648_v60, %v6656_v37  ;;  %v5501_v11 = vor.u32 %v5500_v44, %v5497_v48  ;;  %v15024_v6 = vsel %vm1152_vm1, %v6079_v53, %v6080_v45  ;;  %v6670_v57 = vshll.u32 %v6250_v1, 16  ;;  %v5941_v44 = vld [vmem:[#allocation2 + $0xe0] sm:$0xf0]  ;;  %v5942_v1 = vld [vmem:[#allocation2 + $0xe8] sm:$0xf] }
 0x47a   :  { %18609 = vst [vmem:[#allocation25_spill] sm:$0xff] %v15021_v32  ;;  %18610 = vst [vmem:[#allocation24_spill] sm:$0xff] %v15024_v6  ;;  %11023 = vmatprep.mubr.bf16.mxu1 %v15021_v32  ;;  %v5509_v59 = vor.u32 %v5508_v63, %v5505_v54  ;;  %v6661_v56 = vrot.slane %v6659_v21, 4  ;;  %v6664_v40 = vrot.slane %v6662_v46, 5  ;;  %v6669_v42 = vrot.slane %v6667_v13, 4 }
 0x47b   :  { %v6672_v41 = vrot.slane %v6670_v57, 5  ;;  %v6676_v7 = vshrl.u32 %v6251_v9, 16  ;;  %v6679_v16 = vshll.u32 %v6251_v9, 16  ;;  %v6684_v17 = vshrl.u32 %v6252_v36, 16  ;;  %v6253_v46 = vld [vmem:[#allocation2 + $0x1c0] sm:$0xf0] }
 0x47c   :  { %v15028_v60 = vsel %vm414_vm2, %v5501_v11, %v5509_v59  ;;  %v6665_v48 = vor.u32 %v6664_v40, %v6661_v56  ;;  %v6687_v37 = vshll.u32 %v6252_v36, 16  ;;  %v5512_v53 = vshrl.u32 %v5267_v15, 16  ;;  %v6254_v11 = vld [vmem:[#allocation2 + $0x1c8] sm:$0x1f] }
 0x47d   :  { %18611 = vst [vmem:[#allocation8_spill] sm:$0xff] %v15028_v60  ;;  %7429 = vmatmul.mubr.bf16.gmra.mrb[44].mxu0 %v15028_v60  ;;  %v6673_v45 = vor.u32 %v6672_v41, %v6669_v42  ;;  %v6678_v63 = vrot.slane %v6676_v7, 4  ;;  %v6681_v21 = vrot.slane %v6679_v16, 5  ;;  %v6686_v54 = vrot.slane %v6684_v17, 4  ;;  %v6255_v17 = vld [vmem:[#allocation2 + $0x1d0] sm:$0xf0] }
 0x47e   :  { %7436 = vmatprep.mubr.bf16.mxu0 %v15024_v6  ;;  %v6689_v9 = vrot.slane %v6687_v37, 5  ;;  %v5514_v13 = vrot.slane %v5512_v53, 3  ;;  %v5515_v57 = vshll.u32 %v5267_v15, 16  ;;  %v5520_v32 = vshrl.u32 %v5268_v58, 16  ;;  %v6256_v15 = vld [vmem:[#allocation2 + $0x1d8] sm:$0x1f] }
 0x47f   :  { %v15033_v59 = vsel %vm1377_vm0, %v6665_v48, %v6673_v45  ;;  %v6682_v36 = vor.u32 %v6681_v21, %v6678_v63  ;;  %v5523_v56 = vshll.u32 %v5268_v58, 16  ;;  %v6082_v40 = vrot.slane %v5941_v44, 4  ;;  %v5269_v44 = vld [vmem:[#allocation2 + $0xe0] sm:$0xf8] }
 0x480   :  { %18612 = vst [vmem:[#allocation9_spill] sm:$0xff] %v15033_v59  ;;  %11024 = vmatmul.mubr.bf16.gmra.mrb[108].mxu1 %v15033_v59  ;;  %v6690_v42 = vor.u32 %v6689_v9, %v6686_v54  ;;  %v5517_v41 = vrot.slane %v5515_v57, 4  ;;  %v5522_v7 = vrot.slane %v5520_v32, 3  ;;  %v6083_v16 = vrot.slane %v5942_v1, 4 }
 0x481   :  { %v5525_v33 = vrot.slane %v5523_v56, 4  ;;  %v6693_v31 = vshrl.u32 %v6253_v46, 16  ;;  %v6696_v37 = vshll.u32 %v6253_v46, 16  ;;  %v6701_v53 = vshrl.u32 %v6254_v11, 16  ;;  %v5270_v56 = vld [vmem:[#allocation2 + $0xe8] sm:$0xf] }
 0x482   :  { %v15037_v20 = vsel %vm1377_vm0, %v6682_v36, %v6690_v42  ;;  %v5518_v48 = vor.u32 %v5517_v41, %v5514_v13  ;;  %v15040_v45 = vsel %vm1152_vm1, %v6082_v40, %v6083_v16  ;;  %v6704_v58 = vshll.u32 %v6254_v11, 16  ;;  %v5943_v41 = vld [vmem:[#allocation2 + $0xf0] sm:$0xf0]  ;;  %v5944_v11 = vld [vmem:[#allocation2 + $0xf8] sm:$0xf] }
 0x483   :  { %18613 = vst [vmem:[#allocation10_spill] sm:$0xff] %v15037_v20  ;;  %18614 = vst [vmem:[#allocation31_spill] sm:$0xff] %v15040_v45  ;;  %11027 = vmatprep.mubr.bf16.mxu1 %v15037_v20  ;;  %v5526_v63 = vor.u32 %v5525_v33, %v5522_v7  ;;  %v6695_v32 = vrot.slane %v6693_v31, 4  ;;  %v6698_v1 = vrot.slane %v6696_v37, 5  ;;  %v6703_v21 = vrot.slane %v6701_v53, 4 }
 0x484   :  { %v6706_v54 = vrot.slane %v6704_v58, 5  ;;  %v6710_v9 = vshrl.u32 %v6255_v17, 16  ;;  %v6713_v46 = vshll.u32 %v6255_v17, 16  ;;  %v6718_v57 = vshrl.u32 %v6256_v15, 16  ;;  %v6257_v37 = vld [vmem:[#allocation2 + $0x1e0] sm:$0xf0] }
 0x485   :  { %v15044_v36 = vsel %vm414_vm2, %v5518_v48, %v5526_v63  ;;  %v6699_v13 = vor.u32 %v6698_v1, %v6695_v32  ;;  %v6721_v42 = vshll.u32 %v6256_v15, 16  ;;  %v5529_v40 = vshrl.u32 %v5269_v44, 16  ;;  %v6258_v48 = vld [vmem:[#allocation2 + $0x1e8] sm:$0x1f] }
 0x486   :  { %18615 = vst [vmem:[#allocation106_spill] sm:$0xff] %v15044_v36  ;;  %7437 = vmatmul.mubr.bf16.gmra.mrb[48].mxu0 %v15044_v36  ;;  %v6707_v16 = vor.u32 %v6706_v54, %v6703_v21  ;;  %v6712_v33 = vrot.slane %v6710_v9, 4  ;;  %v6715_v31 = vrot.slane %v6713_v46, 5  ;;  %v6720_v7 = vrot.slane %v6718_v57, 4  ;;  %v6259_v57 = vld [vmem:[#allocation2 + $0x1f0] sm:$0xf0] }
 0x487   :  { %7444 = vmatprep.mubr.bf16.mxu0 %v15040_v45  ;;  %v6723_v17 = vrot.slane %v6721_v42, 5  ;;  %v5531_v53 = vrot.slane %v5529_v40, 3  ;;  %v5532_v58 = vshll.u32 %v5269_v44, 16  ;;  %v5537_v20 = vshrl.u32 %v5270_v56, 16  ;;  %v11326_v42 = vld [vmem:[%s17653_s2 + $0xb8] sm:$0xff]  }
 0x488   :  { %v15049_v63 = vsel %vm1377_vm0, %v6699_v13, %v6707_v16  ;;  %v6716_v15 = vor.u32 %v6715_v31, %v6712_v33  ;;  %v5540_v32 = vshll.u32 %v5270_v56, 16  ;;  %v6085_v1 = vrot.slane %v5943_v41, 4  ;;  %v6260_v13 = vld [vmem:[#allocation2 + $0x1f8] sm:$0x1f]  ;;  %11057 = vmatprep.subr.bf16.mxu0 %v11326_v42 }
 0x489   :  { %18616 = vst [vmem:[#allocation30_spill] sm:$0xff] %v15049_v63  ;;  %11028 = vmatmul.mubr.bf16.gmra.mrb[112].mxu1 %v15049_v63  ;;  %v6724_v21 = vor.u32 %v6723_v17, %v6720_v7  ;;  %v5534_v54 = vrot.slane %v5532_v58, 4  ;;  %v5539_v9 = vrot.slane %v5537_v20, 3  ;;  %v6086_v46 = vrot.slane %v5944_v11, 4  ;;  %v5271_v20 = vld [vmem:[#allocation2 + $0xf0] sm:$0xf8]  ;;  %11058 = vmatpush3.bf16.msra.mxu0 %v11326_v42 }
 0x48a   :  { %v5542_v44 = vrot.slane %v5540_v32, 4  ;;  %v6727_v40 = vshrl.u32 %v6257_v37, 16  ;;  %v6730_v59 = vshll.u32 %v6257_v37, 16  ;;  %v6735_v0 = vshrl.u32 %v6258_v48, 16  ;;  %8897 = vmatprep.subr.bf16.mxu0 %v18571_v14 }
 0x48b   :  { %v15056_v16 = vsel %vm1377_vm0, %v6716_v15, %v6724_v21  ;;  %v5535_v56 = vor.u32 %v5534_v54, %v5531_v53  ;;  %v15059_v41 = vsel %vm1152_vm1, %v6085_v1, %v6086_v46  ;;  %v6738_v33 = vshll.u32 %v6258_v48, 16  ;;  %v5272_v15 = vld [vmem:[#allocation2 + $0xf8] sm:$0xf]  ;;  %v5945_v54 = vld [vmem:[#allocation2 + $0x100] sm:$0xf0] }
 0x48c   :  { %18617 = vst [vmem:[#allocation12_spill] sm:$0xff] %v15056_v16  ;;  %18618 = vst [vmem:[#allocation11_spill] sm:$0xff] %v15059_v41  ;;  %11031 = vmatprep.mubr.bf16.mxu1 %v15056_v16  ;;  %v5543_v11 = vor.u32 %v5542_v44, %v5539_v9  ;;  %v6729_v31 = vrot.slane %v6727_v40, 4  ;;  %v6732_v7 = vrot.slane %v6730_v59, 5  ;;  %v6737_v17 = vrot.slane %v6735_v0, 4 }
 0x48d   :  { %v6740_v37 = vrot.slane %v6738_v33, 5  ;;  %v6744_v58 = vshrl.u32 %v6259_v57, 16  ;;  %v6747_v32 = vshll.u32 %v6259_v57, 16  ;;  %v6752_v63 = vshrl.u32 %v6260_v13, 16  ;;  %v5946_v46 = vld [vmem:[#allocation2 + $0x108] sm:$0xf] }
 0x48e   :  { %v15064_v53 = vsel %vm414_vm2, %v5535_v56, %v5543_v11  ;;  %v6733_v48 = vor.u32 %v6732_v7, %v6729_v31  ;;  %v6755_v1 = vshll.u32 %v6260_v13, 16  ;;  %v5546_v21 = vshrl.u32 %v5271_v20, 16  ;;  %v6261_v44 = vld [vmem:[#allocation2 + $0x200] sm:$0xf0]  ;;  %v6262_v56 = vld [vmem:[#allocation2 + $0x208] sm:$0x1f] }
 0x48f   :  { %18619 = vst [vmem:[#allocation107_spill] sm:$0xff] %v15064_v53  ;;  %7445 = vmatmul.mubr.bf16.gmra.mrb[52].mxu0 %v15064_v53  ;;  %v6741_v59 = vor.u32 %v6740_v37, %v6737_v17  ;;  %v6746_v0 = vrot.slane %v6744_v58, 4  ;;  %v6749_v9 = vrot.slane %v6747_v32, 5  ;;  %v6754_v42 = vrot.slane %v6752_v63, 4  ;;  %v6263_v32 = vld [vmem:[#allocation2 + $0x210] sm:$0xf0] }
 0x490   :  { %7452 = vmatprep.mubr.bf16.mxu0 %v15059_v41  ;;  %v6757_v57 = vrot.slane %v6755_v1, 5  ;;  %v5548_v40 = vrot.slane %v5546_v21, 3  ;;  %v5549_v33 = vshll.u32 %v5271_v20, 16  ;;  %v5554_v16 = vshrl.u32 %v5272_v15, 16  ;;  %v6264_v20 = vld [vmem:[#allocation2 + $0x218] sm:$0x1f] }
 0x491   :  { %v15069_v11 = vsel %vm1377_vm0, %v6733_v48, %v6741_v59  ;;  %v6750_v13 = vor.u32 %v6749_v9, %v6746_v0  ;;  %v5557_v31 = vshll.u32 %v5272_v15, 16  ;;  %v6088_v7 = vrot.slane %v5945_v54, 4  ;;  %v5273_v54 = vld [vmem:[#allocation2 + $0x100] sm:$0xf8] }
 0x492   :  { %18620 = vst [vmem:[#allocation33_spill] sm:$0xff] %v15069_v11  ;;  %11032 = vmatmul.mubr.bf16.gmra.mrb[116].mxu1 %v15069_v11  ;;  %v6758_v17 = vor.u32 %v6757_v57, %v6754_v42  ;;  %v5551_v37 = vrot.slane %v5549_v33, 4  ;;  %v5556_v58 = vrot.slane %v5554_v16, 3  ;;  %v6089_v63 = vrot.slane %v5946_v46, 4 }
 0x493   :  { %v5559_v47 = vrot.slane %v5557_v31, 4  ;;  %v6761_v24 = vshrl.u32 %v6261_v44, 16  ;;  %v6764_v1 = vshll.u32 %v6261_v44, 16  ;;  %v6769_v21 = vshrl.u32 %v6262_v56, 16  ;;  %v5274_v31 = vld [vmem:[#allocation2 + $0x108] sm:$0xf] }
 0x494   :  { %v15073_v34 = vsel %vm1377_vm0, %v6750_v13, %v6758_v17  ;;  %v5552_v48 = vor.u32 %v5551_v37, %v5548_v40  ;;  %v15076_v59 = vsel %vm1152_vm1, %v6088_v7, %v6089_v63  ;;  %v6772_v15 = vshll.u32 %v6262_v56, 16  ;;  %v5947_v37 = vld [vmem:[#allocation2 + $0x130] sm:$0xf0]  ;;  %v5948_v56 = vld [vmem:[#allocation2 + $0x138] sm:$0xf] }
 0x495   :  { %18621 = vst [vmem:[#allocation108_spill] sm:$0xff] %v15073_v34  ;;  %18622 = vst [vmem:[#allocation32_spill] sm:$0xff] %v15076_v59  ;;  %11035 = vmatprep.mubr.bf16.mxu1 %v15073_v34  ;;  %v5560_v0 = vor.u32 %v5559_v47, %v5556_v58  ;;  %v6763_v16 = vrot.slane %v6761_v24, 4  ;;  %v6766_v46 = vrot.slane %v6764_v1, 5  ;;  %v6771_v9 = vrot.slane %v6769_v21, 4 }
 0x496   :  { %v6774_v42 = vrot.slane %v6772_v15, 5  ;;  %v6778_v57 = vshrl.u32 %v6263_v32, 16  ;;  %v6781_v44 = vshll.u32 %v6263_v32, 16  ;;  %v6786_v33 = vshrl.u32 %v6264_v20, 16  ;;  %v6265_v1 = vld [vmem:[#allocation2 + $0x220] sm:$0xf0] }
 0x497   :  { %v15080_v13 = vsel %vm414_vm2, %v5552_v48, %v5560_v0  ;;  %v6767_v40 = vor.u32 %v6766_v46, %v6763_v16  ;;  %v6789_v17 = vshll.u32 %v6264_v20, 16  ;;  %v5563_v7 = vshrl.u32 %v5273_v54, 16  ;;  %v6266_v48 = vld [vmem:[#allocation2 + $0x228] sm:$0x1f] }
 0x498   :  { %18623 = vst [vmem:[#allocation15_spill] sm:$0xff] %v15080_v13  ;;  %7453 = vmatmul.mubr.bf16.gmra.mrb[56].mxu0 %v15080_v13  ;;  %v6775_v63 = vor.u32 %v6774_v42, %v6771_v9  ;;  %v6780_v47 = vrot.slane %v6778_v57, 4  ;;  %v6783_v24 = vrot.slane %v6781_v44, 5  ;;  %v6788_v58 = vrot.slane %v6786_v33, 4  ;;  %v5275_v33 = vld [vmem:[#allocation2 + $0x130] sm:$0xf8] }
 0x499   :  { %7460 = vmatprep.mubr.bf16.mxu0 %v15076_v59  ;;  %v6791_v32 = vrot.slane %v6789_v17, 5  ;;  %v5565_v21 = vrot.slane %v5563_v7, 3  ;;  %v5566_v15 = vshll.u32 %v5273_v54, 16  ;;  %v5571_v34 = vshrl.u32 %v5274_v31, 16  ;;  %v5276_v54 = vld [vmem:[#allocation2 + $0x138] sm:$0xf] }
 0x49a   :  { %v15085_v0 = vsel %vm1377_vm0, %v6767_v40, %v6775_v63  ;;  %v6784_v20 = vor.u32 %v6783_v24, %v6780_v47  ;;  %v5574_v16 = vshll.u32 %v5274_v31, 16  ;;  %v6091_v46 = vrot.slane %v5947_v37, 4 }
 0x49b   :  { %18624 = vst [vmem:[#allocation39_spill] sm:$0xff] %v15085_v0  ;;  %11036 = vmatmul.mubr.bf16.gmra.mrb[120].mxu1 %v15085_v0  ;;  %v6792_v9 = vor.u32 %v6791_v32, %v6788_v58  ;;  %v5568_v42 = vrot.slane %v5566_v15, 4  ;;  %v5573_v57 = vrot.slane %v5571_v34, 3  ;;  %v6092_v44 = vrot.slane %v5948_v56, 4 }
 0x49c   :  { %v5576_v11 = vrot.slane %v5574_v16, 4  ;;  %v6795_v59 = vshrl.u32 %v6265_v1, 16  ;;  %v6798_v17 = vshll.u32 %v6265_v1, 16  ;;  %v6803_v7 = vshrl.u32 %v6266_v48, 16 }
 0x49d   :  { %v15089_v61 = vsel %vm1377_vm0, %v6784_v20, %v6792_v9  ;;  %v5569_v40 = vor.u32 %v5568_v42, %v5565_v21  ;;  %v6806_v63 = vshll.u32 %v6266_v48, 16  ;;  %v5580_v34 = vshrl.u32 %v5275_v33, 16  ;;  %v5277_v21 = vld [vmem:[#allocation2 + $0x140] sm:$0xf8]  ;;  %v5278_v42 = vld [vmem:[#allocation2 + $0x148] sm:$0xf] }
 0x49e   :  { %18625 = vst [vmem:[#allocation38_spill] sm:$0xff] %v15089_v61  ;;  %11039 = vmatprep.mubr.bf16.mxu1 %v15089_v61  ;;  %v5577_v31 = vor.u32 %v5576_v11, %v5573_v57  ;;  %v6797_v37 = vrot.slane %v6795_v59, 4  ;;  %v6800_v47 = vrot.slane %v6798_v17, 5  ;;  %v6805_v24 = vrot.slane %v6803_v7, 4  ;;  %v5950_v17 = vld [vmem:[#allocation2 + $0x148] sm:$0xf] }
 0x49f   :  { %v6808_v58 = vrot.slane %v6806_v63, 5  ;;  %v5583_v56 = vshll.u32 %v5275_v33, 16  ;;  %v5588_v32 = vshrl.u32 %v5276_v54, 16  ;;  %v15096_v1 = vsel %vm1152_vm1, %v6091_v46, %v6092_v44  ;;  %v5949_v33 = vld [vmem:[#allocation2 + $0x140] sm:$0xf0] }
 0x4a0   :  { %v15093_v15 = vsel %vm414_vm2, %v5569_v40, %v5577_v31  ;;  %v6801_v20 = vor.u32 %v6800_v47, %v6797_v37  ;;  %v5591_v16 = vshll.u32 %v5276_v54, 16  ;;  %v5582_v11 = vrot.slane %v5580_v34, 3  ;;  %v11327_v37 = vld [vmem:[%s17653_s2 + $0x200] sm:$0xff]  }
 0x4a1   :  { %18626 = vst [vmem:[#allocation110_spill] sm:$0xff] %v15093_v15  ;;  %7461 = vmatmul.mubr.bf16.gmra.mrb[60].mxu0 %v15093_v15  ;;  %v6809_v48 = vor.u32 %v6808_v58, %v6805_v24  ;;  %v5585_v59 = vrot.slane %v5583_v56, 4  ;;  %v5590_v9 = vrot.slane %v5588_v32, 3  ;;  %v5597_v46 = vshrl.u32 %v5277_v21, 16  ;;  %11123 = vmatprep.subr.bf16.mxu1 %v11327_v37  ;;  %v5285_v15 = vld [vmem:[#allocation2 + $0x180] sm:$0xf8] }
 0x4a2   :  { %7468 = vmatprep.mubr.bf16.mxu0 %v15096_v1  ;;  %v5593_v57 = vrot.slane %v5591_v16, 4  ;;  %v5600_v44 = vshll.u32 %v5277_v21, 16  ;;  %v5605_v63 = vshrl.u32 %v5278_v42, 16  ;;  %v5608_v31 = vshll.u32 %v5278_v42, 16  ;;  %v5279_v16 = vld [vmem:[#allocation2 + $0x150] sm:$0xf8] }
 0x4a3   :  { %v15101_v7 = vsel %vm1377_vm0, %v6801_v20, %v6809_v48  ;;  %v5586_v54 = vor.u32 %v5585_v59, %v5582_v11  ;;  %v6094_v47 = vrot.slane %v5949_v33, 4  ;;  %v6095_v24 = vrot.slane %v5950_v17, 4  ;;  %v5280_v48 = vld [vmem:[#allocation2 + $0x158] sm:$0xf]  ;;  %v5951_v11 = vld [vmem:[#allocation2 + $0x150] sm:$0xf0] }
 0x4a4   :  { %18627 = vst [vmem:[#allocation42_spill] sm:$0xff] %v15101_v7  ;;  %11040 = vmatmul.mubr.bf16.gmra.mrb[124].mxu1 %v15101_v7  ;;  %v5594_v40 = vor.u32 %v5593_v57, %v5590_v9  ;;  %v5599_v58 = vrot.slane %v5597_v46, 3  ;;  %v5602_v56 = vrot.slane %v5600_v44, 4  ;;  %v5607_v32 = vrot.slane %v5605_v63, 3  ;;  %v5952_v59 = vld [vmem:[#allocation2 + $0x158] sm:$0xf] }
 0x4a5   :  { %8062 = vmatprep.mubr.bf16.mxu1 %v18571_v14  ;;  %v5610_v20 = vrot.slane %v5608_v31, 4  ;;  %v15113_v21 = vsel %vm1152_vm1, %v6094_v47, %v6095_v24  ;;  %v5614_v9 = vshrl.u32 %v5279_v16, 16  ;;  %v5617_v42 = vshll.u32 %v5279_v16, 16  ;;  %v5281_v7 = vld [vmem:[#allocation2 + $0x160] sm:$0xf8] }
 0x4a6   :  { %v15109_v34 = vsel %vm414_vm2, %v5586_v54, %v5594_v40  ;;  %18628 = vst [vmem:[#allocation41_spill] sm:$0xff] %v15113_v21  ;;  %v5603_v57 = vor.u32 %v5602_v56, %v5599_v58  ;;  %v5622_v17 = vshrl.u32 %v5280_v48, 16  ;;  %v5625_v46 = vshll.u32 %v5280_v48, 16  ;;  %v5282_v56 = vld [vmem:[#allocation2 + $0x168] sm:$0xf] }
 0x4a7   :  { %v5611_v33 = vor.u32 %v5610_v20, %v5607_v32  ;;  %v6097_v44 = vrot.slane %v5951_v11, 4  ;;  %v6098_v54 = vrot.slane %v5952_v59, 4  ;;  %v5616_v40 = vrot.slane %v5614_v9, 3  ;;  %v5954_v32 = vld [vmem:[#allocation2 + $0x168] sm:$0xf] }
 0x4a8   :  { %v5619_v63 = vrot.slane %v5617_v42, 4  ;;  %v5624_v47 = vrot.slane %v5622_v17, 3  ;;  %v5627_v24 = vrot.slane %v5625_v46, 4  ;;  %v5634_v48 = vshll.u32 %v5281_v7, 16 }
 0x4a9   :  { %7469 = vmatmul.mubr.bf16.gmra.mrb[64].mxu0 %v15109_v34  ;;  %v15119_v31 = vsel %vm414_vm2, %v5603_v57, %v5611_v33  ;;  %v15123_v58 = vsel %vm1152_vm1, %v6097_v44, %v6098_v54  ;;  %v5639_v11 = vshrl.u32 %v5282_v56, 16  ;;  %v5642_v59 = vshll.u32 %v5282_v56, 16  ;;  %v5283_v54 = vld [vmem:[#allocation2 + $0x170] sm:$0xf8] }
 0x4aa   :  { %7476 = vmatprep.mubr.bf16.mxu0 %v15113_v21  ;;  %18629 = vst [vmem:[#allocation109_spill] sm:$0xff] %v15119_v31  ;;  %18630 = vst [vmem:[#allocation16_spill] sm:$0xff] %v15123_v58  ;;  %v5620_v20 = vor.u32 %v5619_v63, %v5616_v40  ;;  %v5628_v16 = vor.u32 %v5627_v24, %v5624_v47  ;;  %v6101_v42 = vrot.slane %v5954_v32, 4  ;;  %v5636_v17 = vrot.slane %v5634_v48, 4  ;;  %v5955_v40 = vld [vmem:[#allocation2 + $0x170] sm:$0xf0] }
 0x4ab   :  { %v5641_v46 = vrot.slane %v5639_v11, 3  ;;  %v5644_v44 = vrot.slane %v5642_v59, 4  ;;  %v5956_v63 = vld [vmem:[#allocation2 + $0x178] sm:$0xf]  ;;  %v5648_v47 = vshrl.u32 %v5283_v54, 16  ;;  %v5651_v24 = vshll.u32 %v5283_v54, 16 }
 0x4ac   :  { %8063 = vmatmul.mubr.bf16.vlgmr.msra.gmra.mrb[128].mxu1 %v18571_v14  ;;  %v15129_v33 = vsel %vm414_vm2, %v5620_v20, %v5628_v16  ;;  %v6104_v16 = vrot.slane %v5956_v63, 4 }
 0x4ad   :  { %8070 = vmatprep.mubr.bf16.mxu1 %v14759_v27  ;;  %11124 = vmatpush3.bf16.msra.mxu1 %v11327_v37  ;;  %v5953_v27 = vld [vmem:[#allocation2 + $0x160] sm:$0xf0]  ;;  %v5631_v37 = vshrl.u32 %v5281_v7, 16  ;;  %18631 = vst [vmem:[#allocation44_spill] sm:$0xff] %v15129_v33  ;;  %v5284_v7 = vld [vmem:[#allocation2 + $0x178] sm:$0xf] }
 0x4ae   :  { %v6100_v9 = vrot.slane %v5953_v27, 4  ;;  %v5645_v27 = vor.u32 %v5644_v44, %v5641_v46  ;;  %v5656_v32 = vshrl.u32 %v5284_v7, 16  ;;  %v5659_v20 = vshll.u32 %v5284_v7, 16  ;;  %v5958_v46 = vld [vmem:[#allocation2 + $0x188] sm:$0xf] }
 0x4af   :  { %v5633_v57 = vrot.slane %v5631_v37, 3  ;;  %v6103_v37 = vrot.slane %v5955_v40, 4  ;;  %v5650_v48 = vrot.slane %v5648_v47, 3  ;;  %v5653_v59 = vrot.slane %v5651_v24, 4 }
 0x4b0   :  { %v5665_v44 = vshrl.u32 %v5285_v15, 16  ;;  %v5668_v7 = vshll.u32 %v5285_v15, 16 }
 0x4b1   :  { %7477 = vmatmul.mubr.bf16.gmra.mrb[68].mxu0 %v15119_v31  ;;  %v5637_v56 = vor.u32 %v5636_v17, %v5633_v57  ;;  %v15143_v54 = vsel %vm1152_vm1, %v6103_v37, %v6104_v16  ;;  %v5286_v57 = vld [vmem:[#allocation2 + $0x188] sm:$0xf]  ;;  %v5957_v17 = vld [vmem:[#allocation2 + $0x180] sm:$0xf0]  ;;  %v5654_v40 = vor.u32 %v5653_v59, %v5650_v48  ;;  %v5287_v48 = vld [vmem:[#allocation2 + $0x190] sm:$0xf8] }
 0x4b2   :  { %7484 = vmatprep.mubr.bf16.mxu0 %v15123_v58  ;;  %18634 = vst [vmem:[#allocation112_spill] sm:$0xff] %v15143_v54  ;;  %v5673_v47 = vshrl.u32 %v5286_v57, 16  ;;  %v5676_v24 = vshll.u32 %v5286_v57, 16  ;;  %v5670_v15 = vrot.slane %v5668_v7, 4  ;;  %v5960_v57 = vld [vmem:[#allocation2 + $0x198] sm:$0xf] }
 0x4b3   :  { %v15139_v11 = vsel %vm414_vm2, %v5637_v56, %v5645_v27  ;;  %v6106_v56 = vrot.slane %v5957_v17, 4  ;;  %v6107_v27 = vrot.slane %v5958_v46, 4  ;;  %v5682_v17 = vshrl.u32 %v5287_v48, 16 }
 0x4b4   :  { %8071 = vmatmul.mubr.bf16.gmra.mrb[132].mxu1 %v14766_v5  ;;  %v15133_v5 = vsel %vm1152_vm1, %v6100_v9, %v6101_v42  ;;  %18633 = vst [vmem:[#allocation18_spill] sm:$0xff] %v15139_v11  ;;  %v5658_v9 = vrot.slane %v5656_v32, 3  ;;  %v5661_v42 = vrot.slane %v5659_v20, 4  ;;  %v11332_v32 = vld [vmem:[%s17653_s2 + $0x208] sm:$0xff]   ;;  %v5667_v20 = vrot.slane %v5665_v44, 3 }
 0x4b5   :  { %8078 = vmatprep.mubr.bf16.mxu1 %v14769_v30  ;;  %18632 = vst [vmem:[#allocation45_spill] sm:$0xff] %v15133_v5  ;;  %11125 = vmatprep.subr.bf16.mxu1 %v11332_v32  ;;  %v5675_v16 = vrot.slane %v5673_v47, 3  ;;  %v15156_v59 = vsel %vm1152_vm1, %v6106_v56, %v6107_v27  ;;  %v5685_v46 = vshll.u32 %v5287_v48, 16 }
 0x4b6   :  { %v5662_v63 = vor.u32 %v5661_v42, %v5658_v9  ;;  %11126 = vmatpush3.bf16.msra.mxu1 %v11332_v32  ;;  %18636 = vst [vmem:[#allocation50_spill] sm:$0xff] %v15156_v59  ;;  %v5288_v9 = vld [vmem:[#allocation2 + $0x198] sm:$0xf]  ;;  %v5959_v42 = vld [vmem:[#allocation2 + $0x190] sm:$0xf0]  ;;  %v5671_v44 = vor.u32 %v5670_v15, %v5667_v20  ;;  %v5684_v32 = vrot.slane %v5682_v17, 3 }
 0x4b7   :  { %v6109_v47 = vrot.slane %v5959_v42, 4  ;;  %v5687_v56 = vrot.slane %v5685_v46, 4  ;;  %v5961_v20 = vld [vmem:[#allocation2 + $0x1a0] sm:$0xf0]  ;;  %v5962_v15 = vld [vmem:[#allocation2 + $0x1a8] sm:$0xf] }
 0x4b8   :  { %v15152_v37 = vsel %vm414_vm2, %v5654_v40, %v5662_v63  ;;  %v5690_v40 = vshrl.u32 %v5288_v9, 16  ;;  %v5693_v63 = vshll.u32 %v5288_v9, 16 }
 0x4b9   :  { %7485 = vmatmul.mubr.bf16.gmra.mrb[72].mxu0 %v15129_v33  ;;  %18635 = vst [vmem:[#allocation51_spill] sm:$0xff] %v15152_v37 }
 0x4ba   :  { %7492 = vmatprep.mubr.bf16.mxu0 %v15133_v5 }
 0x4bc   :  { %8079 = vmatmul.mubr.bf16.gmra.mrb[136].mxu1 %v14803_v19  ;;  %v5289_v19 = vld [vmem:[#allocation2 + $0x1a0] sm:$0xf8] }
 0x4bd   :  { %8086 = vmatprep.mubr.bf16.mxu1 %v14798_v43  ;;  %v5695_v43 = vrot.slane %v5693_v63, 4  ;;  %v5699_v9 = vshrl.u32 %v5289_v19, 16 }
 0x4c1   :  { %7493 = vmatmul.mubr.bf16.gmra.mrb[76].mxu0 %v15139_v11 }
 0x4c2   :  { %7500 = vmatprep.mubr.bf16.mxu0 %v15143_v54 }
 0x4c4   :  { %8087 = vmatmul.mubr.bf16.gmra.mrb[140].mxu1 %v14830_v18  ;;  %v5678_v18 = vrot.slane %v5676_v24, 4  ;;  %v6110_v24 = vrot.slane %v5960_v57, 4  ;;  %v5702_v57 = vshll.u32 %v5289_v19, 16  ;;  %v5963_v19 = vld [vmem:[#allocation2 + $0x1b0] sm:$0xf0] }
 0x4c5   :  { %8094 = vmatprep.mubr.bf16.mxu1 %v14822_v26  ;;  %v5692_v26 = vrot.slane %v5690_v40, 3  ;;  %v5701_v40 = vrot.slane %v5699_v9, 3 }
 0x4c6   :  { %v5679_v7 = vor.u32 %v5678_v18, %v5675_v16  ;;  %v15166_v48 = vsel %vm1152_vm1, %v6109_v47, %v6110_v24  ;;  %v5290_v18 = vld [vmem:[#allocation2 + $0x1a8] sm:$0xf]  ;;  %v5688_v16 = vor.u32 %v5687_v56, %v5684_v32  ;;  %v5704_v47 = vrot.slane %v5702_v57, 4 }
 0x4c7   :  { %18638 = vst [vmem:[#allocation111_spill] sm:$0xff] %v15166_v48  ;;  %v5696_v42 = vor.u32 %v5695_v43, %v5692_v26  ;;  %v5707_v17 = vshrl.u32 %v5290_v18, 16  ;;  %v5710_v46 = vshll.u32 %v5290_v18, 16  ;;  %v5292_v43 = vld [vmem:[#allocation2 + $0x1b8] sm:$0xf] }
 0x4c8   :  { %v15162_v27 = vsel %vm414_vm2, %v5671_v44, %v5679_v7  ;;  %v6112_v44 = vrot.slane %v5961_v20, 4  ;;  %v6113_v7 = vrot.slane %v5962_v15, 4  ;;  %v5964_v26 = vld [vmem:[#allocation2 + $0x1b8] sm:$0xf]  ;;  %v5705_v20 = vor.u32 %v5704_v47, %v5701_v40  ;;  %v5965_v40 = vld [vmem:[#allocation2 + $0x1c0] sm:$0xf0] }
 0x4c9   :  { %7501 = vmatmul.mubr.bf16.gmra.mrb[80].mxu0 %v15152_v37  ;;  %18637 = vst [vmem:[#allocation17_spill] sm:$0xff] %v15162_v27  ;;  %v15172_v63 = vsel %vm414_vm2, %v5688_v16, %v5696_v42  ;;  %v5709_v24 = vrot.slane %v5707_v17, 3  ;;  %v5724_v16 = vshrl.u32 %v5292_v43, 16  ;;  %v5727_v9 = vshll.u32 %v5292_v43, 16  ;;  %v5966_v47 = vld [vmem:[#allocation2 + $0x1c8] sm:$0xf] }
 0x4ca   :  { %7508 = vmatprep.mubr.bf16.mxu0 %v15156_v59  ;;  %18639 = vst [vmem:[#allocation23_spill] sm:$0xff] %v15172_v63  ;;  %v15176_v32 = vsel %vm1152_vm1, %v6112_v44, %v6113_v7  ;;  %v6115_v42 = vrot.slane %v5963_v19, 4  ;;  %v6116_v57 = vrot.slane %v5964_v26, 4 }
 0x4cb   :  { %18640 = vst [vmem:[#allocation53_spill] sm:$0xff] %v15176_v32  ;;  %v5726_v7 = vrot.slane %v5724_v16, 3  ;;  %v11337_v16 = vld [vmem:[%s17653_s2 + $0x210] sm:$0xff]  }
 0x4cc   :  { %8095 = vmatmul.mubr.bf16.gmra.mrb[144].mxu1 %v14854_v52  ;;  %v5291_v52 = vld [vmem:[#allocation2 + $0x1b0] sm:$0xf8]  ;;  %11127 = vmatprep.subr.bf16.mxu1 %v11337_v16 }
 0x4cd   :  { %8102 = vmatprep.mubr.bf16.mxu1 %v14849_v38  ;;  %v5712_v38 = vrot.slane %v5710_v46, 4  ;;  %v5716_v56 = vshrl.u32 %v5291_v52, 16  ;;  %v5719_v18 = vshll.u32 %v5291_v52, 16  ;;  %v15186_v52 = vsel %vm1152_vm1, %v6115_v42, %v6116_v57  ;;  %11128 = vmatpush3.bf16.msra.mxu1 %v11337_v16 }
 0x4ce   :  { %18642 = vst [vmem:[#allocation52_spill] sm:$0xff] %v15186_v52 }
 0x4cf   :  { %v5713_v15 = vor.u32 %v5712_v38, %v5709_v24  ;;  %v5718_v17 = vrot.slane %v5716_v56, 3  ;;  %v5721_v44 = vrot.slane %v5719_v18, 4  ;;  %v5294_v38 = vld [vmem:[#allocation2 + $0x1c8] sm:$0xf] }
 0x4d0   :  { %v5741_v56 = vshrl.u32 %v5294_v38, 16  ;;  %v5744_v18 = vshll.u32 %v5294_v38, 16  ;;  %v5968_v38 = vld [vmem:[#allocation2 + $0x1d8] sm:$0xf] }
 0x4d1   :  { %7509 = vmatmul.mubr.bf16.gmra.mrb[84].mxu0 %v15162_v27  ;;  %v15182_v46 = vsel %vm414_vm2, %v5705_v20, %v5713_v15  ;;  %v5722_v19 = vor.u32 %v5721_v44, %v5718_v17  ;;  %v6118_v20 = vrot.slane %v5965_v40, 4  ;;  %v6119_v15 = vrot.slane %v5966_v47, 4  ;;  %v5295_v17 = vld [vmem:[#allocation2 + $0x1d0] sm:$0xf8]  ;;  %v5296_v44 = vld [vmem:[#allocation2 + $0x1d8] sm:$0xf] }
 0x4d2   :  { %7516 = vmatprep.mubr.bf16.mxu0 %v15166_v48  ;;  %18641 = vst [vmem:[#allocation29_spill] sm:$0xff] %v15182_v46  ;;  %v5743_v57 = vrot.slane %v5741_v56, 3  ;;  %v5750_v47 = vshrl.u32 %v5295_v17, 16  ;;  %v5758_v56 = vshrl.u32 %v5296_v44, 16 }
 0x4d4   :  { %8103 = vmatmul.mubr.bf16.gmra.mrb[148].mxu1 %v14878_v10  ;;  %v5293_v10 = vld [vmem:[#allocation2 + $0x1c0] sm:$0xf8]  ;;  %v5760_v61 = vrot.slane %v5758_v56, 3 }
 0x4d5   :  { %8110 = vmatprep.mubr.bf16.mxu1 %v14873_v49  ;;  %v5729_v49 = vrot.slane %v5727_v9, 4  ;;  %v5733_v24 = vshrl.u32 %v5293_v10, 16  ;;  %v5736_v43 = vshll.u32 %v5293_v10, 16 }
 0x4d7   :  { %v5730_v26 = vor.u32 %v5729_v49, %v5726_v7  ;;  %v5735_v9 = vrot.slane %v5733_v24, 3  ;;  %v5738_v10 = vrot.slane %v5736_v43, 4  ;;  %v15199_v49 = vsel %vm1152_vm1, %v6118_v20, %v6119_v15  ;;  %v5967_v7 = vld [vmem:[#allocation2 + $0x1d0] sm:$0xf0] }
 0x4d8   :  { %18644 = vst [vmem:[#allocation59_spill] sm:$0xff] %v15199_v49  ;;  %v5753_v24 = vshll.u32 %v5295_v17, 16  ;;  %v6121_v20 = vrot.slane %v5967_v7, 4  ;;  %v6122_v15 = vrot.slane %v5968_v38, 4 }
 0x4d9   :  { %7517 = vmatmul.mubr.bf16.gmra.mrb[88].mxu0 %v15172_v63  ;;  %v15195_v42 = vsel %vm414_vm2, %v5722_v19, %v5730_v26  ;;  %v5739_v43 = vor.u32 %v5738_v10, %v5735_v9  ;;  %v5298_v10 = vld [vmem:[#allocation2 + $0x1e8] sm:$0xf] }
 0x4da   :  { %7524 = vmatprep.mubr.bf16.mxu0 %v15176_v32  ;;  %18643 = vst [vmem:[#allocation113_spill] sm:$0xff] %v15195_v42 }
 0x4dc   :  { %8111 = vmatmul.mubr.bf16.gmra.mrb[152].mxu1 %v14902_v2  ;;  %v5755_v2 = vrot.slane %v5753_v24, 4 }
 0x4dd   :  { %8118 = vmatprep.mubr.bf16.mxu1 %v14897_v51  ;;  %v5752_v51 = vrot.slane %v5750_v47, 3 }
 0x4df   :  { %v5756_v38 = vor.u32 %v5755_v2, %v5752_v51 }
 0x4e1   :  { %7525 = vmatmul.mubr.bf16.gmra.mrb[92].mxu0 %v15182_v46 }
 0x4e2   :  { %7532 = vmatprep.mubr.bf16.mxu0 %v15186_v52 }
 0x4e4   :  { %8119 = vmatmul.mubr.bf16.gmra.mrb[156].mxu1 %v14929_v25  ;;  %v5746_v25 = vrot.slane %v5744_v18, 4  ;;  %v5761_v18 = vshll.u32 %v5296_v44, 16 }
 0x4e5   :  { %8126 = vmatprep.mubr.bf16.mxu1 %v14924_v29 }
 0x4e6   :  { %v5747_v26 = vor.u32 %v5746_v25, %v5743_v57  ;;  %v5763_v17 = vrot.slane %v5761_v18, 4  ;;  %v15211_v25 = vsel %vm1152_vm1, %v6121_v20, %v6122_v15  ;;  %v5970_v57 = vld [vmem:[#allocation2 + $0x1e8] sm:$0xf]  ;;  %v5775_v18 = vshrl.u32 %v5298_v10, 16 }
 0x4e7   :  { %18646 = vst [vmem:[#allocation26_spill] sm:$0xff] %v15211_v25  ;;  %v5778_v20 = vshll.u32 %v5298_v10, 16 }
 0x4e8   :  { %v15205_v30 = vsel %vm414_vm2, %v5739_v43, %v5747_v26  ;;  %v5764_v26 = vor.u32 %v5763_v17, %v5760_v61  ;;  %v5777_v2 = vrot.slane %v5775_v18, 3  ;;  %v5299_v61 = vld [vmem:[#allocation2 + $0x1f0] sm:$0xf8] }
 0x4e9   :  { %7533 = vmatmul.mubr.bf16.gmra.mrb[96].mxu0 %v15195_v42  ;;  %18645 = vst [vmem:[#allocation37_spill] sm:$0xff] %v15205_v30 }
 0x4ea   :  { %7540 = vmatprep.mubr.bf16.mxu0 %v15199_v49  ;;  %v7342_v40 = vpop.f32.mrb[0].mxu0 }
 0x4eb   :  { %v7344_v19 = vpop.f32.mrb[1].mxu0 }
 0x4ec   :  { %8127 = vmatmul.mubr.bf16.gmra.mrb[160].mxu1 %v14953_v12  ;;  %v7345_v16 = vpop.f32.mrb[2].mxu0  ;;  %v5297_v12 = vld [vmem:[#allocation2 + $0x1e0] sm:$0xf8] }
 0x4ed   :  { %8134 = vmatprep.mubr.bf16.mxu1 %v14948_v3  ;;  %v7347_v29 = vpop.f32.mrb[3].mxu0  ;;  %v5767_v24 = vshrl.u32 %v5297_v12, 16  ;;  %v5770_v43 = vshll.u32 %v5297_v12, 16  ;;  %v6125_v3 = vrot.slane %v5970_v57, 4  ;;  %v5780_v12 = vrot.slane %v5778_v20, 4 }
 0x4ee   :  { %v5969_v29 = vld [vmem:[#allocation2 + $0x1e0] sm:$0xf0]  ;;  %v5971_v57 = vld [vmem:[#allocation2 + $0x1f0] sm:$0xf0] }
 0x4ef   :  { %v6124_v15 = vrot.slane %v5969_v29, 4  ;;  %v5772_v51 = vrot.slane %v5770_v43, 4  ;;  %v5300_v29 = vld [vmem:[#allocation2 + $0x1f8] sm:$0xf]  ;;  %v5784_v43 = vshrl.u32 %v5299_v61, 16  ;;  %v5781_v20 = vor.u32 %v5780_v12, %v5777_v2 }
 0x4f0   :  { %v15207_v19 = vpop.f32.mrb[64].mxu1  ;;  %v5302_v12 = vld [vmem:[#allocation2 + $0x208] sm:$0xf] }
 0x4f1   :  { %7541 = vmatmul.mubr.bf16.gmra.mrb[100].mxu0 %v15205_v30  ;;  %v7631_v9 = vpop.f32.mrb[65].mxu1 }
 0x4f2   :  { %7548 = vmatprep.mubr.bf16.mxu0 %v15211_v25  ;;  %v15214_v44 = vadd.f32 %v7631_v9, %v7342_v40  ;;  %v15216_v7 = vpop.f32.mrb[66].mxu1  ;;  %v5769_v40 = vrot.slane %v5767_v24, 3 }
 0x4f3   :  { %v7634_v47 = vpop.f32.mrb[67].mxu1 }
 0x4f4   :  { %18647 = vst [vmem:[#allocation64_spill] sm:$0xff] %v15214_v44  ;;  %8135 = vmatmul.mubr.bf16.gmra.mrb[164].mxu1 %v14977_v35  ;;  %v15219_v56 = vadd.f32 %v7634_v47, %v7345_v16  ;;  %v15223_v44 = vsel %vm414_vm2, %v5756_v38, %v5764_v26  ;;  %v15229_v16 = vsel %vm1152_vm1, %v6124_v15, %v6125_v3  ;;  %v5972_v38 = vld [vmem:[#allocation2 + $0x1f8] sm:$0xf]  ;;  %v5787_v26 = vshll.u32 %v5299_v61, 16 }
 0x4f5   :  { %8142 = vmatprep.mubr.bf16.mxu1 %v14972_v8  ;;  %18649 = vst [vmem:[#allocation65_spill] sm:$0xff] %v15223_v44  ;;  %18650 = vst [vmem:[#allocation46_spill] sm:$0xff] %v15229_v16  ;;  %v5773_v18 = vor.u32 %v5772_v51, %v5769_v40  ;;  %v5792_v15 = vshrl.u32 %v5300_v29, 16  ;;  %v6128_v8 = vrot.slane %v5972_v38, 4  ;;  %v5786_v35 = vrot.slane %v5784_v43, 3 }
 0x4f6   :  { %18648 = vst [vmem:[#allocation28_spill] sm:$0xff] %v15219_v56  ;;  %v7350_v0 = vpop.f32.mrb[4].mxu0  ;;  %v5789_v56 = vrot.slane %v5787_v26, 4  ;;  %v5301_v40 = vld [vmem:[#allocation2 + $0x200] sm:$0xf8] }
 0x4f7   :  { %v7352_v9 = vpop.f32.mrb[5].mxu0  ;;  %v5794_v61 = vrot.slane %v5792_v15, 3  ;;  %v5801_v26 = vshrl.u32 %v5301_v40, 16 }
 0x4f8   :  { %v15225_v25 = vpop.f32.mrb[6].mxu0  ;;  %v5795_v9 = vshll.u32 %v5300_v29, 16  ;;  %v5973_v29 = vld [vmem:[#allocation2 + $0x200] sm:$0xf0] }
 0x4f9   :  { %7549 = vmatmul.mubr.bf16.gmra.mrb[104].mxu0 %v15223_v44  ;;  %v15231_v17 = vpop.f32.mrb[68].mxu1  ;;  %v7355_v10 = vpop.f32.mrb[7].mxu0  ;;  %v15245_v44 = vsel %vm414_vm2, %v5773_v18, %v5781_v20  ;;  %v5804_v20 = vshll.u32 %v5301_v40, 16  ;;  %v15266_v40 = vadd.f32 %v15207_v19, %v7350_v0 }
 0x4fa   :  { %7556 = vmatprep.mubr.bf16.mxu0 %v15229_v16  ;;  %v15234_v47 = vpop.f32.mrb[69].mxu1  ;;  %v6127_v10 = vrot.slane %v5971_v57, 4  ;;  %18651 = vst [vmem:[#allocation47_spill] sm:$0xff] %v15245_v44  ;;  %v5797_v30 = vrot.slane %v5795_v9, 4  ;;  %v5974_v57 = vld [vmem:[#allocation2 + $0x208] sm:$0xf] }
 0x4fb   :  { %v15236_v24 = vpop.f32.mrb[70].mxu1  ;;  %18653 = vst [vmem:[#allocation20_spill] sm:$0xff] %v15266_v40 }
 0x4fc   :  { %8143 = vmatmul.mubr.bf16.gmra.mrb[168].mxu1 %v14993_v62  ;;  %v15239_v3 = vpop.f32.mrb[71].mxu1  ;;  %v15249_v51 = vsel %vm1152_vm1, %v6127_v10, %v6128_v8  ;;  %v5798_v15 = vor.u32 %v5797_v30, %v5794_v61  ;;  %v5809_v8 = vshrl.u32 %v5302_v12, 16  ;;  %v5812_v10 = vshll.u32 %v5302_v12, 16 }
 0x4fd   :  { %8150 = vmatprep.mubr.bf16.mxu1 %v14989_v55  ;;  %18652 = vst [vmem:[#allocation36_spill] sm:$0xff] %v15249_v51  ;;  %v6130_v55 = vrot.slane %v5973_v29, 4  ;;  %v5303_v29 = vld [vmem:[#allocation2 + $0x210] sm:$0xf8] }
 0x4fe   :  { %v5814_v61 = vrot.slane %v5812_v10, 4 }
 0x4ff   :  { %v15242_v16 = vpop.f32.mrb[8].mxu0 }
 0x500   :  { %v7360_v62 = vpop.f32.mrb[9].mxu0  ;;  %v15290_v40 = vadd.f32 %v15234_v47, %v15242_v16  ;;  %v5306_v47 = vld [vmem:[#allocation2 + $0x228] sm:$0xf] }
 0x501   :  { %7557 = vmatmul.mubr.bf16.gmra.mrb[108].mxu0 %v15245_v44  ;;  %v7361_v2 = vpop.f32.mrb[10].mxu0  ;;  %v5790_v62 = vor.u32 %v5789_v56, %v5786_v35  ;;  %v5806_v35 = vrot.slane %v5804_v20, 4  ;;  %v5811_v56 = vrot.slane %v5809_v8, 3  ;;  %v5975_v20 = vld [vmem:[#allocation2 + $0x210] sm:$0xf0] }
 0x502   :  { %7564 = vmatprep.mubr.bf16.mxu0 %v15249_v51  ;;  %v15252_v38 = vpop.f32.mrb[72].mxu1  ;;  %v7363_v43 = vpop.f32.mrb[11].mxu0  ;;  %v6131_v51 = vrot.slane %v5974_v57, 4  ;;  %v15273_v57 = vadd.f32 %v15216_v7, %v15225_v25  ;;  %18657 = vst [vmem:[#allocation114_spill] sm:$0xff] %v15290_v40 }
 0x503   :  { %v15254_v18 = vpop.f32.mrb[73].mxu1  ;;  %v11342_v43 = vld [vmem:[%s17653_s2 + $0x218] sm:$0xff]   ;;  %v15269_v30 = vsel %vm414_vm2, %v5790_v62, %v5798_v15  ;;  %v5815_v7 = vor.u32 %v5814_v61, %v5811_v56  ;;  %v5305_v61 = vld [vmem:[#allocation2 + $0x220] sm:$0xf8] }
 0x504   :  { %8151 = vmatmul.mubr.bf16.gmra.mrb[172].mxu1 %v15012_v23  ;;  %v15257_v9 = vpop.f32.mrb[74].mxu1  ;;  %v5803_v23 = vrot.slane %v5801_v26, 3  ;;  %11129 = vmatprep.subr.bf16.mxu1 %v11342_v43  ;;  %18654 = vst [vmem:[#allocation58_spill] sm:$0xff] %v15269_v30  ;;  %18655 = vst [vmem:[#allocation27_spill] sm:$0xff] %v15273_v57  ;;  %v15277_v0 = vsel %vm1152_vm1, %v6130_v55, %v6131_v51  ;;  %v5304_v26 = vld [vmem:[#allocation2 + $0x218] sm:$0xf] }
 0x505   :  { %8158 = vmatprep.mubr.bf16.mxu1 %v15008_v39  ;;  %v15260_v44 = vpop.f32.mrb[75].mxu1  ;;  %11130 = vmatpush3.bf16.msra.mxu1 %v11342_v43  ;;  %18656 = vst [vmem:[#allocation60_spill] sm:$0xff] %v15277_v0  ;;  %v5976_v62 = vld [vmem:[#allocation2 + $0x218] sm:$0xf]  ;;  %v5818_v43 = vshrl.u32 %v5303_v29, 16  ;;  %v5821_v39 = vshll.u32 %v5303_v29, 16 }
 0x506   :  { %v5807_v25 = vor.u32 %v5806_v35, %v5803_v23  ;;  %v5826_v55 = vshrl.u32 %v5304_v26, 16  ;;  %v5829_v51 = vshll.u32 %v5304_v26, 16  ;;  %v15298_v26 = vadd.f32 %v15239_v3, %v7361_v2 }
 0x507   :  { %v5820_v29 = vrot.slane %v5818_v43, 3 }
 0x508   :  { %v7366_v12 = vpop.f32.mrb[12].mxu0  ;;  %v15295_v23 = vsel %vm414_vm2, %v5807_v25, %v5815_v7  ;;  %v5828_v35 = vrot.slane %v5826_v55, 3  ;;  %v5831_v56 = vrot.slane %v5829_v51, 4  ;;  %18659 = vst [vmem:[#allocation40_spill] sm:$0xff] %v15298_v26  ;;  %v5835_v7 = vshrl.u32 %v5305_v61, 16 }
 0x509   :  { %7565 = vmatmul.mubr.bf16.gmra.mrb[112].mxu0 %v15269_v30  ;;  %v7368_v19 = vpop.f32.mrb[13].mxu0  ;;  %18658 = vst [vmem:[#allocation61_spill] sm:$0xff] %v15295_v23  ;;  %v5838_v55 = vshll.u32 %v5305_v61, 16 }
 0x50a   :  { %7572 = vmatprep.mubr.bf16.mxu0 %v15277_v0  ;;  %v7369_v15 = vpop.f32.mrb[14].mxu0  ;;  %v6133_v19 = vrot.slane %v5975_v20, 4  ;;  %v6134_v0 = vrot.slane %v5976_v62, 4  ;;  %v5977_v62 = vld [vmem:[#allocation2 + $0x220] sm:$0xf0]  ;;  %v5832_v3 = vor.u32 %v5831_v56, %v5828_v35 }
 0x50b   :  { %v15280_v8 = vpop.f32.mrb[76].mxu1  ;;  %v7371_v10 = vpop.f32.mrb[15].mxu0 }
 0x50c   :  { %8159 = vmatmul.mubr.bf16.gmra.mrb[176].mxu1 %v15028_v60  ;;  %v15283_v30 = vpop.f32.mrb[77].mxu1  ;;  %v5823_v60 = vrot.slane %v5821_v39, 4  ;;  %v15302_v20 = vsel %vm1152_vm1, %v6133_v19, %v6134_v0  ;;  %v5978_v39 = vld [vmem:[#allocation2 + $0x228] sm:$0xf]  ;;  %v5846_v0 = vshll.u32 %v5306_v47, 16  ;;  %v6136_v19 = vrot.slane %v5977_v62, 4 }
 0x50d   :  { %8166 = vmatprep.mubr.bf16.mxu1 %v15024_v6  ;;  %v15286_v57 = vpop.f32.mrb[78].mxu1  ;;  %18660 = vst [vmem:[#allocation43_spill] sm:$0xff] %v15302_v20  ;;  %v6137_v26 = vrot.slane %v5978_v39, 4 }
 0x50e   :  { %v15292_v10 = vpop.f32.mrb[79].mxu1  ;;  %v5824_v51 = vor.u32 %v5823_v60, %v5820_v29  ;;  %v5837_v60 = vrot.slane %v5835_v7, 3  ;;  %v5840_v29 = vrot.slane %v5838_v55, 4  ;;  %v5848_v56 = vrot.slane %v5846_v0, 4 }
 0x50f   :  { %v15326_v62 = vsel %vm1152_vm1, %v6136_v19, %v6137_v26 }
 0x510   :  { %v15319_v35 = vsel %vm414_vm2, %v5824_v51, %v5832_v3  ;;  %18662 = vst [vmem:[#allocation115_spill] sm:$0xff] %v15326_v62  ;;  %v5841_v39 = vor.u32 %v5840_v29, %v5837_v60  ;;  %v11347_v60 = vld [vmem:[%s17653_s2 + $0x228] sm:$0xff]  }
 0x511   :  { %7573 = vmatmul.mubr.bf16.gmra.mrb[116].mxu0 %v15295_v23  ;;  %v7374_v16 = vpop.f32.mrb[16].mxu0  ;;  %v5843_v23 = vshrl.u32 %v5306_v47, 16  ;;  %18661 = vst [vmem:[#allocation34_spill] sm:$0xff] %v15319_v35  ;;  %v15322_v47 = vadd.f32 %v15236_v24, %v7369_v15 }
 0x512   :  { %7580 = vmatprep.mubr.bf16.mxu0 %v15302_v20  ;;  %v7376_v43 = vpop.f32.mrb[17].mxu0  ;;  %v15337_v26 = vadd.f32 %v15254_v18, %v7374_v16 }
 0x513   :  { %v7377_v25 = vpop.f32.mrb[18].mxu0  ;;  %v15312_v43 = vadd.f32 %v15231_v17, %v7366_v12 }
 0x514   :  { %8167 = vmatmul.mubr.bf16.gmra.mrb[180].mxu1 %v15044_v36  ;;  %v15306_v2 = vpop.f32.mrb[80].mxu1  ;;  %v7379_v6 = vpop.f32.mrb[19].mxu0  ;;  %v15352_v29 = vadd.f32 %v15260_v44, %v7377_v25  ;;  %v11328_v25 = vld [vmem:[%s17653_s2 + $0x180] sm:$0xff]  }
 0x515   :  { %8174 = vmatprep.mubr.bf16.mxu1 %v15040_v45  ;;  %v15309_v20 = vpop.f32.mrb[81].mxu1  ;;  %v5845_v6 = vrot.slane %v5843_v23, 3  ;;  %v11346_v23 = vld [vmem:[%s17653_s2 + $0x220] sm:$0xff]   ;;  %v18668_v45 = vld [vmem:[#allocation77_spill] sm:$0xff] }
 0x516   :  { %v15314_v40 = vpop.f32.mrb[82].mxu1  ;;  %11131 = vmatprep.subr.bf16.mxu1 %v11346_v23 }
 0x517   :  { %v15316_v61 = vpop.f32.mrb[83].mxu1  ;;  %v5849_v7 = vor.u32 %v5848_v56, %v5845_v6  ;;  %11132 = vmatpush3.bf16.msra.mxu1 %v11346_v23  ;;  %v11349_v6 = vld [vmem:[%s17653_s2 + $0x230] sm:$0xff]  }
 0x518   :  { %11133 = vmatprep.subr.bf16.mxu1 %v11347_v60 }
 0x519   :  { %7581 = vmatmul.mubr.bf16.gmra.mrb[120].mxu0 %v15319_v35  ;;  %v15344_v0 = vsel %vm414_vm2, %v5841_v39, %v5849_v7 }
 0x51a   :  { %7588 = vmatprep.mubr.bf16.mxu0 %v15326_v62  ;;  %v7382_v17 = vpop.f32.mrb[20].mxu0  ;;  %18663 = vst [vmem:[#allocation67_spill] sm:$0xff] %v15344_v0 }
 0x51b   :  { %v7384_v12 = vpop.f32.mrb[21].mxu0  ;;  %11134 = vmatpush3.bf16.msra.mxu1 %v11347_v60  ;;  %v15362_v44 = vadd.f32 %v15252_v38, %v7382_v17  ;;  %v11329_v60 = vld [vmem:[%s17653_s2 + $0x188] sm:$0xff]  }
 0x51c   :  { %8175 = vmatmul.mubr.bf16.gmra.mrb[184].mxu1 %v15064_v53  ;;  %v7385_v55 = vpop.f32.mrb[22].mxu0  ;;  %11135 = vmatprep.subr.bf16.mxu1 %v11349_v6 }
 0x51d   :  { %8182 = vmatprep.mubr.bf16.mxu1 %v15059_v41  ;;  %v15334_v24 = vpop.f32.mrb[84].mxu1  ;;  %v7387_v15 = vpop.f32.mrb[23].mxu0  ;;  %v15377_v38 = vadd.f32 %v15257_v9, %v7385_v55 }
 0x51e   :  { %v15339_v51 = vpop.f32.mrb[85].mxu1  ;;  %v11350_v15 = vld [vmem:[%s17653_s2 + $0x238] sm:$0xff]  }
 0x51f   :  { %v15341_v3 = vpop.f32.mrb[86].mxu1  ;;  %11136 = vmatpush3.bf16.msra.mxu1 %v11349_v6  ;;  %v11330_v6 = vld [vmem:[%s17653_s2 + $0x190] sm:$0xff]  }
 0x520   :  { %v15346_v19 = vpop.f32.mrb[87].mxu1  ;;  %11137 = vmatprep.subr.bf16.mxu1 %v11350_v15 }
 0x521   :  { %7589 = vmatmul.mubr.bf16.gmra.mrb[124].mxu0 %v15344_v0 }
 0x522   :  { %11059 = vmatprep.mubr.bf16.mxu0 %v18571_v14 }
 0x523   :  { %v7390_v18 = vpop.f32.mrb[24].mxu0  ;;  %11138 = vmatpush3.bf16.msra.mxu1 %v11350_v15  ;;  %v11331_v15 = vld [vmem:[%s17653_s2 + $0x198] sm:$0xff]  }
 0x524   :  { %8183 = vmatmul.mubr.bf16.gmra.mrb[188].mxu1 %v15080_v13  ;;  %v7392_v16 = vpop.f32.mrb[25].mxu0 }
 0x525   :  { %8190 = vmatprep.mubr.bf16.mxu1 %v18571_v14  ;;  %v7393_v56 = vpop.f32.mrb[26].mxu0 }
 0x526   :  { %v15367_v12 = vpop.f32.mrb[88].mxu1  ;;  %v7395_v39 = vpop.f32.mrb[27].mxu0 }
 0x527   :  { %v15369_v7 = vpop.f32.mrb[89].mxu1 }
 0x528   :  { %v15371_v23 = vpop.f32.mrb[90].mxu1 }
 0x529   :  { %11060 = vmatmul.mubr.bf16.vlgmr.msra.gmra.mrb[128].mxu0 %v14778_v28  ;;  %v15380_v17 = vpop.f32.mrb[91].mxu1  ;;  %v15390_v28 = vadd.f32 %v15283_v30, %v7390_v18 }
 0x52a   :  { %11063 = vmatprep.mubr.bf16.mxu0 %v14785_v4  ;;  %8898 = vmatpush1.bf16.msra.mxu0 %v11328_v25 }
 0x52b   :  { %8899 = vmatprep.subr.bf16.mxu0 %v18571_v14 }
 0x52c   :  { %8191 = vmatmul.mubr.bf16.gmra.mrb[192].mxu1 %v18571_v14  ;;  %v7398_v16 = vpop.f32.mrb[28].mxu0 }
 0x52d   :  { %8198 = vmatprep.mubr.bf16.mxu1 %v15096_v1  ;;  %v7400_v9 = vpop.f32.mrb[29].mxu0  ;;  %v15401_v1 = vadd.f32 %v15292_v10, %v7393_v56  ;;  %v15416_v56 = vadd.f32 %v15280_v8, %v7398_v16  ;;  %v18665_v8 = vld [vmem:[#allocation76_spill] sm:$0xff] }
 0x52e   :  { %8900 = vmatpush1.bf16.msra.mxu0 %v11329_v60  ;;  %v7401_v55 = vpop.f32.mrb[30].mxu0  ;;  %v11333_v9 = vld [vmem:[%s17653_s2 + $0x1a0] sm:$0xff]  }
 0x52f   :  { %v15395_v25 = vpop.f32.mrb[92].mxu1  ;;  %v7403_v39 = vpop.f32.mrb[31].mxu0  ;;  %8901 = vmatprep.subr.bf16.mxu0 %v18571_v14 }
 0x530   :  { %v15398_v0 = vpop.f32.mrb[93].mxu1 }
 0x531   :  { %11064 = vmatmul.mubr.bf16.gmra.mrb[132].mxu0 %v14795_v22  ;;  %v15404_v30 = vpop.f32.mrb[94].mxu1 }
 0x532   :  { %11067 = vmatprep.mubr.bf16.mxu0 %v14812_v50  ;;  %v15407_v18 = vpop.f32.mrb[95].mxu1  ;;  %8902 = vmatpush1.bf16.msra.mxu0 %v11330_v6 }
 0x533   :  { %8903 = vmatprep.subr.bf16.mxu0 %v18571_v14 }
 0x534   :  { %8199 = vmatmul.mubr.bf16.gmra.mrb[196].mxu1 %v15109_v34  ;;  %v15425_v34 = vadd.f32 %v15286_v57, %v7401_v55  ;;  %v11335_v55 = vld [vmem:[%s17653_s2 + $0x1b0] sm:$0xff]  }
 0x535   :  { %8206 = vmatprep.mubr.bf16.mxu1 %v15113_v21  ;;  %v7406_v10 = vpop.f32.mrb[32].mxu0  ;;  %v18664_v21 = vld [vmem:[#allocation74_spill] sm:$0xff] }
 0x536   :  { %v7408_v60 = vpop.f32.mrb[33].mxu0  ;;  %8904 = vmatpush1.bf16.msra.mxu0 %v11331_v15  ;;  %v11334_v15 = vld [vmem:[%s17653_s2 + $0x1a8] sm:$0xff]   ;;  %v15442_v57 = vadd.f32 %v15309_v20, %v7406_v10 }
 0x537   :  { %v7409_v6 = vpop.f32.mrb[34].mxu0  ;;  %8905 = vmatprep.subr.bf16.mxu0 %v18571_v14  ;;  %v18669_v20 = vld [vmem:[#allocation80_spill] sm:$0xff] }
 0x538   :  { %v15422_v39 = vpop.f32.mrb[96].mxu1  ;;  %v7411_v62 = vpop.f32.mrb[35].mxu0  ;;  %18666 = vst [vmem:[#allocation35_spill] sm:$0xff] %v15442_v57  ;;  %v15449_v53 = vadd.f32 %v15316_v61, %v7409_v6  ;;  %v11338_v6 = vld [vmem:[%s17653_s2 + $0x1c0] sm:$0xff]  }
 0x539   :  { %11068 = vmatmul.mubr.bf16.gmra.mrb[136].mxu0 %v18664_v21  ;;  %v15428_v13 = vpop.f32.mrb[97].mxu1 }
 0x53a   :  { %11071 = vmatprep.mubr.bf16.mxu0 %v18665_v8  ;;  %v15431_v16 = vpop.f32.mrb[98].mxu1  ;;  %8906 = vmatpush1.bf16.msra.mxu0 %v11333_v9  ;;  %18667 = vst [vmem:[#allocation101_spill] sm:$0xff] %v15449_v53 }
 0x53b   :  { %v15436_v60 = vpop.f32.mrb[99].mxu1  ;;  %8907 = vmatprep.subr.bf16.mxu0 %v18571_v14 }
 0x53c   :  { %8207 = vmatmul.mubr.bf16.gmra.mrb[200].mxu1 %v15119_v31 }
 0x53d   :  { %8214 = vmatprep.mubr.bf16.mxu1 %v15123_v58 }
 0x53e   :  { %v7414_v62 = vpop.f32.mrb[36].mxu0  ;;  %8908 = vmatpush1.bf16.msra.mxu0 %v11334_v15  ;;  %v11336_v15 = vld [vmem:[%s17653_s2 + $0x1b8] sm:$0xff]  }
 0x53f   :  { %v7416_v9 = vpop.f32.mrb[37].mxu0  ;;  %8909 = vmatprep.subr.bf16.mxu0 %v18571_v14 }
 0x540   :  { %v7417_v41 = vpop.f32.mrb[38].mxu0 }
 0x541   :  { %11072 = vmatmul.mubr.bf16.gmra.mrb[140].mxu0 %v18668_v45  ;;  %v15452_v31 = vpop.f32.mrb[100].mxu1  ;;  %v7419_v58 = vpop.f32.mrb[39].mxu0  ;;  %v15475_v53 = vadd.f32 %v15314_v40, %v7417_v41 }
 0x542   :  { %11075 = vmatprep.mubr.bf16.mxu0 %v18669_v20  ;;  %v15455_v10 = vpop.f32.mrb[101].mxu1  ;;  %8910 = vmatpush1.bf16.msra.mxu0 %v11335_v55  ;;  %v15468_v58 = vadd.f32 %v15306_v2, %v7414_v62  ;;  %v18673_v20 = vld [vmem:[#allocation84_spill] sm:$0xff] }
 0x543   :  { %v15460_v9 = vpop.f32.mrb[102].mxu1  ;;  %8911 = vmatprep.subr.bf16.mxu0 %v18571_v14  ;;  %18671 = vst [vmem:[#allocation103_spill] sm:$0xff] %v15475_v53  ;;  %v11339_v62 = vld [vmem:[%s17653_s2 + $0x1c8] sm:$0xff]  }
 0x544   :  { %8215 = vmatmul.mubr.bf16.gmra.mrb[204].mxu1 %v15129_v33  ;;  %v15464_v61 = vpop.f32.mrb[103].mxu1  ;;  %18670 = vst [vmem:[#allocation68_spill] sm:$0xff] %v15468_v58  ;;  %v18672_v33 = vld [vmem:[#allocation81_spill] sm:$0xff] }
 0x545   :  { %8222 = vmatprep.mubr.bf16.mxu1 %v15133_v5 }
 0x546   :  { %8912 = vmatpush1.bf16.msra.mxu0 %v11336_v15 }
 0x547   :  { %v7422_v55 = vpop.f32.mrb[40].mxu0  ;;  %8913 = vmatprep.subr.bf16.mxu0 %v18571_v14 }
 0x548   :  { %v7424_v36 = vpop.f32.mrb[41].mxu0  ;;  %v15494_v40 = vadd.f32 %v15339_v51, %v7422_v55  ;;  %v11341_v51 = vld [vmem:[%s17653_s2 + $0x1d8] sm:$0xff]  }
 0x549   :  { %11076 = vmatmul.mubr.bf16.gmra.mrb[144].mxu0 %v18672_v33  ;;  %v7425_v57 = vpop.f32.mrb[42].mxu0 }
 0x54a   :  { %11079 = vmatprep.mubr.bf16.mxu0 %v18673_v20  ;;  %v15479_v5 = vpop.f32.mrb[104].mxu1  ;;  %v7427_v2 = vpop.f32.mrb[43].mxu0  ;;  %8914 = vmatpush1.bf16.msra.mxu0 %v11338_v6  ;;  %18674 = vst [vmem:[#allocation96_spill] sm:$0xff] %v15494_v40  ;;  %v11340_v6 = vld [vmem:[%s17653_s2 + $0x1d0] sm:$0xff]   ;;  %v15501_v53 = vadd.f32 %v15346_v19, %v7425_v57  ;;  %v18681_v40 = vld [vmem:[#allocation88_spill] sm:$0xff] }
 0x54b   :  { %v15484_v15 = vpop.f32.mrb[105].mxu1  ;;  %8915 = vmatprep.subr.bf16.mxu0 %v18571_v14 }
 0x54c   :  { %8223 = vmatmul.mubr.bf16.gmra.mrb[208].mxu1 %v15139_v11  ;;  %v15488_v36 = vpop.f32.mrb[106].mxu1  ;;  %18675 = vst [vmem:[#allocation92_spill] sm:$0xff] %v15501_v53  ;;  %v18676_v11 = vld [vmem:[#allocation85_spill] sm:$0xff]  ;;  %v18680_v53 = vld [vmem:[#allocation87_spill] sm:$0xff] }
 0x54d   :  { %8230 = vmatprep.mubr.bf16.mxu1 %v15143_v54  ;;  %v15491_v41 = vpop.f32.mrb[107].mxu1  ;;  %v18677_v54 = vld [vmem:[#allocation86_spill] sm:$0xff] }
 0x54e   :  { %8916 = vmatpush1.bf16.msra.mxu0 %v11339_v62 }
 0x54f   :  { %8917 = vmatprep.subr.bf16.mxu0 %v18571_v14 }
 0x550   :  { %v7430_v2 = vpop.f32.mrb[44].mxu0 }
 0x551   :  { %11080 = vmatmul.mubr.bf16.gmra.mrb[148].mxu0 %v18676_v11  ;;  %v7432_v58 = vpop.f32.mrb[45].mxu0 }
 0x552   :  { %11083 = vmatprep.mubr.bf16.mxu0 %v18677_v54  ;;  %v7433_v20 = vpop.f32.mrb[46].mxu0  ;;  %8918 = vmatpush1.bf16.msra.mxu0 %v11340_v6  ;;  %v15518_v58 = vadd.f32 %v15334_v24, %v7430_v2  ;;  %v11344_v24 = vld [vmem:[%s17653_s2 + $0x1e8] sm:$0xff]  }
 0x553   :  { %v15508_v55 = vpop.f32.mrb[108].mxu1  ;;  %v7435_v62 = vpop.f32.mrb[47].mxu0  ;;  %8919 = vmatprep.subr.bf16.mxu0 %v18571_v14 }
 0x554   :  { %8231 = vmatmul.mubr.bf16.gmra.mrb[212].mxu1 %v15152_v37  ;;  %v15512_v19 = vpop.f32.mrb[109].mxu1  ;;  %18678 = vst [vmem:[#allocation71_spill] sm:$0xff] %v15518_v58  ;;  %v11343_v62 = vld [vmem:[%s17653_s2 + $0x1e0] sm:$0xff]   ;;  %v15527_v37 = vadd.f32 %v15341_v3, %v7433_v20 }
 0x555   :  { %8238 = vmatprep.mubr.bf16.mxu1 %v15156_v59  ;;  %v15515_v57 = vpop.f32.mrb[110].mxu1 }
 0x556   :  { %v15520_v6 = vpop.f32.mrb[111].mxu1  ;;  %8920 = vmatpush1.bf16.msra.mxu0 %v11341_v51  ;;  %18679 = vst [vmem:[#allocation94_spill] sm:$0xff] %v15527_v37 }
 0x557   :  { %8921 = vmatprep.subr.bf16.mxu0 %v18571_v14 }
 0x559   :  { %11084 = vmatmul.mubr.bf16.gmra.mrb[152].mxu0 %v18680_v53  ;;  %v7438_v59 = vpop.f32.mrb[48].mxu0 }
 0x55a   :  { %11087 = vmatprep.mubr.bf16.mxu0 %v18681_v40  ;;  %v7440_v54 = vpop.f32.mrb[49].mxu0  ;;  %8922 = vmatpush1.bf16.msra.mxu0 %v11343_v62  ;;  %v15542_v37 = vadd.f32 %v15369_v7, %v7438_v59  ;;  %v11345_v62 = vld [vmem:[%s17653_s2 + $0x1f0] sm:$0xff]   ;;  %v11348_v59 = vld [vmem:[%s17653_s2 + $0x1f8] sm:$0xff]  }
 0x55b   :  { %v7441_v2 = vpop.f32.mrb[50].mxu0  ;;  %8923 = vmatprep.subr.bf16.mxu0 %v18571_v14 }
 0x55c   :  { %8239 = vmatmul.mubr.bf16.gmra.mrb[216].mxu1 %v15162_v27  ;;  %v15536_v51 = vpop.f32.mrb[112].mxu1  ;;  %v7443_v3 = vpop.f32.mrb[51].mxu0  ;;  %18682 = vst [vmem:[#allocation57_spill] sm:$0xff] %v15542_v37 }
 0x55d   :  { %8246 = vmatprep.mubr.bf16.mxu1 %v15166_v48  ;;  %v15539_v20 = vpop.f32.mrb[113].mxu1  ;;  %v15553_v3 = vadd.f32 %v15380_v17, %v7441_v2  ;;  %v18684_v48 = vld [vmem:[#allocation89_spill] sm:$0xff] }
 0x55e   :  { %v15544_v54 = vpop.f32.mrb[114].mxu1  ;;  %8924 = vmatpush1.bf16.msra.mxu0 %v11344_v24 }
 0x55f   :  { %v15549_v58 = vpop.f32.mrb[115].mxu1  ;;  %8925 = vmatprep.subr.bf16.mxu0 %v18571_v14  ;;  %18683 = vst [vmem:[#allocation49_spill] sm:$0xff] %v15553_v3 }
 0x561   :  { %11088 = vmatmul.mubr.bf16.gmra.mrb[156].mxu0 %v18684_v48 }
 0x562   :  { %v7446_v27 = vpop.f32.mrb[52].mxu0  ;;  %11091 = vmatprep.mubr.bf16.mxu0 %v18571_v14  ;;  %8926 = vmatpush1.bf16.msra.mxu0 %v11345_v62 }
 0x563   :  { %v7448_v7 = vpop.f32.mrb[53].mxu0  ;;  %8927 = vmatprep.subr.bf16.mxu0 %v18571_v14  ;;  %v15566_v3 = vadd.f32 %v15367_v12, %v7446_v27  ;;  %v18689_v14 = vld [vmem:[#allocation93_spill] sm:$0xff] }
 0x564   :  { %8247 = vmatmul.mubr.bf16.gmra.mrb[220].mxu1 %v15172_v63  ;;  %v7449_v24 = vpop.f32.mrb[54].mxu0  ;;  %v18688_v63 = vld [vmem:[#allocation91_spill] sm:$0xff] }
 0x565   :  { %8254 = vmatprep.mubr.bf16.mxu1 %v15176_v32  ;;  %v15563_v17 = vpop.f32.mrb[116].mxu1  ;;  %v7451_v2 = vpop.f32.mrb[55].mxu0  ;;  %18685 = vst [vmem:[#allocation98_spill] sm:$0xff] %v15566_v3  ;;  %v15575_v7 = vadd.f32 %v15371_v23, %v7449_v24 }
 0x566   :  { %v15568_v37 = vpop.f32.mrb[117].mxu1  ;;  %8928 = vmatpush1.bf16.msra.mxu0 %v11348_v59 }
 0x567   :  { %v15570_v62 = vpop.f32.mrb[118].mxu1  ;;  %18687 = vst [vmem:[#allocation73_spill] sm:$0xff] %v15575_v7 }
 0x568   :  { %18686 = vst [vmem:[#allocation72_spill] sm:$0xff] %v15570_v62  ;;  %v15572_v48 = vpop.f32.mrb[119].mxu1 }
 0x569   :  { %11092 = vmatmul.mubr.bf16.gmra.mrb[160].mxu0 %v18688_v63 }
 0x56a   :  { %11095 = vmatprep.mubr.bf16.mxu0 %v18689_v14 }
 0x56b   :  { %v7454_v32 = vpop.f32.mrb[56].mxu0 }
 0x56c   :  { %8255 = vmatmul.mubr.bf16.gmra.mrb[224].mxu1 %v15182_v46  ;;  %v7456_v2 = vpop.f32.mrb[57].mxu0  ;;  %v15582_v12 = vadd.f32 %v15398_v0, %v7454_v32  ;;  %v18692_v46 = vld [vmem:[#allocation95_spill] sm:$0xff] }
 0x56d   :  { %8262 = vmatprep.mubr.bf16.mxu1 %v15186_v52  ;;  %v7457_v27 = vpop.f32.mrb[58].mxu0  ;;  %v18693_v2 = vld [vmem:[#allocation100_spill] sm:$0xff] }
 0x56e   :  { %18690 = vst [vmem:[#allocation48_spill] sm:$0xff] %v15582_v12  ;;  %v15584_v59 = vpop.f32.mrb[120].mxu1  ;;  %v7459_v3 = vpop.f32.mrb[59].mxu0  ;;  %v15591_v63 = vadd.f32 %v15407_v18, %v7457_v27 }
 0x56f   :  { %v15586_v62 = vpop.f32.mrb[121].mxu1 }
 0x570   :  { %v15588_v23 = vpop.f32.mrb[122].mxu1  ;;  %18691 = vst [vmem:[#allocation66_spill] sm:$0xff] %v15591_v63 }
 0x571   :  { %v15593_v24 = vpop.f32.mrb[123].mxu1  ;;  %11096 = vmatmul.mubr.bf16.gmra.mrb[164].mxu0 %v18692_v46 }
 0x572   :  { %11099 = vmatprep.mubr.bf16.mxu0 %v18693_v2  ;;  %v18699_v2 = vld [vmem:[#allocation102_spill] sm:$0xff] }
 0x574   :  { %8263 = vmatmul.mubr.bf16.gmra.mrb[228].mxu1 %v15195_v42  ;;  %v7462_v32 = vpop.f32.mrb[60].mxu0 }
 0x575   :  { %8270 = vmatprep.mubr.bf16.mxu1 %v15199_v49  ;;  %v7464_v0 = vpop.f32.mrb[61].mxu0  ;;  %v15600_v3 = vadd.f32 %v15395_v25, %v7462_v32  ;;  %v18701_v49 = vld [vmem:[#allocation69_spill] sm:$0xff]  ;;  %v18703_v32 = vld [vmem:[#allocation26_spill] sm:$0xff] }
 0x576   :  { %v7465_v52 = vpop.f32.mrb[62].mxu0  ;;  %v18702_v0 = vld [vmem:[#allocation37_spill] sm:$0xff] }
 0x577   :  { %18694 = vst [vmem:[#allocation74_spill] sm:$0xff] %v15600_v3  ;;  %v15602_v12 = vpop.f32.mrb[124].mxu1  ;;  %v7467_v18 = vpop.f32.mrb[63].mxu0  ;;  %v15607_v63 = vadd.f32 %v15404_v30, %v7465_v52 }
 0x578   :  { %18695 = vst [vmem:[#allocation76_spill] sm:$0xff] %v15602_v12  ;;  %v15604_v27 = vpop.f32.mrb[125].mxu1 }
 0x579   :  { %18696 = vst [vmem:[#allocation77_spill] sm:$0xff] %v15604_v27  ;;  %18697 = vst [vmem:[#allocation81_spill] sm:$0xff] %v15607_v63  ;;  %v15609_v46 = vpop.f32.mrb[126].mxu1  ;;  %11100 = vmatmul.mubr.bf16.gmra.mrb[168].mxu0 %v18699_v2  ;;  %v18708_v27 = vld [vmem:[#allocation25_spill] sm:$0xff] }
 0x57a   :  { %18698 = vst [vmem:[#allocation85_spill] sm:$0xff] %v15609_v46  ;;  %v15612_v42 = vpop.f32.mrb[127].mxu1  ;;  %11103 = vmatprep.mubr.bf16.mxu0 %v18701_v49  ;;  %v18706_v46 = vld [vmem:[#allocation64_spill] sm:$0xff] }
 0x57b   :  { %18700 = vst [vmem:[#allocation87_spill] sm:$0xff] %v15612_v42 }
 0x57c   :  { %8271 = vmatmul.mubr.bf16.gmra.mrb[232].mxu1 %v18702_v0  ;;  %v7470_v25 = vpop.f32.mrb[64].mxu0  ;;  %v18709_v0 = vld [vmem:[#allocation28_spill] sm:$0xff] }
 0x57d   :  { %8278 = vmatprep.mubr.bf16.mxu1 %v18703_v32  ;;  %v15618_v18 = vadd.f32 %v15428_v13, %v7470_v25  ;;  %v7472_v3 = vpop.f32.mrb[65].mxu0  ;;  %v18711_v32 = vld [vmem:[#allocation9_spill] sm:$0xff] }
 0x57e   :  { %v7473_v12 = vpop.f32.mrb[66].mxu0  ;;  %v18712_v3 = vld [vmem:[#allocation65_spill] sm:$0xff] }
 0x57f   :  { %18704 = vst [vmem:[#allocation88_spill] sm:$0xff] %v15618_v18  ;;  %v8064_v52 = vpop.f32.mrb[128].mxu1  ;;  %v15621_v30 = vadd.f32 %v15436_v60, %v7473_v12  ;;  %v7475_v63 = vpop.f32.mrb[67].mxu0  ;;  %v18713_v18 = vld [vmem:[#allocation46_spill] sm:$0xff] }
 0x580   :  { %v15624_v2 = vadd.f32 %v8064_v52, %v18706_v46  ;;  %v8066_v42 = vpop.f32.mrb[129].mxu1 }
 0x581   :  { %18705 = vst [vmem:[#allocation91_spill] sm:$0xff] %v15621_v30  ;;  %v8067_v49 = vpop.f32.mrb[130].mxu1  ;;  %11104 = vmatmul.mubr.bf16.gmra.mrb[172].mxu0 %v18708_v27 }
 0x582   :  { %18707 = vst [vmem:[#allocation93_spill] sm:$0xff] %v15624_v2  ;;  %v15628_v7 = vadd.f32 %v8067_v49, %v18709_v0  ;;  %11107 = vmatprep.mubr.bf16.mxu0 %v18711_v32  ;;  %v8069_v13 = vpop.f32.mrb[131].mxu1  ;;  %v18716_v49 = vld [vmem:[#allocation20_spill] sm:$0xff] }
 0x584   :  { %18710 = vst [vmem:[#allocation64_spill] sm:$0xff] %v15628_v7  ;;  %8279 = vmatmul.mubr.bf16.gmra.mrb[236].mxu1 %v18712_v3  ;;  %v7478_v25 = vpop.f32.mrb[68].mxu0  ;;  %v18717_v7 = vld [vmem:[#allocation10_spill] sm:$0xff]  ;;  %v18718_v3 = vld [vmem:[#allocation27_spill] sm:$0xff] }
 0x585   :  { %8286 = vmatprep.mubr.bf16.mxu1 %v18713_v18  ;;  %v15634_v60 = vadd.f32 %v15422_v39, %v7478_v25  ;;  %v7480_v46 = vpop.f32.mrb[69].mxu0  ;;  %v18719_v39 = vld [vmem:[#allocation30_spill] sm:$0xff]  ;;  %v18720_v25 = vld [vmem:[#allocation47_spill] sm:$0xff] }
 0x586   :  { %v7481_v12 = vpop.f32.mrb[70].mxu0 }
 0x587   :  { %18714 = vst [vmem:[#allocation25_spill] sm:$0xff] %v15634_v60  ;;  %v8072_v42 = vpop.f32.mrb[132].mxu1  ;;  %v15637_v63 = vadd.f32 %v15431_v16, %v7481_v12  ;;  %v7483_v52 = vpop.f32.mrb[71].mxu0  ;;  %v18721_v60 = vld [vmem:[#allocation36_spill] sm:$0xff] }
 0x588   :  { %v15640_v0 = vadd.f32 %v8072_v42, %v18716_v49  ;;  %v8074_v30 = vpop.f32.mrb[133].mxu1 }
 0x589   :  { %18715 = vst [vmem:[#allocation28_spill] sm:$0xff] %v15637_v63  ;;  %v8075_v13 = vpop.f32.mrb[134].mxu1  ;;  %11108 = vmatmul.mubr.bf16.gmra.mrb[176].mxu0 %v18717_v7 }
 0x58a   :  { %v15644_v2 = vadd.f32 %v8075_v13, %v18718_v3  ;;  %v8077_v18 = vpop.f32.mrb[135].mxu1  ;;  %11111 = vmatprep.mubr.bf16.mxu0 %v18719_v39  ;;  %v18724_v3 = vld [vmem:[#allocation114_spill] sm:$0xff]  ;;  %v18725_v39 = vld [vmem:[#allocation12_spill] sm:$0xff] }
 0x58c   :  { %8287 = vmatmul.mubr.bf16.gmra.mrb[240].mxu1 %v18720_v25  ;;  %v7486_v46 = vpop.f32.mrb[72].mxu0  ;;  %v18726_v25 = vld [vmem:[#allocation40_spill] sm:$0xff] }
 0x58d   :  { %8294 = vmatprep.mubr.bf16.mxu1 %v18721_v60  ;;  %v15650_v16 = vadd.f32 %v15455_v10, %v7486_v46  ;;  %v7488_v12 = vpop.f32.mrb[73].mxu0  ;;  %v18727_v10 = vld [vmem:[#allocation33_spill] sm:$0xff]  ;;  %v18728_v46 = vld [vmem:[#allocation58_spill] sm:$0xff] }
 0x58e   :  { %v7489_v42 = vpop.f32.mrb[74].mxu0 }
 0x58f   :  { %18722 = vst [vmem:[#allocation9_spill] sm:$0xff] %v15650_v16  ;;  %v8080_v30 = vpop.f32.mrb[136].mxu1  ;;  %v15653_v52 = vadd.f32 %v15464_v61, %v7489_v42  ;;  %v7491_v49 = vpop.f32.mrb[75].mxu0  ;;  %v18729_v16 = vld [vmem:[#allocation60_spill] sm:$0xff] }
 0x590   :  { %v15656_v13 = vadd.f32 %v8080_v30, %v18724_v3  ;;  %v8082_v18 = vpop.f32.mrb[137].mxu1 }
 0x591   :  { %18723 = vst [vmem:[#allocation20_spill] sm:$0xff] %v15653_v52  ;;  %v8083_v63 = vpop.f32.mrb[138].mxu1  ;;  %11112 = vmatmul.mubr.bf16.gmra.mrb[180].mxu0 %v18725_v39  ;;  %v18732_v52 = vld [vmem:[#allocation108_spill] sm:$0xff] }
 0x592   :  { %v15660_v7 = vadd.f32 %v8083_v63, %v18726_v25  ;;  %v8085_v60 = vpop.f32.mrb[139].mxu1  ;;  %11115 = vmatprep.mubr.bf16.mxu0 %v18727_v10 }
 0x594   :  { %8295 = vmatmul.mubr.bf16.gmra.mrb[244].mxu1 %v18728_v46  ;;  %v7494_v12 = vpop.f32.mrb[76].mxu0 }
 0x595   :  { %8302 = vmatprep.mubr.bf16.mxu1 %v18729_v16  ;;  %v15666_v61 = vadd.f32 %v15452_v31, %v7494_v12  ;;  %v7496_v42 = vpop.f32.mrb[77].mxu0  ;;  %v18733_v31 = vld [vmem:[#allocation39_spill] sm:$0xff]  ;;  %v18734_v12 = vld [vmem:[#allocation61_spill] sm:$0xff] }
 0x596   :  { %v7497_v30 = vpop.f32.mrb[78].mxu0 }
 0x597   :  { %18730 = vst [vmem:[#allocation27_spill] sm:$0xff] %v15666_v61  ;;  %v8088_v49 = vpop.f32.mrb[140].mxu1  ;;  %v15669_v3 = vadd.f32 %v15460_v9, %v7497_v30  ;;  %v7499_v18 = vpop.f32.mrb[79].mxu0  ;;  %v18735_v61 = vld [vmem:[#allocation43_spill] sm:$0xff] }
 0x598   :  { %v15672_v63 = vadd.f32 %v8088_v49, %v15312_v43  ;;  %v8090_v60 = vpop.f32.mrb[141].mxu1 }
 0x599   :  { %18731 = vst [vmem:[#allocation114_spill] sm:$0xff] %v15669_v3  ;;  %v8091_v25 = vpop.f32.mrb[142].mxu1  ;;  %11116 = vmatmul.mubr.bf16.gmra.mrb[184].mxu0 %v18732_v52  ;;  %v18736_v3 = vld [vmem:[#allocation38_spill] sm:$0xff] }
 0x59a   :  { %v15676_v46 = vadd.f32 %v8091_v25, %v15322_v47  ;;  %v8093_v16 = vpop.f32.mrb[143].mxu1  ;;  %11119 = vmatprep.mubr.bf16.mxu0 %v18733_v31 }
 0x59c   :  { %8303 = vmatmul.mubr.bf16.gmra.mrb[248].mxu1 %v18734_v12  ;;  %v7502_v42 = vpop.f32.mrb[80].mxu0 }
 0x59d   :  { %8310 = vmatprep.mubr.bf16.mxu1 %v18735_v61  ;;  %v15682_v9 = vadd.f32 %v15484_v15, %v7502_v42  ;;  %v7504_v43 = vpop.f32.mrb[81].mxu0  ;;  %v18737_v15 = vld [vmem:[#allocation62_spill] sm:$0xff] }
 0x59e   :  { %v7505_v30 = vpop.f32.mrb[82].mxu0 }
 0x59f   :  { %v8096_v49 = vpop.f32.mrb[144].mxu1  ;;  %v15685_v18 = vadd.f32 %v15491_v41, %v7505_v30  ;;  %v7507_v60 = vpop.f32.mrb[83].mxu0 }
 0x5a0   :  { %v15688_v47 = vadd.f32 %v8096_v49, %v15337_v26  ;;  %v8098_v16 = vpop.f32.mrb[145].mxu1 }
 0x5a1   :  { %v8099_v25 = vpop.f32.mrb[146].mxu1  ;;  %11120 = vmatmul.mubr.bf16.gmra.mrb[188].mxu0 %v18736_v3 }
 0x5a2   :  { %v15692_v12 = vadd.f32 %v8099_v25, %v15352_v29  ;;  %v8101_v61 = vpop.f32.mrb[147].mxu1  ;;  %8929 = vmatprep.mubr.bf16.mxu0 %v18737_v15  ;;  %v18738_v25 = vld [vmem:[#allocation13_spill] sm:$0xff] }
 0x5a4   :  { %8311 = vmatmul.mubr.bf16.gmra.mrb[252].mxu1 %v15319_v35  ;;  %v7510_v42 = vpop.f32.mrb[84].mxu0  ;;  %v18770_v35 = vld [vmem:[#allocation90_spill] sm:$0xff] }
 0x5a5   :  { %11139 = vmatprep.mubr.bf16.mxu1 %v14785_v4  ;;  %v15698_v41 = vadd.f32 %v15479_v5, %v7510_v42  ;;  %v7512_v26 = vpop.f32.mrb[85].mxu0  ;;  %v18739_v5 = vld [vmem:[#allocation63_spill] sm:$0xff] }
 0x5a6   :  { %v7513_v43 = vpop.f32.mrb[86].mxu0 }
 0x5a7   :  { %v8104_v30 = vpop.f32.mrb[148].mxu1  ;;  %v15701_v49 = vadd.f32 %v15488_v36, %v7513_v43  ;;  %v7515_v60 = vpop.f32.mrb[87].mxu0 }
 0x5a8   :  { %v15704_v29 = vadd.f32 %v8104_v30, %v15362_v44  ;;  %v8106_v61 = vpop.f32.mrb[149].mxu1 }
 0x5a9   :  { %v8107_v16 = vpop.f32.mrb[150].mxu1  ;;  %8930 = vmatmul.mubr.bf16.vlgmr.msra.gmra.mrb[192].mxu0 %v18738_v25  ;;  %v18740_v25 = vld [vmem:[#allocation54_spill] sm:$0xff] }
 0x5aa   :  { %v15708_v15 = vadd.f32 %v8107_v16, %v15377_v38  ;;  %v8109_v4 = vpop.f32.mrb[151].mxu1  ;;  %8937 = vmatprep.mubr.bf16.mxu0 %v18739_v5 }
 0x5ac   :  { %11140 = vmatmul.mubr.bf16.vlgmr.msra.gmra.mrb[0].mxu1 %v14795_v22  ;;  %v7518_v42 = vpop.f32.mrb[88].mxu0 }
 0x5ad   :  { %11143 = vmatprep.mubr.bf16.mxu1 %v14812_v50  ;;  %v15714_v36 = vadd.f32 %v15512_v19, %v7518_v42  ;;  %v7520_v44 = vpop.f32.mrb[89].mxu0  ;;  %v18741_v19 = vld [vmem:[#allocation75_spill] sm:$0xff] }
 0x5ae   :  { %v7521_v26 = vpop.f32.mrb[90].mxu0 }
 0x5af   :  { %v8112_v43 = vpop.f32.mrb[152].mxu1  ;;  %v15717_v30 = vadd.f32 %v15520_v6, %v7521_v26  ;;  %v7523_v60 = vpop.f32.mrb[91].mxu0 }
 0x5b0   :  { %v15720_v38 = vadd.f32 %v8112_v43, %v15390_v28  ;;  %v8114_v61 = vpop.f32.mrb[153].mxu1 }
 0x5b1   :  { %v8115_v16 = vpop.f32.mrb[154].mxu1  ;;  %8938 = vmatmul.mubr.bf16.gmra.mrb[196].mxu0 %v18740_v25  ;;  %v18742_v61 = vld [vmem:[#allocation79_spill] sm:$0xff]  ;;  %v18744_v25 = vld [vmem:[#allocation80_spill] sm:$0xff] }
 0x5b2   :  { %v15724_v22 = vadd.f32 %v8115_v16, %v15401_v1  ;;  %v8117_v50 = vpop.f32.mrb[155].mxu1  ;;  %8945 = vmatprep.mubr.bf16.mxu0 %v18741_v19 }
 0x5b4   :  { %11144 = vmatmul.mubr.bf16.gmra.mrb[4].mxu1 %v18664_v21  ;;  %v7526_v4 = vpop.f32.mrb[92].mxu0 }
 0x5b5   :  { %11147 = vmatprep.mubr.bf16.mxu1 %v18665_v8  ;;  %v15730_v6 = vadd.f32 %v15508_v55, %v7526_v4  ;;  %v7528_v28 = vpop.f32.mrb[93].mxu0  ;;  %v18743_v55 = vld [vmem:[#allocation78_spill] sm:$0xff] }
 0x5b6   :  { %v7529_v5 = vpop.f32.mrb[94].mxu0 }
 0x5b7   :  { %v8120_v42 = vpop.f32.mrb[156].mxu1  ;;  %v15733_v44 = vadd.f32 %v15515_v57, %v7529_v5  ;;  %v7531_v26 = vpop.f32.mrb[95].mxu0 }
 0x5b8   :  { %v15736_v1 = vadd.f32 %v8120_v42, %v15416_v56  ;;  %v8122_v43 = vpop.f32.mrb[157].mxu1 }
 0x5b9   :  { %v8123_v60 = vpop.f32.mrb[158].mxu1  ;;  %8946 = vmatmul.mubr.bf16.gmra.mrb[200].mxu0 %v18742_v61  ;;  %v18746_v43 = vld [vmem:[#allocation83_spill] sm:$0xff] }
 0x5ba   :  { %v15740_v21 = vadd.f32 %v8123_v60, %v15425_v34  ;;  %v8125_v8 = vpop.f32.mrb[159].mxu1  ;;  %8953 = vmatprep.mubr.bf16.mxu0 %v18743_v55  ;;  %v18745_v34 = vld [vmem:[#allocation35_spill] sm:$0xff]  ;;  %v18749_v55 = vld [vmem:[#allocation84_spill] sm:$0xff] }
 0x5bc   :  { %11148 = vmatmul.mubr.bf16.gmra.mrb[8].mxu1 %v18668_v45  ;;  %v7534_v16 = vpop.f32.mrb[96].mxu0  ;;  %v18747_v45 = vld [vmem:[#allocation101_spill] sm:$0xff] }
 0x5bd   :  { %11151 = vmatprep.mubr.bf16.mxu1 %v18744_v25  ;;  %v15746_v57 = vadd.f32 %v15539_v20, %v7534_v16  ;;  %v7536_v56 = vpop.f32.mrb[97].mxu0  ;;  %v18748_v20 = vld [vmem:[#allocation82_spill] sm:$0xff] }
 0x5be   :  { %v7537_v50 = vpop.f32.mrb[98].mxu0 }
 0x5bf   :  { %v8128_v19 = vpop.f32.mrb[160].mxu1  ;;  %v15749_v4 = vadd.f32 %v15549_v58, %v7537_v50  ;;  %v7539_v28 = vpop.f32.mrb[99].mxu0 }
 0x5c0   :  { %v15752_v5 = vadd.f32 %v8128_v19, %v18745_v34  ;;  %v8130_v42 = vpop.f32.mrb[161].mxu1  ;;  %v18751_v28 = vld [vmem:[#allocation68_spill] sm:$0xff] }
 0x5c1   :  { %v8131_v26 = vpop.f32.mrb[162].mxu1  ;;  %8954 = vmatmul.mubr.bf16.gmra.mrb[204].mxu0 %v18746_v43  ;;  %v18752_v43 = vld [vmem:[#allocation14_spill] sm:$0xff] }
 0x5c2   :  { %v15756_v60 = vadd.f32 %v8131_v26, %v18747_v45  ;;  %v8133_v61 = vpop.f32.mrb[163].mxu1  ;;  %8961 = vmatprep.mubr.bf16.mxu0 %v18748_v20 }
 0x5c4   :  { %11152 = vmatmul.mubr.bf16.gmra.mrb[12].mxu1 %v18672_v33  ;;  %v7542_v8 = vpop.f32.mrb[100].mxu0  ;;  %v18753_v33 = vld [vmem:[#allocation103_spill] sm:$0xff] }
 0x5c5   :  { %11155 = vmatprep.mubr.bf16.mxu1 %v18749_v55  ;;  %v15762_v58 = vadd.f32 %v15536_v51, %v7542_v8  ;;  %v7544_v16 = vpop.f32.mrb[101].mxu0  ;;  %v18754_v51 = vld [vmem:[#allocation55_spill] sm:$0xff]  ;;  %v18755_v8 = vld [vmem:[#allocation86_spill] sm:$0xff] }
 0x5c6   :  { %v7545_v25 = vpop.f32.mrb[102].mxu0 }
 0x5c7   :  { %v8136_v56 = vpop.f32.mrb[164].mxu1  ;;  %v15765_v50 = vadd.f32 %v15544_v54, %v7545_v25  ;;  %v7547_v19 = vpop.f32.mrb[103].mxu0 }
 0x5c8   :  { %v15768_v34 = vadd.f32 %v8136_v56, %v18751_v28  ;;  %v8138_v42 = vpop.f32.mrb[165].mxu1  ;;  %v18758_v28 = vld [vmem:[#allocation96_spill] sm:$0xff] }
 0x5c9   :  { %18750 = vst [vmem:[#allocation12_spill] sm:$0xff] %v15765_v50  ;;  %v8139_v26 = vpop.f32.mrb[166].mxu1  ;;  %8962 = vmatmul.mubr.bf16.gmra.mrb[208].mxu0 %v18752_v43 }
 0x5ca   :  { %v15772_v45 = vadd.f32 %v8139_v26, %v18753_v33  ;;  %v8141_v61 = vpop.f32.mrb[167].mxu1  ;;  %8969 = vmatprep.mubr.bf16.mxu0 %v18754_v51  ;;  %v18759_v33 = vld [vmem:[#allocation56_spill] sm:$0xff] }
 0x5cc   :  { %11156 = vmatmul.mubr.bf16.gmra.mrb[16].mxu1 %v18676_v11  ;;  %v7550_v20 = vpop.f32.mrb[104].mxu0  ;;  %v18760_v11 = vld [vmem:[#allocation92_spill] sm:$0xff] }
 0x5cd   :  { %11159 = vmatprep.mubr.bf16.mxu1 %v18755_v8  ;;  %v15778_v54 = vadd.f32 %v15568_v37, %v7550_v20  ;;  %v7552_v55 = vpop.f32.mrb[105].mxu0  ;;  %v18761_v37 = vld [vmem:[#allocation19_spill] sm:$0xff] }
 0x5ce   :  { %v7553_v16 = vpop.f32.mrb[106].mxu0 }
 0x5cf   :  { %18756 = vst [vmem:[#allocation40_spill] sm:$0xff] %v15778_v54  ;;  %v8144_v25 = vpop.f32.mrb[168].mxu1  ;;  %v15781_v56 = vadd.f32 %v15572_v48, %v7553_v16  ;;  %v7555_v19 = vpop.f32.mrb[107].mxu0  ;;  %v18799_v54 = vld [vmem:[#allocation8_spill] sm:$0xff] }
 0x5d0   :  { %v15784_v42 = vadd.f32 %v8144_v25, %v18758_v28  ;;  %v8146_v26 = vpop.f32.mrb[169].mxu1  ;;  %v18763_v25 = vld [vmem:[#allocation72_spill] sm:$0xff] }
 0x5d1   :  { %18757 = vst [vmem:[#allocation33_spill] sm:$0xff] %v15781_v56  ;;  %v8147_v43 = vpop.f32.mrb[170].mxu1  ;;  %8970 = vmatmul.mubr.bf16.gmra.mrb[212].mxu0 %v18759_v33  ;;  %v18765_v26 = vld [vmem:[#allocation71_spill] sm:$0xff] }
 0x5d2   :  { %v15788_v61 = vadd.f32 %v8147_v43, %v18760_v11  ;;  %v8149_v51 = vpop.f32.mrb[171].mxu1  ;;  %8977 = vmatprep.mubr.bf16.mxu0 %v18761_v37 }
 0x5d3   :  { %v18766_v51 = vld [vmem:[#allocation21_spill] sm:$0xff] }
 0x5d4   :  { %11160 = vmatmul.mubr.bf16.gmra.mrb[20].mxu1 %v18680_v53  ;;  %v7558_v20 = vpop.f32.mrb[108].mxu0  ;;  %v18767_v53 = vld [vmem:[#allocation94_spill] sm:$0xff] }
 0x5d5   :  { %11163 = vmatprep.mubr.bf16.mxu1 %v18681_v40  ;;  %v15794_v48 = vadd.f32 %v15563_v17, %v7558_v20  ;;  %v7560_v8 = vpop.f32.mrb[109].mxu0  ;;  %v18768_v17 = vld [vmem:[#allocation22_spill] sm:$0xff]  ;;  %v18769_v20 = vld [vmem:[#allocation89_spill] sm:$0xff] }
 0x5d6   :  { %v7561_v55 = vpop.f32.mrb[110].mxu0 }
 0x5d7   :  { %18762 = vst [vmem:[#allocation108_spill] sm:$0xff] %v15794_v48  ;;  %v8152_v16 = vpop.f32.mrb[172].mxu1  ;;  %v15797_v19 = vadd.f32 %v18763_v25, %v7561_v55  ;;  %v7563_v28 = vpop.f32.mrb[111].mxu0  ;;  %v18791_v48 = vld [vmem:[#allocation105_spill] sm:$0xff] }
 0x5d8   :  { %v15800_v43 = vadd.f32 %v8152_v16, %v18765_v26  ;;  %v8154_v33 = vpop.f32.mrb[173].mxu1 }
 0x5d9   :  { %18764 = vst [vmem:[#allocation39_spill] sm:$0xff] %v15797_v19  ;;  %v8155_v11 = vpop.f32.mrb[174].mxu1  ;;  %8978 = vmatmul.mubr.bf16.gmra.mrb[216].mxu0 %v18766_v51 }
 0x5da   :  { %v15804_v37 = vadd.f32 %v8155_v11, %v18767_v53  ;;  %v8157_v40 = vpop.f32.mrb[175].mxu1  ;;  %8985 = vmatprep.mubr.bf16.mxu0 %v18768_v17  ;;  %v18773_v11 = vld [vmem:[#allocation57_spill] sm:$0xff]  ;;  %v18774_v17 = vld [vmem:[#allocation7_spill] sm:$0xff] }
 0x5dc   :  { %11164 = vmatmul.mubr.bf16.gmra.mrb[24].mxu1 %v18769_v20  ;;  %v7566_v8 = vpop.f32.mrb[112].mxu0  ;;  %v18775_v20 = vld [vmem:[#allocation49_spill] sm:$0xff] }
 0x5dd   :  { %11167 = vmatprep.mubr.bf16.mxu1 %v18770_v35  ;;  %v15810_v55 = vadd.f32 %v15586_v62, %v7566_v8  ;;  %v7568_v16 = vpop.f32.mrb[113].mxu0  ;;  %v18776_v62 = vld [vmem:[#allocation70_spill] sm:$0xff]  ;;  %v18777_v8 = vmov 0  }
 0x5de   :  { %v7569_v25 = vpop.f32.mrb[114].mxu0 }
 0x5df   :  { %18771 = vst [vmem:[#allocation38_spill] sm:$0xff] %v15810_v55  ;;  %v8160_v28 = vpop.f32.mrb[176].mxu1  ;;  %v15813_v26 = vadd.f32 %v15593_v24, %v7569_v25  ;;  %v7571_v33 = vpop.f32.mrb[115].mxu0 }
 0x5e0   :  { %v15816_v51 = vadd.f32 %v8160_v28, %v18773_v11  ;;  %v8162_v53 = vpop.f32.mrb[177].mxu1 }
 0x5e1   :  { %18772 = vst [vmem:[#allocation62_spill] sm:$0xff] %v15813_v26  ;;  %v8163_v40 = vpop.f32.mrb[178].mxu1  ;;  %8986 = vmatmul.mubr.bf16.gmra.mrb[220].mxu0 %v18774_v17  ;;  %v18782_v26 = vld [vmem:[#allocation73_spill] sm:$0xff] }
 0x5e2   :  { %v15820_v19 = vadd.f32 %v8163_v40, %v18775_v20  ;;  %v8165_v35 = vpop.f32.mrb[179].mxu1  ;;  %8993 = vmatprep.mubr.bf16.mxu0 %v18776_v62  ;;  %v18780_v40 = vld [vmem:[#allocation98_spill] sm:$0xff]  ;;  %v18781_v62 = vld [vmem:[#allocation99_spill] sm:$0xff] }
 0x5e4   :  { %11168 = vmatmul.mubr.bf16.gmra.mrb[28].mxu1 %v18777_v8  ;;  %v7574_v16 = vpop.f32.mrb[116].mxu0 }
 0x5e5   :  { %11171 = vmatprep.mubr.bf16.mxu1 %v18689_v14  ;;  %v15826_v24 = vadd.f32 %v15584_v59, %v7574_v16  ;;  %v7576_v25 = vpop.f32.mrb[117].mxu0  ;;  %v18783_v59 = vld [vmem:[#allocation97_spill] sm:$0xff]  ;;  %v18784_v16 = vld [vmem:[#allocation95_spill] sm:$0xff] }
 0x5e6   :  { %v7577_v28 = vpop.f32.mrb[118].mxu0 }
 0x5e7   :  { %18778 = vst [vmem:[#allocation13_spill] sm:$0xff] %v15826_v24  ;;  %v8168_v33 = vpop.f32.mrb[180].mxu1  ;;  %v15829_v11 = vadd.f32 %v15588_v23, %v7577_v28  ;;  %v7579_v53 = vpop.f32.mrb[119].mxu0  ;;  %v18785_v24 = vld [vmem:[#allocation100_spill] sm:$0xff]  ;;  %v18786_v23 = vld [vmem:[#allocation77_spill] sm:$0xff] }
 0x5e8   :  { %v15832_v17 = vadd.f32 %v8168_v33, %v18780_v40  ;;  %v8170_v20 = vpop.f32.mrb[181].mxu1 }
 0x5e9   :  { %18779 = vst [vmem:[#allocation63_spill] sm:$0xff] %v15829_v11  ;;  %v8171_v35 = vpop.f32.mrb[182].mxu1  ;;  %8994 = vmatmul.mubr.bf16.gmra.mrb[224].mxu0 %v18781_v62  ;;  %v18788_v20 = vld [vmem:[#allocation87_spill] sm:$0xff] }
 0x5ea   :  { %v15836_v55 = vadd.f32 %v8171_v35, %v18782_v26  ;;  %v8173_v14 = vpop.f32.mrb[183].mxu1  ;;  %9001 = vmatprep.mubr.bf16.mxu0 %v18783_v59  ;;  %v18790_v26 = vld [vmem:[#allocation48_spill] sm:$0xff] }
 0x5ec   :  { %11172 = vmatmul.mubr.bf16.gmra.mrb[32].mxu1 %v18784_v16  ;;  %v7582_v25 = vpop.f32.mrb[120].mxu0  ;;  %v18792_v16 = vld [vmem:[#allocation66_spill] sm:$0xff] }
 0x5ed   :  { %11175 = vmatprep.mubr.bf16.mxu1 %v18785_v24  ;;  %v15842_v28 = vadd.f32 %v18786_v23, %v7582_v25  ;;  %v7584_v33 = vpop.f32.mrb[121].mxu0  ;;  %v18793_v25 = vld [vmem:[#allocation104_spill] sm:$0xff]  ;;  %v18794_v23 = vld [vmem:[#allocation102_spill] sm:$0xff] }
 0x5ee   :  { %v7585_v53 = vpop.f32.mrb[122].mxu0 }
 0x5ef   :  { %18787 = vst [vmem:[#allocation54_spill] sm:$0xff] %v15842_v28  ;;  %v8176_v40 = vpop.f32.mrb[184].mxu1  ;;  %v15845_v11 = vadd.f32 %v18788_v20, %v7585_v53  ;;  %v7587_v62 = vpop.f32.mrb[123].mxu0  ;;  %v18795_v28 = vld [vmem:[#allocation69_spill] sm:$0xff]  ;;  %v18796_v53 = vld [vmem:[#allocation76_spill] sm:$0xff] }
 0x5f0   :  { %v15848_v35 = vadd.f32 %v8176_v40, %v18790_v26  ;;  %v8178_v14 = vpop.f32.mrb[185].mxu1 }
 0x5f1   :  { %18789 = vst [vmem:[#allocation75_spill] sm:$0xff] %v15845_v11  ;;  %v8179_v59 = vpop.f32.mrb[186].mxu1  ;;  %9002 = vmatmul.mubr.bf16.gmra.mrb[228].mxu0 %v18791_v48  ;;  %v18797_v14 = vld [vmem:[#allocation85_spill] sm:$0xff] }
 0x5f2   :  { %v15852_v56 = vadd.f32 %v8179_v59, %v18792_v16  ;;  %v8181_v24 = vpop.f32.mrb[187].mxu1  ;;  %9009 = vmatprep.mubr.bf16.mxu0 %v18793_v25  ;;  %v18798_v59 = vld [vmem:[#allocation74_spill] sm:$0xff] }
 0x5f4   :  { %11176 = vmatmul.mubr.bf16.gmra.mrb[36].mxu1 %v18794_v23  ;;  %v7590_v33 = vpop.f32.mrb[124].mxu0  ;;  %v18800_v23 = vld [vmem:[#allocation81_spill] sm:$0xff] }
 0x5f5   :  { %11179 = vmatprep.mubr.bf16.mxu1 %v18795_v28  ;;  %v15858_v20 = vadd.f32 %v18796_v53, %v7590_v33  ;;  %v7592_v40 = vpop.f32.mrb[125].mxu0  ;;  %v18801_v33 = vld [vmem:[#allocation24_spill] sm:$0xff] }
 0x5f6   :  { %v7593_v62 = vpop.f32.mrb[126].mxu0 }
 0x5f7   :  { %v8184_v26 = vpop.f32.mrb[188].mxu1  ;;  %v15861_v11 = vadd.f32 %v18797_v14, %v7593_v62  ;;  %v7595_v48 = vpop.f32.mrb[127].mxu0 }
 0x5f8   :  { %v15864_v16 = vadd.f32 %v8184_v26, %v18798_v59  ;;  %v8186_v24 = vpop.f32.mrb[189].mxu1  ;;  %v18803_v26 = vld [vmem:[#allocation93_spill] sm:$0xff] }
 0x5f9   :  { %v8187_v25 = vpop.f32.mrb[190].mxu1  ;;  %9010 = vmatmul.mubr.bf16.gmra.mrb[232].mxu0 %v18799_v54 }
 0x5fa   :  { %v15868_v50 = vadd.f32 %v8187_v25, %v18800_v23  ;;  %v8189_v28 = vpop.f32.mrb[191].mxu1  ;;  %9017 = vmatprep.mubr.bf16.mxu0 %v18801_v33  ;;  %v18805_v25 = vld [vmem:[#allocation88_spill] sm:$0xff] }
 0x5fb   :  { %v18806_v28 = vld [vmem:[#allocation64_spill] sm:$0xff] }
 0x5fc   :  { %11180 = vmatmul.mubr.bf16.gmra.mrb[40].mxu1 %v18708_v27  ;;  %v11061_v53 = vpop.f32.mrb[128].mxu0 }
 0x5fd   :  { %11183 = vmatprep.mubr.bf16.mxu1 %v18711_v32  ;;  %v15874_v40 = vadd.f32 %v11061_v53, %v15640_v0  ;;  %v8353_v62 = vpop.f32.mrb[129].mxu0  ;;  %v18807_v0 = vld [vmem:[#allocation106_spill] sm:$0xff]  ;;  %v18808_v53 = vld [vmem:[#allocation91_spill] sm:$0xff] }
 0x5fe   :  { %v15877_v14 = vadd.f32 %v8353_v62, %v18803_v26  ;;  %v11062_v48 = vpop.f32.mrb[130].mxu0  ;;  %v18809_v62 = vld [vmem:[#allocation31_spill] sm:$0xff] }
 0x5ff   :  { %18802 = vst [vmem:[#allocation79_spill] sm:$0xff] %v15874_v40  ;;  %v8192_v54 = vpop.f32.mrb[192].mxu1  ;;  %v15880_v59 = vadd.f32 %v11062_v48, %v15644_v2  ;;  %v8356_v24 = vpop.f32.mrb[131].mxu0  ;;  %v18811_v48 = vld [vmem:[#allocation30_spill] sm:$0xff] }
 0x600   :  { %18804 = vst [vmem:[#allocation78_spill] sm:$0xff] %v15877_v14  ;;  %v15883_v23 = vadd.f32 %v8192_v54, %v18805_v25  ;;  %v8194_v27 = vpop.f32.mrb[193].mxu1  ;;  %v15886_v33 = vadd.f32 %v8356_v24, %v18806_v28  ;;  %v18810_v14 = vld [vmem:[#allocation10_spill] sm:$0xff] }
 0x601   :  { %v8195_v32 = vpop.f32.mrb[194].mxu1  ;;  %9018 = vmatmul.mubr.bf16.gmra.mrb[236].mxu0 %v18807_v0 }
 0x602   :  { %v15890_v40 = vadd.f32 %v8195_v32, %v18808_v53  ;;  %9025 = vmatprep.mubr.bf16.mxu0 %v18809_v62  ;;  %v8197_v26 = vpop.f32.mrb[195].mxu1  ;;  %v18813_v53 = vld [vmem:[#allocation25_spill] sm:$0xff] }
 0x604   :  { %11184 = vmatmul.mubr.bf16.gmra.mrb[44].mxu1 %v18810_v14  ;;  %v11065_v2 = vpop.f32.mrb[132].mxu0 }
 0x605   :  { %11187 = vmatprep.mubr.bf16.mxu1 %v18811_v48  ;;  %v15896_v54 = vadd.f32 %v11065_v2, %v15672_v63  ;;  %v8369_v25 = vpop.f32.mrb[133].mxu0  ;;  %v18814_v63 = vld [vmem:[#allocation107_spill] sm:$0xff]  ;;  %v18815_v2 = vld [vmem:[#allocation28_spill] sm:$0xff] }
 0x606   :  { %v15899_v24 = vadd.f32 %v8369_v25, %v15656_v13  ;;  %v11066_v27 = vpop.f32.mrb[134].mxu0  ;;  %v18816_v25 = vld [vmem:[#allocation11_spill] sm:$0xff] }
 0x607   :  { %18812 = vst [vmem:[#allocation80_spill] sm:$0xff] %v15896_v54  ;;  %v8200_v28 = vpop.f32.mrb[196].mxu1  ;;  %v15902_v32 = vadd.f32 %v11066_v27, %v15676_v46  ;;  %v8372_v0 = vpop.f32.mrb[135].mxu0 }
 0x608   :  { %v15905_v62 = vadd.f32 %v8200_v28, %v18813_v53  ;;  %v8202_v14 = vpop.f32.mrb[197].mxu1  ;;  %v15908_v26 = vadd.f32 %v8372_v0, %v15660_v7 }
 0x609   :  { %v8203_v48 = vpop.f32.mrb[198].mxu1  ;;  %9026 = vmatmul.mubr.bf16.gmra.mrb[240].mxu0 %v18814_v63  ;;  %v18817_v63 = vld [vmem:[#allocation9_spill] sm:$0xff] }
 0x60a   :  { %v15912_v54 = vadd.f32 %v8203_v48, %v18815_v2  ;;  %v8205_v13 = vpop.f32.mrb[199].mxu1  ;;  %9033 = vmatprep.mubr.bf16.mxu0 %v18816_v25  ;;  %v18819_v25 = vld [vmem:[#allocation20_spill] sm:$0xff] }
 0x60c   :  { %11188 = vmatmul.mubr.bf16.gmra.mrb[48].mxu1 %v18725_v39  ;;  %v11069_v46 = vpop.f32.mrb[136].mxu0 }
 0x60d   :  { %11191 = vmatprep.mubr.bf16.mxu1 %v18727_v10  ;;  %v15918_v27 = vadd.f32 %v11069_v46, %v15704_v29  ;;  %v8385_v28 = vpop.f32.mrb[137].mxu0  ;;  %v18818_v29 = vld [vmem:[#allocation15_spill] sm:$0xff] }
 0x60e   :  { %v15921_v7 = vadd.f32 %v8385_v28, %v15688_v47  ;;  %v11070_v0 = vpop.f32.mrb[138].mxu0  ;;  %v18820_v28 = vld [vmem:[#allocation32_spill] sm:$0xff] }
 0x60f   :  { %v8208_v53 = vpop.f32.mrb[200].mxu1  ;;  %v15924_v14 = vadd.f32 %v11070_v0, %v15708_v15  ;;  %v8388_v48 = vpop.f32.mrb[139].mxu0 }
 0x610   :  { %v15927_v2 = vadd.f32 %v8208_v53, %v18817_v63  ;;  %v8210_v39 = vpop.f32.mrb[201].mxu1  ;;  %v15930_v13 = vadd.f32 %v8388_v48, %v15692_v12 }
 0x611   :  { %v8211_v10 = vpop.f32.mrb[202].mxu1  ;;  %9034 = vmatmul.mubr.bf16.gmra.mrb[244].mxu0 %v18818_v29  ;;  %v18821_v29 = vld [vmem:[#allocation27_spill] sm:$0xff] }
 0x612   :  { %v15934_v46 = vadd.f32 %v8211_v10, %v18819_v25  ;;  %v8213_v47 = vpop.f32.mrb[203].mxu1  ;;  %9041 = vmatprep.mubr.bf16.mxu0 %v18820_v28  ;;  %v18823_v28 = vld [vmem:[#allocation114_spill] sm:$0xff] }
 0x614   :  { %11192 = vmatmul.mubr.bf16.gmra.mrb[52].mxu1 %v18732_v52  ;;  %v11073_v15 = vpop.f32.mrb[140].mxu0 }
 0x615   :  { %11195 = vmatprep.mubr.bf16.mxu1 %v18733_v31  ;;  %v15940_v0 = vadd.f32 %v11073_v15, %v15736_v1  ;;  %v8401_v53 = vpop.f32.mrb[141].mxu0  ;;  %v18822_v1 = vld [vmem:[#allocation110_spill] sm:$0xff] }
 0x616   :  { %v15943_v12 = vadd.f32 %v8401_v53, %v15720_v38  ;;  %v11074_v48 = vpop.f32.mrb[142].mxu0  ;;  %v18824_v53 = vld [vmem:[#allocation42_spill] sm:$0xff] }
 0x617   :  { %v8216_v63 = vpop.f32.mrb[204].mxu1  ;;  %v15946_v39 = vadd.f32 %v11074_v48, %v15740_v21  ;;  %v8404_v10 = vpop.f32.mrb[143].mxu0 }
 0x618   :  { %v15949_v25 = vadd.f32 %v8216_v63, %v18821_v29  ;;  %v8218_v52 = vpop.f32.mrb[205].mxu1  ;;  %v15952_v47 = vadd.f32 %v8404_v10, %v15724_v22 }
 0x619   :  { %v8219_v31 = vpop.f32.mrb[206].mxu1  ;;  %9042 = vmatmul.mubr.bf16.gmra.mrb[248].mxu0 %v18822_v1 }
 0x61a   :  { %v15956_v15 = vadd.f32 %v8219_v31, %v18823_v28  ;;  %v8221_v38 = vpop.f32.mrb[207].mxu1  ;;  %9049 = vmatprep.mubr.bf16.mxu0 %v18777_v8 }
 0x61c   :  { %11196 = vmatmul.mubr.bf16.gmra.mrb[56].mxu1 %v18736_v3  ;;  %v11077_v21 = vpop.f32.mrb[144].mxu0 }
 0x61d   :  { %11199 = vmatprep.mubr.bf16.mxu1 %v18824_v53  ;;  %v15962_v48 = vadd.f32 %v11077_v21, %v15768_v34  ;;  %v8417_v63 = vpop.f32.mrb[145].mxu0  ;;  %v18825_v21 = vld [vmem:[#allocation41_spill] sm:$0xff] }
 0x61e   :  { %v15965_v22 = vadd.f32 %v8417_v63, %v15752_v5  ;;  %v11078_v10 = vpop.f32.mrb[146].mxu0 }
 0x61f   :  { %v8224_v29 = vpop.f32.mrb[208].mxu1  ;;  %v15968_v52 = vadd.f32 %v11078_v10, %v15772_v45  ;;  %v8420_v31 = vpop.f32.mrb[147].mxu0 }
 0x620   :  { %v15971_v1 = vadd.f32 %v8224_v29, %v15682_v9  ;;  %v8226_v3 = vpop.f32.mrb[209].mxu1  ;;  %v15974_v28 = vadd.f32 %v8420_v31, %v15756_v60 }
 0x621   :  { %v8227_v38 = vpop.f32.mrb[210].mxu1  ;;  %9050 = vmatmul.mubr.bf16.gmra.mrb[252].mxu0 %v18777_v8 }
 0x622   :  { %v15978_v34 = vadd.f32 %v8227_v38, %v15685_v18  ;;  %v8229_v5 = vpop.f32.mrb[211].mxu1  ;;  %9057 = vmatprep.mubr.bf16.mxu0 %v18825_v21 }
 0x624   :  { %v11081_v53 = vpop.f32.mrb[148].mxu0  ;;  %11200 = vmatmul.mubr.bf16.gmra.mrb[60].mxu1 %v18777_v8 }
 0x625   :  { %v15983_v45 = vadd.f32 %v11081_v53, %v15800_v43  ;;  %v8433_v9 = vpop.f32.mrb[149].mxu0  ;;  %v18826_v43 = vld [vmem:[#allocation109_spill] sm:$0xff]  ;;  %v18827_v53 = vld [vmem:[#allocation16_spill] sm:$0xff] }
 0x626   :  { %v15986_v63 = vadd.f32 %v8433_v9, %v15784_v42  ;;  %v11082_v60 = vpop.f32.mrb[150].mxu0 }
 0x627   :  { %v8232_v10 = vpop.f32.mrb[212].mxu1  ;;  %v15989_v29 = vadd.f32 %v11082_v60, %v15804_v37  ;;  %v8436_v18 = vpop.f32.mrb[151].mxu0 }
 0x628   :  { %v15992_v31 = vadd.f32 %v8232_v10, %v15698_v41  ;;  %v8234_v3 = vpop.f32.mrb[213].mxu1  ;;  %v15995_v38 = vadd.f32 %v8436_v18, %v15788_v61 }
 0x629   :  { %v8235_v5 = vpop.f32.mrb[214].mxu1  ;;  %9058 = vmatmul.mubr.bf16.gmra.mrb[0].mxu0 %v18826_v43 }
 0x62a   :  { %v15999_v21 = vadd.f32 %v8235_v5, %v15701_v49  ;;  %v8237_v42 = vpop.f32.mrb[215].mxu1  ;;  %9065 = vmatprep.mubr.bf16.mxu0 %v18827_v53 }
 0x62c   :  { %v11085_v9 = vpop.f32.mrb[152].mxu0 }
 0x62d   :  { %v16003_v37 = vadd.f32 %v11085_v9, %v15832_v17  ;;  %v8449_v60 = vpop.f32.mrb[153].mxu0  ;;  %v18828_v17 = vld [vmem:[#allocation44_spill] sm:$0xff]  ;;  %v18829_v9 = vld [vmem:[#allocation45_spill] sm:$0xff] }
 0x62e   :  { %v16006_v41 = vadd.f32 %v8449_v60, %v15816_v51  ;;  %v11086_v10 = vpop.f32.mrb[154].mxu0 }
 0x62f   :  { %v8240_v61 = vpop.f32.mrb[216].mxu1  ;;  %v16009_v18 = vadd.f32 %v11086_v10, %v15836_v55  ;;  %v8452_v3 = vpop.f32.mrb[155].mxu0 }
 0x630   :  { %v16012_v49 = vadd.f32 %v8240_v61, %v15714_v36  ;;  %v8242_v5 = vpop.f32.mrb[217].mxu1  ;;  %v16015_v43 = vadd.f32 %v8452_v3, %v15820_v19 }
 0x631   :  { %v8243_v42 = vpop.f32.mrb[218].mxu1  ;;  %9066 = vmatmul.mubr.bf16.gmra.mrb[4].mxu0 %v18828_v17 }
 0x632   :  { %v16019_v53 = vadd.f32 %v8243_v42, %v15717_v30  ;;  %v8245_v51 = vpop.f32.mrb[219].mxu1  ;;  %9073 = vmatprep.mubr.bf16.mxu0 %v18829_v9  ;;  %v18831_v9 = vld [vmem:[#allocation18_spill] sm:$0xff] }
 0x634   :  { %v11089_v60 = vpop.f32.mrb[156].mxu0 }
 0x635   :  { %v16023_v55 = vadd.f32 %v11089_v60, %v15864_v16  ;;  %v8465_v10 = vpop.f32.mrb[157].mxu0 }
 0x636   :  { %v16026_v36 = vadd.f32 %v8465_v10, %v15848_v35  ;;  %v11090_v61 = vpop.f32.mrb[158].mxu0  ;;  %v18832_v35 = vld [vmem:[#allocation112_spill] sm:$0xff] }
 0x637   :  { %18830 = vst [vmem:[#allocation35_spill] sm:$0xff] %v16023_v55  ;;  %v8248_v19 = vpop.f32.mrb[220].mxu1  ;;  %v16029_v3 = vadd.f32 %v11090_v61, %v15868_v50  ;;  %v8468_v5 = vpop.f32.mrb[159].mxu0 }
 0x638   :  { %v8249_v30 = vadd.f32 %v8248_v19, %v15730_v6  ;;  %v8250_v42 = vpop.f32.mrb[221].mxu1  ;;  %v16033_v17 = vadd.f32 %v8468_v5, %v15852_v56 }
 0x639   :  { %v8251_v51 = vpop.f32.mrb[222].mxu1  ;;  %9074 = vmatmul.mubr.bf16.gmra.mrb[8].mxu0 %v18831_v9 }
 0x63a   :  { %v8252_v16 = vadd.f32 %v8251_v51, %v15733_v44  ;;  %v8253_v60 = vpop.f32.mrb[223].mxu1  ;;  %9081 = vmatprep.mubr.bf16.mxu0 %v18832_v35 }
 0x63b   :  { %v18836_v60 = vld [vmem:[#allocation51_spill] sm:$0xff] }
 0x63c   :  { %v11093_v10 = vpop.f32.mrb[160].mxu0 }
 0x63d   :  { %v16039_v55 = vadd.f32 %v11093_v10, %v15905_v62  ;;  %v8481_v50 = vpop.f32.mrb[161].mxu0 }
 0x63e   :  { %v16042_v61 = vadd.f32 %v8481_v50, %v15883_v23  ;;  %v11094_v6 = vpop.f32.mrb[162].mxu0  ;;  %v18837_v23 = vld [vmem:[#allocation50_spill] sm:$0xff] }
 0x63f   :  { %18833 = vst [vmem:[#allocation83_spill] sm:$0xff] %v16039_v55  ;;  %v8256_v19 = vpop.f32.mrb[224].mxu1  ;;  %v16045_v56 = vadd.f32 %v11094_v6, %v15912_v54  ;;  %v8484_v5 = vpop.f32.mrb[163].mxu0 }
 0x640   :  { %v8257_v42 = vadd.f32 %v8256_v19, %v15746_v57  ;;  %v8258_v44 = vpop.f32.mrb[225].mxu1  ;;  %v16049_v51 = vadd.f32 %v8484_v5, %v15890_v40 }
 0x641   :  { %18834 = vst [vmem:[#allocation101_spill] sm:$0xff] %v16045_v56  ;;  %v8259_v9 = vpop.f32.mrb[226].mxu1  ;;  %9082 = vmatmul.mubr.bf16.gmra.mrb[12].mxu0 %v18836_v60 }
 0x642   :  { %18835 = vst [vmem:[#allocation82_spill] sm:$0xff] %v16049_v51  ;;  %v8260_v62 = vadd.f32 %v8259_v9, %v15749_v4  ;;  %v8261_v35 = vpop.f32.mrb[227].mxu1  ;;  %9089 = vmatprep.mubr.bf16.mxu0 %v18837_v23 }
 0x643   :  { %v18842_v35 = vld [vmem:[#allocation17_spill] sm:$0xff] }
 0x644   :  { %v11097_v10 = vpop.f32.mrb[164].mxu0 }
 0x645   :  { %v16055_v50 = vadd.f32 %v11097_v10, %v15949_v25  ;;  %v8497_v54 = vpop.f32.mrb[165].mxu0  ;;  %v18843_v25 = vld [vmem:[#allocation12_spill] sm:$0xff] }
 0x646   :  { %v16058_v6 = vadd.f32 %v8497_v54, %v15927_v2  ;;  %v11098_v57 = vpop.f32.mrb[166].mxu0  ;;  %v18844_v2 = vld [vmem:[#allocation111_spill] sm:$0xff] }
 0x647   :  { %18838 = vst [vmem:[#allocation84_spill] sm:$0xff] %v16055_v50  ;;  %v8264_v19 = vpop.f32.mrb[228].mxu1  ;;  %v16061_v40 = vadd.f32 %v11098_v57, %v15956_v15  ;;  %v8500_v5 = vpop.f32.mrb[167].mxu0 }
 0x648   :  { %18839 = vst [vmem:[#allocation68_spill] sm:$0xff] %v16058_v6  ;;  %v8265_v44 = vadd.f32 %v8264_v19, %v15762_v58  ;;  %v8266_v4 = vpop.f32.mrb[229].mxu1  ;;  %v16065_v9 = vadd.f32 %v8500_v5, %v15934_v46 }
 0x649   :  { %18840 = vst [vmem:[#allocation14_spill] sm:$0xff] %v16061_v40  ;;  %v8267_v60 = vpop.f32.mrb[230].mxu1  ;;  %9090 = vmatmul.mubr.bf16.gmra.mrb[16].mxu0 %v18842_v35  ;;  %v18848_v4 = vld [vmem:[#allocation40_spill] sm:$0xff] }
 0x64a   :  { %18841 = vst [vmem:[#allocation103_spill] sm:$0xff] %v16065_v9  ;;  %v8268_v23 = vadd.f32 %v8267_v60, %v18843_v25  ;;  %v8269_v10 = vpop.f32.mrb[231].mxu1  ;;  %9097 = vmatprep.mubr.bf16.mxu0 %v18844_v2  ;;  %v18850_v2 = vld [vmem:[#allocation23_spill] sm:$0xff] }
 0x64c   :  { %v11101_v54 = vpop.f32.mrb[168].mxu0 }
 0x64d   :  { %v16071_v50 = vadd.f32 %v11101_v54, %v15992_v31  ;;  %v8513_v15 = vpop.f32.mrb[169].mxu0  ;;  %v18851_v31 = vld [vmem:[#allocation33_spill] sm:$0xff] }
 0x64e   :  { %v16074_v57 = vadd.f32 %v8513_v15, %v15971_v1  ;;  %v11102_v58 = vpop.f32.mrb[170].mxu0  ;;  %v18852_v1 = vld [vmem:[#allocation53_spill] sm:$0xff] }
 0x64f   :  { %18845 = vst [vmem:[#allocation55_spill] sm:$0xff] %v16071_v50  ;;  %v8272_v19 = vpop.f32.mrb[232].mxu1  ;;  %v16077_v46 = vadd.f32 %v11102_v58, %v15999_v21  ;;  %v8516_v5 = vpop.f32.mrb[171].mxu0 }
 0x650   :  { %18846 = vst [vmem:[#allocation86_spill] sm:$0xff] %v16074_v57  ;;  %v8273_v35 = vadd.f32 %v8272_v19, %v18848_v4  ;;  %v8274_v60 = vpop.f32.mrb[233].mxu1  ;;  %v16081_v25 = vadd.f32 %v8516_v5, %v15978_v34  ;;  %v18856_v5 = vld [vmem:[#allocation108_spill] sm:$0xff] }
 0x651   :  { %18847 = vst [vmem:[#allocation96_spill] sm:$0xff] %v16077_v46  ;;  %v8275_v10 = vpop.f32.mrb[234].mxu1  ;;  %9098 = vmatmul.mubr.bf16.gmra.mrb[20].mxu0 %v18850_v2 }
 0x652   :  { %18849 = vst [vmem:[#allocation56_spill] sm:$0xff] %v16081_v25  ;;  %v8276_v54 = vadd.f32 %v8275_v10, %v18851_v31  ;;  %v8277_v50 = vpop.f32.mrb[235].mxu1  ;;  %9105 = vmatprep.mubr.bf16.mxu0 %v18852_v1  ;;  %v18858_v31 = vld [vmem:[#allocation29_spill] sm:$0xff] }
 0x654   :  { %v11105_v15 = vpop.f32.mrb[172].mxu0 }
 0x655   :  { %v16086_v57 = vadd.f32 %v11105_v15, %v8249_v30  ;;  %v8529_v21 = vpop.f32.mrb[173].mxu0  ;;  %v18859_v30 = vld [vmem:[#allocation39_spill] sm:$0xff] }
 0x656   :  { %v16089_v58 = vadd.f32 %v8529_v21, %v16012_v49  ;;  %v11106_v19 = vpop.f32.mrb[174].mxu0 }
 0x657   :  { %18853 = vst [vmem:[#allocation92_spill] sm:$0xff] %v16086_v57  ;;  %v8280_v4 = vpop.f32.mrb[236].mxu1  ;;  %v16091_v60 = vadd.f32 %v11106_v19, %v8252_v16  ;;  %v8532_v34 = vpop.f32.mrb[175].mxu0  ;;  %v18860_v57 = vld [vmem:[#allocation52_spill] sm:$0xff] }
 0x658   :  { %18854 = vst [vmem:[#allocation19_spill] sm:$0xff] %v16089_v58  ;;  %v8281_v46 = vadd.f32 %v8280_v4, %v18856_v5  ;;  %v8282_v2 = vpop.f32.mrb[237].mxu1  ;;  %v16095_v10 = vadd.f32 %v8532_v34, %v16019_v53  ;;  %v18864_v34 = vld [vmem:[#allocation38_spill] sm:$0xff] }
 0x659   :  { %18855 = vst [vmem:[#allocation72_spill] sm:$0xff] %v16091_v60  ;;  %v8283_v50 = vpop.f32.mrb[238].mxu1  ;;  %9106 = vmatmul.mubr.bf16.gmra.mrb[24].mxu0 %v18858_v31 }
 0x65a   :  { %18857 = vst [vmem:[#allocation71_spill] sm:$0xff] %v16095_v10  ;;  %v8284_v1 = vadd.f32 %v8283_v50, %v18859_v30  ;;  %v8285_v15 = vpop.f32.mrb[239].mxu1  ;;  %9113 = vmatprep.mubr.bf16.mxu0 %v18860_v57  ;;  %v18866_v30 = vld [vmem:[#allocation113_spill] sm:$0xff]  ;;  %v18867_v57 = vld [vmem:[#allocation62_spill] sm:$0xff] }
 0x65c   :  { %v11109_v49 = vpop.f32.mrb[176].mxu0 }
 0x65d   :  { %v16100_v21 = vadd.f32 %v11109_v49, %v8265_v44  ;;  %v8545_v16 = vpop.f32.mrb[177].mxu0  ;;  %v18868_v49 = vld [vmem:[#allocation59_spill] sm:$0xff] }
 0x65e   :  { %v16102_v19 = vadd.f32 %v8545_v16, %v8257_v42  ;;  %v11110_v60 = vpop.f32.mrb[178].mxu0 }
 0x65f   :  { %18861 = vst [vmem:[#allocation21_spill] sm:$0xff] %v16100_v21  ;;  %v8288_v4 = vpop.f32.mrb[240].mxu1  ;;  %v16104_v5 = vadd.f32 %v11110_v60, %v8268_v23  ;;  %v8548_v53 = vpop.f32.mrb[179].mxu0 }
 0x660   :  { %18862 = vst [vmem:[#allocation94_spill] sm:$0xff] %v16102_v19  ;;  %v8289_v2 = vadd.f32 %v8288_v4, %v18864_v34  ;;  %v8290_v10 = vpop.f32.mrb[241].mxu1  ;;  %v16107_v31 = vadd.f32 %v8548_v53, %v8260_v62 }
 0x661   :  { %18863 = vst [vmem:[#allocation22_spill] sm:$0xff] %v16104_v5  ;;  %v8291_v50 = vpop.f32.mrb[242].mxu1  ;;  %9114 = vmatmul.mubr.bf16.gmra.mrb[28].mxu0 %v18866_v30  ;;  %v18872_v10 = vld [vmem:[#allocation13_spill] sm:$0xff] }
 0x662   :  { %18865 = vst [vmem:[#allocation89_spill] sm:$0xff] %v16107_v31  ;;  %v8292_v15 = vadd.f32 %v8291_v50, %v18867_v57  ;;  %v8293_v44 = vpop.f32.mrb[243].mxu1  ;;  %9121 = vmatprep.mubr.bf16.mxu0 %v18868_v49  ;;  %v18874_v57 = vld [vmem:[#allocation37_spill] sm:$0xff] }
 0x663   :  { %v18875_v44 = vld [vmem:[#allocation63_spill] sm:$0xff] }
 0x664   :  { %v11113_v42 = vpop.f32.mrb[180].mxu0 }
 0x665   :  { %v16112_v16 = vadd.f32 %v11113_v42, %v8281_v46  ;;  %v8561_v21 = vpop.f32.mrb[181].mxu0  ;;  %v18876_v42 = vld [vmem:[#allocation26_spill] sm:$0xff] }
 0x666   :  { %v16114_v23 = vadd.f32 %v8561_v21, %v8273_v35  ;;  %v11114_v60 = vpop.f32.mrb[182].mxu0 }
 0x667   :  { %18869 = vst [vmem:[#allocation90_spill] sm:$0xff] %v16112_v16  ;;  %v8296_v5 = vpop.f32.mrb[244].mxu1  ;;  %v16116_v4 = vadd.f32 %v11114_v60, %v8284_v1  ;;  %v8564_v62 = vpop.f32.mrb[183].mxu0 }
 0x668   :  { %18870 = vst [vmem:[#allocation57_spill] sm:$0xff] %v16114_v23  ;;  %v8297_v53 = vadd.f32 %v8296_v5, %v18872_v10  ;;  %v8298_v34 = vpop.f32.mrb[245].mxu1  ;;  %v16119_v30 = vadd.f32 %v8564_v62, %v8276_v54  ;;  %v18880_v62 = vld [vmem:[#allocation54_spill] sm:$0xff] }
 0x669   :  { %18871 = vst [vmem:[#allocation7_spill] sm:$0xff] %v16116_v4  ;;  %v8299_v50 = vpop.f32.mrb[246].mxu1  ;;  %9122 = vmatmul.mubr.bf16.gmra.mrb[32].mxu0 %v18874_v57 }
 0x66a   :  { %18873 = vst [vmem:[#allocation49_spill] sm:$0xff] %v16119_v30  ;;  %v8300_v49 = vadd.f32 %v8299_v50, %v18875_v44  ;;  %v8301_v46 = vpop.f32.mrb[247].mxu1  ;;  %9129 = vmatprep.mubr.bf16.mxu0 %v18876_v42  ;;  %v18882_v44 = vld [vmem:[#allocation65_spill] sm:$0xff]  ;;  %v18905_v30 = vld [vmem:[#allocation67_spill] sm:$0xff] }
 0x66b   :  { %v18883_v46 = vld [vmem:[#allocation75_spill] sm:$0xff] }
 0x66c   :  { %v11117_v35 = vpop.f32.mrb[184].mxu0 }
 0x66d   :  { %v16124_v21 = vadd.f32 %v11117_v35, %v8297_v53  ;;  %v8577_v16 = vpop.f32.mrb[185].mxu0  ;;  %v18884_v35 = vld [vmem:[#allocation46_spill] sm:$0xff] }
 0x66e   :  { %v16126_v1 = vadd.f32 %v8577_v16, %v8289_v2  ;;  %v11118_v60 = vpop.f32.mrb[186].mxu0 }
 0x66f   :  { %18877 = vst [vmem:[#allocation70_spill] sm:$0xff] %v16124_v21  ;;  %v8304_v4 = vpop.f32.mrb[248].mxu1  ;;  %v16128_v5 = vadd.f32 %v11118_v60, %v8300_v49  ;;  %v8580_v54 = vpop.f32.mrb[187].mxu0 }
 0x670   :  { %18878 = vst [vmem:[#allocation98_spill] sm:$0xff] %v16126_v1  ;;  %v8305_v10 = vadd.f32 %v8304_v4, %v18880_v62  ;;  %v8306_v34 = vpop.f32.mrb[249].mxu1  ;;  %v16131_v57 = vadd.f32 %v8580_v54, %v8292_v15  ;;  %v18902_v1 = vld [vmem:[#allocation80_spill] sm:$0xff] }
 0x671   :  { %18879 = vst [vmem:[#allocation99_spill] sm:$0xff] %v16128_v5  ;;  %v8307_v50 = vpop.f32.mrb[250].mxu1  ;;  %9130 = vmatmul.mubr.bf16.gmra.mrb[36].mxu0 %v18882_v44  ;;  %v18887_v34 = vld [vmem:[#allocation47_spill] sm:$0xff] }
 0x672   :  { %18881 = vst [vmem:[#allocation73_spill] sm:$0xff] %v16131_v57  ;;  %v8308_v42 = vadd.f32 %v8307_v50, %v18883_v46  ;;  %v8309_v53 = vpop.f32.mrb[251].mxu1  ;;  %9137 = vmatprep.mubr.bf16.mxu0 %v18884_v35 }
 0x673   :  { %v18889_v53 = vld [vmem:[#allocation36_spill] sm:$0xff] }
 0x674   :  { %v11121_v2 = vpop.f32.mrb[188].mxu0 }
 0x675   :  { %v8593_v16 = vpop.f32.mrb[189].mxu0 }
 0x676   :  { %v16136_v21 = vadd.f32 %v8593_v16, %v8305_v10  ;;  %v11122_v49 = vpop.f32.mrb[190].mxu0 }
 0x677   :  { %v8312_v60 = vpop.f32.mrb[252].mxu1  ;;  %v8596_v5 = vpop.f32.mrb[191].mxu0 }
 0x678   :  { %18885 = vst [vmem:[#allocation97_spill] sm:$0xff] %v16136_v21  ;;  %v8313_v4 = vadd.f32 %v8312_v60, %v15858_v20  ;;  %v8314_v62 = vpop.f32.mrb[253].mxu1  ;;  %v16139_v15 = vadd.f32 %v8596_v5, %v8308_v42 }
 0x679   :  { %v8315_v54 = vpop.f32.mrb[254].mxu1  ;;  %9138 = vmatmul.mubr.bf16.gmra.mrb[40].mxu0 %v18887_v34  ;;  %v18891_v62 = vld [vmem:[#allocation58_spill] sm:$0xff] }
 0x67a   :  { %18886 = vst [vmem:[#allocation95_spill] sm:$0xff] %v16139_v15  ;;  %v16142_v44 = vadd.f32 %v11121_v2, %v8313_v4  ;;  %v8316_v50 = vadd.f32 %v8315_v54, %v15861_v11  ;;  %v8317_v46 = vpop.f32.mrb[255].mxu1  ;;  %9145 = vmatprep.mubr.bf16.mxu0 %v18889_v53  ;;  %v18892_v2 = vld [vmem:[#allocation60_spill] sm:$0xff]  ;;  %v18893_v4 = vld [vmem:[#allocation78_spill] sm:$0xff]  ;;  %v18901_v15 = vld [vmem:[#allocation115_spill] sm:$0xff] }
 0x67c   :  { %18888 = vst [vmem:[#allocation100_spill] sm:$0xff] %v16142_v44  ;;  %v16146_v10 = vadd.f32 %v11122_v49, %v8316_v50  ;;  %v8931_v35 = vpop.f32.mrb[192].mxu0 }
 0x67d   :  { %v8933_v16 = vpop.f32.mrb[193].mxu0 }
 0x67e   :  { %18890 = vst [vmem:[#allocation77_spill] sm:$0xff] %v16146_v10  ;;  %v8934_v21 = vpop.f32.mrb[194].mxu0 }
 0x67f   :  { %v11141_v57 = vpop.f32.mrb[0].mxu1  ;;  %v8936_v20 = vpop.f32.mrb[195].mxu0 }
 0x680   :  { %v9220_v60 = vpop.f32.mrb[1].mxu1  ;;  %v18895_v20 = vld [vmem:[#allocation79_spill] sm:$0xff] }
 0x681   :  { %v9221_v5 = vadd.f32 %v9220_v60, %v8931_v35  ;;  %v11142_v42 = vpop.f32.mrb[2].mxu1  ;;  %9146 = vmatmul.mubr.bf16.gmra.mrb[44].mxu0 %v18891_v62 }
 0x682   :  { %v9223_v34 = vpop.f32.mrb[3].mxu1  ;;  %9153 = vmatprep.mubr.bf16.mxu0 %v18892_v2 }
 0x683   :  { %v16151_v11 = vadd.f32 %v9221_v5, %v18893_v4  ;;  %v9224_v54 = vadd.f32 %v9223_v34, %v8934_v21  ;;  %v18898_v4 = vld [vmem:[#allocation61_spill] sm:$0xff]  ;;  %v18899_v34 = vld [vmem:[#allocation43_spill] sm:$0xff] }
 0x684   :  { %v8939_v46 = vpop.f32.mrb[196].mxu0 }
 0x685   :  { %v16154_v49 = vadd.f32 %v9224_v54, %v15886_v33  ;;  %v9229_v50 = vadd.f32 %v11141_v57, %v8939_v46  ;;  %v8941_v53 = vpop.f32.mrb[197].mxu0 }
 0x686   :  { %v8942_v16 = vpop.f32.mrb[198].mxu0 }
 0x687   :  { %18894 = vst [vmem:[#allocation87_spill] sm:$0xff] %v16154_v49  ;;  %v16157_v10 = vadd.f32 %v9229_v50, %v18895_v20  ;;  %v11145_v35 = vpop.f32.mrb[4].mxu1  ;;  %v9232_v60 = vadd.f32 %v11142_v42, %v8942_v16  ;;  %v8944_v62 = vpop.f32.mrb[199].mxu0 }
 0x688   :  { %v9236_v44 = vpop.f32.mrb[5].mxu1  ;;  %v18900_v62 = vld [vmem:[#allocation34_spill] sm:$0xff] }
 0x689   :  { %18896 = vst [vmem:[#allocation48_spill] sm:$0xff] %v16157_v10  ;;  %v16160_v2 = vadd.f32 %v9232_v60, %v15880_v59  ;;  %v11146_v5 = vpop.f32.mrb[6].mxu1  ;;  %9154 = vmatmul.mubr.bf16.gmra.mrb[48].mxu0 %v18898_v4 }
 0x68a   :  { %v9239_v21 = vpop.f32.mrb[7].mxu1  ;;  %9161 = vmatprep.mubr.bf16.mxu0 %v18899_v34 }
 0x68b   :  { %18897 = vst [vmem:[#allocation105_spill] sm:$0xff] %v16160_v2 }
 0x68c   :  { %v8947_v33 = vpop.f32.mrb[200].mxu0 }
 0x68d   :  { %v9237_v57 = vadd.f32 %v9236_v44, %v8947_v33  ;;  %v8949_v54 = vpop.f32.mrb[201].mxu0 }
 0x68e   :  { %v8950_v46 = vpop.f32.mrb[202].mxu0 }
 0x68f   :  { %v16165_v50 = vadd.f32 %v9237_v57, %v15899_v24  ;;  %v11149_v53 = vpop.f32.mrb[8].mxu1  ;;  %v9240_v42 = vadd.f32 %v9239_v21, %v8950_v46  ;;  %v8952_v16 = vpop.f32.mrb[203].mxu0 }
 0x690   :  { %v9252_v20 = vpop.f32.mrb[9].mxu1 }
 0x691   :  { %v16168_v59 = vadd.f32 %v9240_v42, %v15908_v26  ;;  %v11150_v60 = vpop.f32.mrb[10].mxu1  ;;  %9162 = vmatmul.mubr.bf16.gmra.mrb[52].mxu0 %v18900_v62 }
 0x692   :  { %v9255_v4 = vpop.f32.mrb[11].mxu1  ;;  %9169 = vmatprep.mubr.bf16.mxu0 %v18901_v15 }
 0x694   :  { %v8955_v34 = vpop.f32.mrb[204].mxu0 }
 0x695   :  { %v9245_v44 = vadd.f32 %v11145_v35, %v8955_v34  ;;  %v8957_v33 = vpop.f32.mrb[205].mxu0 }
 0x696   :  { %v8958_v54 = vpop.f32.mrb[206].mxu0 }
 0x697   :  { %v16173_v24 = vadd.f32 %v9245_v44, %v18902_v1  ;;  %v11153_v57 = vpop.f32.mrb[12].mxu1  ;;  %v9248_v21 = vadd.f32 %v11146_v5, %v8958_v54  ;;  %v8960_v46 = vpop.f32.mrb[207].mxu0 }
 0x698   :  { %v9268_v16 = vpop.f32.mrb[13].mxu1 }
 0x699   :  { %18903 = vst [vmem:[#allocation66_spill] sm:$0xff] %v16173_v24  ;;  %v16176_v26 = vadd.f32 %v9248_v21, %v15902_v32  ;;  %v11154_v42 = vpop.f32.mrb[14].mxu1  ;;  %9170 = vmatmul.mubr.bf16.gmra.mrb[56].mxu0 %v18905_v30 }
 0x69a   :  { %v9271_v62 = vpop.f32.mrb[15].mxu1  ;;  %9177 = vmatprep.mubr.bf16.mxu0 %v18777_v8 }
 0x69b   :  { %18904 = vst [vmem:[#allocation104_spill] sm:$0xff] %v16176_v26 }
 0x69c   :  { %v8963_v15 = vpop.f32.mrb[208].mxu0 }
 0x69d   :  { %v9253_v35 = vadd.f32 %v9252_v20, %v8963_v15  ;;  %v8965_v34 = vpop.f32.mrb[209].mxu0 }
 0x69e   :  { %v8966_v33 = vpop.f32.mrb[210].mxu0 }
 0x69f   :  { %v16181_v1 = vadd.f32 %v9253_v35, %v15921_v7  ;;  %v16183_v44 = vpop.f32.mrb[16].mxu1  ;;  %v9256_v5 = vadd.f32 %v9255_v4, %v8966_v33  ;;  %v8968_v54 = vpop.f32.mrb[211].mxu0 }
 0x6a0   :  { %v9284_v46 = vpop.f32.mrb[17].mxu1 }
 0x6a1   :  { %18906 = vst [vmem:[#allocation102_spill] sm:$0xff] %v16181_v1  ;;  %v16186_v32 = vadd.f32 %v9256_v5, %v15930_v13  ;;  %v16188_v21 = vpop.f32.mrb[18].mxu1  ;;  %9178 = vmatmul.mubr.bf16.gmra.mrb[60].mxu0 %v18777_v8 }
 0x6a2   :  { %v9287_v30 = vpop.f32.mrb[19].mxu1 }
 0x6a3   :  { %18907 = vst [vmem:[#allocation69_spill] sm:$0xff] %v16186_v32 }
 0x6a4   :  { %v8971_v23 = vpop.f32.mrb[212].mxu0 }
 0x6a5   :  { %v9261_v20 = vadd.f32 %v11149_v53, %v8971_v23  ;;  %v8973_v15 = vpop.f32.mrb[213].mxu0 }
 0x6a6   :  { %v8974_v34 = vpop.f32.mrb[214].mxu0 }
 0x6a7   :  { %v16192_v7 = vadd.f32 %v9261_v20, %v15918_v27  ;;  %v16194_v35 = vpop.f32.mrb[20].mxu1  ;;  %v9264_v4 = vadd.f32 %v11150_v60, %v8974_v34  ;;  %v8976_v33 = vpop.f32.mrb[215].mxu0 }
 0x6a8   :  { %v16196_v54 = vpop.f32.mrb[21].mxu1 }
 0x6a9   :  { %18908 = vst [vmem:[#allocation76_spill] sm:$0xff] %v16192_v7  ;;  %v16199_v13 = vadd.f32 %v9264_v4, %v15924_v14  ;;  %v16201_v5 = vpop.f32.mrb[22].mxu1 }
 0x6aa   :  { %v16203_v8 = vpop.f32.mrb[23].mxu1 }
 0x6ab   :  { %18909 = vst [vmem:[#allocation85_spill] sm:$0xff] %v16199_v13 }
 0x6ac   :  { %v8979_v31 = vpop.f32.mrb[216].mxu0 }
 0x6ad   :  { %v9269_v23 = vadd.f32 %v9268_v16, %v8979_v31  ;;  %v8981_v53 = vpop.f32.mrb[217].mxu0 }
 0x6ae   :  { %v8982_v15 = vpop.f32.mrb[218].mxu0 }
 0x6af   :  { %v16206_v27 = vadd.f32 %v9269_v23, %v15943_v12  ;;  %v16208_v20 = vpop.f32.mrb[24].mxu1  ;;  %v9272_v60 = vadd.f32 %v9271_v62, %v8982_v15  ;;  %v8984_v34 = vpop.f32.mrb[219].mxu0 }
 0x6b0   :  { %v16210_v33 = vpop.f32.mrb[25].mxu1 }
 0x6b1   :  { %18910 = vst [vmem:[#allocation74_spill] sm:$0xff] %v16206_v27  ;;  %v16213_v14 = vadd.f32 %v9272_v60, %v15952_v47  ;;  %v16215_v4 = vpop.f32.mrb[26].mxu1 }
 0x6b2   :  { %v16217_v19 = vpop.f32.mrb[27].mxu1 }
 0x6b3   :  { %18911 = vst [vmem:[#allocation8_spill] sm:$0xff] %v16213_v14 }
 0x6b4   :  { %v8987_v58 = vpop.f32.mrb[220].mxu0 }
 0x6b5   :  { %v9277_v31 = vadd.f32 %v11153_v57, %v8987_v58  ;;  %v8989_v16 = vpop.f32.mrb[221].mxu0  ;;  %v9609_v58 = vmul.f32 %v16154_v49, %v16154_v49 }
 0x6b6   :  { %v8990_v53 = vpop.f32.mrb[222].mxu0 }
 0x6b7   :  { %v16220_v12 = vadd.f32 %v9277_v31, %v15940_v0  ;;  %v9280_v23 = vadd.f32 %v11154_v42, %v8990_v53  ;;  %v8992_v25 = vpop.f32.mrb[223].mxu0  ;;  %v16222_v62 = vpop.f32.mrb[28].mxu1  ;;  %v9608_v0 = vmul.f32 %v16151_v11, %v16151_v11  ;;  %v9610_v42 = vmul.f32 %v16157_v10, %v16157_v10 }
 0x6b8   :  { %v16224_v15 = vpop.f32.mrb[29].mxu1  ;;  %v9539_v25 = vadd.f32 %v16154_v49, %v16151_v11  ;;  %v9611_v49 = vmul.f32 %v16160_v2, %v16160_v2 }
 0x6b9   :  { %18912 = vst [vmem:[#allocation81_spill] sm:$0xff] %v16220_v12  ;;  %v16227_v47 = vadd.f32 %v9280_v23, %v15946_v39  ;;  %v16229_v60 = vpop.f32.mrb[30].mxu1  ;;  %v9672_v53 = vadd.f32 %v9609_v58, %v9608_v0  ;;  %v9612_v0 = vmul.f32 %v16165_v50, %v16165_v50 }
 0x6ba   :  { %v16231_v34 = vpop.f32.mrb[31].mxu1  ;;  %v9540_v23 = vadd.f32 %v9539_v25, %v16157_v10 }
 0x6bb   :  { %18913 = vst [vmem:[#allocation24_spill] sm:$0xff] %v16227_v47  ;;  %v9673_v51 = vadd.f32 %v9672_v53, %v9610_v42 }
 0x6bc   :  { %v8995_v57 = vpop.f32.mrb[224].mxu0 }
 0x6bd   :  { %v9285_v31 = vadd.f32 %v9284_v46, %v8995_v57  ;;  %v8997_v39 = vpop.f32.mrb[225].mxu0 }
 0x6be   :  { %v8998_v16 = vpop.f32.mrb[226].mxu0 }
 0x6bf   :  { %v16243_v40 = vadd.f32 %v9285_v31, %v15965_v22  ;;  %v16245_v9 = vpop.f32.mrb[32].mxu1  ;;  %v9288_v6 = vadd.f32 %v9287_v30, %v8998_v16  ;;  %v9000_v56 = vpop.f32.mrb[227].mxu0  ;;  %v9541_v22 = vadd.f32 %v9540_v23, %v16160_v2 }
 0x6c0   :  { %v16247_v55 = vpop.f32.mrb[33].mxu1  ;;  %v9674_v56 = vadd.f32 %v9673_v51, %v9611_v49  ;;  %v9614_v49 = vmul.f32 %v16173_v24, %v16173_v24 }
 0x6c1   :  { %18914 = vst [vmem:[#allocation93_spill] sm:$0xff] %v16243_v40  ;;  %v16252_v46 = vadd.f32 %v9288_v6, %v15974_v28  ;;  %v16254_v57 = vpop.f32.mrb[34].mxu1  ;;  %v9542_v25 = vadd.f32 %v9541_v22, %v16165_v50  ;;  %v9613_v28 = vmul.f32 %v16168_v59, %v16168_v59 }
 0x6c2   :  { %v16256_v58 = vpop.f32.mrb[35].mxu1  ;;  %v9675_v16 = vadd.f32 %v9674_v56, %v9612_v0 }
 0x6c3   :  { %18915 = vst [vmem:[#allocation88_spill] sm:$0xff] %v16252_v46  ;;  %v9543_v51 = vadd.f32 %v9542_v25, %v16168_v59 }
 0x6c4   :  { %v9003_v30 = vpop.f32.mrb[228].mxu0 }
 0x6c5   :  { %v9293_v42 = vadd.f32 %v16183_v44, %v9003_v30  ;;  %v9005_v31 = vpop.f32.mrb[229].mxu0  ;;  %v9544_v30 = vadd.f32 %v9543_v51, %v16173_v24 }
 0x6c6   :  { %v9006_v39 = vpop.f32.mrb[230].mxu0 }
 0x6c7   :  { %v16266_v6 = vadd.f32 %v9293_v42, %v15962_v48  ;;  %v16268_v53 = vpop.f32.mrb[36].mxu1  ;;  %v9296_v23 = vadd.f32 %v16188_v21, %v9006_v39  ;;  %v9008_v2 = vpop.f32.mrb[231].mxu0  ;;  %v9676_v48 = vadd.f32 %v9675_v16, %v9613_v28  ;;  %v9545_v39 = vadd.f32 %v9544_v30, %v16176_v26 }
 0x6c8   :  { %v16271_v10 = vpop.f32.mrb[37].mxu1  ;;  %v9615_v2 = vmul.f32 %v16176_v26, %v16176_v26 }
 0x6c9   :  { %18916 = vst [vmem:[#allocation64_spill] sm:$0xff] %v16266_v6  ;;  %v16277_v44 = vadd.f32 %v9296_v23, %v15968_v52  ;;  %v16279_v22 = vpop.f32.mrb[38].mxu1  ;;  %v9677_v21 = vadd.f32 %v9676_v48, %v9614_v49  ;;  %v9616_v52 = vmul.f32 %v16181_v1, %v16181_v1 }
 0x6ca   :  { %v16281_v0 = vpop.f32.mrb[39].mxu1 }
 0x6cb   :  { %18917 = vst [vmem:[#allocation106_spill] sm:$0xff] %v16277_v44  ;;  %v9678_v48 = vadd.f32 %v9677_v21, %v9615_v2 }
 0x6cc   :  { %v9011_v56 = vpop.f32.mrb[232].mxu0 }
 0x6cd   :  { %v9301_v25 = vadd.f32 %v16196_v54, %v9011_v56  ;;  %v9013_v42 = vpop.f32.mrb[233].mxu0  ;;  %v9546_v54 = vadd.f32 %v9545_v39, %v16181_v1  ;;  %v9679_v26 = vadd.f32 %v9678_v48, %v9616_v52 }
 0x6ce   :  { %v9014_v31 = vpop.f32.mrb[234].mxu0 }
 0x6cf   :  { %v16291_v23 = vadd.f32 %v9301_v25, %v15986_v63  ;;  %v16293_v16 = vpop.f32.mrb[40].mxu1  ;;  %v9304_v28 = vadd.f32 %v16203_v8, %v9014_v31  ;;  %v9016_v51 = vpop.f32.mrb[235].mxu0  ;;  %v9617_v63 = vmul.f32 %v16186_v32, %v16186_v32  ;;  %v9547_v8 = vadd.f32 %v9546_v54, %v16186_v32 }
 0x6d0   :  { %v16296_v49 = vpop.f32.mrb[41].mxu1  ;;  %v9618_v31 = vmul.f32 %v16192_v7, %v16192_v7  ;;  %v9619_v32 = vmul.f32 %v16199_v13, %v16199_v13 }
 0x6d1   :  { %v16300_v56 = vadd.f32 %v9304_v28, %v15995_v38  ;;  %v16302_v30 = vpop.f32.mrb[42].mxu1  ;;  %v9680_v38 = vadd.f32 %v9679_v26, %v9617_v63  ;;  %v9548_v28 = vadd.f32 %v9547_v8, %v16192_v7 }
 0x6d2   :  { %v16304_v42 = vpop.f32.mrb[43].mxu1 }
 0x6d3   :  { %v9681_v54 = vadd.f32 %v9680_v38, %v9618_v31 }
 0x6d4   :  { %v9019_v25 = vpop.f32.mrb[236].mxu0 }
 0x6d5   :  { %v9309_v21 = vadd.f32 %v16194_v35, %v9019_v25  ;;  %v9021_v2 = vpop.f32.mrb[237].mxu0  ;;  %v9620_v25 = vmul.f32 %v16206_v27, %v16206_v27 }
 0x6d6   :  { %v9022_v39 = vpop.f32.mrb[238].mxu0 }
 0x6d7   :  { %v16314_v51 = vadd.f32 %v9309_v21, %v15983_v45  ;;  %v16316_v52 = vpop.f32.mrb[44].mxu1  ;;  %v9312_v48 = vadd.f32 %v16201_v5, %v9022_v39  ;;  %v9024_v1 = vpop.f32.mrb[239].mxu0  ;;  %v9549_v45 = vadd.f32 %v9548_v28, %v16199_v13 }
 0x6d8   :  { %v16319_v24 = vpop.f32.mrb[45].mxu1  ;;  %v9682_v1 = vadd.f32 %v9681_v54, %v9619_v32 }
 0x6d9   :  { %18918 = vst [vmem:[#allocation91_spill] sm:$0xff] %v16314_v51  ;;  %v16324_v35 = vadd.f32 %v9312_v48, %v15989_v29  ;;  %v16326_v26 = vpop.f32.mrb[46].mxu1  ;;  %v9550_v8 = vadd.f32 %v9549_v45, %v16206_v27  ;;  %v9621_v29 = vmul.f32 %v16213_v14, %v16213_v14 }
 0x6da   :  { %v16328_v63 = vpop.f32.mrb[47].mxu1  ;;  %v9683_v39 = vadd.f32 %v9682_v1, %v9620_v25 }
 0x6db   :  { %v9551_v32 = vadd.f32 %v9550_v8, %v16213_v14 }
 0x6dc   :  { %v9027_v5 = vpop.f32.mrb[240].mxu0 }
 0x6dd   :  { %v9317_v31 = vadd.f32 %v16210_v33, %v9027_v5  ;;  %v9029_v21 = vpop.f32.mrb[241].mxu0  ;;  %v9622_v33 = vmul.f32 %v16220_v12, %v16220_v12  ;;  %v9552_v5 = vadd.f32 %v9551_v32, %v16220_v12 }
 0x6de   :  { %v9030_v2 = vpop.f32.mrb[242].mxu0 }
 0x6df   :  { %v16338_v38 = vadd.f32 %v9317_v31, %v16006_v41  ;;  %v16340_v48 = vpop.f32.mrb[48].mxu1  ;;  %v9320_v28 = vadd.f32 %v16217_v19, %v9030_v2  ;;  %v9032_v13 = vpop.f32.mrb[243].mxu0  ;;  %v9684_v41 = vadd.f32 %v9683_v39, %v9621_v29  ;;  %v9553_v2 = vadd.f32 %v9552_v5, %v16227_v47 }
 0x6e0   :  { %v16343_v7 = vpop.f32.mrb[49].mxu1  ;;  %v9623_v13 = vmul.f32 %v16227_v47, %v16227_v47 }
 0x6e1   :  { %v16349_v54 = vadd.f32 %v9320_v28, %v16015_v43  ;;  %v16351_v45 = vpop.f32.mrb[50].mxu1  ;;  %v9685_v19 = vadd.f32 %v9684_v41, %v9622_v33  ;;  %v9624_v43 = vmul.f32 %v16243_v40, %v16243_v40 }
 0x6e2   :  { %v16353_v25 = vpop.f32.mrb[51].mxu1 }
 0x6e3   :  { %18919 = vst [vmem:[#allocation31_spill] sm:$0xff] %v16349_v54  ;;  %v9686_v41 = vadd.f32 %v9685_v19, %v9623_v13 }
 0x6e4   :  { %v9035_v1 = vpop.f32.mrb[244].mxu0 }
 0x6e5   :  { %v9325_v8 = vadd.f32 %v16208_v20, %v9035_v1  ;;  %v9037_v31 = vpop.f32.mrb[245].mxu0  ;;  %v9554_v20 = vadd.f32 %v9553_v2, %v16243_v40  ;;  %v9687_v47 = vadd.f32 %v9686_v41, %v9624_v43 }
 0x6e6   :  { %v9038_v21 = vpop.f32.mrb[246].mxu0 }
 0x6e7   :  { %v16363_v28 = vadd.f32 %v9325_v8, %v16003_v37  ;;  %v16365_v39 = vpop.f32.mrb[52].mxu1  ;;  %v9328_v29 = vadd.f32 %v16215_v4, %v9038_v21  ;;  %v9040_v32 = vpop.f32.mrb[247].mxu0  ;;  %v9625_v37 = vmul.f32 %v16252_v46, %v16252_v46  ;;  %v9555_v4 = vadd.f32 %v9554_v20, %v16252_v46 }
 0x6e8   :  { %v16368_v33 = vpop.f32.mrb[53].mxu1  ;;  %v9626_v21 = vmul.f32 %v16266_v6, %v16266_v6  ;;  %v9627_v46 = vmul.f32 %v16277_v44, %v16277_v44 }
 0x6e9   :  { %v16372_v1 = vadd.f32 %v9328_v29, %v16009_v18  ;;  %v16374_v5 = vpop.f32.mrb[54].mxu1  ;;  %v9688_v18 = vadd.f32 %v9687_v47, %v9625_v37  ;;  %v9556_v29 = vadd.f32 %v9555_v4, %v16266_v6 }
 0x6ea   :  { %v16376_v31 = vpop.f32.mrb[55].mxu1 }
 0x6eb   :  { %v9689_v20 = vadd.f32 %v9688_v18, %v9626_v21  ;;  %v18920_v18 = vld [vmem:[#allocation35_spill] sm:$0xff] }
 0x6ec   :  { %v9043_v8 = vpop.f32.mrb[248].mxu0 }
 0x6ed   :  { %v9333_v19 = vadd.f32 %v16224_v15, %v9043_v8  ;;  %v9045_v13 = vpop.f32.mrb[249].mxu0  ;;  %v9628_v8 = vmul.f32 %v16291_v23, %v16291_v23 }
 0x6ee   :  { %v9046_v2 = vpop.f32.mrb[250].mxu0 }
 0x6ef   :  { %v16386_v32 = vadd.f32 %v9333_v19, %v16026_v36  ;;  %v16388_v43 = vpop.f32.mrb[56].mxu1  ;;  %v9336_v41 = vadd.f32 %v16231_v34, %v9046_v2  ;;  %v9048_v40 = vpop.f32.mrb[251].mxu0  ;;  %v9557_v36 = vadd.f32 %v9556_v29, %v16277_v44 }
 0x6f0   :  { %v16391_v12 = vpop.f32.mrb[57].mxu1  ;;  %v9690_v40 = vadd.f32 %v9689_v20, %v9627_v46 }
 0x6f1   :  { %v16396_v15 = vadd.f32 %v9336_v41, %v16033_v17  ;;  %v16398_v47 = vpop.f32.mrb[58].mxu1  ;;  %v9558_v4 = vadd.f32 %v9557_v36, %v16291_v23  ;;  %v9629_v17 = vmul.f32 %v16300_v56, %v16300_v56 }
 0x6f2   :  { %v16400_v37 = vpop.f32.mrb[59].mxu1  ;;  %v9691_v2 = vadd.f32 %v9690_v40, %v9628_v8 }
 0x6f3   :  { %v9559_v46 = vadd.f32 %v9558_v4, %v16300_v56 }
 0x6f4   :  { %v9051_v34 = vpop.f32.mrb[252].mxu0 }
 0x6f5   :  { %v9341_v21 = vadd.f32 %v16222_v62, %v9051_v34  ;;  %v9053_v19 = vpop.f32.mrb[253].mxu0  ;;  %v9630_v62 = vmul.f32 %v16314_v51, %v16314_v51  ;;  %v9692_v34 = vadd.f32 %v9691_v2, %v9629_v17 }
 0x6f6   :  { %v9054_v13 = vpop.f32.mrb[254].mxu0 }
 0x6f7   :  { %v16410_v41 = vadd.f32 %v9341_v21, %v18920_v18  ;;  %v9344_v29 = vadd.f32 %v16229_v60, %v9054_v13  ;;  %v9056_v44 = vpop.f32.mrb[255].mxu0  ;;  %v16413_v6 = vpop.f32.mrb[60].mxu1  ;;  %v9560_v60 = vadd.f32 %v9559_v46, %v16314_v51  ;;  %v9693_v40 = vadd.f32 %v9692_v34, %v9630_v62  ;;  %v18921_v34 = vld [vmem:[#allocation82_spill] sm:$0xff] }
 0x6f8   :  { %v16415_v14 = vpop.f32.mrb[61].mxu1  ;;  %v9631_v21 = vmul.f32 %v16324_v35, %v16324_v35 }
 0x6f9   :  { %v16421_v20 = vadd.f32 %v9344_v29, %v16029_v3  ;;  %v16423_v36 = vpop.f32.mrb[62].mxu1  ;;  %v9561_v18 = vadd.f32 %v9560_v60, %v16324_v35  ;;  %v9632_v3 = vmul.f32 %v16338_v38, %v16338_v38 }
 0x6fa   :  { %v16425_v8 = vpop.f32.mrb[63].mxu1  ;;  %v9694_v46 = vadd.f32 %v9693_v40, %v9631_v21 }
 0x6fb   :  { %v9562_v62 = vadd.f32 %v9561_v18, %v16338_v38  ;;  %v18922_v18 = vld [vmem:[#allocation83_spill] sm:$0xff] }
 0x6fc   :  { %v9059_v44 = vpop.f32.mrb[0].mxu0 }
 0x6fd   :  { %v9349_v4 = vadd.f32 %v16247_v55, %v9059_v44  ;;  %v9061_v19 = vpop.f32.mrb[1].mxu0  ;;  %v9695_v55 = vadd.f32 %v9694_v46, %v9632_v3  ;;  %v9633_v44 = vmul.f32 %v16349_v54, %v16349_v54 }
 0x6fe   :  { %v9062_v13 = vpop.f32.mrb[2].mxu0  ;;  %v9563_v19 = vadd.f32 %v9562_v62, %v16349_v54  ;;  %v9635_v62 = vmul.f32 %v16372_v1, %v16372_v1 }
 0x6ff   :  { %v16435_v29 = vadd.f32 %v9349_v4, %v16042_v61  ;;  %v9352_v2 = vadd.f32 %v16256_v58, %v9062_v13  ;;  %v9064_v17 = vpop.f32.mrb[3].mxu0  ;;  %v9634_v61 = vmul.f32 %v16363_v28, %v16363_v28  ;;  %v9696_v40 = vadd.f32 %v9695_v55, %v9633_v44 }
 0x700   :  { %v9564_v21 = vadd.f32 %v9563_v19, %v16363_v28  ;;  %v9636_v55 = vmul.f32 %v16386_v32, %v16386_v32 }
 0x701   :  { %v16440_v51 = vadd.f32 %v9352_v2, %v18921_v34  ;;  %v9697_v46 = vadd.f32 %v9696_v40, %v9634_v61  ;;  %v18923_v34 = vld [vmem:[#allocation101_spill] sm:$0xff]  ;;  %v18924_v40 = vld [vmem:[#allocation68_spill] sm:$0xff] }
 0x704   :  { %v9067_v60 = vpop.f32.mrb[4].mxu0 }
 0x705   :  { %v9357_v4 = vadd.f32 %v16245_v9, %v9067_v60  ;;  %v9069_v58 = vpop.f32.mrb[5].mxu0  ;;  %v9565_v9 = vadd.f32 %v9564_v21, %v16372_v1  ;;  %v9698_v60 = vadd.f32 %v9697_v46, %v9635_v62  ;;  %v9638_v46 = vmul.f32 %v16410_v41, %v16410_v41  ;;  %v18925_v62 = vld [vmem:[#allocation103_spill] sm:$0xff] }
 0x706   :  { %v9070_v13 = vpop.f32.mrb[6].mxu0 }
 0x707   :  { %v16450_v2 = vadd.f32 %v9357_v4, %v18922_v18  ;;  %v9360_v3 = vadd.f32 %v16254_v57, %v9070_v13  ;;  %v9072_v17 = vpop.f32.mrb[7].mxu0  ;;  %v9566_v19 = vadd.f32 %v9565_v9, %v16386_v32  ;;  %v9699_v61 = vadd.f32 %v9698_v60, %v9636_v55 }
 0x708   :  { %v9637_v13 = vmul.f32 %v16396_v15, %v16396_v15  ;;  %v9639_v60 = vmul.f32 %v16421_v20, %v16421_v20 }
 0x709   :  { %v16456_v54 = vadd.f32 %v9360_v3, %v18923_v34  ;;  %v9567_v17 = vadd.f32 %v9566_v19, %v16396_v15 }
 0x70b   :  { %v9568_v9 = vadd.f32 %v9567_v17, %v16410_v41 }
 0x70c   :  { %v9075_v44 = vpop.f32.mrb[8].mxu0 }
 0x70d   :  { %v9365_v4 = vadd.f32 %v16271_v10, %v9075_v44  ;;  %v9077_v57 = vpop.f32.mrb[9].mxu0  ;;  %v9700_v10 = vadd.f32 %v9699_v61, %v9637_v13  ;;  %v9569_v19 = vadd.f32 %v9568_v9, %v16421_v20 }
 0x70e   :  { %v9078_v58 = vpop.f32.mrb[10].mxu0 }
 0x70f   :  { %v16466_v18 = vadd.f32 %v9365_v4, %v18924_v40  ;;  %v9368_v21 = vadd.f32 %v16281_v0, %v9078_v58  ;;  %v9080_v3 = vpop.f32.mrb[11].mxu0  ;;  %v9701_v44 = vadd.f32 %v9700_v10, %v9638_v46  ;;  %v9640_v58 = vmul.f32 %v16435_v29, %v16435_v29  ;;  %v18926_v40 = vld [vmem:[#allocation84_spill] sm:$0xff]  ;;  %v18927_v46 = vld [vmem:[#allocation14_spill] sm:$0xff] }
 0x710   :  { %v9570_v17 = vadd.f32 %v9569_v19, %v16435_v29  ;;  %v9641_v10 = vmul.f32 %v16440_v51, %v16440_v51  ;;  %v18928_v19 = vld [vmem:[#allocation86_spill] sm:$0xff] }
 0x711   :  { %v16473_v34 = vadd.f32 %v9368_v21, %v18925_v62  ;;  %v9702_v3 = vadd.f32 %v9701_v44, %v9639_v60 }
 0x714   :  { %v9083_v55 = vpop.f32.mrb[12].mxu0 }
 0x715   :  { %v9373_v4 = vadd.f32 %v16268_v53, %v9083_v55  ;;  %v9085_v0 = vpop.f32.mrb[13].mxu0  ;;  %v9703_v53 = vadd.f32 %v9702_v3, %v9640_v58  ;;  %v9571_v55 = vadd.f32 %v9570_v17, %v16440_v51  ;;  %v9643_v3 = vmul.f32 %v16456_v54, %v16456_v54  ;;  %v18929_v17 = vld [vmem:[#allocation56_spill] sm:$0xff] }
 0x716   :  { %v9086_v57 = vpop.f32.mrb[14].mxu0 }
 0x717   :  { %v16483_v21 = vadd.f32 %v9373_v4, %v18926_v40  ;;  %v9376_v61 = vadd.f32 %v16279_v22, %v9086_v57  ;;  %v9088_v13 = vpop.f32.mrb[15].mxu0  ;;  %v9642_v4 = vmul.f32 %v16450_v2, %v16450_v2  ;;  %v9704_v44 = vadd.f32 %v9703_v53, %v9641_v10 }
 0x718   :  { %v9572_v60 = vadd.f32 %v9571_v55, %v16450_v2  ;;  %v9644_v53 = vmul.f32 %v16466_v18, %v16466_v18 }
 0x719   :  { %v16488_v62 = vadd.f32 %v9376_v61, %v18927_v46  ;;  %v9705_v13 = vadd.f32 %v9704_v44, %v9642_v4  ;;  %v18930_v44 = vld [vmem:[#allocation55_spill] sm:$0xff] }
 0x71c   :  { %v9091_v9 = vpop.f32.mrb[16].mxu0 }
 0x71d   :  { %v9381_v0 = vadd.f32 %v16296_v49, %v9091_v9  ;;  %v9093_v22 = vpop.f32.mrb[17].mxu0  ;;  %v9573_v49 = vadd.f32 %v9572_v60, %v16456_v54  ;;  %v9706_v9 = vadd.f32 %v9705_v13, %v9643_v3  ;;  %v9646_v13 = vmul.f32 %v16483_v21, %v16483_v21  ;;  %v18931_v3 = vld [vmem:[#allocation96_spill] sm:$0xff] }
 0x71e   :  { %v9094_v57 = vpop.f32.mrb[18].mxu0 }
 0x71f   :  { %v16498_v40 = vadd.f32 %v9381_v0, %v18928_v19  ;;  %v9384_v58 = vadd.f32 %v16304_v42, %v9094_v57  ;;  %v9096_v61 = vpop.f32.mrb[19].mxu0  ;;  %v9574_v55 = vadd.f32 %v9573_v49, %v16466_v18  ;;  %v9707_v4 = vadd.f32 %v9706_v9, %v9644_v53 }
 0x720   :  { %v9645_v57 = vmul.f32 %v16473_v34, %v16473_v34  ;;  %v9647_v9 = vmul.f32 %v16488_v62, %v16488_v62 }
 0x721   :  { %v16504_v46 = vadd.f32 %v9384_v58, %v18929_v17  ;;  %v9575_v61 = vadd.f32 %v9574_v55, %v16473_v34 }
 0x723   :  { %v9576_v49 = vadd.f32 %v9575_v61, %v16483_v21 }
 0x724   :  { %v9099_v10 = vpop.f32.mrb[20].mxu0 }
 0x725   :  { %v9389_v0 = vadd.f32 %v16293_v16, %v9099_v10  ;;  %v9101_v42 = vpop.f32.mrb[21].mxu0  ;;  %v9708_v16 = vadd.f32 %v9707_v4, %v9645_v57  ;;  %v9577_v55 = vadd.f32 %v9576_v49, %v16488_v62 }
 0x726   :  { %v9102_v22 = vpop.f32.mrb[22].mxu0 }
 0x727   :  { %v16514_v19 = vadd.f32 %v9389_v0, %v18930_v44  ;;  %v9392_v60 = vadd.f32 %v16302_v30, %v9102_v22  ;;  %v9104_v58 = vpop.f32.mrb[23].mxu0  ;;  %v9709_v10 = vadd.f32 %v9708_v16, %v9646_v13  ;;  %v9648_v22 = vmul.f32 %v16498_v40, %v16498_v40  ;;  %v18932_v44 = vld [vmem:[#allocation19_spill] sm:$0xff] }
 0x728   :  { %v9578_v61 = vadd.f32 %v9577_v55, %v16498_v40  ;;  %v18933_v13 = vld [vmem:[#allocation71_spill] sm:$0xff]  ;;  %v9649_v16 = vmul.f32 %v16504_v46, %v16504_v46  ;;  %v18934_v55 = vld [vmem:[#allocation92_spill] sm:$0xff] }
 0x729   :  { %v16521_v17 = vadd.f32 %v9392_v60, %v18931_v3  ;;  %v9710_v58 = vadd.f32 %v9709_v10, %v9647_v9 }
 0x72c   :  { %v9107_v53 = vpop.f32.mrb[24].mxu0 }
 0x72d   :  { %v9397_v0 = vadd.f32 %v16319_v24, %v9107_v53  ;;  %v9109_v30 = vpop.f32.mrb[25].mxu0  ;;  %v9711_v24 = vadd.f32 %v9710_v58, %v9648_v22  ;;  %v9579_v53 = vadd.f32 %v9578_v61, %v16504_v46  ;;  %v9651_v58 = vmul.f32 %v16521_v17, %v16521_v17  ;;  %v18935_v61 = vld [vmem:[#allocation72_spill] sm:$0xff] }
 0x72e   :  { %v9110_v42 = vpop.f32.mrb[26].mxu0 }
 0x72f   :  { %v16531_v60 = vadd.f32 %v9397_v0, %v18932_v44  ;;  %v9400_v4 = vadd.f32 %v16328_v63, %v9110_v42  ;;  %v9112_v57 = vpop.f32.mrb[27].mxu0  ;;  %v9650_v0 = vmul.f32 %v16514_v19, %v16514_v19  ;;  %v9712_v10 = vadd.f32 %v9711_v24, %v9649_v16 }
 0x730   :  { %v9580_v9 = vadd.f32 %v9579_v53, %v16514_v19 }
 0x731   :  { %v16536_v3 = vadd.f32 %v9400_v4, %v18933_v13  ;;  %v9713_v57 = vadd.f32 %v9712_v10, %v9650_v0  ;;  %v9652_v24 = vmul.f32 %v16531_v60, %v16531_v60  ;;  %v18936_v10 = vld [vmem:[#allocation94_spill] sm:$0xff] }
 0x734   :  { %v9115_v49 = vpop.f32.mrb[28].mxu0 }
 0x735   :  { %v9405_v30 = vadd.f32 %v16316_v52, %v9115_v49  ;;  %v9117_v63 = vpop.f32.mrb[29].mxu0  ;;  %v9581_v52 = vadd.f32 %v9580_v9, %v16521_v17  ;;  %v9714_v49 = vadd.f32 %v9713_v57, %v9651_v58  ;;  %v18937_v58 = vld [vmem:[#allocation89_spill] sm:$0xff] }
 0x736   :  { %v9118_v42 = vpop.f32.mrb[30].mxu0 }
 0x737   :  { %v16546_v44 = vadd.f32 %v9405_v30, %v18934_v55  ;;  %v9408_v22 = vadd.f32 %v16326_v26, %v9118_v42  ;;  %v9120_v4 = vpop.f32.mrb[31].mxu0  ;;  %v9582_v53 = vadd.f32 %v9581_v52, %v16531_v60  ;;  %v9715_v0 = vadd.f32 %v9714_v49, %v9652_v24 }
 0x738   :  { %v9653_v42 = vmul.f32 %v16536_v3, %v16536_v3 }
 0x739   :  { %v16552_v13 = vadd.f32 %v9408_v22, %v18935_v61  ;;  %v9583_v4 = vadd.f32 %v9582_v53, %v16536_v3  ;;  %v9654_v57 = vmul.f32 %v16546_v44, %v16546_v44 }
 0x73b   :  { %v9584_v52 = vadd.f32 %v9583_v4, %v16546_v44  ;;  %v9655_v49 = vmul.f32 %v16552_v13, %v16552_v13 }
 0x73c   :  { %v9123_v16 = vpop.f32.mrb[32].mxu0 }
 0x73d   :  { %v9413_v30 = vadd.f32 %v16343_v7, %v9123_v16  ;;  %v9125_v26 = vpop.f32.mrb[33].mxu0  ;;  %v9716_v7 = vadd.f32 %v9715_v0, %v9653_v42  ;;  %v9585_v53 = vadd.f32 %v9584_v52, %v16552_v13 }
 0x73e   :  { %v9126_v63 = vpop.f32.mrb[34].mxu0 }
 0x73f   :  { %v16562_v55 = vadd.f32 %v9413_v30, %v18936_v10  ;;  %v9416_v9 = vadd.f32 %v16353_v25, %v9126_v63  ;;  %v9128_v22 = vpop.f32.mrb[35].mxu0  ;;  %v9717_v16 = vadd.f32 %v9716_v7, %v9654_v57  ;;  %v18938_v10 = vld [vmem:[#allocation21_spill] sm:$0xff]  ;;  %v18940_v57 = vld [vmem:[#allocation22_spill] sm:$0xff] }
 0x741   :  { %v16569_v61 = vadd.f32 %v9416_v9, %v18937_v58  ;;  %v9656_v63 = vmul.f32 %v16562_v55, %v16562_v55  ;;  %v9718_v22 = vadd.f32 %v9717_v16, %v9655_v49  ;;  %v9586_v4 = vadd.f32 %v9585_v53, %v16562_v55  ;;  %v18941_v53 = vld [vmem:[#allocation57_spill] sm:$0xff] }
 0x743   :  { %v9657_v7 = vmul.f32 %v16569_v61, %v16569_v61 }
 0x744   :  { %v9131_v24 = vpop.f32.mrb[36].mxu0 }
 0x745   :  { %v9421_v30 = vadd.f32 %v16340_v48, %v9131_v24  ;;  %v9133_v25 = vpop.f32.mrb[37].mxu0  ;;  %v9719_v48 = vadd.f32 %v9718_v22, %v9656_v63  ;;  %v9587_v24 = vadd.f32 %v9586_v4, %v16569_v61  ;;  %v18942_v4 = vld [vmem:[#allocation49_spill] sm:$0xff] }
 0x746   :  { %v9134_v26 = vpop.f32.mrb[38].mxu0 }
 0x747   :  { %v16579_v9 = vadd.f32 %v9421_v30, %v18938_v10  ;;  %v9424_v0 = vadd.f32 %v16351_v45, %v9134_v26  ;;  %v9136_v42 = vpop.f32.mrb[39].mxu0  ;;  %v9720_v16 = vadd.f32 %v9719_v48, %v9657_v7 }
 0x749   :  { %18939 = vst [vmem:[#allocation10_spill] sm:$0xff] %v16579_v9  ;;  %v16584_v58 = vadd.f32 %v9424_v0, %v18940_v57  ;;  %v9658_v30 = vmul.f32 %v16579_v9, %v16579_v9  ;;  %v9588_v49 = vadd.f32 %v9587_v24, %v16579_v9 }
 0x74b   :  { %v9721_v42 = vadd.f32 %v9720_v16, %v9658_v30  ;;  %v9659_v22 = vmul.f32 %v16584_v58, %v16584_v58  ;;  %v18943_v16 = vld [vmem:[#allocation90_spill] sm:$0xff] }
 0x74c   :  { %v9139_v52 = vpop.f32.mrb[40].mxu0 }
 0x74d   :  { %v9429_v25 = vadd.f32 %v16368_v33, %v9139_v52  ;;  %v9141_v45 = vpop.f32.mrb[41].mxu0  ;;  %v9589_v33 = vadd.f32 %v9588_v49, %v16584_v58  ;;  %v9722_v52 = vadd.f32 %v9721_v42, %v9659_v22  ;;  %v18944_v22 = vld [vmem:[#allocation7_spill] sm:$0xff] }
 0x74e   :  { %v9142_v26 = vpop.f32.mrb[42].mxu0 }
 0x74f   :  { %v16594_v10 = vadd.f32 %v9429_v25, %v18941_v53  ;;  %v9432_v63 = vadd.f32 %v16376_v31, %v9142_v26  ;;  %v9144_v0 = vpop.f32.mrb[43].mxu0 }
 0x751   :  { %v16600_v57 = vadd.f32 %v9432_v63, %v18942_v4  ;;  %v9660_v48 = vmul.f32 %v16594_v10, %v16594_v10  ;;  %v9590_v24 = vadd.f32 %v9589_v33, %v16594_v10 }
 0x753   :  { %v9723_v30 = vadd.f32 %v9722_v52, %v9660_v48  ;;  %v9661_v26 = vmul.f32 %v16600_v57, %v16600_v57  ;;  %v9591_v0 = vadd.f32 %v9590_v24, %v16600_v57 }
 0x754   :  { %v9147_v7 = vpop.f32.mrb[44].mxu0 }
 0x755   :  { %v9437_v25 = vadd.f32 %v16365_v39, %v9147_v7  ;;  %v9149_v31 = vpop.f32.mrb[45].mxu0  ;;  %v9724_v39 = vadd.f32 %v9723_v30, %v9661_v26 }
 0x756   :  { %v9150_v45 = vpop.f32.mrb[46].mxu0 }
 0x757   :  { %v16610_v53 = vadd.f32 %v9437_v25, %v18943_v16  ;;  %v9440_v49 = vadd.f32 %v16374_v5, %v9150_v45  ;;  %v9152_v63 = vpop.f32.mrb[47].mxu0  ;;  %v18946_v45 = vld [vmem:[#allocation98_spill] sm:$0xff] }
 0x759   :  { %v9662_v42 = vmul.f32 %v16610_v53, %v16610_v53  ;;  %v16617_v4 = vadd.f32 %v9440_v49, %v18944_v22  ;;  %v9592_v33 = vadd.f32 %v9591_v0, %v16610_v53 }
 0x75b   :  { %18945 = vst [vmem:[#allocation30_spill] sm:$0xff] %v16617_v4  ;;  %v9725_v7 = vadd.f32 %v9724_v39, %v9662_v42  ;;  %v9663_v52 = vmul.f32 %v16617_v4, %v16617_v4  ;;  %v9593_v24 = vadd.f32 %v9592_v33, %v16617_v4  ;;  %v18948_v42 = vld [vmem:[#allocation73_spill] sm:$0xff] }
 0x75c   :  { %v9155_v48 = vpop.f32.mrb[48].mxu0 }
 0x75d   :  { %v9445_v25 = vadd.f32 %v16391_v12, %v9155_v48  ;;  %v9157_v5 = vpop.f32.mrb[49].mxu0  ;;  %v9726_v30 = vadd.f32 %v9725_v7, %v9663_v52  ;;  %v18950_v52 = vld [vmem:[#allocation70_spill] sm:$0xff] }
 0x75e   :  { %v9158_v31 = vpop.f32.mrb[50].mxu0 }
 0x75f   :  { %v16625_v16 = vadd.f32 %v9445_v25, %v18946_v45  ;;  %v9448_v49 = vadd.f32 %v16400_v37, %v9158_v31  ;;  %v9160_v63 = vpop.f32.mrb[51].mxu0 }
 0x761   :  { %18947 = vst [vmem:[#allocation25_spill] sm:$0xff] %v16625_v16  ;;  %v9594_v26 = vadd.f32 %v9593_v24, %v16625_v16  ;;  %v9664_v0 = vmul.f32 %v16625_v16, %v16625_v16  ;;  %v16632_v22 = vadd.f32 %v9448_v49, %v18948_v42 }
 0x763   :  { %18949 = vst [vmem:[#allocation107_spill] sm:$0xff] %v16632_v22  ;;  %v9727_v12 = vadd.f32 %v9726_v30, %v9664_v0  ;;  %v9595_v39 = vadd.f32 %v9594_v26, %v16632_v22  ;;  %v9665_v33 = vmul.f32 %v16632_v22, %v16632_v22  ;;  %v18952_v30 = vld [vmem:[#allocation99_spill] sm:$0xff] }
 0x764   :  { %v9163_v48 = vpop.f32.mrb[52].mxu0 }
 0x765   :  { %v9728_v25 = vadd.f32 %v9727_v12, %v9665_v33  ;;  %v9453_v37 = vadd.f32 %v16388_v43, %v9163_v48  ;;  %v9165_v5 = vpop.f32.mrb[53].mxu0 }
 0x766   :  { %v9166_v7 = vpop.f32.mrb[54].mxu0  ;;  %v18953_v5 = vld [vmem:[#allocation97_spill] sm:$0xff] }
 0x767   :  { %v16639_v31 = vadd.f32 %v9453_v37, %v18950_v52  ;;  %v9456_v24 = vadd.f32 %v16398_v47, %v9166_v7  ;;  %v9168_v45 = vpop.f32.mrb[55].mxu0 }
 0x768   :  { %v18954_v45 = vld [vmem:[#allocation95_spill] sm:$0xff] }
 0x769   :  { %18951 = vst [vmem:[#allocation28_spill] sm:$0xff] %v16639_v31  ;;  %v9596_v49 = vadd.f32 %v9595_v39, %v16639_v31  ;;  %v9666_v63 = vmul.f32 %v16639_v31, %v16639_v31  ;;  %v16646_v26 = vadd.f32 %v9456_v24, %v18952_v30 }
 0x76b   :  { %v9729_v0 = vadd.f32 %v9728_v25, %v9666_v63  ;;  %v9597_v42 = vadd.f32 %v9596_v49, %v16646_v26  ;;  %v9667_v43 = vmul.f32 %v16646_v26, %v16646_v26 }
 0x76c   :  { %v9171_v12 = vpop.f32.mrb[56].mxu0 }
 0x76d   :  { %v9730_v33 = vadd.f32 %v9729_v0, %v9667_v43  ;;  %v9461_v48 = vadd.f32 %v16415_v14, %v9171_v12  ;;  %v9173_v47 = vpop.f32.mrb[57].mxu0 }
 0x76e   :  { %v9174_v37 = vpop.f32.mrb[58].mxu0  ;;  %v18956_v47 = vld [vmem:[#allocation100_spill] sm:$0xff] }
 0x76f   :  { %v16653_v39 = vadd.f32 %v9461_v48, %v18953_v5  ;;  %v9464_v7 = vadd.f32 %v16425_v8, %v9174_v37  ;;  %v9176_v52 = vpop.f32.mrb[59].mxu0 }
 0x770   :  { %v18958_v52 = vld [vmem:[#allocation77_spill] sm:$0xff] }
 0x771   :  { %v9598_v24 = vadd.f32 %v9597_v42, %v16653_v39  ;;  %v9668_v25 = vmul.f32 %v16653_v39, %v16653_v39  ;;  %v16660_v49 = vadd.f32 %v9464_v7, %v18954_v45 }
 0x773   :  { %18955 = vst [vmem:[#allocation11_spill] sm:$0xff] %v16660_v49  ;;  %v9731_v63 = vadd.f32 %v9730_v33, %v9668_v25  ;;  %v9599_v30 = vadd.f32 %v9598_v24, %v16660_v49  ;;  %v9669_v14 = vmul.f32 %v16660_v49, %v16660_v49 }
 0x774   :  { %v9179_v0 = vpop.f32.mrb[60].mxu0 }
 0x775   :  { %v9732_v43 = vadd.f32 %v9731_v63, %v9669_v14  ;;  %v9469_v12 = vadd.f32 %v16413_v6, %v9179_v0  ;;  %v9181_v8 = vpop.f32.mrb[61].mxu0 }
 0x776   :  { %v9182_v48 = vpop.f32.mrb[62].mxu0 }
 0x777   :  { %v16667_v42 = vadd.f32 %v9469_v12, %v18956_v47  ;;  %v9472_v37 = vadd.f32 %v16423_v36, %v9182_v48  ;;  %v9184_v5 = vpop.f32.mrb[63].mxu0 }
 0x779   :  { %18957 = vst [vmem:[#allocation9_spill] sm:$0xff] %v16667_v42  ;;  %v9600_v7 = vadd.f32 %v9599_v30, %v16667_v42  ;;  %v9670_v33 = vmul.f32 %v16667_v42, %v16667_v42  ;;  %v16674_v24 = vadd.f32 %v9472_v37, %v18958_v52 }
 0x77b   :  { %v9733_v25 = vadd.f32 %v9732_v43, %v9670_v33  ;;  %v9601_v45 = vadd.f32 %v9600_v7, %v16674_v24  ;;  %v9671_v6 = vmul.f32 %v16674_v24, %v16674_v24 }
 0x77d   :  { %v9602_v63 = vrot.slane %v9601_v45, 4  ;;  %v9734_v14 = vadd.f32 %v9733_v25, %v9671_v6  ;;  %v18971_v6 = vld [vmem:[#allocation93_spill] sm:$0xff]  ;;  %v18972_v25 = vld [vmem:[#allocation88_spill] sm:$0xff] }
 0x77f   :  { %v9603_v0 = vadd.f32 %v9602_v63, %v9601_v45  ;;  %v9735_v12 = vrot.slane %v9734_v14, 4  ;;  %v18959_v45 = vld [vmem:[#allocation87_spill] sm:$0xff]  ;;  %v18960_v63 = vld [vmem:[#allocation48_spill] sm:$0xff] }
 0x780   :  { %v18979_v16 = vld [vmem:[#allocation9_spill] sm:$0xff] }
 0x781   :  { %v9604_v36 = vrot.slane %v9603_v0, 2  ;;  %v9736_v8 = vadd.f32 %v9735_v12, %v9734_v14 }
 0x783   :  { %v9605_v48 = vadd.f32 %v9604_v36, %v9603_v0  ;;  %v9737_v30 = vrot.slane %v9736_v8, 2  ;;  %v18974_v36 = vld [vmem:[#allocation106_spill] sm:$0xff] }
 0x785   :  { %v9606_v47 = vrot.slane %v9605_v48, 1  ;;  %v9738_v5 = vadd.f32 %v9737_v30, %v9736_v8  ;;  %v18962_v8 = vld [vmem:[#allocation66_spill] sm:$0xff]  ;;  %v18977_v30 = vld [vmem:[#allocation11_spill] sm:$0xff] }
 0x787   :  { %v9607_v42 = vadd.f32 %v9606_v47, %v9605_v48  ;;  %v9739_v49 = vrot.slane %v9738_v5, 1  ;;  %v18968_v48 = vld [vmem:[#allocation8_spill] sm:$0xff]  ;;  %v18969_v47 = vld [vmem:[#allocation81_spill] sm:$0xff] }
 0x789   :  { %v9740_v37 = vadd.f32 %v9739_v49, %v9738_v5  ;;  %v16679_v52 = vmul.f32 0.001953125, %v9607_v42  ;;  %v18961_v49 = vld [vmem:[#allocation105_spill] sm:$0xff]  ;;  %v18975_v5 = vld [vmem:[#allocation91_spill] sm:$0xff]  ;;  %v9938_v42 = vld [vmem:[%s17651_s0 + $0x1f8] sm:$0xff] }
 0x78b   :  { %v9742_v43 = vmul.f32 0.001953125, %v9740_v37  ;;  %v9743_v7 = vmul.f32 %v16679_v52, %v16679_v52  ;;  %v18978_v37 = vsub.f32 %v16674_v24, %v16679_v52  ;;  %v18981_v33 = vsub.f32 %v18959_v45, %v16679_v52 }
 0x78c   :  { %v18982_v24 = vsub.f32 %v18960_v63, %v16679_v52  ;;  %v18983_v4 = vsub.f32 %v18961_v49, %v16679_v52  ;;  %v18988_v14 = vsub.f32 %v18962_v8, %v16679_v52 }
 0x78d   :  { %v9744_v12 = vsub.f32 %v9742_v43, %v9743_v7  ;;  %v18967_v43 = vld [vmem:[#allocation85_spill] sm:$0xff]  ;;  %v18980_v7 = vsub.f32 %v16151_v11, %v16679_v52 }
 0x78f   :  { %v9809_v0 = vadd.f32 1e-05, %v9744_v12  ;;  %v18973_v12 = vld [vmem:[#allocation64_spill] sm:$0xff] }
 0x791   :  { %11353 = vrsqrt.f32 %v9809_v0  ;;  %v18976_v0 = vld [vmem:[#allocation31_spill] sm:$0xff] }
 0x79b   :  { %v16801_v9 = vpop.eup %11353 }
 0x79c   :  { %v9874_v22 = vmul.f32 %v16801_v9, %v18978_v37  ;;  %v16824_v31 = vmul.f32 %v16801_v9, %v18980_v7  ;;  %v16830_v27 = vmul.f32 %v16801_v9, %v18981_v33  ;;  %v16836_v37 = vmul.f32 %v16801_v9, %v18982_v24 }
 0x79d   :  { %v16842_v11 = vmul.f32 %v16801_v9, %v18983_v4  ;;  %v18985_v7 = vsub.f32 %v16165_v50, %v16679_v52  ;;  %v18987_v33 = vsub.f32 %v16168_v59, %v16679_v52  ;;  %v16860_v49 = vmul.f32 %v16801_v9, %v18988_v14  ;;  %v18989_v4 = vld [vmem:[#allocation104_spill] sm:$0xff] }
 0x79e   :  { %v10002_v24 = vadd.f32 %v9938_v42, %v9874_v22  ;;  %v18997_v14 = vld [vmem:[#allocation76_spill] sm:$0xff] }
 0x79f   :  { %18984 = vst [vmem:[#allocation15_spill] sm:$0xff] %v16842_v11  ;;  %v16848_v45 = vmul.f32 %v16801_v9, %v18985_v7  ;;  %v16854_v63 = vmul.f32 %v16801_v9, %v18987_v33  ;;  %v18990_v11 = vsub.f32 %v18989_v4, %v16679_v52  ;;  %v18991_v7 = vld [vmem:[#allocation102_spill] sm:$0xff]  ;;  %v18994_v33 = vld [vmem:[#allocation69_spill] sm:$0xff]  ;;  %v18998_v8 = vsub.f32 %v18997_v14, %v16679_v52 }
 0x7a0   :  { %v18995_v22 = vsub.f32 %v18994_v33, %v16679_v52 }
 0x7a1   :  { %18986 = vst [vmem:[#allocation20_spill] sm:$0xff] %v16848_v45  ;;  %v16866_v50 = vmul.f32 %v16801_v9, %v18990_v11  ;;  %v18992_v45 = vsub.f32 %v18991_v7, %v16679_v52  ;;  %v16884_v4 = vmul.f32 %v16801_v9, %v18998_v8  ;;  %v18999_v11 = vsub.f32 %v18967_v43, %v16679_v52 }
 0x7a2   :  { %v16878_v42 = vmul.f32 %v16801_v9, %v18995_v22  ;;  %v10066_v22 = vmax.f32 %v10002_v24, 0.0  ;;  %v19004_v8 = vsub.f32 %v18969_v47, %v16679_v52  ;;  %v19007_v24 = vsub.f32 %v18971_v6, %v16679_v52 }
 0x7a3   :  { %v16872_v59 = vmul.f32 %v16801_v9, %v18992_v45  ;;  %v16890_v7 = vmul.f32 %v16801_v9, %v18999_v11  ;;  %v19001_v45 = vld [vmem:[#allocation74_spill] sm:$0xff]  ;;  %v19005_v11 = vld [vmem:[#allocation24_spill] sm:$0xff] }
 0x7a4   :  { %18996 = vst [vmem:[#allocation27_spill] sm:$0xff] %v16878_v42  ;;  %v19003_v42 = vsub.f32 %v18968_v48, %v16679_v52  ;;  %v16908_v43 = vmul.f32 %v16801_v9, %v19004_v8  ;;  %v16920_v48 = vmul.f32 %v16801_v9, %v19007_v24  ;;  %10130 = vst [vmem:[#allocation4 + $0x1f8] sm:$0xff] %v10066_v22 }
 0x7a5   :  { %18993 = vst [vmem:[#allocation32_spill] sm:$0xff] %v16872_v59  ;;  %19000 = vst [vmem:[#allocation110_spill] sm:$0xff] %v16890_v7  ;;  %v19002_v59 = vsub.f32 %v19001_v45, %v16679_v52  ;;  %v19006_v7 = vsub.f32 %v19005_v11, %v16679_v52  ;;  %v19011_v11 = vsub.f32 %v16291_v23, %v16679_v52 }
 0x7a6   :  { %v16902_v14 = vmul.f32 %v16801_v9, %v19003_v42  ;;  %v19009_v42 = vsub.f32 %v18973_v12, %v16679_v52  ;;  %v19012_v24 = vsub.f32 %v16300_v56, %v16679_v52  ;;  %v19014_v22 = vsub.f32 %v16324_v35, %v16679_v52 }
 0x7a7   :  { %v16896_v33 = vmul.f32 %v16801_v9, %v19002_v59  ;;  %v16914_v45 = vmul.f32 %v16801_v9, %v19006_v7  ;;  %v19008_v59 = vsub.f32 %v18972_v25, %v16679_v52  ;;  %v19010_v7 = vsub.f32 %v18974_v36, %v16679_v52 }
 0x7a8   :  { %v16932_v8 = vmul.f32 %v16801_v9, %v19009_v42  ;;  %v16944_v25 = vmul.f32 %v16801_v9, %v19011_v11  ;;  %v16950_v12 = vmul.f32 %v16801_v9, %v19012_v24  ;;  %v16962_v23 = vmul.f32 %v16801_v9, %v19014_v22 }
 0x7a9   :  { %v16926_v47 = vmul.f32 %v16801_v9, %v19008_v59  ;;  %v16938_v6 = vmul.f32 %v16801_v9, %v19010_v7  ;;  %v19013_v59 = vsub.f32 %v18975_v5, %v16679_v52  ;;  %v19015_v42 = vsub.f32 %v16338_v38, %v16679_v52 }
 0x7aa   :  { %v19016_v7 = vsub.f32 %v18976_v0, %v16679_v52  ;;  %v19017_v11 = vsub.f32 %v16363_v28, %v16679_v52  ;;  %v19018_v24 = vsub.f32 %v16372_v1, %v16679_v52  ;;  %v19020_v22 = vsub.f32 %v16396_v15, %v16679_v52 }
 0x7ab   :  { %v16956_v36 = vmul.f32 %v16801_v9, %v19013_v59  ;;  %v16968_v56 = vmul.f32 %v16801_v9, %v19015_v42  ;;  %v19019_v59 = vsub.f32 %v16386_v32, %v16679_v52  ;;  %v19021_v42 = vsub.f32 %v16410_v41, %v16679_v52 }
 0x7ac   :  { %v16974_v5 = vmul.f32 %v16801_v9, %v19016_v7  ;;  %v16980_v35 = vmul.f32 %v16801_v9, %v19017_v11  ;;  %v16986_v38 = vmul.f32 %v16801_v9, %v19018_v24  ;;  %v16998_v28 = vmul.f32 %v16801_v9, %v19020_v22 }
 0x7ad   :  { %v16992_v0 = vmul.f32 %v16801_v9, %v19019_v59  ;;  %v17004_v1 = vmul.f32 %v16801_v9, %v19021_v42  ;;  %v19022_v7 = vsub.f32 %v16421_v20, %v16679_v52  ;;  %v19023_v11 = vsub.f32 %v16435_v29, %v16679_v52 }
 0x7ae   :  { %v19024_v24 = vsub.f32 %v16440_v51, %v16679_v52  ;;  %v19025_v59 = vsub.f32 %v16450_v2, %v16679_v52  ;;  %v19026_v22 = vsub.f32 %v16456_v54, %v16679_v52  ;;  %v19027_v42 = vsub.f32 %v16466_v18, %v16679_v52 }
 0x7af   :  { %v17010_v32 = vmul.f32 %v16801_v9, %v19022_v7  ;;  %v17016_v15 = vmul.f32 %v16801_v9, %v19023_v11  ;;  %v19029_v7 = vsub.f32 %v16473_v34, %v16679_v52  ;;  %v19031_v11 = vsub.f32 %v16483_v21, %v16679_v52 }
 0x7b0   :  { %v17022_v41 = vmul.f32 %v16801_v9, %v19024_v24  ;;  %v17028_v20 = vmul.f32 %v16801_v9, %v19025_v59  ;;  %v17034_v29 = vmul.f32 %v16801_v9, %v19026_v22  ;;  %v17040_v51 = vmul.f32 %v16801_v9, %v19027_v42  ;;  %v9875_v59 = vld [vmem:[%s17651_s0] sm:$0xff] }
 0x7b1   :  { %v17046_v2 = vmul.f32 %v16801_v9, %v19029_v7  ;;  %v17052_v54 = vmul.f32 %v16801_v9, %v19031_v11  ;;  %v19033_v24 = vsub.f32 %v16488_v62, %v16679_v52  ;;  %v19035_v34 = vsub.f32 %v16498_v40, %v16679_v52 }
 0x7b2   :  { %19028 = vst [vmem:[#allocation114_spill] sm:$0xff] %v17040_v51  ;;  %v19037_v21 = vsub.f32 %v16504_v46, %v16679_v52  ;;  %v19039_v62 = vsub.f32 %v16514_v19, %v16679_v52  ;;  %v19041_v11 = vsub.f32 %v16521_v17, %v16679_v52  ;;  %v9877_v46 = vld [vmem:[%s17651_s0 + $0x10] sm:$0xff]  ;;  %v9878_v19 = vld [vmem:[%s17651_s0 + $0x18] sm:$0xff]  ;;  %v19043_v17 = vsub.f32 %v16531_v60, %v16679_v52 }
 0x7b3   :  { %19030 = vst [vmem:[#allocation42_spill] sm:$0xff] %v17046_v2  ;;  %19032 = vst [vmem:[#allocation41_spill] sm:$0xff] %v17052_v54  ;;  %v17058_v18 = vmul.f32 %v16801_v9, %v19033_v24  ;;  %v17067_v22 = vmul.f32 %v16801_v9, %v19035_v34  ;;  %v9876_v24 = vld [vmem:[%s17651_s0 + $0x8] sm:$0xff]  ;;  %v9879_v34 = vld [vmem:[%s17651_s0 + $0x20] sm:$0xff]  ;;  %v19078_v51 = vsub.f32 %v16646_v26, %v16679_v52 }
 0x7b4   :  { %v17073_v42 = vmul.f32 %v16801_v9, %v19037_v21  ;;  %v17079_v7 = vmul.f32 %v16801_v9, %v19039_v62  ;;  %v17085_v40 = vmul.f32 %v16801_v9, %v19041_v11  ;;  %v17103_v21 = vmul.f32 %v16801_v9, %v19043_v17  ;;  %v9880_v17 = vld [vmem:[%s17651_s0 + $0x28] sm:$0xff] }
 0x7b5   :  { %19034 = vst [vmem:[#allocation109_spill] sm:$0xff] %v17058_v18  ;;  %19036 = vst [vmem:[#allocation16_spill] sm:$0xff] %v17067_v22  ;;  %v19045_v62 = vsub.f32 %v16536_v3, %v16679_v52  ;;  %v9881_v3 = vld [vmem:[%s17651_s0 + $0x30] sm:$0xff]  ;;  %v19058_v22 = vsub.f32 %v16584_v58, %v16679_v52  ;;  %v19060_v58 = vsub.f32 %v16594_v10, %v16679_v52 }
 0x7b6   :  { %19038 = vst [vmem:[#allocation44_spill] sm:$0xff] %v17073_v42  ;;  %19040 = vst [vmem:[#allocation45_spill] sm:$0xff] %v17079_v7  ;;  %v19049_v42 = vsub.f32 %v16552_v13, %v16679_v52  ;;  %v19051_v13 = vsub.f32 %v16562_v55, %v16679_v52  ;;  %v19080_v26 = vsub.f32 %v16653_v39, %v16679_v52  ;;  %v9896_v39 = vld [vmem:[%s17651_s0 + $0xa8] sm:$0xff] }
 0x7b7   :  { %19042 = vst [vmem:[#allocation18_spill] sm:$0xff] %v17085_v40  ;;  %19044 = vst [vmem:[#allocation112_spill] sm:$0xff] %v17103_v21  ;;  %v17109_v11 = vmul.f32 %v16801_v9, %v19045_v62  ;;  %v19047_v40 = vsub.f32 %v16546_v44, %v16679_v52  ;;  %v9882_v44 = vld [vmem:[%s17651_s0 + $0x38] sm:$0xff]  ;;  %v19053_v62 = vsub.f32 %v16569_v61, %v16679_v52  ;;  %v9885_v61 = vld [vmem:[%s17651_s0 + $0x50] sm:$0xff] }
 0x7b8   :  { %v17121_v60 = vmul.f32 %v16801_v9, %v19049_v42  ;;  %v17139_v42 = vmul.f32 %v16801_v9, %v19051_v13  ;;  %v17157_v55 = vmul.f32 %v16801_v9, %v19058_v22  ;;  %v9884_v13 = vld [vmem:[%s17651_s0 + $0x48] sm:$0xff]  ;;  %v17175_v22 = vmul.f32 %v16801_v9, %v19060_v58 }
 0x7b9   :  { %19046 = vst [vmem:[#allocation51_spill] sm:$0xff] %v17109_v11  ;;  %v17115_v7 = vmul.f32 %v16801_v9, %v19047_v40  ;;  %v9883_v40 = vld [vmem:[%s17651_s0 + $0x40] sm:$0xff]  ;;  %v9888_v58 = vld [vmem:[%s17651_s0 + $0x68] sm:$0xff] }
 0x7ba   :  { %19050 = vst [vmem:[#allocation17_spill] sm:$0xff] %v17121_v60  ;;  %19052 = vst [vmem:[#allocation12_spill] sm:$0xff] %v17139_v42  ;;  %v17145_v60 = vmul.f32 %v16801_v9, %v19053_v62  ;;  %v19062_v62 = vsub.f32 %v16600_v57, %v16679_v52  ;;  %v19066_v42 = vld [vmem:[#allocation30_spill] sm:$0xff]  ;;  %v9889_v57 = vld [vmem:[%s17651_s0 + $0x70] sm:$0xff] }
 0x7bb   :  { %19048 = vst [vmem:[#allocation50_spill] sm:$0xff] %v17115_v7  ;;  %v19055_v7 = vld [vmem:[#allocation10_spill] sm:$0xff]  ;;  %19059 = vst [vmem:[#allocation23_spill] sm:$0xff] %v17157_v55  ;;  %v19067_v18 = vsub.f32 %v19066_v42, %v16679_v52  ;;  %v19069_v42 = vld [vmem:[#allocation25_spill] sm:$0xff] }
 0x7bc   :  { %19054 = vst [vmem:[#allocation111_spill] sm:$0xff] %v17145_v60  ;;  %v19056_v11 = vsub.f32 %v19055_v7, %v16679_v52  ;;  %v9886_v7 = vld [vmem:[%s17651_s0 + $0x58] sm:$0xff]  ;;  %19061 = vst [vmem:[#allocation33_spill] sm:$0xff] %v17175_v22  ;;  %v17181_v55 = vmul.f32 %v16801_v9, %v19062_v62  ;;  %v19075_v22 = vld [vmem:[#allocation28_spill] sm:$0xff] }
 0x7bd   :  { %v17193_v10 = vmul.f32 %v16801_v9, %v19067_v18  ;;  %v19070_v18 = vsub.f32 %v19069_v42, %v16679_v52  ;;  %v19076_v54 = vsub.f32 %v19075_v22, %v16679_v52  ;;  %v17229_v42 = vmul.f32 %v16801_v9, %v19078_v51  ;;  %v9894_v22 = vld [vmem:[%s17651_s0 + $0x98] sm:$0xff] }
 0x7be   :  { %v17151_v21 = vmul.f32 %v16801_v9, %v19056_v11  ;;  %v9887_v11 = vld [vmem:[%s17651_s0 + $0x60] sm:$0xff]  ;;  %19063 = vst [vmem:[#allocation53_spill] sm:$0xff] %v17181_v55  ;;  %v17247_v51 = vmul.f32 %v16801_v9, %v19080_v26  ;;  %v9898_v26 = vld [vmem:[%s17651_s0 + $0xb8] sm:$0xff] }
 0x7bf   :  { %19068 = vst [vmem:[#allocation29_spill] sm:$0xff] %v17193_v10  ;;  %v17211_v62 = vmul.f32 %v16801_v9, %v19070_v18  ;;  %v19072_v10 = vld [vmem:[#allocation107_spill] sm:$0xff]  ;;  %v17223_v2 = vmul.f32 %v16801_v9, %v19076_v54  ;;  %19079 = vst [vmem:[#allocation113_spill] sm:$0xff] %v17229_v42  ;;  %v9892_v18 = vld [vmem:[%s17651_s0 + $0x88] sm:$0xff] }
 0x7c0   :  { %19057 = vst [vmem:[#allocation40_spill] sm:$0xff] %v17151_v21  ;;  %v19064_v21 = vsub.f32 %v16610_v53, %v16679_v52  ;;  %v9890_v53 = vld [vmem:[%s17651_s0 + $0x78] sm:$0xff]  ;;  %v9895_v54 = vld [vmem:[%s17651_s0 + $0xa0] sm:$0xff] }
 0x7c1   :  { %19071 = vst [vmem:[#allocation39_spill] sm:$0xff] %v17211_v62  ;;  %19077 = vst [vmem:[#allocation38_spill] sm:$0xff] %v17223_v2  ;;  %v19082_v2 = vsub.f32 %v18979_v16, %v16679_v52  ;;  %v17262_v62 = vadd.f32 %v9875_v59, %v16824_v31  ;;  %v17277_v16 = vadd.f32 %v9876_v24, %v16830_v27  ;;  %v19086_v59 = vld [vmem:[#allocation20_spill] sm:$0xff]  ;;  %v9902_v27 = vld [vmem:[%s17651_s0 + $0xd8] sm:$0xff] }
 0x7c2   :  { %v17187_v60 = vmul.f32 %v16801_v9, %v19064_v21  ;;  %v9891_v21 = vld [vmem:[%s17651_s0 + $0x80] sm:$0xff]  ;;  %v17280_v31 = vadd.f32 %v9877_v46, %v16836_v37  ;;  %v17301_v24 = vadd.f32 %v9880_v17, %v16854_v63  ;;  %v17304_v46 = vadd.f32 %v9881_v3, %v16860_v49  ;;  %v9906_v63 = vld [vmem:[%s17651_s0 + $0xf8] sm:$0xff] }
 0x7c3   :  { %19084 = vst [vmem:[#allocation59_spill] sm:$0xff] %v17262_v62  ;;  %v9900_v62 = vld [vmem:[%s17651_s0 + $0xc8] sm:$0xff]  ;;  %v9903_v37 = vld [vmem:[%s17651_s0 + $0xe0] sm:$0xff]  ;;  %v17328_v3 = vadd.f32 %v9885_v61, %v16884_v4  ;;  %v17349_v61 = vadd.f32 %v9888_v58, %v16902_v14  ;;  %v9914_v14 = vld [vmem:[%s17651_s0 + $0x138] sm:$0xff]  ;;  %v17379_v58 = vadd.f32 %v9895_v54, %v16944_v25  ;;  %v17397_v25 = vadd.f32 %v9898_v26, %v16962_v23 }
 0x7c4   :  { %19065 = vst [vmem:[#allocation108_spill] sm:$0xff] %v17187_v60  ;;  %v19073_v60 = vsub.f32 %v19072_v10, %v16679_v52  ;;  %v19081_v10 = vsub.f32 %v18977_v30, %v16679_v52  ;;  %v9897_v30 = vld [vmem:[%s17651_s0 + $0xb0] sm:$0xff]  ;;  %v19085_v52 = vld [vmem:[#allocation15_spill] sm:$0xff]  ;;  %v19093_v26 = vld [vmem:[#allocation114_spill] sm:$0xff] }
 0x7c5   :  { %v9907_v49 = vld [vmem:[%s17651_s0 + $0x100] sm:$0xff]  ;;  %v9921_v54 = vld [vmem:[%s17651_s0 + $0x170] sm:$0xff] }
 0x7c6   :  { %v17217_v55 = vmul.f32 %v16801_v9, %v19073_v60  ;;  %v9893_v60 = vld [vmem:[%s17651_s0 + $0x90] sm:$0xff]  ;;  %v17253_v42 = vmul.f32 %v16801_v9, %v19081_v10  ;;  %v17286_v10 = vadd.f32 %v9879_v34, %v19086_v59  ;;  %v19089_v34 = vld [vmem:[#allocation32_spill] sm:$0xff]  ;;  %v9911_v4 = vld [vmem:[%s17651_s0 + $0x120] sm:$0xff] }
 0x7c7   :  { %v9904_v59 = vld [vmem:[%s17651_s0 + $0xe8] sm:$0xff] }
 0x7c8   :  { %19074 = vst [vmem:[#allocation52_spill] sm:$0xff] %v17217_v55  ;;  %v17259_v55 = vmul.f32 %v16801_v9, %v19082_v2  ;;  %v9899_v9 = vld [vmem:[%s17651_s0 + $0xc0] sm:$0xff]  ;;  %v17283_v2 = vadd.f32 %v9878_v19, %v19085_v52  ;;  %19087 = vst [vmem:[#allocation13_spill] sm:$0xff] %v17286_v10  ;;  %v17307_v19 = vadd.f32 %v9882_v44, %v16866_v50  ;;  %v9905_v10 = vld [vmem:[%s17651_s0 + $0xf0] sm:$0xff] }
 0x7c9   :  { %v17310_v52 = vadd.f32 %v9883_v40, %v19089_v34  ;;  %v19091_v50 = vld [vmem:[#allocation27_spill] sm:$0xff]  ;;  %v19092_v44 = vld [vmem:[#allocation110_spill] sm:$0xff]  ;;  %v17334_v34 = vadd.f32 %v9887_v11, %v16896_v33  ;;  %v17352_v33 = vadd.f32 %v9889_v57, %v16908_v43  ;;  %v17358_v11 = vadd.f32 %v9891_v21, %v16920_v48 }
 0x7ca   :  { %19083 = vst [vmem:[#allocation62_spill] sm:$0xff] %v17259_v55  ;;  %v9901_v55 = vld [vmem:[%s17651_s0 + $0xd0] sm:$0xff]  ;;  %19088 = vst [vmem:[#allocation37_spill] sm:$0xff] %v17307_v19  ;;  %v17325_v17 = vadd.f32 %v9884_v13, %v19091_v50  ;;  %v17331_v40 = vadd.f32 %v9886_v7, %v19092_v44  ;;  %v9910_v13 = vld [vmem:[%s17651_s0 + $0x118] sm:$0xff]  ;;  %v17355_v7 = vadd.f32 %v9890_v53, %v16914_v45 }
 0x7cb   :  { %19090 = vst [vmem:[#allocation63_spill] sm:$0xff] %v17310_v52  ;;  %v9908_v52 = vld [vmem:[%s17651_s0 + $0x108] sm:$0xff]  ;;  %v9909_v19 = vld [vmem:[%s17651_s0 + $0x110] sm:$0xff]  ;;  %v17370_v43 = vadd.f32 %v9892_v18, %v16926_v47  ;;  %v17373_v45 = vadd.f32 %v9893_v60, %v16932_v8  ;;  %v17376_v48 = vadd.f32 %v9894_v22, %v16938_v6  ;;  %v9915_v57 = vld [vmem:[%s17651_s0 + $0x140] sm:$0xff]  ;;  %v17391_v8 = vadd.f32 %v9896_v39, %v16950_v12 }
 0x7cc   :  { %v9912_v50 = vld [vmem:[%s17651_s0 + $0x128] sm:$0xff]  ;;  %v9913_v44 = vld [vmem:[%s17651_s0 + $0x130] sm:$0xff]  ;;  %v17394_v6 = vadd.f32 %v9897_v30, %v16956_v36  ;;  %v17400_v21 = vadd.f32 %v9899_v9, %v16968_v56  ;;  %v9918_v18 = vld [vmem:[%s17651_s0 + $0x158] sm:$0xff]  ;;  %v17412_v36 = vadd.f32 %v9900_v62, %v16974_v5  ;;  %v17415_v23 = vadd.f32 %v9901_v55, %v16980_v35 }
 0x7cd   :  { %v9916_v53 = vld [vmem:[%s17651_s0 + $0x148] sm:$0xff]  ;;  %v9917_v47 = vld [vmem:[%s17651_s0 + $0x150] sm:$0xff]  ;;  %v9919_v60 = vld [vmem:[%s17651_s0 + $0x160] sm:$0xff]  ;;  %v17418_v56 = vadd.f32 %v9902_v27, %v16986_v38  ;;  %v17421_v22 = vadd.f32 %v9903_v37, %v16992_v0  ;;  %v17433_v35 = vadd.f32 %v9904_v59, %v16998_v28  ;;  %v17436_v38 = vadd.f32 %v9905_v10, %v17004_v1 }
 0x7ce   :  { %v9920_v12 = vld [vmem:[%s17651_s0 + $0x168] sm:$0xff]  ;;  %v9922_v39 = vld [vmem:[%s17651_s0 + $0x178] sm:$0xff]  ;;  %v9923_v5 = vld [vmem:[%s17651_s0 + $0x180] sm:$0xff]  ;;  %v17439_v0 = vadd.f32 %v9906_v63, %v17010_v32  ;;  %v17442_v55 = vadd.f32 %v9907_v49, %v17016_v15  ;;  %v17454_v1 = vadd.f32 %v9908_v52, %v17022_v41  ;;  %v17457_v32 = vadd.f32 %v9909_v19, %v17028_v20 }
 0x7cf   :  { %v9924_v62 = vld [vmem:[%s17651_s0 + $0x188] sm:$0xff]  ;;  %v9925_v30 = vld [vmem:[%s17651_s0 + $0x190] sm:$0xff]  ;;  %v9926_v28 = vld [vmem:[%s17651_s0 + $0x198] sm:$0xff]  ;;  %v17460_v15 = vadd.f32 %v9910_v13, %v17034_v29  ;;  %v17463_v9 = vadd.f32 %v9911_v4, %v19093_v26 }
 0x7d0   :  { %v9927_v10 = vld [vmem:[%s17651_s0 + $0x1a0] sm:$0xff]  ;;  %v9928_v27 = vld [vmem:[%s17651_s0 + $0x1a8] sm:$0xff]  ;;  %v9929_v41 = vld [vmem:[%s17651_s0 + $0x1b0] sm:$0xff] }
 0x7d1   :  { %v19094_v20 = vld [vmem:[#allocation42_spill] sm:$0xff]  ;;  %v19095_v29 = vld [vmem:[#allocation41_spill] sm:$0xff]  ;;  %v19099_v63 = vld [vmem:[#allocation16_spill] sm:$0xff] }
 0x7d2   :  { %v17475_v37 = vadd.f32 %v9912_v50, %v19094_v20  ;;  %v17478_v19 = vadd.f32 %v9913_v44, %v19095_v29  ;;  %v19097_v52 = vld [vmem:[#allocation109_spill] sm:$0xff]  ;;  %v17484_v49 = vadd.f32 %v9915_v57, %v19099_v63  ;;  %v9930_v13 = vld [vmem:[%s17651_s0 + $0x1b8] sm:$0xff]  ;;  %v9931_v4 = vld [vmem:[%s17651_s0 + $0x1c0] sm:$0xff] }
 0x7d3   :  { %v17481_v59 = vadd.f32 %v9914_v14, %v19097_v52  ;;  %v9932_v50 = vld [vmem:[%s17651_s0 + $0x1c8] sm:$0xff]  ;;  %v19103_v14 = vld [vmem:[#allocation45_spill] sm:$0xff]  ;;  %v19105_v57 = vld [vmem:[#allocation18_spill] sm:$0xff] }
 0x7d4   :  { %19096 = vst [vmem:[#allocation26_spill] sm:$0xff] %v17478_v19  ;;  %19100 = vst [vmem:[#allocation65_spill] sm:$0xff] %v17484_v49  ;;  %v19101_v44 = vld [vmem:[#allocation44_spill] sm:$0xff]  ;;  %v17499_v20 = vadd.f32 %v9917_v47, %v19103_v14  ;;  %v17502_v29 = vadd.f32 %v9918_v18, %v19105_v57  ;;  %v9933_v49 = vld [vmem:[%s17651_s0 + $0x1d0] sm:$0xff] }
 0x7d5   :  { %19098 = vst [vmem:[#allocation54_spill] sm:$0xff] %v17481_v59  ;;  %v17496_v26 = vadd.f32 %v9916_v53, %v19101_v44  ;;  %v19107_v52 = vld [vmem:[#allocation112_spill] sm:$0xff]  ;;  %v9934_v59 = vld [vmem:[%s17651_s0 + $0x1d8] sm:$0xff]  ;;  %v9935_v53 = vld [vmem:[%s17651_s0 + $0x1e0] sm:$0xff] }
 0x7d6   :  { %19104 = vst [vmem:[#allocation46_spill] sm:$0xff] %v17499_v20  ;;  %19106 = vst [vmem:[#allocation47_spill] sm:$0xff] %v17502_v29  ;;  %v17505_v63 = vadd.f32 %v9919_v60, %v19107_v52  ;;  %v19109_v47 = vld [vmem:[#allocation51_spill] sm:$0xff]  ;;  %v19111_v18 = vld [vmem:[#allocation50_spill] sm:$0xff] }
 0x7d7   :  { %19102 = vst [vmem:[#allocation75_spill] sm:$0xff] %v17496_v26  ;;  %v17517_v44 = vadd.f32 %v9920_v12, %v19109_v47  ;;  %v17520_v14 = vadd.f32 %v9921_v54, %v19111_v18  ;;  %v19113_v60 = vld [vmem:[#allocation17_spill] sm:$0xff]  ;;  %v19115_v52 = vld [vmem:[#allocation12_spill] sm:$0xff]  ;;  %v19117_v26 = vld [vmem:[#allocation111_spill] sm:$0xff] }
 0x7d8   :  { %19108 = vst [vmem:[#allocation36_spill] sm:$0xff] %v17505_v63  ;;  %v17523_v57 = vadd.f32 %v9922_v39, %v19113_v60  ;;  %v17526_v63 = vadd.f32 %v9923_v5, %v19115_v52  ;;  %v9936_v29 = vld [vmem:[%s17651_s0 + $0x1e8] sm:$0xff]  ;;  %v9937_v20 = vld [vmem:[%s17651_s0 + $0x1f0] sm:$0xff]  ;;  %v17535_v12 = vadd.f32 %v9924_v62, %v19117_v26  ;;  %v19119_v18 = vld [vmem:[#allocation23_spill] sm:$0xff]  ;;  %s11380_s0 = smov [#allocation4]  }
 0x7d9   :  { %19110 = vst [vmem:[#allocation58_spill] sm:$0xff] %v17517_v44  ;;  %19112 = vst [vmem:[#allocation60_spill] sm:$0xff] %v17520_v14  ;;  %v19118_v47 = vld [vmem:[#allocation40_spill] sm:$0xff]  ;;  %v17541_v39 = vadd.f32 %v9926_v28, %v19119_v18  ;;  %v19120_v60 = vld [vmem:[#allocation33_spill] sm:$0xff]  ;;  %s10136_s28 = sshll.u32 %s11380_s0, 4  ;;  %s10137_s28 = int_to_ptr.vmem [resolvable:$true] %s10136_s28 }
 0x7da   :  { %19114 = vst [vmem:[#allocation78_spill] sm:$0xff] %v17523_v57  ;;  %19116 = vst [vmem:[#allocation79_spill] sm:$0xff] %v17526_v63  ;;  %v17538_v54 = vadd.f32 %v9925_v30, %v19118_v47  ;;  %v17544_v5 = vadd.f32 %v9927_v10, %v19120_v60  ;;  %v19121_v52 = vld [vmem:[#allocation53_spill] sm:$0xff]  ;;  %v19122_v57 = vld [vmem:[#allocation108_spill] sm:$0xff]  ;;  %s11355_s29 = scalar_lea.vmem %s10137_s28, 8192  ;;  %p11360_p1 = scmp.lt.s32.totalorder %s10137_s28, %s10137_s28 }
 0x7db   :  { %v17547_v63 = vadd.f32 %v9928_v27, %v19121_v52  ;;  %v17550_v14 = vadd.f32 %v9929_v41, %v19122_v57  ;;  %v19123_v44 = vld [vmem:[#allocation29_spill] sm:$0xff]  ;;  %v19124_v62 = vld [vmem:[#allocation39_spill] sm:$0xff]  ;;  %v19125_v30 = vld [vmem:[#allocation52_spill] sm:$0xff]  ;;  %v17568_v27 = vadd.f32 %v9935_v53, %v17247_v51  ;;  %v17571_v41 = vadd.f32 %v9936_v29, %v17253_v42  ;;  %p11356_p0 = scmp.ne.s32.totalorder %s10137_s28, %s11355_s29  ;;  %p11361_p2 = scmp.lt.s32.totalorder %s11355_s29, %s11355_s29 }
 0x7dc   :  { %v17553_v19 = vadd.f32 %v9930_v13, %v19123_v44  ;;  %v17556_v26 = vadd.f32 %v9931_v4, %v19124_v62  ;;  %v17559_v47 = vadd.f32 %v9932_v50, %v19125_v30  ;;  %v19126_v28 = vld [vmem:[#allocation38_spill] sm:$0xff]  ;;  %v19127_v10 = vld [vmem:[#allocation113_spill] sm:$0xff]  ;;  %v19129_v4 = vld [vmem:[#allocation59_spill] sm:$0xff]  ;;  %v10004_v50 = vmax.f32 %v17277_v16, 0.0 }
 0x7dd   :  { %v17562_v18 = vadd.f32 %v9933_v49, %v19126_v28  ;;  %v17565_v60 = vadd.f32 %v9934_v59, %v19127_v10  ;;  %v19128_v13 = vld [vmem:[#allocation62_spill] sm:$0xff]  ;;  %v10003_v57 = vmax.f32 %v19129_v4, 0.0  ;;  %v10005_v52 = vmax.f32 %v17280_v31, 0.0  ;;  %v19130_v62 = vld [vmem:[#allocation13_spill] sm:$0xff]  ;;  %v19132_v29 = vld [vmem:[#allocation63_spill] sm:$0xff]  ;;  %p11362_p3 = por %p11361_p2, %p11360_p1 }
 0x7de   :  { %v17574_v44 = vadd.f32 %v9937_v20, %v19128_v13  ;;  %v10006_v49 = vmax.f32 %v17283_v2, 0.0  ;;  %v10007_v59 = vmax.f32 %v19130_v62, 0.0  ;;  %v10008_v30 = vmax.f32 %v17301_v24, 0.0  ;;  %v19131_v53 = vld [vmem:[#allocation37_spill] sm:$0xff]  ;;  %10068 = vst [vmem:[#allocation4 + $0x8] sm:$0xff] %v10004_v50  ;;  %v19136_v50 = vld [vmem:[#allocation75_spill] sm:$0xff] }
 0x7df   :  { %v10009_v51 = vmax.f32 %v17304_v46, 0.0  ;;  %v10010_v42 = vmax.f32 %v19131_v53, 0.0  ;;  %v10011_v28 = vmax.f32 %v19132_v29, 0.0  ;;  %v10012_v20 = vmax.f32 %v17325_v17, 0.0  ;;  %10067 = vst [vmem:[#allocation4] sm:$0xff] %v10003_v57  ;;  %10069 = vst [vmem:[#allocation4 + $0x10] sm:$0xff] %v10005_v52  ;;  %p11363_p4 = pnand %p11362_p3, %p11356_p0 }
 0x7e0   :  { %v10013_v16 = vmax.f32 %v17328_v3, 0.0  ;;  %v10014_v31 = vmax.f32 %v17331_v40, 0.0  ;;  %v10015_v2 = vmax.f32 %v17334_v34, 0.0  ;;  %v10016_v10 = vmax.f32 %v17349_v61, 0.0  ;;  %10070 = vst [vmem:[#allocation4 + $0x18] sm:$0xff] %v10006_v49  ;;  %10071 = vst [vmem:[#allocation4 + $0x20] sm:$0xff] %v10007_v59 }
 0x7e1   :  { %10072 = vst [vmem:[#allocation4 + $0x28] sm:$0xff] %v10008_v30  ;;  %v10017_v24 = vmax.f32 %v17352_v33, 0.0  ;;  %v10018_v46 = vmax.f32 %v17355_v7, 0.0  ;;  %v10019_v17 = vmax.f32 %v17358_v11, 0.0  ;;  %v10020_v13 = vmax.f32 %v17370_v43, 0.0  ;;  %10073 = vst [vmem:[#allocation4 + $0x30] sm:$0xff] %v10009_v51 }
 0x7e2   :  { %10074 = vst [vmem:[#allocation4 + $0x38] sm:$0xff] %v10010_v42  ;;  %10075 = vst [vmem:[#allocation4 + $0x40] sm:$0xff] %v10011_v28  ;;  %v10021_v3 = vmax.f32 %v17373_v45, 0.0  ;;  %v10022_v40 = vmax.f32 %v17376_v48, 0.0  ;;  %v10023_v34 = vmax.f32 %v17379_v58, 0.0  ;;  %v10024_v61 = vmax.f32 %v17391_v8, 0.0 }
 0x7e3   :  { %10076 = vst [vmem:[#allocation4 + $0x48] sm:$0xff] %v10012_v20  ;;  %10077 = vst [vmem:[#allocation4 + $0x50] sm:$0xff] %v10013_v16  ;;  %v10025_v33 = vmax.f32 %v17394_v6, 0.0  ;;  %v10026_v7 = vmax.f32 %v17397_v25, 0.0  ;;  %v10027_v11 = vmax.f32 %v17400_v21, 0.0  ;;  %v10028_v43 = vmax.f32 %v17412_v36, 0.0 }
 0x7e4   :  { %10078 = vst [vmem:[#allocation4 + $0x58] sm:$0xff] %v10014_v31  ;;  %10079 = vst [vmem:[#allocation4 + $0x60] sm:$0xff] %v10015_v2  ;;  %v10029_v45 = vmax.f32 %v17415_v23, 0.0  ;;  %v10030_v48 = vmax.f32 %v17418_v56, 0.0  ;;  %v10031_v58 = vmax.f32 %v17421_v22, 0.0  ;;  %v10032_v8 = vmax.f32 %v17433_v35, 0.0 }
 0x7e5   :  { %10080 = vst [vmem:[#allocation4 + $0x68] sm:$0xff] %v10016_v10  ;;  %10081 = vst [vmem:[#allocation4 + $0x70] sm:$0xff] %v10017_v24  ;;  %v10033_v6 = vmax.f32 %v17436_v38, 0.0  ;;  %v10034_v25 = vmax.f32 %v17439_v0, 0.0  ;;  %v10035_v21 = vmax.f32 %v17442_v55, 0.0  ;;  %v10036_v36 = vmax.f32 %v17454_v1, 0.0 }
 0x7e6   :  { %10082 = vst [vmem:[#allocation4 + $0x78] sm:$0xff] %v10018_v46  ;;  %10083 = vst [vmem:[#allocation4 + $0x80] sm:$0xff] %v10019_v17  ;;  %v10037_v23 = vmax.f32 %v17457_v32, 0.0  ;;  %v10038_v56 = vmax.f32 %v17460_v15, 0.0  ;;  %v10039_v22 = vmax.f32 %v17463_v9, 0.0  ;;  %v10040_v35 = vmax.f32 %v17475_v37, 0.0 }
 0x7e7   :  { %10084 = vst [vmem:[#allocation4 + $0x88] sm:$0xff] %v10020_v13  ;;  %10085 = vst [vmem:[#allocation4 + $0x90] sm:$0xff] %v10021_v3  ;;  %v19133_v38 = vld [vmem:[#allocation26_spill] sm:$0xff]  ;;  %v19135_v4 = vld [vmem:[#allocation65_spill] sm:$0xff]  ;;  %v10044_v52 = vmax.f32 %v19136_v50, 0.0  ;;  %v10052_v16 = vmax.f32 %v17535_v12, 0.0 }
 0x7e8   :  { %10086 = vst [vmem:[#allocation4 + $0x98] sm:$0xff] %v10022_v40  ;;  %10087 = vst [vmem:[#allocation4 + $0xa0] sm:$0xff] %v10023_v34  ;;  %v10041_v0 = vmax.f32 %v19133_v38, 0.0  ;;  %v19134_v55 = vld [vmem:[#allocation54_spill] sm:$0xff]  ;;  %v10043_v57 = vmax.f32 %v19135_v4, 0.0  ;;  %v19138_v9 = vld [vmem:[#allocation47_spill] sm:$0xff] }
 0x7e9   :  { %10088 = vst [vmem:[#allocation4 + $0xa8] sm:$0xff] %v10024_v61  ;;  %10089 = vst [vmem:[#allocation4 + $0xb0] sm:$0xff] %v10025_v33  ;;  %v10042_v1 = vmax.f32 %v19134_v55, 0.0  ;;  %v19137_v32 = vld [vmem:[#allocation46_spill] sm:$0xff]  ;;  %v10046_v37 = vmax.f32 %v19138_v9, 0.0  ;;  %v19139_v49 = vld [vmem:[#allocation36_spill] sm:$0xff] }
 0x7ea   :  { %10090 = vst [vmem:[#allocation4 + $0xb8] sm:$0xff] %v10026_v7  ;;  %10091 = vst [vmem:[#allocation4 + $0xc0] sm:$0xff] %v10027_v11  ;;  %v10045_v15 = vmax.f32 %v19137_v32, 0.0  ;;  %v10047_v62 = vmax.f32 %v19139_v49, 0.0  ;;  %v19140_v59 = vld [vmem:[#allocation58_spill] sm:$0xff]  ;;  %v19141_v51 = vld [vmem:[#allocation60_spill] sm:$0xff] }
 0x7eb   :  { %10092 = vst [vmem:[#allocation4 + $0xc8] sm:$0xff] %v10028_v43  ;;  %10093 = vst [vmem:[#allocation4 + $0xd0] sm:$0xff] %v10029_v45  ;;  %v10048_v30 = vmax.f32 %v19140_v59, 0.0  ;;  %v10049_v53 = vmax.f32 %v19141_v51, 0.0  ;;  %v19142_v42 = vld [vmem:[#allocation78_spill] sm:$0xff]  ;;  %v19143_v28 = vld [vmem:[#allocation79_spill] sm:$0xff] }
 0x7ec   :  { %10094 = vst [vmem:[#allocation4 + $0xd8] sm:$0xff] %v10030_v48  ;;  %10095 = vst [vmem:[#allocation4 + $0xe0] sm:$0xff] %v10031_v58  ;;  %v10050_v29 = vmax.f32 %v19142_v42, 0.0  ;;  %v10051_v20 = vmax.f32 %v19143_v28, 0.0  ;;  %v10053_v31 = vmax.f32 %v17538_v54, 0.0  ;;  %v10054_v2 = vmax.f32 %v17541_v39, 0.0 }
 0x7ed   :  { %10096 = vst [vmem:[#allocation4 + $0xe8] sm:$0xff] %v10032_v8  ;;  %10097 = vst [vmem:[#allocation4 + $0xf0] sm:$0xff] %v10033_v6  ;;  %v10055_v10 = vmax.f32 %v17544_v5, 0.0  ;;  %v10056_v24 = vmax.f32 %v17547_v63, 0.0  ;;  %v10057_v12 = vmax.f32 %v17550_v14, 0.0  ;;  %v10058_v46 = vmax.f32 %v17553_v19, 0.0 }
 0x7ee   :  { %10098 = vst [vmem:[#allocation4 + $0xf8] sm:$0xff] %v10034_v25  ;;  %10099 = vst [vmem:[#allocation4 + $0x100] sm:$0xff] %v10035_v21  ;;  %v10059_v17 = vmax.f32 %v17556_v26, 0.0  ;;  %v10060_v54 = vmax.f32 %v17559_v47, 0.0  ;;  %v10061_v63 = vmax.f32 %v17562_v18, 0.0  ;;  %v10062_v39 = vmax.f32 %v17565_v60, 0.0 }
 0x7ef   :  { %10100 = vst [vmem:[#allocation4 + $0x108] sm:$0xff] %v10036_v36  ;;  %10101 = vst [vmem:[#allocation4 + $0x110] sm:$0xff] %v10037_v23  ;;  %v10063_v5 = vmax.f32 %v17568_v27, 0.0  ;;  %v10064_v13 = vmax.f32 %v17571_v41, 0.0  ;;  %v10065_v19 = vmax.f32 %v17574_v44, 0.0 }
 0x7f0   :  { %10102 = vst [vmem:[#allocation4 + $0x118] sm:$0xff] %v10038_v56  ;;  %10103 = vst [vmem:[#allocation4 + $0x120] sm:$0xff] %v10039_v22 }
 0x7f1   :  { %10104 = vst [vmem:[#allocation4 + $0x128] sm:$0xff] %v10040_v35  ;;  %10105 = vst [vmem:[#allocation4 + $0x130] sm:$0xff] %v10041_v0 }
 0x7f2   :  { %10106 = vst [vmem:[#allocation4 + $0x138] sm:$0xff] %v10042_v1  ;;  %10107 = vst [vmem:[#allocation4 + $0x140] sm:$0xff] %v10043_v57 }
 0x7f3   :  { %10108 = vst [vmem:[#allocation4 + $0x148] sm:$0xff] %v10044_v52  ;;  %10109 = vst [vmem:[#allocation4 + $0x150] sm:$0xff] %v10045_v15 }
 0x7f4   :  { %10110 = vst [vmem:[#allocation4 + $0x158] sm:$0xff] %v10046_v37  ;;  %10111 = vst [vmem:[#allocation4 + $0x160] sm:$0xff] %v10047_v62 }
 0x7f5   :  { %10112 = vst [vmem:[#allocation4 + $0x168] sm:$0xff] %v10048_v30  ;;  %10113 = vst [vmem:[#allocation4 + $0x170] sm:$0xff] %v10049_v53 }
 0x7f6   :  { %10114 = vst [vmem:[#allocation4 + $0x178] sm:$0xff] %v10050_v29  ;;  %10115 = vst [vmem:[#allocation4 + $0x180] sm:$0xff] %v10051_v20 }
 0x7f7   :  { %10116 = vst [vmem:[#allocation4 + $0x188] sm:$0xff] %v10052_v16  ;;  %10117 = vst [vmem:[#allocation4 + $0x190] sm:$0xff] %v10053_v31 }
 0x7f8   :  { %10118 = vst [vmem:[#allocation4 + $0x198] sm:$0xff] %v10054_v2  ;;  %10119 = vst [vmem:[#allocation4 + $0x1a0] sm:$0xff] %v10055_v10 }
 0x7f9   :  { %10120 = vst [vmem:[#allocation4 + $0x1a8] sm:$0xff] %v10056_v24  ;;  %10121 = vst [vmem:[#allocation4 + $0x1b0] sm:$0xff] %v10057_v12 }
 0x7fa   :  { %10122 = vst [vmem:[#allocation4 + $0x1b8] sm:$0xff] %v10058_v46  ;;  %10123 = vst [vmem:[#allocation4 + $0x1c0] sm:$0xff] %v10059_v17 }
 0x7fb   :  { %10124 = vst [vmem:[#allocation4 + $0x1c8] sm:$0xff] %v10060_v54  ;;  %10125 = vst [vmem:[#allocation4 + $0x1d0] sm:$0xff] %v10061_v63 }
 0x7fc   :  { %10126 = vst [vmem:[#allocation4 + $0x1d8] sm:$0xff] %v10062_v39  ;;  %10127 = vst [vmem:[#allocation4 + $0x1e0] sm:$0xff] %v10063_v5 }
 0x7fd   :  { %10128 = vst [vmem:[#allocation4 + $0x1e8] sm:$0xff] %v10064_v13  ;;  %10129 = vst [vmem:[#allocation4 + $0x1f0] sm:$0xff] %v10065_v19 }
 0x7fe   :  { %11366 = shalt.err (!%p11363_p4)
}
 0x7ff   :  { %s11367_s5 = scalar_lea.hbm %s17654_s3, 8192 }
 0x800   :  { %p11368_p5 = scmp.ne.s32.totalorder %s17654_s3, %s11367_s5  ;;  %p11371_p6 = scmp.lt.u32.totalorder %s11367_s5, %s17654_s3 }
 0x802   :  { %p11373_p7 = pnand %p11371_p6, %p11368_p5 }
 0x804   :  { %11376 = shalt.err (!%p11373_p7)
}
 0x805   :  { %s11381_s10 = smov 128   ;;  %s11382_s11 = smov 8  }
 0x806   :  { %10142 = dma.vmem_to_hbm [thread:$0]  %s10137_s28, 8192, %s17654_s3, [#allocation5], %s11381_s10, %s11381_s10, %s11382_s11  }
 0x807   :  { %11377 = dma.done.wait [#allocation5], 8192  }
 0x808   :  { %11378 = vsyncadd [#allocation5], 4294959104 }
 0x809   :  { %10146 = vsyncpa [#allocation5], 1 }

</bundles_post_ra>
